<compile_context>
chip_gen: v5e
topology: v5e:2x2
jax: 0.10.0
libtpu: 0.0.40
codegen_flags: <defaults>
</compile_context>

<pallas_src>
import functools

import jax
import jax.numpy as jnp
from jax.experimental import pallas as pl
from jax.experimental.pallas import tpu as pltpu


_BN_EPS = 1e-5
_LEAKY_SLOPE = 0.01   # InPlaceABNSync default activation: leaky_relu(0.01)


def _aspp_kernel(x_ref, w1_ref, w2_ref, w3_ref, w4_ref, wb_ref,
                 b1_ref, b2_ref, b3_ref, b4_ref, bb_ref,
                 o_ref, a1_ref, a2_ref, a3_ref, a4_ref,
                 *, dilations, slope):
    # x_ref : (1, H, W, CB)   one image, one C-slab, channels on lanes (bf16)
    # w1_ref: (CB, F)          1x1 conv weight slab (BN folded), (in, out), bf16
    # wN_ref: (3, 3, CB, F)    dilated 3x3 conv weight slabs (BN folded), bf16
    # wb_ref: (4, F, F)        bottleneck weight split per branch, (branch, in, out), bf16
    # bN_ref: (1, F)           folded BN biases, f32
    # o_ref : (1, H, W, F)
    # aN_ref: (H, W, F) f32    persistent pre-activation accumulators (one per branch)
    _, H, W, CB = x_ref.shape
    F = o_ref.shape[3]
    HW = H * W

    c_idx = pl.program_id(1)
    last_c = pl.num_programs(1) - 1

    dot = functools.partial(jnp.dot, preferred_element_type=jnp.float32)

    def leaky(v):
        return jnp.where(v > 0, v, slope * v)

    # Zero the persistent branch accumulators on the first C-slab of each image.
    @pl.when(c_idx == 0)
    def _():
        for acc in (a1_ref, a2_ref, a3_ref, a4_ref):
            acc[...] = jnp.zeros_like(acc)

    x2d = x_ref[...].reshape(HW, CB)

    # Branch 1: 1x1 conv partial sum for this C-slab.
    a1_ref[...] += dot(x2d, w1_ref[...]).reshape(H, W, F)

    # Branches 2-4: dilated 3x3 convs via output-side shifted accumulation.
    def dilated_accumulate(w_ref, acc_ref, d):
        for ky in range(3):
            for kx in range(3):
                oy, ox = (ky - 1) * d, (kx - 1) * d
                if abs(oy) >= H or abs(ox) >= W:
                    continue  # this tap only ever reads zero padding
                hsz, wsz = H - abs(oy), W - abs(ox)
                sy, dy = (oy, 0) if oy > 0 else (0, -oy)
                sx, dx = (ox, 0) if ox > 0 else (0, -ox)
                if oy == 0:
                    xw = x2d
                else:
                    # Only the valid input rows; full W so the reshape is layout-preserving.
                    xw = x_ref[0, sy:sy + hsz, :, :].reshape(hsz * W, CB)
                contrib = dot(xw, w_ref[ky, kx, :, :]).reshape(hsz, W, F)
                if ox != 0:
                    contrib = contrib[:, sx:sx + wsz, :]
                acc_ref[dy:dy + hsz, dx:dx + wsz, :] += contrib

    dilated_accumulate(w2_ref, a2_ref, dilations[0])
    dilated_accumulate(w3_ref, a3_ref, dilations[1])
    dilated_accumulate(w4_ref, a4_ref, dilations[2])

    # Last C-slab: BN bias + LeakyReLU per branch, fused bottleneck 1x1 (concat never
    # materialized), LeakyReLU, write the output tile.
    @pl.when(c_idx == last_c)
    def _():
        mxu_dt = x_ref.dtype  # bf16 branch activations -> native-rate bottleneck matmul
        bottle = bb_ref[...].astype(jnp.float32)
        for i, (acc_ref, b_ref) in enumerate(((a1_ref, b1_ref), (a2_ref, b2_ref),
                                              (a3_ref, b3_ref), (a4_ref, b4_ref))):
            f = leaky(acc_ref[...].reshape(HW, F) + b_ref[...]).astype(mxu_dt)
            bottle = bottle + dot(f, wb_ref[i, :, :])   # f dropped right after its use
        o_ref[...] = leaky(bottle).reshape(o_ref.shape).astype(o_ref.dtype)


def aspp_module_nhwc(x_nhwc, w1, w2, w3, w4, wb, bn_params, dilations=(12, 24, 36),
                     eps=_BN_EPS, slope=_LEAKY_SLOPE, c_block=None,
                     compute_dtype=jnp.bfloat16):
    """ASPP forward pass (inference), NHWC in / NHWC out.

    x_nhwc:    (N, H, W, C)
    w1:        (F, C)        conv1 1x1 weight
    w2,w3,w4:  (F, C, 3, 3)  dilated 3x3 conv weights
    wb:        (F, 4*F)      bottleneck 1x1 weight
    bn_params: 5 tuples (gamma, beta, running_mean, running_var), each (F,)
               for conv1..conv4 and the bottleneck.
    """
    N, H, W, C = x_nhwc.shape
    F_out = w1.shape[0]
    d = tuple(int(v) for v in dilations)

    if c_block is None:
        c_block = C
        if C % 128 == 0:
            for cand in (512, 384, 256, 128):
                if C % cand == 0:
                    c_block = cand
                    break
    assert C % c_block == 0, f"C={C} must be divisible by c_block={c_block}"
    num_c = C // c_block

    # Fold inference BN  y = gamma*(conv - mean)/sqrt(var+eps) + beta  into an
    # output-channel scale on the conv weight plus a bias.
    scales, shifts = [], []
    for gamma, beta, mean, var in bn_params:
        s = (gamma / jnp.sqrt(var + eps)).astype(jnp.float32)
        scales.append(s)
        shifts.append((beta - mean * s).astype(jnp.float32))

    # Weights laid out as (in, out) so channels stay on the lane axis; bf16 operands.
    w1_k = jnp.transpose(w1 * scales[0][:, None], (1, 0)).astype(compute_dtype)
    w2_k = jnp.transpose(w2 * scales[1][:, None, None, None], (2, 3, 1, 0)).astype(compute_dtype)
    w3_k = jnp.transpose(w3 * scales[2][:, None, None, None], (2, 3, 1, 0)).astype(compute_dtype)
    w4_k = jnp.transpose(w4 * scales[3][:, None, None, None], (2, 3, 1, 0)).astype(compute_dtype)
    wb_k = jnp.transpose((wb * scales[4][:, None]).reshape(F_out, 4, F_out),
                         (1, 2, 0)).astype(compute_dtype)            # (4, F_in, F_out)
    b1, b2, b3, b4, bb = (s[None, :] for s in shifts)                # (1, F) f32 each

    x_k = x_nhwc.astype(compute_dtype)
    out_dtype = x_nhwc.dtype

    kernel = functools.partial(_aspp_kernel, dilations=d, slope=float(slope))

    out_nhwc = pl.pallas_call(
        kernel,
        out_shape=jax.ShapeDtypeStruct((N, H, W, F_out), out_dtype),
        grid_spec=pltpu.PrefetchScalarGridSpec(
            num_scalar_prefetch=0,
            grid=(N, num_c),   # C-slab axis last (reduction)
            in_specs=[
                pl.BlockSpec((1, H, W, c_block), lambda n, c: (n, 0, 0, c)),
                pl.BlockSpec((c_block, F_out), lambda n, c: (c, 0)),
                pl.BlockSpec((3, 3, c_block, F_out), lambda n, c: (0, 0, c, 0)),
                pl.BlockSpec((3, 3, c_block, F_out), lambda n, c: (0, 0, c, 0)),
                pl.BlockSpec((3, 3, c_block, F_out), lambda n, c: (0, 0, c, 0)),
                pl.BlockSpec((4, F_out, F_out), lambda n, c: (0, 0, 0)),
                pl.BlockSpec((1, F_out), lambda n, c: (0, 0)),
                pl.BlockSpec((1, F_out), lambda n, c: (0, 0)),
                pl.BlockSpec((1, F_out), lambda n, c: (0, 0)),
                pl.BlockSpec((1, F_out), lambda n, c: (0, 0)),
                pl.BlockSpec((1, F_out), lambda n, c: (0, 0)),
            ],
            out_specs=pl.BlockSpec((1, H, W, F_out), lambda n, c: (n, 0, 0, 0)),
            scratch_shapes=[pltpu.VMEM((H, W, F_out), jnp.float32)] * 4,
        ),
        compiler_params=pltpu.CompilerParams(
            dimension_semantics=("parallel", "arbitrary"),
            vmem_limit_bytes=64 * 1024 * 1024),
    )(x_k, w1_k, w2_k, w3_k, w4_k, wb_k, b1, b2, b3, b4, bb)

    return out_nhwc


def aspp_module(x_nchw, w1, w2, w3, w4, wb, bn_params, dilations=(12, 24, 36),
                eps=_BN_EPS, slope=_LEAKY_SLOPE, c_block=None,
                compute_dtype=jnp.bfloat16):
    """NCHW-compatible wrapper matching the PyTorch module's layout."""
    # TODO(synk): keep the surrounding model NHWC end-to-end; these two transposes are an
    # extra HBM round trip of x and out kept only for drop-in NCHW compatibility.
    x_nhwc = jnp.transpose(x_nchw, (0, 2, 3, 1))
    out_nhwc = aspp_module_nhwc(x_nhwc, w1, w2, w3, w4, wb, bn_params, dilations,
                                eps=eps, slope=slope, c_block=c_block,
                                compute_dtype=compute_dtype)
    return jnp.transpose(out_nhwc, (0, 3, 1, 2))


def _reference(x, w1, w2, w3, w4, wb, bn_params, dilations,
               eps=_BN_EPS, slope=_LEAKY_SLOPE):
    """Pure-JAX (lax.conv, f32 HIGHEST) reference of the ASPP forward pass."""
    prec = jax.lax.Precision.HIGHEST
    dn = ('NCHW', 'OIHW', 'NCHW')

    def bn_act(y, p):
        gamma, beta, mean, var = p
        scale = gamma / jnp.sqrt(var + eps)
        shift = beta - mean * scale
        y = y * scale[None, :, None, None] + shift[None, :, None, None]
        return jnp.where(y > 0, y, slope * y)

    def conv1x1(inp, w):
        return jax.lax.conv_general_dilated(
            inp, w[:, :, None, None], (1, 1), [(0, 0), (0, 0)],
            dimension_numbers=dn, precision=prec)

    def conv3x3(inp, w, dil):
        return jax.lax.conv_general_dilated(
            inp, w, (1, 1), [(dil, dil), (dil, dil)], rhs_dilation=(dil, dil),
            dimension_numbers=dn, precision=prec)

    f1 = bn_act(conv1x1(x, w1), bn_params[0])
    f2 = bn_act(conv3x3(x, w2, dilations[0]), bn_params[1])
    f3 = bn_act(conv3x3(x, w3, dilations[1]), bn_params[2])
    f4 = bn_act(conv3x3(x, w4, dilations[2]), bn_params[3])
    cat = jnp.concatenate([f1, f2, f3, f4], axis=1)
    return bn_act(conv1x1(cat, wb), bn_params[4])


if __name__ == "__main__":
    key = jax.random.PRNGKey(0)
    keys = jax.random.split(key, 11)

    # Small but lane-dense demo: C=256 gives two 128-wide C-slabs (exercises the streamed
    # contraction + accumulator path); F=128 keeps all matmul operands lane-dense.
    N, C, H, W = 2, 256, 16, 16
    F_out = 128
    dilations = (2, 6, 12)          # small dilations so every 3x3 tap is exercised at 16x16

    x = jax.random.normal(keys[0], (N, C, H, W), dtype=jnp.float32)
    w1 = jax.random.normal(keys[1], (F_out, C), jnp.float32) / jnp.sqrt(C * 1.0)
    w2 = jax.random.normal(keys[2], (F_out, C, 3, 3), jnp.float32) / jnp.sqrt(9.0 * C)
    w3 = jax.random.normal(keys[3], (F_out, C, 3, 3), jnp.float32) / jnp.sqrt(9.0 * C)
    w4 = jax.random.normal(keys[4], (F_out, C, 3, 3), jnp.float32) / jnp.sqrt(9.0 * C)
    wb = jax.random.normal(keys[5], (F_out, 4 * F_out), jnp.float32) / jnp.sqrt(4.0 * F_out)

    def make_bn(k, n):
        k1, k2, k3, k4 = jax.random.split(k, 4)
        gamma = jax.random.uniform(k1, (n,), jnp.float32, 0.8, 1.2)
        beta = jax.random.normal(k2, (n,), jnp.float32) * 0.1
        mean = jax.random.normal(k3, (n,), jnp.float32) * 0.1
        var = jax.random.uniform(k4, (n,), jnp.float32, 0.8, 1.2)
        return gamma, beta, mean, var

    bn_params = tuple(make_bn(keys[6 + i], F_out) for i in range(5))

    out = aspp_module(x, w1, w2, w3, w4, wb, bn_params, dilations, c_block=128)
    out = jax.block_until_ready(out)

    ref = _reference(x, w1, w2, w3, w4, wb, bn_params, dilations)
    assert out.shape == (N, F_out, H, W)
    max_err = float(jnp.max(jnp.abs(out - ref)))
    # bf16 operands with f32 accumulation vs. an f32 HIGHEST-precision reference.
    assert jnp.allclose(out, ref, atol=5e-2, rtol=5e-2), f"max abs err = {max_err}"

    print("KERNEL_OK")
</pallas_src>

<mosaic_0001>
module attributes {stable_mosaic.version = 11 : i64} {
  func.func @_aspp_kernel(%arg0: i32, %arg1: i32, %arg2: memref<1x16x16x128xbf16, #tpu.memory_space<vmem>>, %arg3: memref<128x128xbf16, #tpu.memory_space<vmem>>, %arg4: memref<3x3x128x128xbf16, #tpu.memory_space<vmem>>, %arg5: memref<3x3x128x128xbf16, #tpu.memory_space<vmem>>, %arg6: memref<3x3x128x128xbf16, #tpu.memory_space<vmem>>, %arg7: memref<4x128x128xbf16, #tpu.memory_space<vmem>>, %arg8: memref<1x128xf32, #tpu.memory_space<vmem>>, %arg9: memref<1x128xf32, #tpu.memory_space<vmem>>, %arg10: memref<1x128xf32, #tpu.memory_space<vmem>>, %arg11: memref<1x128xf32, #tpu.memory_space<vmem>>, %arg12: memref<1x128xf32, #tpu.memory_space<vmem>>, %arg13: memref<1x16x16x128xf32, #tpu.memory_space<vmem>>, %arg14: memref<16x16x128xf32, #tpu.memory_space<vmem>>, %arg15: memref<16x16x128xf32, #tpu.memory_space<vmem>>, %arg16: memref<16x16x128xf32, #tpu.memory_space<vmem>>, %arg17: memref<16x16x128xf32, #tpu.memory_space<vmem>>) attributes {dimension_semantics = [#tpu.dimension_semantics<parallel>, #tpu.dimension_semantics<arbitrary>], iteration_bounds = array<i64: 2, 2>, scalar_prefetch = 0 : i64, scratch_operands = 4 : i64, tpu.core_type = #tpu.core_type<tc>, window_params = [{transform_indices = @transform_0, window_bounds = array<i64: 1, 16, 16, 128>}, {transform_indices = @transform_1, window_bounds = array<i64: 128, 128>}, {transform_indices = @transform_2, window_bounds = array<i64: 3, 3, 128, 128>}, {transform_indices = @transform_3, window_bounds = array<i64: 3, 3, 128, 128>}, {transform_indices = @transform_4, window_bounds = array<i64: 3, 3, 128, 128>}, {pipeline_mode = #tpu.pipeline_mode<synchronous>, transform_indices = @transform_5, window_bounds = array<i64: 4, 128, 128>}, {pipeline_mode = #tpu.pipeline_mode<synchronous>, transform_indices = @transform_6, window_bounds = array<i64: 1, 128>}, {pipeline_mode = #tpu.pipeline_mode<synchronous>, transform_indices = @transform_7, window_bounds = array<i64: 1, 128>}, {pipeline_mode = #tpu.pipeline_mode<synchronous>, transform_indices = @transform_8, window_bounds = array<i64: 1, 128>}, {pipeline_mode = #tpu.pipeline_mode<synchronous>, transform_indices = @transform_9, window_bounds = array<i64: 1, 128>}, {pipeline_mode = #tpu.pipeline_mode<synchronous>, transform_indices = @transform_10, window_bounds = array<i64: 1, 128>}, {transform_indices = @transform_11, window_bounds = array<i64: 1, 16, 16, 128>}]} {
    %c0_i32 = arith.constant 0 : i32
    %0 = arith.cmpi eq, %arg1, %c0_i32 : i32
    %1 = arith.extui %0 : i1 to i32
    %c0_i32_0 = arith.constant 0 : i32
    %2 = arith.cmpi ne, %1, %c0_i32_0 : i32
    scf.if %2 {
      %cst_378 = arith.constant 0.000000e+00 : f32
      %275 = vector.broadcast %cst_378 : f32 to vector<16x16x128xf32>
      %c0_379 = arith.constant 0 : index
      %c0_380 = arith.constant 0 : index
      %c0_381 = arith.constant 0 : index
      %276 = vector.load %arg14[%c0_379, %c0_380, %c0_381] : memref<16x16x128xf32, #tpu.memory_space<vmem>>, vector<16x16x128xf32>
      tpu.vector_store %arg14[%c0_379, %c0_380, %c0_381], %275 {strides = array<i32>} : memref<16x16x128xf32, #tpu.memory_space<vmem>>, vector<16x16x128xf32>,
      %cst_382 = arith.constant 0.000000e+00 : f32
      %277 = vector.broadcast %cst_382 : f32 to vector<16x16x128xf32>
      %c0_383 = arith.constant 0 : index
      %c0_384 = arith.constant 0 : index
      %c0_385 = arith.constant 0 : index
      %278 = vector.load %arg15[%c0_383, %c0_384, %c0_385] : memref<16x16x128xf32, #tpu.memory_space<vmem>>, vector<16x16x128xf32>
      tpu.vector_store %arg15[%c0_383, %c0_384, %c0_385], %277 {strides = array<i32>} : memref<16x16x128xf32, #tpu.memory_space<vmem>>, vector<16x16x128xf32>,
      %cst_386 = arith.constant 0.000000e+00 : f32
      %279 = vector.broadcast %cst_386 : f32 to vector<16x16x128xf32>
      %c0_387 = arith.constant 0 : index
      %c0_388 = arith.constant 0 : index
      %c0_389 = arith.constant 0 : index
      %280 = vector.load %arg16[%c0_387, %c0_388, %c0_389] : memref<16x16x128xf32, #tpu.memory_space<vmem>>, vector<16x16x128xf32>
      tpu.vector_store %arg16[%c0_387, %c0_388, %c0_389], %279 {strides = array<i32>} : memref<16x16x128xf32, #tpu.memory_space<vmem>>, vector<16x16x128xf32>,
      %cst_390 = arith.constant 0.000000e+00 : f32
      %281 = vector.broadcast %cst_390 : f32 to vector<16x16x128xf32>
      %c0_391 = arith.constant 0 : index
      %c0_392 = arith.constant 0 : index
      %c0_393 = arith.constant 0 : index
      %282 = vector.load %arg17[%c0_391, %c0_392, %c0_393] : memref<16x16x128xf32, #tpu.memory_space<vmem>>, vector<16x16x128xf32>
      tpu.vector_store %arg17[%c0_391, %c0_392, %c0_393], %281 {strides = array<i32>} : memref<16x16x128xf32, #tpu.memory_space<vmem>>, vector<16x16x128xf32>,
    } else {
    }
    %c0 = arith.constant 0 : index
    %c0_1 = arith.constant 0 : index
    %c0_2 = arith.constant 0 : index
    %c0_3 = arith.constant 0 : index
    %3 = vector.load %arg2[%c0, %c0_1, %c0_2, %c0_3] : memref<1x16x16x128xbf16, #tpu.memory_space<vmem>>, vector<1x16x16x128xbf16>
    %4 = vector.shape_cast %3 : vector<1x16x16x128xbf16> to vector<256x128xbf16>
    %c0_4 = arith.constant 0 : index
    %c0_5 = arith.constant 0 : index
    %c0_6 = arith.constant 0 : index
    %5 = vector.load %arg14[%c0_4, %c0_5, %c0_6] : memref<16x16x128xf32, #tpu.memory_space<vmem>>, vector<16x16x128xf32>
    %c0_7 = arith.constant 0 : index
    %c0_8 = arith.constant 0 : index
    %6 = vector.load %arg3[%c0_7, %c0_8] : memref<128x128xbf16, #tpu.memory_space<vmem>>, vector<128x128xbf16>
    %cst = arith.constant dense<0.000000e+00> : vector<256x128xf32>
    %7 = tpu.matmul %4, %6, %cst {dimension_numbers = #tpu.dot_dimension_numbers<[1], [0], [0], [1], [0, 0, 1, 1], [], []>} : vector<256x128xbf16>, vector<128x128xbf16>, vector<256x128xf32> -> vector<256x128xf32>
    %8 = vector.shape_cast %7 : vector<256x128xf32> to vector<16x16x128xf32>
    %9 = arith.addf %5, %8 : vector<16x16x128xf32>
    %c0_9 = arith.constant 0 : index
    %c0_10 = arith.constant 0 : index
    %c0_11 = arith.constant 0 : index
    %10 = vector.load %arg14[%c0_9, %c0_10, %c0_11] : memref<16x16x128xf32, #tpu.memory_space<vmem>>, vector<16x16x128xf32>
    tpu.vector_store %arg14[%c0_9, %c0_10, %c0_11], %9 {strides = array<i32>} : memref<16x16x128xf32, #tpu.memory_space<vmem>>, vector<16x16x128xf32>,
    %c0_12 = arith.constant 0 : index
    %c0_13 = arith.constant 0 : index
    %c0_14 = arith.constant 0 : index
    %c0_15 = arith.constant 0 : index
    %11 = vector.load %arg2[%c0_12, %c0_13, %c0_14, %c0_15] : memref<1x16x16x128xbf16, #tpu.memory_space<vmem>>, vector<1x14x16x128xbf16>
    %12 = vector.shape_cast %11 : vector<1x14x16x128xbf16> to vector<14x16x128xbf16>
    %13 = vector.shape_cast %12 : vector<14x16x128xbf16> to vector<224x128xbf16>
    %c0_16 = arith.constant 0 : index
    %c0_17 = arith.constant 0 : index
    %c0_18 = arith.constant 0 : index
    %c0_19 = arith.constant 0 : index
    %14 = vector.load %arg4[%c0_16, %c0_17, %c0_18, %c0_19] : memref<3x3x128x128xbf16, #tpu.memory_space<vmem>>, vector<1x1x128x128xbf16>
    %15 = vector.shape_cast %14 : vector<1x1x128x128xbf16> to vector<128x128xbf16>
    %cst_20 = arith.constant dense<0.000000e+00> : vector<224x128xf32>
    %16 = tpu.matmul %13, %15, %cst_20 {dimension_numbers = #tpu.dot_dimension_numbers<[1], [0], [0], [1], [0, 0, 1, 1], [], []>} : vector<224x128xbf16>, vector<128x128xbf16>, vector<224x128xf32> -> vector<224x128xf32>
    %17 = vector.shape_cast %16 : vector<224x128xf32> to vector<14x16x128xf32>
    %18 = vector.extract_strided_slice %17 {offsets = [0, 0, 0], sizes = [14, 14, 128], strides = [1, 1, 1]} : vector<14x16x128xf32> to vector<14x14x128xf32>
    %c2 = arith.constant 2 : index
    %c2_21 = arith.constant 2 : index
    %c0_22 = arith.constant 0 : index
    %19 = vector.load %arg15[%c2, %c2_21, %c0_22] : memref<16x16x128xf32, #tpu.memory_space<vmem>>, vector<14x14x128xf32>
    %20 = arith.addf %19, %18 : vector<14x14x128xf32>
    %c2_23 = arith.constant 2 : index
    %c2_24 = arith.constant 2 : index
    %c0_25 = arith.constant 0 : index
    %21 = vector.load %arg15[%c2_23, %c2_24, %c0_25] : memref<16x16x128xf32, #tpu.memory_space<vmem>>, vector<14x14x128xf32>
    tpu.vector_store %arg15[%c2_23, %c2_24, %c0_25], %20 {strides = array<i32>} : memref<16x16x128xf32, #tpu.memory_space<vmem>>, vector<14x14x128xf32>,
    %c0_26 = arith.constant 0 : index
    %c0_27 = arith.constant 0 : index
    %c0_28 = arith.constant 0 : index
    %c0_29 = arith.constant 0 : index
    %22 = vector.load %arg2[%c0_26, %c0_27, %c0_28, %c0_29] : memref<1x16x16x128xbf16, #tpu.memory_space<vmem>>, vector<1x14x16x128xbf16>
    %23 = vector.shape_cast %22 : vector<1x14x16x128xbf16> to vector<14x16x128xbf16>
    %24 = vector.shape_cast %23 : vector<14x16x128xbf16> to vector<224x128xbf16>
    %c0_30 = arith.constant 0 : index
    %c1 = arith.constant 1 : index
    %c0_31 = arith.constant 0 : index
    %c0_32 = arith.constant 0 : index
    %25 = vector.load %arg4[%c0_30, %c1, %c0_31, %c0_32] : memref<3x3x128x128xbf16, #tpu.memory_space<vmem>>, vector<1x1x128x128xbf16>
    %26 = vector.shape_cast %25 : vector<1x1x128x128xbf16> to vector<128x128xbf16>
    %cst_33 = arith.constant dense<0.000000e+00> : vector<224x128xf32>
    %27 = tpu.matmul %24, %26, %cst_33 {dimension_numbers = #tpu.dot_dimension_numbers<[1], [0], [0], [1], [0, 0, 1, 1], [], []>} : vector<224x128xbf16>, vector<128x128xbf16>, vector<224x128xf32> -> vector<224x128xf32>
    %28 = vector.shape_cast %27 : vector<224x128xf32> to vector<14x16x128xf32>
    %c2_34 = arith.constant 2 : index
    %c0_35 = arith.constant 0 : index
    %c0_36 = arith.constant 0 : index
    %29 = vector.load %arg15[%c2_34, %c0_35, %c0_36] : memref<16x16x128xf32, #tpu.memory_space<vmem>>, vector<14x16x128xf32>
    %30 = arith.addf %29, %28 : vector<14x16x128xf32>
    %c2_37 = arith.constant 2 : index
    %c0_38 = arith.constant 0 : index
    %c0_39 = arith.constant 0 : index
    %31 = vector.load %arg15[%c2_37, %c0_38, %c0_39] : memref<16x16x128xf32, #tpu.memory_space<vmem>>, vector<14x16x128xf32>
    tpu.vector_store %arg15[%c2_37, %c0_38, %c0_39], %30 {strides = array<i32>} : memref<16x16x128xf32, #tpu.memory_space<vmem>>, vector<14x16x128xf32>,
    %c0_40 = arith.constant 0 : index
    %c0_41 = arith.constant 0 : index
    %c0_42 = arith.constant 0 : index
    %c0_43 = arith.constant 0 : index
    %32 = vector.load %arg2[%c0_40, %c0_41, %c0_42, %c0_43] : memref<1x16x16x128xbf16, #tpu.memory_space<vmem>>, vector<1x14x16x128xbf16>
    %33 = vector.shape_cast %32 : vector<1x14x16x128xbf16> to vector<14x16x128xbf16>
    %34 = vector.shape_cast %33 : vector<14x16x128xbf16> to vector<224x128xbf16>
    %c0_44 = arith.constant 0 : index
    %c2_45 = arith.constant 2 : index
    %c0_46 = arith.constant 0 : index
    %c0_47 = arith.constant 0 : index
    %35 = vector.load %arg4[%c0_44, %c2_45, %c0_46, %c0_47] : memref<3x3x128x128xbf16, #tpu.memory_space<vmem>>, vector<1x1x128x128xbf16>
    %36 = vector.shape_cast %35 : vector<1x1x128x128xbf16> to vector<128x128xbf16>
    %cst_48 = arith.constant dense<0.000000e+00> : vector<224x128xf32>
    %37 = tpu.matmul %34, %36, %cst_48 {dimension_numbers = #tpu.dot_dimension_numbers<[1], [0], [0], [1], [0, 0, 1, 1], [], []>} : vector<224x128xbf16>, vector<128x128xbf16>, vector<224x128xf32> -> vector<224x128xf32>
    %38 = vector.shape_cast %37 : vector<224x128xf32> to vector<14x16x128xf32>
    %39 = vector.extract_strided_slice %38 {offsets = [0, 2, 0], sizes = [14, 14, 128], strides = [1, 1, 1]} : vector<14x16x128xf32> to vector<14x14x128xf32>
    %c2_49 = arith.constant 2 : index
    %c0_50 = arith.constant 0 : index
    %c0_51 = arith.constant 0 : index
    %40 = vector.load %arg15[%c2_49, %c0_50, %c0_51] : memref<16x16x128xf32, #tpu.memory_space<vmem>>, vector<14x14x128xf32>
    %41 = arith.addf %40, %39 : vector<14x14x128xf32>
    %c2_52 = arith.constant 2 : index
    %c0_53 = arith.constant 0 : index
    %c0_54 = arith.constant 0 : index
    %42 = vector.load %arg15[%c2_52, %c0_53, %c0_54] : memref<16x16x128xf32, #tpu.memory_space<vmem>>, vector<14x14x128xf32>
    tpu.vector_store %arg15[%c2_52, %c0_53, %c0_54], %41 {strides = array<i32>} : memref<16x16x128xf32, #tpu.memory_space<vmem>>, vector<14x14x128xf32>,
    %c1_55 = arith.constant 1 : index
    %c0_56 = arith.constant 0 : index
    %c0_57 = arith.constant 0 : index
    %c0_58 = arith.constant 0 : index
    %43 = vector.load %arg4[%c1_55, %c0_56, %c0_57, %c0_58] : memref<3x3x128x128xbf16, #tpu.memory_space<vmem>>, vector<1x1x128x128xbf16>
    %44 = vector.shape_cast %43 : vector<1x1x128x128xbf16> to vector<128x128xbf16>
    %cst_59 = arith.constant dense<0.000000e+00> : vector<256x128xf32>
    %45 = tpu.matmul %4, %44, %cst_59 {dimension_numbers = #tpu.dot_dimension_numbers<[1], [0], [0], [1], [0, 0, 1, 1], [], []>} : vector<256x128xbf16>, vector<128x128xbf16>, vector<256x128xf32> -> vector<256x128xf32>
    %46 = vector.shape_cast %45 : vector<256x128xf32> to vector<16x16x128xf32>
    %47 = vector.extract_strided_slice %46 {offsets = [0, 0, 0], sizes = [16, 14, 128], strides = [1, 1, 1]} : vector<16x16x128xf32> to vector<16x14x128xf32>
    %c0_60 = arith.constant 0 : index
    %c2_61 = arith.constant 2 : index
    %c0_62 = arith.constant 0 : index
    %48 = vector.load %arg15[%c0_60, %c2_61, %c0_62] : memref<16x16x128xf32, #tpu.memory_space<vmem>>, vector<16x14x128xf32>
    %49 = arith.addf %48, %47 : vector<16x14x128xf32>
    %c0_63 = arith.constant 0 : index
    %c2_64 = arith.constant 2 : index
    %c0_65 = arith.constant 0 : index
    %50 = vector.load %arg15[%c0_63, %c2_64, %c0_65] : memref<16x16x128xf32, #tpu.memory_space<vmem>>, vector<16x14x128xf32>
    tpu.vector_store %arg15[%c0_63, %c2_64, %c0_65], %49 {strides = array<i32>} : memref<16x16x128xf32, #tpu.memory_space<vmem>>, vector<16x14x128xf32>,
    %c1_66 = arith.constant 1 : index
    %c1_67 = arith.constant 1 : index
    %c0_68 = arith.constant 0 : index
    %c0_69 = arith.constant 0 : index
    %51 = vector.load %arg4[%c1_66, %c1_67, %c0_68, %c0_69] : memref<3x3x128x128xbf16, #tpu.memory_space<vmem>>, vector<1x1x128x128xbf16>
    %52 = vector.shape_cast %51 : vector<1x1x128x128xbf16> to vector<128x128xbf16>
    %cst_70 = arith.constant dense<0.000000e+00> : vector<256x128xf32>
    %53 = tpu.matmul %4, %52, %cst_70 {dimension_numbers = #tpu.dot_dimension_numbers<[1], [0], [0], [1], [0, 0, 1, 1], [], []>} : vector<256x128xbf16>, vector<128x128xbf16>, vector<256x128xf32> -> vector<256x128xf32>
    %54 = vector.shape_cast %53 : vector<256x128xf32> to vector<16x16x128xf32>
    %c0_71 = arith.constant 0 : index
    %c0_72 = arith.constant 0 : index
    %c0_73 = arith.constant 0 : index
    %55 = vector.load %arg15[%c0_71, %c0_72, %c0_73] : memref<16x16x128xf32, #tpu.memory_space<vmem>>, vector<16x16x128xf32>
    %56 = arith.addf %55, %54 : vector<16x16x128xf32>
    %c0_74 = arith.constant 0 : index
    %c0_75 = arith.constant 0 : index
    %c0_76 = arith.constant 0 : index
    %57 = vector.load %arg15[%c0_74, %c0_75, %c0_76] : memref<16x16x128xf32, #tpu.memory_space<vmem>>, vector<16x16x128xf32>
    tpu.vector_store %arg15[%c0_74, %c0_75, %c0_76], %56 {strides = array<i32>} : memref<16x16x128xf32, #tpu.memory_space<vmem>>, vector<16x16x128xf32>,
    %c1_77 = arith.constant 1 : index
    %c2_78 = arith.constant 2 : index
    %c0_79 = arith.constant 0 : index
    %c0_80 = arith.constant 0 : index
    %58 = vector.load %arg4[%c1_77, %c2_78, %c0_79, %c0_80] : memref<3x3x128x128xbf16, #tpu.memory_space<vmem>>, vector<1x1x128x128xbf16>
    %59 = vector.shape_cast %58 : vector<1x1x128x128xbf16> to vector<128x128xbf16>
    %cst_81 = arith.constant dense<0.000000e+00> : vector<256x128xf32>
    %60 = tpu.matmul %4, %59, %cst_81 {dimension_numbers = #tpu.dot_dimension_numbers<[1], [0], [0], [1], [0, 0, 1, 1], [], []>} : vector<256x128xbf16>, vector<128x128xbf16>, vector<256x128xf32> -> vector<256x128xf32>
    %61 = vector.shape_cast %60 : vector<256x128xf32> to vector<16x16x128xf32>
    %62 = vector.extract_strided_slice %61 {offsets = [0, 2, 0], sizes = [16, 14, 128], strides = [1, 1, 1]} : vector<16x16x128xf32> to vector<16x14x128xf32>
    %c0_82 = arith.constant 0 : index
    %c0_83 = arith.constant 0 : index
    %c0_84 = arith.constant 0 : index
    %63 = vector.load %arg15[%c0_82, %c0_83, %c0_84] : memref<16x16x128xf32, #tpu.memory_space<vmem>>, vector<16x14x128xf32>
    %64 = arith.addf %63, %62 : vector<16x14x128xf32>
    %c0_85 = arith.constant 0 : index
    %c0_86 = arith.constant 0 : index
    %c0_87 = arith.constant 0 : index
    %65 = vector.load %arg15[%c0_85, %c0_86, %c0_87] : memref<16x16x128xf32, #tpu.memory_space<vmem>>, vector<16x14x128xf32>
    tpu.vector_store %arg15[%c0_85, %c0_86, %c0_87], %64 {strides = array<i32>} : memref<16x16x128xf32, #tpu.memory_space<vmem>>, vector<16x14x128xf32>,
    %c0_88 = arith.constant 0 : index
    %c2_89 = arith.constant 2 : index
    %c0_90 = arith.constant 0 : index
    %c0_91 = arith.constant 0 : index
    %66 = vector.load %arg2[%c0_88, %c2_89, %c0_90, %c0_91] : memref<1x16x16x128xbf16, #tpu.memory_space<vmem>>, vector<1x14x16x128xbf16>
    %67 = vector.shape_cast %66 : vector<1x14x16x128xbf16> to vector<14x16x128xbf16>
    %68 = vector.shape_cast %67 : vector<14x16x128xbf16> to vector<224x128xbf16>
    %c2_92 = arith.constant 2 : index
    %c0_93 = arith.constant 0 : index
    %c0_94 = arith.constant 0 : index
    %c0_95 = arith.constant 0 : index
    %69 = vector.load %arg4[%c2_92, %c0_93, %c0_94, %c0_95] : memref<3x3x128x128xbf16, #tpu.memory_space<vmem>>, vector<1x1x128x128xbf16>
    %70 = vector.shape_cast %69 : vector<1x1x128x128xbf16> to vector<128x128xbf16>
    %cst_96 = arith.constant dense<0.000000e+00> : vector<224x128xf32>
    %71 = tpu.matmul %68, %70, %cst_96 {dimension_numbers = #tpu.dot_dimension_numbers<[1], [0], [0], [1], [0, 0, 1, 1], [], []>} : vector<224x128xbf16>, vector<128x128xbf16>, vector<224x128xf32> -> vector<224x128xf32>
    %72 = vector.shape_cast %71 : vector<224x128xf32> to vector<14x16x128xf32>
    %73 = vector.extract_strided_slice %72 {offsets = [0, 0, 0], sizes = [14, 14, 128], strides = [1, 1, 1]} : vector<14x16x128xf32> to vector<14x14x128xf32>
    %c0_97 = arith.constant 0 : index
    %c2_98 = arith.constant 2 : index
    %c0_99 = arith.constant 0 : index
    %74 = vector.load %arg15[%c0_97, %c2_98, %c0_99] : memref<16x16x128xf32, #tpu.memory_space<vmem>>, vector<14x14x128xf32>
    %75 = arith.addf %74, %73 : vector<14x14x128xf32>
    %c0_100 = arith.constant 0 : index
    %c2_101 = arith.constant 2 : index
    %c0_102 = arith.constant 0 : index
    %76 = vector.load %arg15[%c0_100, %c2_101, %c0_102] : memref<16x16x128xf32, #tpu.memory_space<vmem>>, vector<14x14x128xf32>
    tpu.vector_store %arg15[%c0_100, %c2_101, %c0_102], %75 {strides = array<i32>} : memref<16x16x128xf32, #tpu.memory_space<vmem>>, vector<14x14x128xf32>,
    %c0_103 = arith.constant 0 : index
    %c2_104 = arith.constant 2 : index
    %c0_105 = arith.constant 0 : index
    %c0_106 = arith.constant 0 : index
    %77 = vector.load %arg2[%c0_103, %c2_104, %c0_105, %c0_106] : memref<1x16x16x128xbf16, #tpu.memory_space<vmem>>, vector<1x14x16x128xbf16>
    %78 = vector.shape_cast %77 : vector<1x14x16x128xbf16> to vector<14x16x128xbf16>
    %79 = vector.shape_cast %78 : vector<14x16x128xbf16> to vector<224x128xbf16>
    %c2_107 = arith.constant 2 : index
    %c1_108 = arith.constant 1 : index
    %c0_109 = arith.constant 0 : index
    %c0_110 = arith.constant 0 : index
    %80 = vector.load %arg4[%c2_107, %c1_108, %c0_109, %c0_110] : memref<3x3x128x128xbf16, #tpu.memory_space<vmem>>, vector<1x1x128x128xbf16>
    %81 = vector.shape_cast %80 : vector<1x1x128x128xbf16> to vector<128x128xbf16>
    %cst_111 = arith.constant dense<0.000000e+00> : vector<224x128xf32>
    %82 = tpu.matmul %79, %81, %cst_111 {dimension_numbers = #tpu.dot_dimension_numbers<[1], [0], [0], [1], [0, 0, 1, 1], [], []>} : vector<224x128xbf16>, vector<128x128xbf16>, vector<224x128xf32> -> vector<224x128xf32>
    %83 = vector.shape_cast %82 : vector<224x128xf32> to vector<14x16x128xf32>
    %c0_112 = arith.constant 0 : index
    %c0_113 = arith.constant 0 : index
    %c0_114 = arith.constant 0 : index
    %84 = vector.load %arg15[%c0_112, %c0_113, %c0_114] : memref<16x16x128xf32, #tpu.memory_space<vmem>>, vector<14x16x128xf32>
    %85 = arith.addf %84, %83 : vector<14x16x128xf32>
    %c0_115 = arith.constant 0 : index
    %c0_116 = arith.constant 0 : index
    %c0_117 = arith.constant 0 : index
    %86 = vector.load %arg15[%c0_115, %c0_116, %c0_117] : memref<16x16x128xf32, #tpu.memory_space<vmem>>, vector<14x16x128xf32>
    tpu.vector_store %arg15[%c0_115, %c0_116, %c0_117], %85 {strides = array<i32>} : memref<16x16x128xf32, #tpu.memory_space<vmem>>, vector<14x16x128xf32>,
    %c0_118 = arith.constant 0 : index
    %c2_119 = arith.constant 2 : index
    %c0_120 = arith.constant 0 : index
    %c0_121 = arith.constant 0 : index
    %87 = vector.load %arg2[%c0_118, %c2_119, %c0_120, %c0_121] : memref<1x16x16x128xbf16, #tpu.memory_space<vmem>>, vector<1x14x16x128xbf16>
    %88 = vector.shape_cast %87 : vector<1x14x16x128xbf16> to vector<14x16x128xbf16>
    %89 = vector.shape_cast %88 : vector<14x16x128xbf16> to vector<224x128xbf16>
    %c2_122 = arith.constant 2 : index
    %c2_123 = arith.constant 2 : index
    %c0_124 = arith.constant 0 : index
    %c0_125 = arith.constant 0 : index
    %90 = vector.load %arg4[%c2_122, %c2_123, %c0_124, %c0_125] : memref<3x3x128x128xbf16, #tpu.memory_space<vmem>>, vector<1x1x128x128xbf16>
    %91 = vector.shape_cast %90 : vector<1x1x128x128xbf16> to vector<128x128xbf16>
    %cst_126 = arith.constant dense<0.000000e+00> : vector<224x128xf32>
    %92 = tpu.matmul %89, %91, %cst_126 {dimension_numbers = #tpu.dot_dimension_numbers<[1], [0], [0], [1], [0, 0, 1, 1], [], []>} : vector<224x128xbf16>, vector<128x128xbf16>, vector<224x128xf32> -> vector<224x128xf32>
    %93 = vector.shape_cast %92 : vector<224x128xf32> to vector<14x16x128xf32>
    %94 = vector.extract_strided_slice %93 {offsets = [0, 2, 0], sizes = [14, 14, 128], strides = [1, 1, 1]} : vector<14x16x128xf32> to vector<14x14x128xf32>
    %c0_127 = arith.constant 0 : index
    %c0_128 = arith.constant 0 : index
    %c0_129 = arith.constant 0 : index
    %95 = vector.load %arg15[%c0_127, %c0_128, %c0_129] : memref<16x16x128xf32, #tpu.memory_space<vmem>>, vector<14x14x128xf32>
    %96 = arith.addf %95, %94 : vector<14x14x128xf32>
    %c0_130 = arith.constant 0 : index
    %c0_131 = arith.constant 0 : index
    %c0_132 = arith.constant 0 : index
    %97 = vector.load %arg15[%c0_130, %c0_131, %c0_132] : memref<16x16x128xf32, #tpu.memory_space<vmem>>, vector<14x14x128xf32>
    tpu.vector_store %arg15[%c0_130, %c0_131, %c0_132], %96 {strides = array<i32>} : memref<16x16x128xf32, #tpu.memory_space<vmem>>, vector<14x14x128xf32>,
    %c0_133 = arith.constant 0 : index
    %c0_134 = arith.constant 0 : index
    %c0_135 = arith.constant 0 : index
    %c0_136 = arith.constant 0 : index
    %98 = vector.load %arg2[%c0_133, %c0_134, %c0_135, %c0_136] : memref<1x16x16x128xbf16, #tpu.memory_space<vmem>>, vector<1x10x16x128xbf16>
    %99 = vector.shape_cast %98 : vector<1x10x16x128xbf16> to vector<10x16x128xbf16>
    %100 = vector.shape_cast %99 : vector<10x16x128xbf16> to vector<160x128xbf16>
    %c0_137 = arith.constant 0 : index
    %c0_138 = arith.constant 0 : index
    %c0_139 = arith.constant 0 : index
    %c0_140 = arith.constant 0 : index
    %101 = vector.load %arg5[%c0_137, %c0_138, %c0_139, %c0_140] : memref<3x3x128x128xbf16, #tpu.memory_space<vmem>>, vector<1x1x128x128xbf16>
    %102 = vector.shape_cast %101 : vector<1x1x128x128xbf16> to vector<128x128xbf16>
    %cst_141 = arith.constant dense<0.000000e+00> : vector<160x128xf32>
    %103 = tpu.matmul %100, %102, %cst_141 {dimension_numbers = #tpu.dot_dimension_numbers<[1], [0], [0], [1], [0, 0, 1, 1], [], []>} : vector<160x128xbf16>, vector<128x128xbf16>, vector<160x128xf32> -> vector<160x128xf32>
    %104 = vector.shape_cast %103 : vector<160x128xf32> to vector<10x16x128xf32>
    %105 = vector.extract_strided_slice %104 {offsets = [0, 0, 0], sizes = [10, 10, 128], strides = [1, 1, 1]} : vector<10x16x128xf32> to vector<10x10x128xf32>
    %c6 = arith.constant 6 : index
    %c6_142 = arith.constant 6 : index
    %c0_143 = arith.constant 0 : index
    %106 = vector.load %arg16[%c6, %c6_142, %c0_143] : memref<16x16x128xf32, #tpu.memory_space<vmem>>, vector<10x10x128xf32>
    %107 = arith.addf %106, %105 : vector<10x10x128xf32>
    %c6_144 = arith.constant 6 : index
    %c6_145 = arith.constant 6 : index
    %c0_146 = arith.constant 0 : index
    %108 = vector.load %arg16[%c6_144, %c6_145, %c0_146] : memref<16x16x128xf32, #tpu.memory_space<vmem>>, vector<10x10x128xf32>
    tpu.vector_store %arg16[%c6_144, %c6_145, %c0_146], %107 {strides = array<i32>} : memref<16x16x128xf32, #tpu.memory_space<vmem>>, vector<10x10x128xf32>,
    %c0_147 = arith.constant 0 : index
    %c0_148 = arith.constant 0 : index
    %c0_149 = arith.constant 0 : index
    %c0_150 = arith.constant 0 : index
    %109 = vector.load %arg2[%c0_147, %c0_148, %c0_149, %c0_150] : memref<1x16x16x128xbf16, #tpu.memory_space<vmem>>, vector<1x10x16x128xbf16>
    %110 = vector.shape_cast %109 : vector<1x10x16x128xbf16> to vector<10x16x128xbf16>
    %111 = vector.shape_cast %110 : vector<10x16x128xbf16> to vector<160x128xbf16>
    %c0_151 = arith.constant 0 : index
    %c1_152 = arith.constant 1 : index
    %c0_153 = arith.constant 0 : index
    %c0_154 = arith.constant 0 : index
    %112 = vector.load %arg5[%c0_151, %c1_152, %c0_153, %c0_154] : memref<3x3x128x128xbf16, #tpu.memory_space<vmem>>, vector<1x1x128x128xbf16>
    %113 = vector.shape_cast %112 : vector<1x1x128x128xbf16> to vector<128x128xbf16>
    %cst_155 = arith.constant dense<0.000000e+00> : vector<160x128xf32>
    %114 = tpu.matmul %111, %113, %cst_155 {dimension_numbers = #tpu.dot_dimension_numbers<[1], [0], [0], [1], [0, 0, 1, 1], [], []>} : vector<160x128xbf16>, vector<128x128xbf16>, vector<160x128xf32> -> vector<160x128xf32>
    %115 = vector.shape_cast %114 : vector<160x128xf32> to vector<10x16x128xf32>
    %c6_156 = arith.constant 6 : index
    %c0_157 = arith.constant 0 : index
    %c0_158 = arith.constant 0 : index
    %116 = vector.load %arg16[%c6_156, %c0_157, %c0_158] : memref<16x16x128xf32, #tpu.memory_space<vmem>>, vector<10x16x128xf32>
    %117 = arith.addf %116, %115 : vector<10x16x128xf32>
    %c6_159 = arith.constant 6 : index
    %c0_160 = arith.constant 0 : index
    %c0_161 = arith.constant 0 : index
    %118 = vector.load %arg16[%c6_159, %c0_160, %c0_161] : memref<16x16x128xf32, #tpu.memory_space<vmem>>, vector<10x16x128xf32>
    tpu.vector_store %arg16[%c6_159, %c0_160, %c0_161], %117 {strides = array<i32>} : memref<16x16x128xf32, #tpu.memory_space<vmem>>, vector<10x16x128xf32>,
    %c0_162 = arith.constant 0 : index
    %c0_163 = arith.constant 0 : index
    %c0_164 = arith.constant 0 : index
    %c0_165 = arith.constant 0 : index
    %119 = vector.load %arg2[%c0_162, %c0_163, %c0_164, %c0_165] : memref<1x16x16x128xbf16, #tpu.memory_space<vmem>>, vector<1x10x16x128xbf16>
    %120 = vector.shape_cast %119 : vector<1x10x16x128xbf16> to vector<10x16x128xbf16>
    %121 = vector.shape_cast %120 : vector<10x16x128xbf16> to vector<160x128xbf16>
    %c0_166 = arith.constant 0 : index
    %c2_167 = arith.constant 2 : index
    %c0_168 = arith.constant 0 : index
    %c0_169 = arith.constant 0 : index
    %122 = vector.load %arg5[%c0_166, %c2_167, %c0_168, %c0_169] : memref<3x3x128x128xbf16, #tpu.memory_space<vmem>>, vector<1x1x128x128xbf16>
    %123 = vector.shape_cast %122 : vector<1x1x128x128xbf16> to vector<128x128xbf16>
    %cst_170 = arith.constant dense<0.000000e+00> : vector<160x128xf32>
    %124 = tpu.matmul %121, %123, %cst_170 {dimension_numbers = #tpu.dot_dimension_numbers<[1], [0], [0], [1], [0, 0, 1, 1], [], []>} : vector<160x128xbf16>, vector<128x128xbf16>, vector<160x128xf32> -> vector<160x128xf32>
    %125 = vector.shape_cast %124 : vector<160x128xf32> to vector<10x16x128xf32>
    %126 = vector.extract_strided_slice %125 {offsets = [0, 6, 0], sizes = [10, 10, 128], strides = [1, 1, 1]} : vector<10x16x128xf32> to vector<10x10x128xf32>
    %c6_171 = arith.constant 6 : index
    %c0_172 = arith.constant 0 : index
    %c0_173 = arith.constant 0 : index
    %127 = vector.load %arg16[%c6_171, %c0_172, %c0_173] : memref<16x16x128xf32, #tpu.memory_space<vmem>>, vector<10x10x128xf32>
    %128 = arith.addf %127, %126 : vector<10x10x128xf32>
    %c6_174 = arith.constant 6 : index
    %c0_175 = arith.constant 0 : index
    %c0_176 = arith.constant 0 : index
    %129 = vector.load %arg16[%c6_174, %c0_175, %c0_176] : memref<16x16x128xf32, #tpu.memory_space<vmem>>, vector<10x10x128xf32>
    tpu.vector_store %arg16[%c6_174, %c0_175, %c0_176], %128 {strides = array<i32>} : memref<16x16x128xf32, #tpu.memory_space<vmem>>, vector<10x10x128xf32>,
    %c1_177 = arith.constant 1 : index
    %c0_178 = arith.constant 0 : index
    %c0_179 = arith.constant 0 : index
    %c0_180 = arith.constant 0 : index
    %130 = vector.load %arg5[%c1_177, %c0_178, %c0_179, %c0_180] : memref<3x3x128x128xbf16, #tpu.memory_space<vmem>>, vector<1x1x128x128xbf16>
    %131 = vector.shape_cast %130 : vector<1x1x128x128xbf16> to vector<128x128xbf16>
    %cst_181 = arith.constant dense<0.000000e+00> : vector<256x128xf32>
    %132 = tpu.matmul %4, %131, %cst_181 {dimension_numbers = #tpu.dot_dimension_numbers<[1], [0], [0], [1], [0, 0, 1, 1], [], []>} : vector<256x128xbf16>, vector<128x128xbf16>, vector<256x128xf32> -> vector<256x128xf32>
    %133 = vector.shape_cast %132 : vector<256x128xf32> to vector<16x16x128xf32>
    %134 = vector.extract_strided_slice %133 {offsets = [0, 0, 0], sizes = [16, 10, 128], strides = [1, 1, 1]} : vector<16x16x128xf32> to vector<16x10x128xf32>
    %c0_182 = arith.constant 0 : index
    %c6_183 = arith.constant 6 : index
    %c0_184 = arith.constant 0 : index
    %135 = vector.load %arg16[%c0_182, %c6_183, %c0_184] : memref<16x16x128xf32, #tpu.memory_space<vmem>>, vector<16x10x128xf32>
    %136 = arith.addf %135, %134 : vector<16x10x128xf32>
    %c0_185 = arith.constant 0 : index
    %c6_186 = arith.constant 6 : index
    %c0_187 = arith.constant 0 : index
    %137 = vector.load %arg16[%c0_185, %c6_186, %c0_187] : memref<16x16x128xf32, #tpu.memory_space<vmem>>, vector<16x10x128xf32>
    tpu.vector_store %arg16[%c0_185, %c6_186, %c0_187], %136 {strides = array<i32>} : memref<16x16x128xf32, #tpu.memory_space<vmem>>, vector<16x10x128xf32>,
    %c1_188 = arith.constant 1 : index
    %c1_189 = arith.constant 1 : index
    %c0_190 = arith.constant 0 : index
    %c0_191 = arith.constant 0 : index
    %138 = vector.load %arg5[%c1_188, %c1_189, %c0_190, %c0_191] : memref<3x3x128x128xbf16, #tpu.memory_space<vmem>>, vector<1x1x128x128xbf16>
    %139 = vector.shape_cast %138 : vector<1x1x128x128xbf16> to vector<128x128xbf16>
    %cst_192 = arith.constant dense<0.000000e+00> : vector<256x128xf32>
    %140 = tpu.matmul %4, %139, %cst_192 {dimension_numbers = #tpu.dot_dimension_numbers<[1], [0], [0], [1], [0, 0, 1, 1], [], []>} : vector<256x128xbf16>, vector<128x128xbf16>, vector<256x128xf32> -> vector<256x128xf32>
    %141 = vector.shape_cast %140 : vector<256x128xf32> to vector<16x16x128xf32>
    %c0_193 = arith.constant 0 : index
    %c0_194 = arith.constant 0 : index
    %c0_195 = arith.constant 0 : index
    %142 = vector.load %arg16[%c0_193, %c0_194, %c0_195] : memref<16x16x128xf32, #tpu.memory_space<vmem>>, vector<16x16x128xf32>
    %143 = arith.addf %142, %141 : vector<16x16x128xf32>
    %c0_196 = arith.constant 0 : index
    %c0_197 = arith.constant 0 : index
    %c0_198 = arith.constant 0 : index
    %144 = vector.load %arg16[%c0_196, %c0_197, %c0_198] : memref<16x16x128xf32, #tpu.memory_space<vmem>>, vector<16x16x128xf32>
    tpu.vector_store %arg16[%c0_196, %c0_197, %c0_198], %143 {strides = array<i32>} : memref<16x16x128xf32, #tpu.memory_space<vmem>>, vector<16x16x128xf32>,
    %c1_199 = arith.constant 1 : index
    %c2_200 = arith.constant 2 : index
    %c0_201 = arith.constant 0 : index
    %c0_202 = arith.constant 0 : index
    %145 = vector.load %arg5[%c1_199, %c2_200, %c0_201, %c0_202] : memref<3x3x128x128xbf16, #tpu.memory_space<vmem>>, vector<1x1x128x128xbf16>
    %146 = vector.shape_cast %145 : vector<1x1x128x128xbf16> to vector<128x128xbf16>
    %cst_203 = arith.constant dense<0.000000e+00> : vector<256x128xf32>
    %147 = tpu.matmul %4, %146, %cst_203 {dimension_numbers = #tpu.dot_dimension_numbers<[1], [0], [0], [1], [0, 0, 1, 1], [], []>} : vector<256x128xbf16>, vector<128x128xbf16>, vector<256x128xf32> -> vector<256x128xf32>
    %148 = vector.shape_cast %147 : vector<256x128xf32> to vector<16x16x128xf32>
    %149 = vector.extract_strided_slice %148 {offsets = [0, 6, 0], sizes = [16, 10, 128], strides = [1, 1, 1]} : vector<16x16x128xf32> to vector<16x10x128xf32>
    %c0_204 = arith.constant 0 : index
    %c0_205 = arith.constant 0 : index
    %c0_206 = arith.constant 0 : index
    %150 = vector.load %arg16[%c0_204, %c0_205, %c0_206] : memref<16x16x128xf32, #tpu.memory_space<vmem>>, vector<16x10x128xf32>
    %151 = arith.addf %150, %149 : vector<16x10x128xf32>
    %c0_207 = arith.constant 0 : index
    %c0_208 = arith.constant 0 : index
    %c0_209 = arith.constant 0 : index
    %152 = vector.load %arg16[%c0_207, %c0_208, %c0_209] : memref<16x16x128xf32, #tpu.memory_space<vmem>>, vector<16x10x128xf32>
    tpu.vector_store %arg16[%c0_207, %c0_208, %c0_209], %151 {strides = array<i32>} : memref<16x16x128xf32, #tpu.memory_space<vmem>>, vector<16x10x128xf32>,
    %c0_210 = arith.constant 0 : index
    %c6_211 = arith.constant 6 : index
    %c0_212 = arith.constant 0 : index
    %c0_213 = arith.constant 0 : index
    %153 = vector.load %arg2[%c0_210, %c6_211, %c0_212, %c0_213] : memref<1x16x16x128xbf16, #tpu.memory_space<vmem>>, vector<1x10x16x128xbf16>
    %154 = vector.shape_cast %153 : vector<1x10x16x128xbf16> to vector<10x16x128xbf16>
    %155 = vector.shape_cast %154 : vector<10x16x128xbf16> to vector<160x128xbf16>
    %c2_214 = arith.constant 2 : index
    %c0_215 = arith.constant 0 : index
    %c0_216 = arith.constant 0 : index
    %c0_217 = arith.constant 0 : index
    %156 = vector.load %arg5[%c2_214, %c0_215, %c0_216, %c0_217] : memref<3x3x128x128xbf16, #tpu.memory_space<vmem>>, vector<1x1x128x128xbf16>
    %157 = vector.shape_cast %156 : vector<1x1x128x128xbf16> to vector<128x128xbf16>
    %cst_218 = arith.constant dense<0.000000e+00> : vector<160x128xf32>
    %158 = tpu.matmul %155, %157, %cst_218 {dimension_numbers = #tpu.dot_dimension_numbers<[1], [0], [0], [1], [0, 0, 1, 1], [], []>} : vector<160x128xbf16>, vector<128x128xbf16>, vector<160x128xf32> -> vector<160x128xf32>
    %159 = vector.shape_cast %158 : vector<160x128xf32> to vector<10x16x128xf32>
    %160 = vector.extract_strided_slice %159 {offsets = [0, 0, 0], sizes = [10, 10, 128], strides = [1, 1, 1]} : vector<10x16x128xf32> to vector<10x10x128xf32>
    %c0_219 = arith.constant 0 : index
    %c6_220 = arith.constant 6 : index
    %c0_221 = arith.constant 0 : index
    %161 = vector.load %arg16[%c0_219, %c6_220, %c0_221] : memref<16x16x128xf32, #tpu.memory_space<vmem>>, vector<10x10x128xf32>
    %162 = arith.addf %161, %160 : vector<10x10x128xf32>
    %c0_222 = arith.constant 0 : index
    %c6_223 = arith.constant 6 : index
    %c0_224 = arith.constant 0 : index
    %163 = vector.load %arg16[%c0_222, %c6_223, %c0_224] : memref<16x16x128xf32, #tpu.memory_space<vmem>>, vector<10x10x128xf32>
    tpu.vector_store %arg16[%c0_222, %c6_223, %c0_224], %162 {strides = array<i32>} : memref<16x16x128xf32, #tpu.memory_space<vmem>>, vector<10x10x128xf32>,
    %c0_225 = arith.constant 0 : index
    %c6_226 = arith.constant 6 : index
    %c0_227 = arith.constant 0 : index
    %c0_228 = arith.constant 0 : index
    %164 = vector.load %arg2[%c0_225, %c6_226, %c0_227, %c0_228] : memref<1x16x16x128xbf16, #tpu.memory_space<vmem>>, vector<1x10x16x128xbf16>
    %165 = vector.shape_cast %164 : vector<1x10x16x128xbf16> to vector<10x16x128xbf16>
    %166 = vector.shape_cast %165 : vector<10x16x128xbf16> to vector<160x128xbf16>
    %c2_229 = arith.constant 2 : index
    %c1_230 = arith.constant 1 : index
    %c0_231 = arith.constant 0 : index
    %c0_232 = arith.constant 0 : index
    %167 = vector.load %arg5[%c2_229, %c1_230, %c0_231, %c0_232] : memref<3x3x128x128xbf16, #tpu.memory_space<vmem>>, vector<1x1x128x128xbf16>
    %168 = vector.shape_cast %167 : vector<1x1x128x128xbf16> to vector<128x128xbf16>
    %cst_233 = arith.constant dense<0.000000e+00> : vector<160x128xf32>
    %169 = tpu.matmul %166, %168, %cst_233 {dimension_numbers = #tpu.dot_dimension_numbers<[1], [0], [0], [1], [0, 0, 1, 1], [], []>} : vector<160x128xbf16>, vector<128x128xbf16>, vector<160x128xf32> -> vector<160x128xf32>
    %170 = vector.shape_cast %169 : vector<160x128xf32> to vector<10x16x128xf32>
    %c0_234 = arith.constant 0 : index
    %c0_235 = arith.constant 0 : index
    %c0_236 = arith.constant 0 : index
    %171 = vector.load %arg16[%c0_234, %c0_235, %c0_236] : memref<16x16x128xf32, #tpu.memory_space<vmem>>, vector<10x16x128xf32>
    %172 = arith.addf %171, %170 : vector<10x16x128xf32>
    %c0_237 = arith.constant 0 : index
    %c0_238 = arith.constant 0 : index
    %c0_239 = arith.constant 0 : index
    %173 = vector.load %arg16[%c0_237, %c0_238, %c0_239] : memref<16x16x128xf32, #tpu.memory_space<vmem>>, vector<10x16x128xf32>
    tpu.vector_store %arg16[%c0_237, %c0_238, %c0_239], %172 {strides = array<i32>} : memref<16x16x128xf32, #tpu.memory_space<vmem>>, vector<10x16x128xf32>,
    %c0_240 = arith.constant 0 : index
    %c6_241 = arith.constant 6 : index
    %c0_242 = arith.constant 0 : index
    %c0_243 = arith.constant 0 : index
    %174 = vector.load %arg2[%c0_240, %c6_241, %c0_242, %c0_243] : memref<1x16x16x128xbf16, #tpu.memory_space<vmem>>, vector<1x10x16x128xbf16>
    %175 = vector.shape_cast %174 : vector<1x10x16x128xbf16> to vector<10x16x128xbf16>
    %176 = vector.shape_cast %175 : vector<10x16x128xbf16> to vector<160x128xbf16>
    %c2_244 = arith.constant 2 : index
    %c2_245 = arith.constant 2 : index
    %c0_246 = arith.constant 0 : index
    %c0_247 = arith.constant 0 : index
    %177 = vector.load %arg5[%c2_244, %c2_245, %c0_246, %c0_247] : memref<3x3x128x128xbf16, #tpu.memory_space<vmem>>, vector<1x1x128x128xbf16>
    %178 = vector.shape_cast %177 : vector<1x1x128x128xbf16> to vector<128x128xbf16>
    %cst_248 = arith.constant dense<0.000000e+00> : vector<160x128xf32>
    %179 = tpu.matmul %176, %178, %cst_248 {dimension_numbers = #tpu.dot_dimension_numbers<[1], [0], [0], [1], [0, 0, 1, 1], [], []>} : vector<160x128xbf16>, vector<128x128xbf16>, vector<160x128xf32> -> vector<160x128xf32>
    %180 = vector.shape_cast %179 : vector<160x128xf32> to vector<10x16x128xf32>
    %181 = vector.extract_strided_slice %180 {offsets = [0, 6, 0], sizes = [10, 10, 128], strides = [1, 1, 1]} : vector<10x16x128xf32> to vector<10x10x128xf32>
    %c0_249 = arith.constant 0 : index
    %c0_250 = arith.constant 0 : index
    %c0_251 = arith.constant 0 : index
    %182 = vector.load %arg16[%c0_249, %c0_250, %c0_251] : memref<16x16x128xf32, #tpu.memory_space<vmem>>, vector<10x10x128xf32>
    %183 = arith.addf %182, %181 : vector<10x10x128xf32>
    %c0_252 = arith.constant 0 : index
    %c0_253 = arith.constant 0 : index
    %c0_254 = arith.constant 0 : index
    %184 = vector.load %arg16[%c0_252, %c0_253, %c0_254] : memref<16x16x128xf32, #tpu.memory_space<vmem>>, vector<10x10x128xf32>
    tpu.vector_store %arg16[%c0_252, %c0_253, %c0_254], %183 {strides = array<i32>} : memref<16x16x128xf32, #tpu.memory_space<vmem>>, vector<10x10x128xf32>,
    %c0_255 = arith.constant 0 : index
    %c0_256 = arith.constant 0 : index
    %c0_257 = arith.constant 0 : index
    %c0_258 = arith.constant 0 : index
    %185 = vector.load %arg2[%c0_255, %c0_256, %c0_257, %c0_258] : memref<1x16x16x128xbf16, #tpu.memory_space<vmem>>, vector<1x4x16x128xbf16>
    %186 = vector.shape_cast %185 : vector<1x4x16x128xbf16> to vector<4x16x128xbf16>
    %187 = vector.shape_cast %186 : vector<4x16x128xbf16> to vector<64x128xbf16>
    %c0_259 = arith.constant 0 : index
    %c0_260 = arith.constant 0 : index
    %c0_261 = arith.constant 0 : index
    %c0_262 = arith.constant 0 : index
    %188 = vector.load %arg6[%c0_259, %c0_260, %c0_261, %c0_262] : memref<3x3x128x128xbf16, #tpu.memory_space<vmem>>, vector<1x1x128x128xbf16>
    %189 = vector.shape_cast %188 : vector<1x1x128x128xbf16> to vector<128x128xbf16>
    %cst_263 = arith.constant dense<0.000000e+00> : vector<64x128xf32>
    %190 = tpu.matmul %187, %189, %cst_263 {dimension_numbers = #tpu.dot_dimension_numbers<[1], [0], [0], [1], [0, 0, 1, 1], [], []>} : vector<64x128xbf16>, vector<128x128xbf16>, vector<64x128xf32> -> vector<64x128xf32>
    %191 = vector.shape_cast %190 : vector<64x128xf32> to vector<4x16x128xf32>
    %192 = vector.extract_strided_slice %191 {offsets = [0, 0, 0], sizes = [4, 4, 128], strides = [1, 1, 1]} : vector<4x16x128xf32> to vector<4x4x128xf32>
    %c12 = arith.constant 12 : index
    %c12_264 = arith.constant 12 : index
    %c0_265 = arith.constant 0 : index
    %193 = vector.load %arg17[%c12, %c12_264, %c0_265] : memref<16x16x128xf32, #tpu.memory_space<vmem>>, vector<4x4x128xf32>
    %194 = arith.addf %193, %192 : vector<4x4x128xf32>
    %c12_266 = arith.constant 12 : index
    %c12_267 = arith.constant 12 : index
    %c0_268 = arith.constant 0 : index
    %195 = vector.load %arg17[%c12_266, %c12_267, %c0_268] : memref<16x16x128xf32, #tpu.memory_space<vmem>>, vector<4x4x128xf32>
    tpu.vector_store %arg17[%c12_266, %c12_267, %c0_268], %194 {strides = array<i32>} : memref<16x16x128xf32, #tpu.memory_space<vmem>>, vector<4x4x128xf32>,
    %c0_269 = arith.constant 0 : index
    %c0_270 = arith.constant 0 : index
    %c0_271 = arith.constant 0 : index
    %c0_272 = arith.constant 0 : index
    %196 = vector.load %arg2[%c0_269, %c0_270, %c0_271, %c0_272] : memref<1x16x16x128xbf16, #tpu.memory_space<vmem>>, vector<1x4x16x128xbf16>
    %197 = vector.shape_cast %196 : vector<1x4x16x128xbf16> to vector<4x16x128xbf16>
    %198 = vector.shape_cast %197 : vector<4x16x128xbf16> to vector<64x128xbf16>
    %c0_273 = arith.constant 0 : index
    %c1_274 = arith.constant 1 : index
    %c0_275 = arith.constant 0 : index
    %c0_276 = arith.constant 0 : index
    %199 = vector.load %arg6[%c0_273, %c1_274, %c0_275, %c0_276] : memref<3x3x128x128xbf16, #tpu.memory_space<vmem>>, vector<1x1x128x128xbf16>
    %200 = vector.shape_cast %199 : vector<1x1x128x128xbf16> to vector<128x128xbf16>
    %cst_277 = arith.constant dense<0.000000e+00> : vector<64x128xf32>
    %201 = tpu.matmul %198, %200, %cst_277 {dimension_numbers = #tpu.dot_dimension_numbers<[1], [0], [0], [1], [0, 0, 1, 1], [], []>} : vector<64x128xbf16>, vector<128x128xbf16>, vector<64x128xf32> -> vector<64x128xf32>
    %202 = vector.shape_cast %201 : vector<64x128xf32> to vector<4x16x128xf32>
    %c12_278 = arith.constant 12 : index
    %c0_279 = arith.constant 0 : index
    %c0_280 = arith.constant 0 : index
    %203 = vector.load %arg17[%c12_278, %c0_279, %c0_280] : memref<16x16x128xf32, #tpu.memory_space<vmem>>, vector<4x16x128xf32>
    %204 = arith.addf %203, %202 : vector<4x16x128xf32>
    %c12_281 = arith.constant 12 : index
    %c0_282 = arith.constant 0 : index
    %c0_283 = arith.constant 0 : index
    %205 = vector.load %arg17[%c12_281, %c0_282, %c0_283] : memref<16x16x128xf32, #tpu.memory_space<vmem>>, vector<4x16x128xf32>
    tpu.vector_store %arg17[%c12_281, %c0_282, %c0_283], %204 {strides = array<i32>} : memref<16x16x128xf32, #tpu.memory_space<vmem>>, vector<4x16x128xf32>,
    %c0_284 = arith.constant 0 : index
    %c0_285 = arith.constant 0 : index
    %c0_286 = arith.constant 0 : index
    %c0_287 = arith.constant 0 : index
    %206 = vector.load %arg2[%c0_284, %c0_285, %c0_286, %c0_287] : memref<1x16x16x128xbf16, #tpu.memory_space<vmem>>, vector<1x4x16x128xbf16>
    %207 = vector.shape_cast %206 : vector<1x4x16x128xbf16> to vector<4x16x128xbf16>
    %208 = vector.shape_cast %207 : vector<4x16x128xbf16> to vector<64x128xbf16>
    %c0_288 = arith.constant 0 : index
    %c2_289 = arith.constant 2 : index
    %c0_290 = arith.constant 0 : index
    %c0_291 = arith.constant 0 : index
    %209 = vector.load %arg6[%c0_288, %c2_289, %c0_290, %c0_291] : memref<3x3x128x128xbf16, #tpu.memory_space<vmem>>, vector<1x1x128x128xbf16>
    %210 = vector.shape_cast %209 : vector<1x1x128x128xbf16> to vector<128x128xbf16>
    %cst_292 = arith.constant dense<0.000000e+00> : vector<64x128xf32>
    %211 = tpu.matmul %208, %210, %cst_292 {dimension_numbers = #tpu.dot_dimension_numbers<[1], [0], [0], [1], [0, 0, 1, 1], [], []>} : vector<64x128xbf16>, vector<128x128xbf16>, vector<64x128xf32> -> vector<64x128xf32>
    %212 = vector.shape_cast %211 : vector<64x128xf32> to vector<4x16x128xf32>
    %213 = vector.extract_strided_slice %212 {offsets = [0, 12, 0], sizes = [4, 4, 128], strides = [1, 1, 1]} : vector<4x16x128xf32> to vector<4x4x128xf32>
    %c12_293 = arith.constant 12 : index
    %c0_294 = arith.constant 0 : index
    %c0_295 = arith.constant 0 : index
    %214 = vector.load %arg17[%c12_293, %c0_294, %c0_295] : memref<16x16x128xf32, #tpu.memory_space<vmem>>, vector<4x4x128xf32>
    %215 = arith.addf %214, %213 : vector<4x4x128xf32>
    %c12_296 = arith.constant 12 : index
    %c0_297 = arith.constant 0 : index
    %c0_298 = arith.constant 0 : index
    %216 = vector.load %arg17[%c12_296, %c0_297, %c0_298] : memref<16x16x128xf32, #tpu.memory_space<vmem>>, vector<4x4x128xf32>
    tpu.vector_store %arg17[%c12_296, %c0_297, %c0_298], %215 {strides = array<i32>} : memref<16x16x128xf32, #tpu.memory_space<vmem>>, vector<4x4x128xf32>,
    %c1_299 = arith.constant 1 : index
    %c0_300 = arith.constant 0 : index
    %c0_301 = arith.constant 0 : index
    %c0_302 = arith.constant 0 : index
    %217 = vector.load %arg6[%c1_299, %c0_300, %c0_301, %c0_302] : memref<3x3x128x128xbf16, #tpu.memory_space<vmem>>, vector<1x1x128x128xbf16>
    %218 = vector.shape_cast %217 : vector<1x1x128x128xbf16> to vector<128x128xbf16>
    %cst_303 = arith.constant dense<0.000000e+00> : vector<256x128xf32>
    %219 = tpu.matmul %4, %218, %cst_303 {dimension_numbers = #tpu.dot_dimension_numbers<[1], [0], [0], [1], [0, 0, 1, 1], [], []>} : vector<256x128xbf16>, vector<128x128xbf16>, vector<256x128xf32> -> vector<256x128xf32>
    %220 = vector.shape_cast %219 : vector<256x128xf32> to vector<16x16x128xf32>
    %221 = vector.extract_strided_slice %220 {offsets = [0, 0, 0], sizes = [16, 4, 128], strides = [1, 1, 1]} : vector<16x16x128xf32> to vector<16x4x128xf32>
    %c0_304 = arith.constant 0 : index
    %c12_305 = arith.constant 12 : index
    %c0_306 = arith.constant 0 : index
    %222 = vector.load %arg17[%c0_304, %c12_305, %c0_306] : memref<16x16x128xf32, #tpu.memory_space<vmem>>, vector<16x4x128xf32>
    %223 = arith.addf %222, %221 : vector<16x4x128xf32>
    %c0_307 = arith.constant 0 : index
    %c12_308 = arith.constant 12 : index
    %c0_309 = arith.constant 0 : index
    %224 = vector.load %arg17[%c0_307, %c12_308, %c0_309] : memref<16x16x128xf32, #tpu.memory_space<vmem>>, vector<16x4x128xf32>
    tpu.vector_store %arg17[%c0_307, %c12_308, %c0_309], %223 {strides = array<i32>} : memref<16x16x128xf32, #tpu.memory_space<vmem>>, vector<16x4x128xf32>,
    %c1_310 = arith.constant 1 : index
    %c1_311 = arith.constant 1 : index
    %c0_312 = arith.constant 0 : index
    %c0_313 = arith.constant 0 : index
    %225 = vector.load %arg6[%c1_310, %c1_311, %c0_312, %c0_313] : memref<3x3x128x128xbf16, #tpu.memory_space<vmem>>, vector<1x1x128x128xbf16>
    %226 = vector.shape_cast %225 : vector<1x1x128x128xbf16> to vector<128x128xbf16>
    %cst_314 = arith.constant dense<0.000000e+00> : vector<256x128xf32>
    %227 = tpu.matmul %4, %226, %cst_314 {dimension_numbers = #tpu.dot_dimension_numbers<[1], [0], [0], [1], [0, 0, 1, 1], [], []>} : vector<256x128xbf16>, vector<128x128xbf16>, vector<256x128xf32> -> vector<256x128xf32>
    %228 = vector.shape_cast %227 : vector<256x128xf32> to vector<16x16x128xf32>
    %c0_315 = arith.constant 0 : index
    %c0_316 = arith.constant 0 : index
    %c0_317 = arith.constant 0 : index
    %229 = vector.load %arg17[%c0_315, %c0_316, %c0_317] : memref<16x16x128xf32, #tpu.memory_space<vmem>>, vector<16x16x128xf32>
    %230 = arith.addf %229, %228 : vector<16x16x128xf32>
    %c0_318 = arith.constant 0 : index
    %c0_319 = arith.constant 0 : index
    %c0_320 = arith.constant 0 : index
    %231 = vector.load %arg17[%c0_318, %c0_319, %c0_320] : memref<16x16x128xf32, #tpu.memory_space<vmem>>, vector<16x16x128xf32>
    tpu.vector_store %arg17[%c0_318, %c0_319, %c0_320], %230 {strides = array<i32>} : memref<16x16x128xf32, #tpu.memory_space<vmem>>, vector<16x16x128xf32>,
    %c1_321 = arith.constant 1 : index
    %c2_322 = arith.constant 2 : index
    %c0_323 = arith.constant 0 : index
    %c0_324 = arith.constant 0 : index
    %232 = vector.load %arg6[%c1_321, %c2_322, %c0_323, %c0_324] : memref<3x3x128x128xbf16, #tpu.memory_space<vmem>>, vector<1x1x128x128xbf16>
    %233 = vector.shape_cast %232 : vector<1x1x128x128xbf16> to vector<128x128xbf16>
    %cst_325 = arith.constant dense<0.000000e+00> : vector<256x128xf32>
    %234 = tpu.matmul %4, %233, %cst_325 {dimension_numbers = #tpu.dot_dimension_numbers<[1], [0], [0], [1], [0, 0, 1, 1], [], []>} : vector<256x128xbf16>, vector<128x128xbf16>, vector<256x128xf32> -> vector<256x128xf32>
    %235 = vector.shape_cast %234 : vector<256x128xf32> to vector<16x16x128xf32>
    %236 = vector.extract_strided_slice %235 {offsets = [0, 12, 0], sizes = [16, 4, 128], strides = [1, 1, 1]} : vector<16x16x128xf32> to vector<16x4x128xf32>
    %c0_326 = arith.constant 0 : index
    %c0_327 = arith.constant 0 : index
    %c0_328 = arith.constant 0 : index
    %237 = vector.load %arg17[%c0_326, %c0_327, %c0_328] : memref<16x16x128xf32, #tpu.memory_space<vmem>>, vector<16x4x128xf32>
    %238 = arith.addf %237, %236 : vector<16x4x128xf32>
    %c0_329 = arith.constant 0 : index
    %c0_330 = arith.constant 0 : index
    %c0_331 = arith.constant 0 : index
    %239 = vector.load %arg17[%c0_329, %c0_330, %c0_331] : memref<16x16x128xf32, #tpu.memory_space<vmem>>, vector<16x4x128xf32>
    tpu.vector_store %arg17[%c0_329, %c0_330, %c0_331], %238 {strides = array<i32>} : memref<16x16x128xf32, #tpu.memory_space<vmem>>, vector<16x4x128xf32>,
    %c0_332 = arith.constant 0 : index
    %c12_333 = arith.constant 12 : index
    %c0_334 = arith.constant 0 : index
    %c0_335 = arith.constant 0 : index
    %240 = vector.load %arg2[%c0_332, %c12_333, %c0_334, %c0_335] : memref<1x16x16x128xbf16, #tpu.memory_space<vmem>>, vector<1x4x16x128xbf16>
    %241 = vector.shape_cast %240 : vector<1x4x16x128xbf16> to vector<4x16x128xbf16>
    %242 = vector.shape_cast %241 : vector<4x16x128xbf16> to vector<64x128xbf16>
    %c2_336 = arith.constant 2 : index
    %c0_337 = arith.constant 0 : index
    %c0_338 = arith.constant 0 : index
    %c0_339 = arith.constant 0 : index
    %243 = vector.load %arg6[%c2_336, %c0_337, %c0_338, %c0_339] : memref<3x3x128x128xbf16, #tpu.memory_space<vmem>>, vector<1x1x128x128xbf16>
    %244 = vector.shape_cast %243 : vector<1x1x128x128xbf16> to vector<128x128xbf16>
    %cst_340 = arith.constant dense<0.000000e+00> : vector<64x128xf32>
    %245 = tpu.matmul %242, %244, %cst_340 {dimension_numbers = #tpu.dot_dimension_numbers<[1], [0], [0], [1], [0, 0, 1, 1], [], []>} : vector<64x128xbf16>, vector<128x128xbf16>, vector<64x128xf32> -> vector<64x128xf32>
    %246 = vector.shape_cast %245 : vector<64x128xf32> to vector<4x16x128xf32>
    %247 = vector.extract_strided_slice %246 {offsets = [0, 0, 0], sizes = [4, 4, 128], strides = [1, 1, 1]} : vector<4x16x128xf32> to vector<4x4x128xf32>
    %c0_341 = arith.constant 0 : index
    %c12_342 = arith.constant 12 : index
    %c0_343 = arith.constant 0 : index
    %248 = vector.load %arg17[%c0_341, %c12_342, %c0_343] : memref<16x16x128xf32, #tpu.memory_space<vmem>>, vector<4x4x128xf32>
    %249 = arith.addf %248, %247 : vector<4x4x128xf32>
    %c0_344 = arith.constant 0 : index
    %c12_345 = arith.constant 12 : index
    %c0_346 = arith.constant 0 : index
    %250 = vector.load %arg17[%c0_344, %c12_345, %c0_346] : memref<16x16x128xf32, #tpu.memory_space<vmem>>, vector<4x4x128xf32>
    tpu.vector_store %arg17[%c0_344, %c12_345, %c0_346], %249 {strides = array<i32>} : memref<16x16x128xf32, #tpu.memory_space<vmem>>, vector<4x4x128xf32>,
    %c0_347 = arith.constant 0 : index
    %c12_348 = arith.constant 12 : index
    %c0_349 = arith.constant 0 : index
    %c0_350 = arith.constant 0 : index
    %251 = vector.load %arg2[%c0_347, %c12_348, %c0_349, %c0_350] : memref<1x16x16x128xbf16, #tpu.memory_space<vmem>>, vector<1x4x16x128xbf16>
    %252 = vector.shape_cast %251 : vector<1x4x16x128xbf16> to vector<4x16x128xbf16>
    %253 = vector.shape_cast %252 : vector<4x16x128xbf16> to vector<64x128xbf16>
    %c2_351 = arith.constant 2 : index
    %c1_352 = arith.constant 1 : index
    %c0_353 = arith.constant 0 : index
    %c0_354 = arith.constant 0 : index
    %254 = vector.load %arg6[%c2_351, %c1_352, %c0_353, %c0_354] : memref<3x3x128x128xbf16, #tpu.memory_space<vmem>>, vector<1x1x128x128xbf16>
    %255 = vector.shape_cast %254 : vector<1x1x128x128xbf16> to vector<128x128xbf16>
    %cst_355 = arith.constant dense<0.000000e+00> : vector<64x128xf32>
    %256 = tpu.matmul %253, %255, %cst_355 {dimension_numbers = #tpu.dot_dimension_numbers<[1], [0], [0], [1], [0, 0, 1, 1], [], []>} : vector<64x128xbf16>, vector<128x128xbf16>, vector<64x128xf32> -> vector<64x128xf32>
    %257 = vector.shape_cast %256 : vector<64x128xf32> to vector<4x16x128xf32>
    %c0_356 = arith.constant 0 : index
    %c0_357 = arith.constant 0 : index
    %c0_358 = arith.constant 0 : index
    %258 = vector.load %arg17[%c0_356, %c0_357, %c0_358] : memref<16x16x128xf32, #tpu.memory_space<vmem>>, vector<4x16x128xf32>
    %259 = arith.addf %258, %257 : vector<4x16x128xf32>
    %c0_359 = arith.constant 0 : index
    %c0_360 = arith.constant 0 : index
    %c0_361 = arith.constant 0 : index
    %260 = vector.load %arg17[%c0_359, %c0_360, %c0_361] : memref<16x16x128xf32, #tpu.memory_space<vmem>>, vector<4x16x128xf32>
    tpu.vector_store %arg17[%c0_359, %c0_360, %c0_361], %259 {strides = array<i32>} : memref<16x16x128xf32, #tpu.memory_space<vmem>>, vector<4x16x128xf32>,
    %c0_362 = arith.constant 0 : index
    %c12_363 = arith.constant 12 : index
    %c0_364 = arith.constant 0 : index
    %c0_365 = arith.constant 0 : index
    %261 = vector.load %arg2[%c0_362, %c12_363, %c0_364, %c0_365] : memref<1x16x16x128xbf16, #tpu.memory_space<vmem>>, vector<1x4x16x128xbf16>
    %262 = vector.shape_cast %261 : vector<1x4x16x128xbf16> to vector<4x16x128xbf16>
    %263 = vector.shape_cast %262 : vector<4x16x128xbf16> to vector<64x128xbf16>
    %c2_366 = arith.constant 2 : index
    %c2_367 = arith.constant 2 : index
    %c0_368 = arith.constant 0 : index
    %c0_369 = arith.constant 0 : index
    %264 = vector.load %arg6[%c2_366, %c2_367, %c0_368, %c0_369] : memref<3x3x128x128xbf16, #tpu.memory_space<vmem>>, vector<1x1x128x128xbf16>
    %265 = vector.shape_cast %264 : vector<1x1x128x128xbf16> to vector<128x128xbf16>
    %cst_370 = arith.constant dense<0.000000e+00> : vector<64x128xf32>
    %266 = tpu.matmul %263, %265, %cst_370 {dimension_numbers = #tpu.dot_dimension_numbers<[1], [0], [0], [1], [0, 0, 1, 1], [], []>} : vector<64x128xbf16>, vector<128x128xbf16>, vector<64x128xf32> -> vector<64x128xf32>
    %267 = vector.shape_cast %266 : vector<64x128xf32> to vector<4x16x128xf32>
    %268 = vector.extract_strided_slice %267 {offsets = [0, 12, 0], sizes = [4, 4, 128], strides = [1, 1, 1]} : vector<4x16x128xf32> to vector<4x4x128xf32>
    %c0_371 = arith.constant 0 : index
    %c0_372 = arith.constant 0 : index
    %c0_373 = arith.constant 0 : index
    %269 = vector.load %arg17[%c0_371, %c0_372, %c0_373] : memref<16x16x128xf32, #tpu.memory_space<vmem>>, vector<4x4x128xf32>
    %270 = arith.addf %269, %268 : vector<4x4x128xf32>
    %c0_374 = arith.constant 0 : index
    %c0_375 = arith.constant 0 : index
    %c0_376 = arith.constant 0 : index
    %271 = vector.load %arg17[%c0_374, %c0_375, %c0_376] : memref<16x16x128xf32, #tpu.memory_space<vmem>>, vector<4x4x128xf32>
    tpu.vector_store %arg17[%c0_374, %c0_375, %c0_376], %270 {strides = array<i32>} : memref<16x16x128xf32, #tpu.memory_space<vmem>>, vector<4x4x128xf32>,
    %c1_i32 = arith.constant 1 : i32
    %272 = arith.cmpi eq, %arg1, %c1_i32 : i32
    %273 = arith.extui %272 : i1 to i32
    %c0_i32_377 = arith.constant 0 : i32
    %274 = arith.cmpi ne, %273, %c0_i32_377 : i32
    scf.if %274 {
      %c0_378 = arith.constant 0 : index
      %c0_379 = arith.constant 0 : index
      %275 = vector.load %arg12[%c0_378, %c0_379] : memref<1x128xf32, #tpu.memory_space<vmem>>, vector<1x128xf32>
      %c0_380 = arith.constant 0 : index
      %c0_381 = arith.constant 0 : index
      %c0_382 = arith.constant 0 : index
      %276 = vector.load %arg14[%c0_380, %c0_381, %c0_382] : memref<16x16x128xf32, #tpu.memory_space<vmem>>, vector<16x16x128xf32>
      %277 = vector.shape_cast %276 : vector<16x16x128xf32> to vector<256x128xf32>
      %c0_383 = arith.constant 0 : index
      %c0_384 = arith.constant 0 : index
      %278 = vector.load %arg8[%c0_383, %c0_384] : memref<1x128xf32, #tpu.memory_space<vmem>>, vector<1x128xf32>
      %279 = vector.broadcast %278 : vector<1x128xf32> to vector<256x128xf32>
      %280 = arith.addf %277, %279 : vector<256x128xf32>
      %cst_385 = arith.constant 0.000000e+00 : f32
      %281 = vector.broadcast %cst_385 : f32 to vector<256x128xf32>
      %282 = arith.cmpf ogt, %280, %281 : vector<256x128xf32>
      %cst_386 = arith.constant 0.00999999977 : f32
      %283 = vector.broadcast %cst_386 : f32 to vector<256x128xf32>
      %284 = arith.mulf %283, %280 : vector<256x128xf32>
      %285 = arith.select %282, %280, %284 : vector<256x128xi1>, vector<256x128xf32>
      %286 = arith.truncf %285 : vector<256x128xf32> to vector<256x128xbf16>
      %c0_387 = arith.constant 0 : index
      %c0_388 = arith.constant 0 : index
      %c0_389 = arith.constant 0 : index
      %287 = vector.load %arg7[%c0_387, %c0_388, %c0_389] : memref<4x128x128xbf16, #tpu.memory_space<vmem>>, vector<1x128x128xbf16>
      %288 = vector.shape_cast %287 : vector<1x128x128xbf16> to vector<128x128xbf16>
      %cst_390 = arith.constant dense<0.000000e+00> : vector<256x128xf32>
      %289 = tpu.matmul %286, %288, %cst_390 {dimension_numbers = #tpu.dot_dimension_numbers<[1], [0], [0], [1], [0, 0, 1, 1], [], []>} : vector<256x128xbf16>, vector<128x128xbf16>, vector<256x128xf32> -> vector<256x128xf32>
      %290 = vector.broadcast %275 : vector<1x128xf32> to vector<256x128xf32>
      %291 = arith.addf %290, %289 : vector<256x128xf32>
      %c0_391 = arith.constant 0 : index
      %c0_392 = arith.constant 0 : index
      %c0_393 = arith.constant 0 : index
      %292 = vector.load %arg15[%c0_391, %c0_392, %c0_393] : memref<16x16x128xf32, #tpu.memory_space<vmem>>, vector<16x16x128xf32>
      %293 = vector.shape_cast %292 : vector<16x16x128xf32> to vector<256x128xf32>
      %c0_394 = arith.constant 0 : index
      %c0_395 = arith.constant 0 : index
      %294 = vector.load %arg9[%c0_394, %c0_395] : memref<1x128xf32, #tpu.memory_space<vmem>>, vector<1x128xf32>
      %295 = vector.broadcast %294 : vector<1x128xf32> to vector<256x128xf32>
      %296 = arith.addf %293, %295 : vector<256x128xf32>
      %cst_396 = arith.constant 0.000000e+00 : f32
      %297 = vector.broadcast %cst_396 : f32 to vector<256x128xf32>
      %298 = arith.cmpf ogt, %296, %297 : vector<256x128xf32>
      %cst_397 = arith.constant 0.00999999977 : f32
      %299 = vector.broadcast %cst_397 : f32 to vector<256x128xf32>
      %300 = arith.mulf %299, %296 : vector<256x128xf32>
      %301 = arith.select %298, %296, %300 : vector<256x128xi1>, vector<256x128xf32>
      %302 = arith.truncf %301 : vector<256x128xf32> to vector<256x128xbf16>
      %c1_398 = arith.constant 1 : index
      %c0_399 = arith.constant 0 : index
      %c0_400 = arith.constant 0 : index
      %303 = vector.load %arg7[%c1_398, %c0_399, %c0_400] : memref<4x128x128xbf16, #tpu.memory_space<vmem>>, vector<1x128x128xbf16>
      %304 = vector.shape_cast %303 : vector<1x128x128xbf16> to vector<128x128xbf16>
      %cst_401 = arith.constant dense<0.000000e+00> : vector<256x128xf32>
      %305 = tpu.matmul %302, %304, %cst_401 {dimension_numbers = #tpu.dot_dimension_numbers<[1], [0], [0], [1], [0, 0, 1, 1], [], []>} : vector<256x128xbf16>, vector<128x128xbf16>, vector<256x128xf32> -> vector<256x128xf32>
      %306 = arith.addf %291, %305 : vector<256x128xf32>
      %c0_402 = arith.constant 0 : index
      %c0_403 = arith.constant 0 : index
      %c0_404 = arith.constant 0 : index
      %307 = vector.load %arg16[%c0_402, %c0_403, %c0_404] : memref<16x16x128xf32, #tpu.memory_space<vmem>>, vector<16x16x128xf32>
      %308 = vector.shape_cast %307 : vector<16x16x128xf32> to vector<256x128xf32>
      %c0_405 = arith.constant 0 : index
      %c0_406 = arith.constant 0 : index
      %309 = vector.load %arg10[%c0_405, %c0_406] : memref<1x128xf32, #tpu.memory_space<vmem>>, vector<1x128xf32>
      %310 = vector.broadcast %309 : vector<1x128xf32> to vector<256x128xf32>
      %311 = arith.addf %308, %310 : vector<256x128xf32>
      %cst_407 = arith.constant 0.000000e+00 : f32
      %312 = vector.broadcast %cst_407 : f32 to vector<256x128xf32>
      %313 = arith.cmpf ogt, %311, %312 : vector<256x128xf32>
      %cst_408 = arith.constant 0.00999999977 : f32
      %314 = vector.broadcast %cst_408 : f32 to vector<256x128xf32>
      %315 = arith.mulf %314, %311 : vector<256x128xf32>
      %316 = arith.select %313, %311, %315 : vector<256x128xi1>, vector<256x128xf32>
      %317 = arith.truncf %316 : vector<256x128xf32> to vector<256x128xbf16>
      %c2_409 = arith.constant 2 : index
      %c0_410 = arith.constant 0 : index
      %c0_411 = arith.constant 0 : index
      %318 = vector.load %arg7[%c2_409, %c0_410, %c0_411] : memref<4x128x128xbf16, #tpu.memory_space<vmem>>, vector<1x128x128xbf16>
      %319 = vector.shape_cast %318 : vector<1x128x128xbf16> to vector<128x128xbf16>
      %cst_412 = arith.constant dense<0.000000e+00> : vector<256x128xf32>
      %320 = tpu.matmul %317, %319, %cst_412 {dimension_numbers = #tpu.dot_dimension_numbers<[1], [0], [0], [1], [0, 0, 1, 1], [], []>} : vector<256x128xbf16>, vector<128x128xbf16>, vector<256x128xf32> -> vector<256x128xf32>
      %321 = arith.addf %306, %320 : vector<256x128xf32>
      %c0_413 = arith.constant 0 : index
      %c0_414 = arith.constant 0 : index
      %c0_415 = arith.constant 0 : index
      %322 = vector.load %arg17[%c0_413, %c0_414, %c0_415] : memref<16x16x128xf32, #tpu.memory_space<vmem>>, vector<16x16x128xf32>
      %323 = vector.shape_cast %322 : vector<16x16x128xf32> to vector<256x128xf32>
      %c0_416 = arith.constant 0 : index
      %c0_417 = arith.constant 0 : index
      %324 = vector.load %arg11[%c0_416, %c0_417] : memref<1x128xf32, #tpu.memory_space<vmem>>, vector<1x128xf32>
      %325 = vector.broadcast %324 : vector<1x128xf32> to vector<256x128xf32>
      %326 = arith.addf %323, %325 : vector<256x128xf32>
      %cst_418 = arith.constant 0.000000e+00 : f32
      %327 = vector.broadcast %cst_418 : f32 to vector<256x128xf32>
      %328 = arith.cmpf ogt, %326, %327 : vector<256x128xf32>
      %cst_419 = arith.constant 0.00999999977 : f32
      %329 = vector.broadcast %cst_419 : f32 to vector<256x128xf32>
      %330 = arith.mulf %329, %326 : vector<256x128xf32>
      %331 = arith.select %328, %326, %330 : vector<256x128xi1>, vector<256x128xf32>
      %332 = arith.truncf %331 : vector<256x128xf32> to vector<256x128xbf16>
      %c3 = arith.constant 3 : index
      %c0_420 = arith.constant 0 : index
      %c0_421 = arith.constant 0 : index
      %333 = vector.load %arg7[%c3, %c0_420, %c0_421] : memref<4x128x128xbf16, #tpu.memory_space<vmem>>, vector<1x128x128xbf16>
      %334 = vector.shape_cast %333 : vector<1x128x128xbf16> to vector<128x128xbf16>
      %cst_422 = arith.constant dense<0.000000e+00> : vector<256x128xf32>
      %335 = tpu.matmul %332, %334, %cst_422 {dimension_numbers = #tpu.dot_dimension_numbers<[1], [0], [0], [1], [0, 0, 1, 1], [], []>} : vector<256x128xbf16>, vector<128x128xbf16>, vector<256x128xf32> -> vector<256x128xf32>
      %336 = arith.addf %321, %335 : vector<256x128xf32>
      %cst_423 = arith.constant 0.000000e+00 : f32
      %337 = vector.broadcast %cst_423 : f32 to vector<256x128xf32>
      %338 = arith.cmpf ogt, %336, %337 : vector<256x128xf32>
      %cst_424 = arith.constant 0.00999999977 : f32
      %339 = vector.broadcast %cst_424 : f32 to vector<256x128xf32>
      %340 = arith.mulf %339, %336 : vector<256x128xf32>
      %341 = arith.select %338, %336, %340 : vector<256x128xi1>, vector<256x128xf32>
      %342 = vector.shape_cast %341 : vector<256x128xf32> to vector<1x16x16x128xf32>
      %c0_425 = arith.constant 0 : index
      %c0_426 = arith.constant 0 : index
      %c0_427 = arith.constant 0 : index
      %c0_428 = arith.constant 0 : index
      %343 = vector.load %arg13[%c0_425, %c0_426, %c0_427, %c0_428] : memref<1x16x16x128xf32, #tpu.memory_space<vmem>>, vector<1x16x16x128xf32>
      tpu.vector_store %arg13[%c0_425, %c0_426, %c0_427, %c0_428], %342 {strides = array<i32>} : memref<1x16x16x128xf32, #tpu.memory_space<vmem>>, vector<1x16x16x128xf32>,
    } else {
    }
    return
  }
  func.func @transform_0(%arg0: i32, %arg1: i32) -> (i32, i32, i32, i32) {
    %c0_i32 = arith.constant 0 : i32
    %c0_i32_0 = arith.constant 0 : i32
    %c0_i32_1 = arith.constant 0 : i32
    return %arg0, %c0_i32, %c0_i32_0, %arg1 : i32, i32, i32, i32
  }
  func.func @transform_1(%arg0: i32, %arg1: i32) -> (i32, i32) {
    %c0_i32 = arith.constant 0 : i32
    %c0_i32_0 = arith.constant 0 : i32
    return %arg1, %c0_i32 : i32, i32
  }
  func.func @transform_2(%arg0: i32, %arg1: i32) -> (i32, i32, i32, i32) {
    %c0_i32 = arith.constant 0 : i32
    %c0_i32_0 = arith.constant 0 : i32
    %c0_i32_1 = arith.constant 0 : i32
    %c0_i32_2 = arith.constant 0 : i32
    return %c0_i32, %c0_i32_0, %arg1, %c0_i32_1 : i32, i32, i32, i32
  }
  func.func @transform_3(%arg0: i32, %arg1: i32) -> (i32, i32, i32, i32) {
    %c0_i32 = arith.constant 0 : i32
    %c0_i32_0 = arith.constant 0 : i32
    %c0_i32_1 = arith.constant 0 : i32
    %c0_i32_2 = arith.constant 0 : i32
    return %c0_i32, %c0_i32_0, %arg1, %c0_i32_1 : i32, i32, i32, i32
  }
  func.func @transform_4(%arg0: i32, %arg1: i32) -> (i32, i32, i32, i32) {
    %c0_i32 = arith.constant 0 : i32
    %c0_i32_0 = arith.constant 0 : i32
    %c0_i32_1 = arith.constant 0 : i32
    %c0_i32_2 = arith.constant 0 : i32
    return %c0_i32, %c0_i32_0, %arg1, %c0_i32_1 : i32, i32, i32, i32
  }
  func.func @transform_5(%arg0: i32, %arg1: i32) -> (i32, i32, i32) {
    %c0_i32 = arith.constant 0 : i32
    %c0_i32_0 = arith.constant 0 : i32
    %c0_i32_1 = arith.constant 0 : i32
    %c0_i32_2 = arith.constant 0 : i32
    return %c0_i32, %c0_i32_0, %c0_i32_1 : i32, i32, i32
  }
  func.func @transform_6(%arg0: i32, %arg1: i32) -> (i32, i32) {
    %c0_i32 = arith.constant 0 : i32
    %c0_i32_0 = arith.constant 0 : i32
    %c0_i32_1 = arith.constant 0 : i32
    return %c0_i32, %c0_i32_0 : i32, i32
  }
  func.func @transform_7(%arg0: i32, %arg1: i32) -> (i32, i32) {
    %c0_i32 = arith.constant 0 : i32
    %c0_i32_0 = arith.constant 0 : i32
    %c0_i32_1 = arith.constant 0 : i32
    return %c0_i32, %c0_i32_0 : i32, i32
  }
  func.func @transform_8(%arg0: i32, %arg1: i32) -> (i32, i32) {
    %c0_i32 = arith.constant 0 : i32
    %c0_i32_0 = arith.constant 0 : i32
    %c0_i32_1 = arith.constant 0 : i32
    return %c0_i32, %c0_i32_0 : i32, i32
  }
  func.func @transform_9(%arg0: i32, %arg1: i32) -> (i32, i32) {
    %c0_i32 = arith.constant 0 : i32
    %c0_i32_0 = arith.constant 0 : i32
    %c0_i32_1 = arith.constant 0 : i32
    return %c0_i32, %c0_i32_0 : i32, i32
  }
  func.func @transform_10(%arg0: i32, %arg1: i32) -> (i32, i32) {
    %c0_i32 = arith.constant 0 : i32
    %c0_i32_0 = arith.constant 0 : i32
    %c0_i32_1 = arith.constant 0 : i32
    return %c0_i32, %c0_i32_0 : i32, i32
  }
  func.func @transform_11(%arg0: i32, %arg1: i32) -> (i32, i32, i32, i32) {
    %c0_i32 = arith.constant 0 : i32
    %c0_i32_0 = arith.constant 0 : i32
    %c0_i32_1 = arith.constant 0 : i32
    %c0_i32_2 = arith.constant 0 : i32
    return %arg0, %c0_i32, %c0_i32_0, %c0_i32_1 : i32, i32, i32, i32
  }
}

</mosaic_0001>

<bundles_post_ra>
// kernel: tpu_custom_call.1
= control target key start
LH: loop header
LB: loop body
LE: loop exit
PB: predicated region body
PF: predicated region fallthrough
CT: control target
= control target key end

     0   :  { %s15733_s0 = inlined_call_operand.hbm [shape: bf16[2,16,16,256], index: 0, kind: input, shape index: {}]   ;;  %s15734_s1 = inlined_call_operand.hbm [shape: bf16[256,128], index: 1, kind: input, shape index: {}]   ;;  %s15735_s2 = inlined_call_operand.hbm [shape: bf16[3,3,256,128], index: 2, kind: input, shape index: {}]   ;;  %s15736_s3 = inlined_call_operand.hbm [shape: bf16[3,3,256,128], index: 3, kind: input, shape index: {}]   ;;  %s15737_s4 = inlined_call_operand.hbm [shape: bf16[3,3,256,128], index: 4, kind: input, shape index: {}]   ;;  %s15738_s5 = inlined_call_operand.hbm [shape: bf16[4,128,128], index: 5, kind: input, shape index: {}]   ;;  %s15739_s6 = inlined_call_operand.vmem [shape: f32[1,128], index: 6, kind: input, shape index: {}]   ;;  %s15740_s7 = inlined_call_operand.vmem [shape: f32[1,128], index: 7, kind: input, shape index: {}]   ;;  %s15741_s8 = inlined_call_operand.vmem [shape: f32[1,128], index: 8, kind: input, shape index: {}]   ;;  %s15742_s9 = inlined_call_operand.vmem [shape: f32[1,128], index: 9, kind: input, shape index: {}]   ;;  %s15743_s10 = inlined_call_operand.vmem [shape: f32[1,128], index: 10, kind: input, shape index: {}]   ;;  %s15744_s11 = inlined_call_operand.hbm [shape: f32[2,16,16,128], index: 11, kind: output, shape index: {}]  }
   0x1   :  { %15766 = sst [smem:[#allocation47_spill]] %s15733_s0 }
   0x2   :  { %15767 = sst [smem:[#allocation48_spill]] %s15734_s1 }
   0x3   :  { %15768 = sst [smem:[#allocation49_spill]] %s15738_s5 }
   0x4   :  { %15769 = sst [smem:[#allocation50_spill]] %s15739_s6 }
   0x5   :  { %15770 = sst [smem:[#allocation51_spill]] %s15740_s7 }
   0x6   :  { %15771 = sst [smem:[#allocation52_spill]] %s15741_s8 }
   0x7   :  { %15772 = sst [smem:[#allocation53_spill]] %s15742_s9 }
   0x8   :  { %15773 = sst [smem:[#allocation54_spill]] %s15743_s10 }
   0x9   :  { %15774 = sst [smem:[#allocation55_spill]] %s15744_s11 }
   0xa   :  { %16 = vsyncpa [#allocation7], 0 }
   0xb   :  { %18 = vsyncpa [#allocation7 + $0x1], 0 }
   0xc   :  { %19 = vsyncpa [#allocation10], 0 }
   0xd   :  { %21 = vsyncpa [#allocation10 + $0x1], 0 }
   0xe   :  { %22 = vsyncpa [#allocation13], 0 }
   0xf   :  { %24 = vsyncpa [#allocation13 + $0x1], 0 }
  0x10   :  { %25 = vsyncpa [#allocation16], 0 }
  0x11   :  { %26 = vsyncpa [#allocation8], 0 }
  0x12   :  { %28 = vsyncpa [#allocation8 + $0x1], 0  ;;  %s13584_s17 = smov 0   ;;  %s13586_s18 = smov 0  }
  0x13   :  { %s13588_s19 = smov 0   ;;  %s13590_s20 = smov 0  }
  0x14   :  { %s13592_s21 = smov 0   ;;  %s13594_s22 = smov 0  }
  0x15   :  { %s13596_s23 = smov 0   ;;  %s13598_s24 = smov 0  }
  0x16   :  { %s13600_s25 = smov 0   ;;  %s13602_s26 = smov 0  }
  0x17   :  { %s13604_s27 = smov 0   ;;  %s13606_s28 = smov 0  }
  0x18   :  { %s13608_s29 = smov 0   ;;  %s13610_s30 = smov 0  }
  0x19 LB: > { %15775 = sst [smem:[#allocation32_spill]] %s13443_s17  ;;  %s13653_s12 = sadd.s32 4294967295, %s13495_s30   ;;  %s13495_s30 = sphi %s13610_s30, %s34_s30   ;;  %s13491_s29 = sphi %s13608_s29, %s15831_s29   ;;  %s13487_s28 = sphi %s13606_s28, %s15840_s28   ;;  %s13483_s27 = sphi %s13604_s27, %s15839_s27   ;;  %s13479_s26 = sphi %s13602_s26, %s15838_s26   ;;  %s13475_s25 = sphi %s13600_s25, %s15837_s25   ;;  %s13471_s24 = sphi %s13598_s24, %s15836_s24   ;;  %s13467_s23 = sphi %s13596_s23, %s15835_s23   ;;  %s13463_s22 = sphi %s13594_s22, %s15834_s22   ;;  %s13459_s21 = sphi %s13592_s21, %s15833_s21   ;;  %s13455_s20 = sphi %s13590_s20, %s15832_s20   ;;  %s13451_s19 = sphi %s13588_s19, %s15825_s19   ;;  %s13447_s18 = sphi %s13586_s18, %s15824_s18   ;;  %s13443_s17 = sphi %s13584_s17, %s15823_s17  }
  0x1a   : > { %15776 = sst [smem:[#allocation33_spill]] %s13447_s18  ;;  %s43_s14 = sadd.s32 1, %s13487_s28 }
  0x1b   : > { %15777 = sst [smem:[#allocation34_spill]] %s13451_s19  ;;  %s46_s15 = sadd.s32 1, %s13491_s29 }
  0x1c   : > { %15778 = sst [smem:[#allocation35_spill]] %s13475_s25  ;;  %p44_p0 = scmp.ge.s32.totalorder %s43_s14, 2 }
  0x1d   : > { %15779 = sst [smem:[#allocation36_spill]] %s13479_s26  ;;  %s55_s16 = sadd.s32 1, %s13475_s25 }
  0x1e   : > { %15780 = sst [smem:[#allocation37_spill]] %s13483_s27  ;;  %p62_p1 = scmp.ne.s32.totalorder %s13475_s25, %s13471_s24 }
  0x1f   : > { %15781 = sst [smem:[#allocation38_spill]] %s13491_s29  ;;  %p63_p2 = scmp.eq.s32.totalorder %s13495_s30, 0 }
  0x20   : > { %s15842_s14 = smov (%p44_p0, %s43_s14), 0  ;;  %s15844_s15 = smov (!%p44_p0, %s46_s15), %s13491_s29 }
  0x21   : > { %15782 = sst [smem:[#allocation39_spill]] %s15842_s14  ;;  %s51_s13 = ssub.s32 %s13487_s28, %s15842_s14 }
  0x22   : > { %p13669_p3 = por %p63_p2, %p62_p1  ;;  %p48_p4 = scmp.ge.s32.totalorder %s15844_s15, 2 }
  0x23   : > { %p68_p5 = scmp.ne.s32.totalorder %s13471_s24, %s13467_s23  ;;  %p15753_p6 = scmp.eq.s32.totalorder %s13653_s12, 0 }
  0x24   : > { %p79_p7 = scmp.eq.s32.totalorder %s51_s13, 0  ;;  %s15846_s15 = smov (%p48_p4, %s15844_s15), 0 }
  0x25   : > { %15784 = sst [smem:[#allocation40_spill]] %s15846_s15  ;;  %p13679_p8 = por %p15753_p6, %p68_p5 }
  0x26   : > { %s81_s27 = sadd.s32 1, %s13463_s22  ;;  %s50_s23 = ssub.s32 %s13491_s29, %s15846_s15 }
  0x27   : > { %p88_p9 = scmp.ne.s32.totalorder %s13463_s22, %s13459_s21  ;;  %s52_s10 = sor.u32 %s51_s13, %s50_s23 }
  0x28   : > { %p94_p10 = scmp.ne.s32.totalorder %s13459_s21, %s13455_s20  ;;  %p53_p11 = scmp.eq.s32.totalorder %s52_s10, 0 }
  0x29   : > { %p13692_p12 = por %p88_p9, %p63_p2  ;;  %p309_p0 = scmp.eq.s32.totalorder %s50_s23, 0 }
  0x2a   : > { %s13697_s8 = scalar_select %p79_p7, %s13463_s22, %s81_s27  }
  0x2b   : > { %s13700_s7 = scalar_select %p53_p11, %s13475_s25, %s55_s16  }
  0x2c   : > { %15787 = sst [smem:[#allocation41_spill]] %s13697_s8  ;;  %p13704_p13 = por %p94_p10, %p15753_p6 }
  0x2d   : > { %15788 = sst [smem:[#allocation42_spill]] %s13700_s7  ;;  %s311_s15 = sadd.s32 1, %s13451_s19 }
  0x2e   : > { %s15789_s6 = scalar_select %p13704_p13, 1, 0 }
  0x2f   : > { %p321_p1 = scmp.ne.s32.totalorder %s13451_s19, %s13447_s18  ;;  %p322_p4 = scmp.eq.s32.totalorder %s13653_s12, 3 }
  0x30   : > { %15790 = sst [smem:[#allocation43_spill]] %s15789_s6  ;;  %p327_p2 = scmp.ne.s32.totalorder %s13447_s18, %s13443_s17 }
  0x31   : > { %s13712_s20 = scalar_select %p309_p0, %s13451_s19, %s311_s15  }
  0x32   : > { %s15792_s10 = sadd.s32 4294967294, %s13495_s30   ;;  %p10207_p9 = scmp.ge.s32.totalorder %s13495_s30, 1 }
  0x33   : > { %15791 = sst [smem:[#allocation44_spill]] %s13712_s20  ;;  %p328_p5 = scmp.eq.s32.totalorder %s15792_s10, 3 }
  0x34   : > { %p13720_p7 = por %p322_p4, %p321_p1  ;;  %p335_p11 = scmp.lt.s32.totalorder %s13495_s30, 5 }
  0x35   : > { %p13725_p10 = por %p328_p5, %p327_p2  ;;  %s15798_s5 = sld [smem:[#allocation49_spill]] }
  0x36   : > { %s15793_s27 = scalar_select %p13720_p7, 1, 0 }
  0x37   : > { %s15795_s13 = scalar_select %p13725_p10, 1, 0 }
  0x38   : > { %15794 = sst [smem:[#allocation45_spill]] %s15793_s27  ;;  %p13729_p6 = pnand %p10207_p9, %p335_p11 }
  0x39   : > { %15796 = sst [smem:[#allocation46_spill]] %s15795_s13  ;;  %s13497_s10 = smov [#allocation15]  }
  0x3a   : > { %p13046_p0 = pneg %p13729_p6  ;;  %s348_s8 = sshll.u32 %s13497_s10, 4  ;;  %s349_s8 = int_to_ptr.vmem [resolvable:$true] %s348_s8 }
  0x3b   : > { %s346_s7 = sshll.u32 %s15798_s5, 4  ;;  %p15799_p1 = scmp.eq.s32.totalorder %s13653_s12, 0  ;;  %s347_s7 = int_to_ptr.hbm [resolvable:$true] %s346_s7 }
  0x3c   : > { %s13498_s20 = smov 64   ;;  %s13499_s19 = smov 4  }
  0x3d   : > { %p13047_p4 = pnand %p13046_p0, %p15799_p1  ;;  %p10209_p2 = scmp.ge.s32.totalorder %s13495_s30, 4 }
  0x3e   : > { %s377_s15 = sand.u32 (!%p10209_p2), 1, %s13475_s25   ;;  %s10211_s23 = sshll.u32 (!%p10209_p2), %s13491_s29, 6 }
  0x3f   : > { %13049 = dma.hbm_to_vmem [thread:$0]  (!%p13047_p4), %s347_s7, 4096, %s349_s8, [#allocation16], %s13498_s20, %s13498_s20, %s13499_s19  }
  0x40   : > { %373 = sbr.rel (%p10209_p2) target bundleno = 117 (0x75), region = 40  ;;  %s10210_s5 = sshll.u32 (!%p10209_p2), %s377_s15, 7 }
  0x41   : > { %s385_s13 = sadd.s32 (!%p10209_p2), %s13487_s28, %s10211_s23  ;;  %s381_s17 = scalar_lea.vmem (!%p10209_p2), [#allocation6], %s10210_s5 }
  0x42   : > { %s10212_s10 = sshll.u32 (!%p10209_p2), %s385_s13, 2  ;;  %s390_s27 = sshll.u32 (!%p10209_p2), %s381_s17, 4  ;;  %s391_s27 = int_to_ptr.vmem [resolvable:$true] %s390_s27 }
  0x43   : > { %s15800_s0 = sld [smem:[#allocation47_spill]] (!%p10209_p2)  ;;  %s400_s19 = sand.u32 (!%p10209_p2), 1, %s13495_s30  }
  0x44   : > { %s378_s20 = scalar_lea.sflag (!%p10209_p2), [#allocation7], %s377_s15  ;;  %s13500_s25 = smov (!%p10209_p2), 128  }
  0x45   : > { %s13501_s29 = smov 64   ;;  %s13502_s6 = smov 4  }
  0x46   : > { %s402_s23 = sand.u32 1, %s13463_s22   ;;  %s13752_s5 = sshll.u32 %s13487_s28, 6 }
  0x47   : > { %s10213_s13 = sshll.u32 %s402_s23, 6  ;;  %s15801_s1 = sld [smem:[#allocation48_spill]] }
  0x48   : > { %s401_s15 = scalar_lea.sflag [#allocation10], %s400_s19 }
  0x49   : > { %s387_s7 = scalar_lea.hbm %s15800_s0, %s10212_s10 }
  0x4a   : > { %s388_s8 = sshll.u32 %s387_s7, 4  ;;  %s404_s7 = scalar_lea.vmem [#allocation9], %s10213_s13  ;;  %s389_s8 = int_to_ptr.hbm [resolvable:$true] %s388_s8 }
  0x4b   : > { %13011 = dma.hbm_to_vmem [thread:$0]  (%p13669_p3), %s389_s8, 2048, %s391_s27, %s378_s20, %s13500_s25, %s13501_s29, %s13502_s6  }
  0x4c   : > { %s412_s0 = sshll.u32 %s404_s7, 4  ;;  %s413_s0 = int_to_ptr.vmem [resolvable:$true] %s412_s0 }
  0x4d   : > { %s409_s26 = scalar_lea.hbm %s15801_s1, %s13752_s5 }
  0x4e   : > { %s410_s10 = sshll.u32 %s409_s26, 4  ;;  %s411_s10 = int_to_ptr.hbm [resolvable:$true] %s410_s10 }
  0x4f   : > { %13012 = dma.hbm_to_vmem [thread:$0]  (%p13692_p12), %s411_s10, 1024, %s413_s0, %s401_s15, %s13501_s29, %s13501_s29, %s13502_s6  }
  0x50   : > { %s13762_s11 = smul.u32 576, %s402_s23  ;;  %s431_s8 = scalar_lea.hbm %s15735_s2, %s13752_s5 }
  0x51   : > { %s13013_s20 = scalar_select %p13692_p12, [#allocation0], [#allocation24] }
  0x52   : > { %s444_s13 = sshll.u32 %s431_s8, 4  ;;  %s426_s0 = scalar_lea.vmem [#allocation11], %s13762_s11  ;;  %s445_s13 = int_to_ptr.hbm [resolvable:$true] %s444_s13 }
  0x53   : > { %s436_s17 = sld [smem:[%s13013_s20]]   ;;  %s446_s6 = sshll.u32 %s426_s0, 4  ;;  %s447_s6 = int_to_ptr.vmem [resolvable:$true] %s446_s6 }
  0x54   : > { %s13503_s29 = smov 2048   ;;  %s13504_s23 = smov 1024  }
  0x55   : > { %13014 = sst [smem:[#allocation19]] (%p13692_p12), %s13503_s29  ;;  %s13505_s18 = smov 16  }
  0x56   : > { %13015 = sst [smem:[#allocation19 + $0x1]] (%p13692_p12), %s13504_s23  ;;  %s13506_s10 = smov 64  }
  0x57   : > { %13016 = sst [smem:[#allocation19 + $0x2]] (%p13692_p12), %s13505_s18  ;;  %s13507_s25 = smov 4  }
  0x58   : > { %13017 = sst [smem:[#allocation19 + $0x3]] (%p13692_p12), %s13506_s10  ;;  %s13508_s27 = smov [#allocation18]  }
  0x59   : > { %s10218_s26 = sshll.u32 %s436_s17, 26  ;;  %13018 = sst [smem:[#allocation19 + $0x4]] (%p13692_p12), %s13506_s10 }
  0x5a   : > { %s10219_s7 = sadd.s32 134217728, %s10218_s26  ;;  %13019 = sst [smem:[#allocation19 + $0x5]] (%p13692_p12), %s13507_s25 }
  0x5b   : > { %13020 = dma.general (%p13692_p12), %s445_s13, 9216, %s447_s6, %s401_s15, %s13508_s27, [#allocation19], %s10219_s7, 0  }
  0x5c   : > { %s478_s17 = scalar_lea.hbm %s15736_s3, %s13752_s5  ;;  %s473_s0 = scalar_lea.vmem [#allocation12], %s13762_s11 }
  0x5d   : > { %s493_s29 = sshll.u32 %s473_s0, 4  ;;  %s491_s18 = sshll.u32 %s478_s17, 4  ;;  %s494_s29 = int_to_ptr.vmem [resolvable:$true] %s493_s29  ;;  %s492_s18 = int_to_ptr.hbm [resolvable:$true] %s491_s18 }
  0x5e   : > { %s13021_s23 = scalar_select %p13692_p12, [#allocation0], [#allocation25] }
  0x5f   : > { %s13509_s13 = smov 2048   ;;  %s13510_s6 = smov 1024  }
  0x60   : > { %s483_s15 = sld [smem:[%s13021_s23]]   ;;  %s13511_s26 = smov 16  }
  0x61   : > { %13022 = sst [smem:[#allocation21]] (%p13692_p12), %s13509_s13  ;;  %s13512_s10 = smov 64  }
  0x62   : > { %13023 = sst [smem:[#allocation21 + $0x1]] (%p13692_p12), %s13510_s6  ;;  %s13513_s27 = smov 4  }
  0x63   : > { %13024 = sst [smem:[#allocation21 + $0x2]] (%p13692_p12), %s13511_s26  ;;  %s470_s8 = scalar_lea.sflag [#allocation13], %s400_s19 }
  0x64   : > { %13025 = sst [smem:[#allocation21 + $0x3]] (%p13692_p12), %s13512_s10  ;;  %s13514_s20 = smov [#allocation20]  }
  0x65   : > { %13026 = sst [smem:[#allocation21 + $0x4]] (%p13692_p12), %s13512_s10 }
  0x66   : > { %s10222_s7 = sshll.u32 %s483_s15, 26  ;;  %13027 = sst [smem:[#allocation21 + $0x5]] (%p13692_p12), %s13513_s27 }
  0x67   : > { %s10223_s25 = sadd.s32 134217728, %s10222_s7 }
  0x68   : > { %13028 = dma.general (%p13692_p12), %s492_s18, 9216, %s494_s29, %s470_s8, %s13514_s20, [#allocation21], %s10223_s25, 0  }
  0x69   : > { %s525_s23 = scalar_lea.hbm %s15737_s4, %s13752_s5  ;;  %s520_s6 = scalar_lea.vmem [#allocation14], %s13762_s11 }
  0x6a   : > { %s13029_s15 = scalar_select %p13692_p12, [#allocation0], [#allocation26] }
  0x6b   : > { %s538_s13 = sshll.u32 %s525_s23, 4  ;;  %s540_s19 = sshll.u32 %s520_s6, 4  ;;  %s539_s13 = int_to_ptr.hbm [resolvable:$true] %s538_s13  ;;  %s541_s19 = int_to_ptr.vmem [resolvable:$true] %s540_s19 }
  0x6c   : > { %s530_s26 = sld [smem:[%s13029_s15]]   ;;  %s13515_s29 = smov 2048  }
  0x6d   : > { %13030 = sst [smem:[#allocation23]] (%p13692_p12), %s13515_s29  ;;  %s13516_s18 = smov 1024  }
  0x6e   : > { %13031 = sst [smem:[#allocation23 + $0x1]] (%p13692_p12), %s13516_s18  ;;  %s13517_s10 = smov 16  }
  0x6f   : > { %13032 = sst [smem:[#allocation23 + $0x2]] (%p13692_p12), %s13517_s10  ;;  %s13518_s5 = smov 64  }
  0x70   : > { %13033 = sst [smem:[#allocation23 + $0x3]] (%p13692_p12), %s13518_s5  ;;  %s13519_s25 = smov 4  }
  0x71   : > { %13034 = sst [smem:[#allocation23 + $0x4]] (%p13692_p12), %s13518_s5  ;;  %s13520_s27 = smov [#allocation22]  }
  0x72   : > { %s10226_s7 = sshll.u32 %s530_s26, 26  ;;  %13035 = sst [smem:[#allocation23 + $0x5]] (%p13692_p12), %s13519_s25 }
  0x73   : > { %s10227_s11 = sadd.s32 134217728, %s10226_s7 }
  0x74   : > { %13036 = dma.general (%p13692_p12), %s539_s13, 9216, %s541_s19, %s470_s8, %s13520_s27, [#allocation23], %s10227_s11, 0  }
  0x75 PF: > { %565 = sbr.rel (%p13729_p6) target bundleno = 2196 (0x894), region = 64  ;;  %s567_s20 = sand.u32 (!%p13729_p6), 1, %s13471_s24  }
  0x76   : > { %s10229_s17 = sshll.u32 (!%p13729_p6), %s567_s20, 7  ;;  %s568_s0 = scalar_lea.sflag (!%p13729_p6), [#allocation7], %s567_s20 }
  0x77   : > { %s13832_s23 = scalar_lea.vmem (!%p13729_p6), [#allocation6], %s10229_s17 }
  0x7a   : > { %13422 = dma.done.wait (%p13679_p8), %s568_s0, 2048  }
  0x7b   : > { %13424 = vsyncadd (%p13679_p8), %s568_s0, 4294965248  ;;  %s577_s8 = sand.u32 1, %s13653_s12   ;;  %s579_s15 = sand.u32 1, %s13459_s21  }
  0x7c   : > { %s10230_s13 = sshll.u32 %s579_s15, 6  ;;  %s578_s16 = scalar_lea.sflag [#allocation10], %s577_s8 }
  0x7d   : > { %s13840_s6 = scalar_lea.vmem [#allocation9], %s10230_s13 }
  0x7e   : > { %13426 = dma.done.wait (%p13704_p13), %s578_s16, 10240  }
  0x7f   : > { %13428 = vsyncadd (%p13704_p13), %s578_s16, 4294957056  ;;  %s13008_s19 = smul.u32 576, %s579_s15  ;;  %s598_s14 = scalar_lea.sflag [#allocation13], %s577_s8 }
  0x81   : > { %s13846_s26 = scalar_lea.vmem [#allocation11], %s13008_s19  ;;  %s13848_s29 = scalar_lea.vmem [#allocation12], %s13008_s19 }
  0x82   : > { %13430 = dma.done.wait (%p13704_p13), %s598_s14, 18432  }
  0x83   : > { %13432 = vsyncadd (%p13704_p13), %s598_s14, 4294948864  ;;  %s13854_s18 = scalar_lea.vmem [#allocation14], %s13008_s19  ;;  %p15803_p3 = scmp.eq.s32.totalorder %s13653_s12, 0 }
  0x85   : > { %13434 = dma.done.wait (%p15803_p3), [#allocation16], 4096   ;;  %p15804_p6 = pmov %p15803_p3 }
  0x86   : > { %s15805_s10 = sld [smem:[#allocation33_spill]] }
  0x87   : > { %13436 = vsyncadd (%p15804_p6), [#allocation16], 4294963200  ;;  %s15806_s25 = sld [smem:[#allocation36_spill]] }
  0x8c   : > { %s673_s5 = sand.u32 1, %s15805_s10  }
  0x8d   : > { %s10232_s7 = sshll.u32 %s673_s5, 8  ;;  %p10233_p8 = scmp.ne.s32.totalorder %s15806_s25, 0 }
  0x8e   : > { %s13863_s11 = scalar_lea.vmem [#allocation17], %s10232_s7 }
  0x8f   : > { %683 = sbr.rel (%p10233_p8) target bundleno = 277 (0x115), region = 92 }
  0x94   : > { %v13521_v0 = vmov 0.0  }
  0x95   : > { %684 = vst [vmem:[#allocation2 + $0xb0] sm:$0xff] %v13521_v0 }
  0x96   : > { %685 = vst [vmem:[#allocation2] sm:$0xff] %v13521_v0 }
  0x97   : > { %686 = vst [vmem:[#allocation2 + $0xd8] sm:$0xff] %v13521_v0 }
  0x98   : > { %687 = vst [vmem:[#allocation2 + $0x18] sm:$0xff] %v13521_v0 }
  0x99   : > { %688 = vst [vmem:[#allocation2 + $0x50] sm:$0xff] %v13521_v0 }
  0x9a   : > { %689 = vst [vmem:[#allocation2 + $0x68] sm:$0xff] %v13521_v0 }
  0x9b   : > { %690 = vst [vmem:[#allocation2 + $0x30] sm:$0xff] %v13521_v0 }
  0x9c   : > { %691 = vst [vmem:[#allocation2 + $0x48] sm:$0xff] %v13521_v0 }
  0x9d   : > { %692 = vst [vmem:[#allocation2 + $0x80] sm:$0xff] %v13521_v0 }
  0x9e   : > { %693 = vst [vmem:[#allocation2 + $0x88] sm:$0xff] %v13521_v0 }
  0x9f   : > { %694 = vst [vmem:[#allocation2 + $0xe8] sm:$0xff] %v13521_v0 }
  0xa0   : > { %695 = vst [vmem:[#allocation2 + $0xb8] sm:$0xff] %v13521_v0 }
  0xa1   : > { %696 = vst [vmem:[#allocation2 + $0x60] sm:$0xff] %v13521_v0 }
  0xa2   : > { %697 = vst [vmem:[#allocation2 + $0xf0] sm:$0xff] %v13521_v0 }
  0xa3   : > { %698 = vst [vmem:[#allocation2 + $0x8] sm:$0xff] %v13521_v0 }
  0xa4   : > { %699 = vst [vmem:[#allocation2 + $0x78] sm:$0xff] %v13521_v0 }
  0xa5   : > { %700 = vst [vmem:[#allocation2 + $0x38] sm:$0xff] %v13521_v0 }
  0xa6   : > { %701 = vst [vmem:[#allocation2 + $0x58] sm:$0xff] %v13521_v0 }
  0xa7   : > { %702 = vst [vmem:[#allocation2 + $0x40] sm:$0xff] %v13521_v0 }
  0xa8   : > { %703 = vst [vmem:[#allocation2 + $0xc8] sm:$0xff] %v13521_v0 }
  0xa9   : > { %704 = vst [vmem:[#allocation2 + $0xe0] sm:$0xff] %v13521_v0 }
  0xaa   : > { %705 = vst [vmem:[#allocation2 + $0x90] sm:$0xff] %v13521_v0 }
  0xab   : > { %706 = vst [vmem:[#allocation2 + $0x70] sm:$0xff] %v13521_v0 }
  0xac   : > { %707 = vst [vmem:[#allocation2 + $0xc0] sm:$0xff] %v13521_v0 }
  0xad   : > { %708 = vst [vmem:[#allocation2 + $0xa8] sm:$0xff] %v13521_v0 }
  0xae   : > { %709 = vst [vmem:[#allocation2 + $0xd0] sm:$0xff] %v13521_v0 }
  0xaf   : > { %710 = vst [vmem:[#allocation2 + $0x10] sm:$0xff] %v13521_v0 }
  0xb0   : > { %711 = vst [vmem:[#allocation2 + $0x28] sm:$0xff] %v13521_v0 }
  0xb1   : > { %712 = vst [vmem:[#allocation2 + $0xa0] sm:$0xff] %v13521_v0 }
  0xb2   : > { %713 = vst [vmem:[#allocation2 + $0xf8] sm:$0xff] %v13521_v0 }
  0xb3   : > { %714 = vst [vmem:[#allocation2 + $0x20] sm:$0xff] %v13521_v0 }
  0xb4   : > { %715 = vst [vmem:[#allocation2 + $0x98] sm:$0xff] %v13521_v0 }
  0xb5   : > { %716 = vst [vmem:[#allocation3] sm:$0xff] %v13521_v0 }
  0xb6   : > { %717 = vst [vmem:[#allocation3 + $0x8] sm:$0xff] %v13521_v0 }
  0xb7   : > { %718 = vst [vmem:[#allocation3 + $0x10] sm:$0xff] %v13521_v0 }
  0xb8   : > { %719 = vst [vmem:[#allocation3 + $0x18] sm:$0xff] %v13521_v0 }
  0xb9   : > { %720 = vst [vmem:[#allocation3 + $0x20] sm:$0xff] %v13521_v0 }
  0xba   : > { %721 = vst [vmem:[#allocation3 + $0x28] sm:$0xff] %v13521_v0 }
  0xbb   : > { %722 = vst [vmem:[#allocation3 + $0x30] sm:$0xff] %v13521_v0 }
  0xbc   : > { %723 = vst [vmem:[#allocation3 + $0x38] sm:$0xff] %v13521_v0 }
  0xbd   : > { %724 = vst [vmem:[#allocation3 + $0x40] sm:$0xff] %v13521_v0 }
  0xbe   : > { %725 = vst [vmem:[#allocation3 + $0x48] sm:$0xff] %v13521_v0 }
  0xbf   : > { %726 = vst [vmem:[#allocation3 + $0x50] sm:$0xff] %v13521_v0 }
  0xc0   : > { %727 = vst [vmem:[#allocation3 + $0x58] sm:$0xff] %v13521_v0 }
  0xc1   : > { %728 = vst [vmem:[#allocation3 + $0x60] sm:$0xff] %v13521_v0 }
  0xc2   : > { %729 = vst [vmem:[#allocation3 + $0x68] sm:$0xff] %v13521_v0 }
  0xc3   : > { %730 = vst [vmem:[#allocation3 + $0x70] sm:$0xff] %v13521_v0 }
  0xc4   : > { %731 = vst [vmem:[#allocation3 + $0x78] sm:$0xff] %v13521_v0 }
  0xc5   : > { %732 = vst [vmem:[#allocation3 + $0x80] sm:$0xff] %v13521_v0 }
  0xc6   : > { %733 = vst [vmem:[#allocation3 + $0x88] sm:$0xff] %v13521_v0 }
  0xc7   : > { %734 = vst [vmem:[#allocation3 + $0x90] sm:$0xff] %v13521_v0 }
  0xc8   : > { %735 = vst [vmem:[#allocation3 + $0x98] sm:$0xff] %v13521_v0 }
  0xc9   : > { %736 = vst [vmem:[#allocation3 + $0xa0] sm:$0xff] %v13521_v0 }
  0xca   : > { %737 = vst [vmem:[#allocation3 + $0xa8] sm:$0xff] %v13521_v0 }
  0xcb   : > { %738 = vst [vmem:[#allocation3 + $0xb0] sm:$0xff] %v13521_v0 }
  0xcc   : > { %739 = vst [vmem:[#allocation3 + $0xb8] sm:$0xff] %v13521_v0 }
  0xcd   : > { %740 = vst [vmem:[#allocation3 + $0xc0] sm:$0xff] %v13521_v0 }
  0xce   : > { %741 = vst [vmem:[#allocation3 + $0xc8] sm:$0xff] %v13521_v0 }
  0xcf   : > { %742 = vst [vmem:[#allocation3 + $0xd0] sm:$0xff] %v13521_v0 }
  0xd0   : > { %743 = vst [vmem:[#allocation3 + $0xd8] sm:$0xff] %v13521_v0 }
  0xd1   : > { %744 = vst [vmem:[#allocation3 + $0xe0] sm:$0xff] %v13521_v0 }
  0xd2   : > { %745 = vst [vmem:[#allocation3 + $0xe8] sm:$0xff] %v13521_v0 }
  0xd3   : > { %746 = vst [vmem:[#allocation3 + $0xf0] sm:$0xff] %v13521_v0 }
  0xd4   : > { %747 = vst [vmem:[#allocation3 + $0xf8] sm:$0xff] %v13521_v0 }
  0xd5   : > { %748 = vst [vmem:[#allocation4] sm:$0xff] %v13521_v0 }
  0xd6   : > { %749 = vst [vmem:[#allocation4 + $0x8] sm:$0xff] %v13521_v0 }
  0xd7   : > { %750 = vst [vmem:[#allocation4 + $0x10] sm:$0xff] %v13521_v0 }
  0xd8   : > { %751 = vst [vmem:[#allocation4 + $0x18] sm:$0xff] %v13521_v0 }
  0xd9   : > { %752 = vst [vmem:[#allocation4 + $0x20] sm:$0xff] %v13521_v0 }
  0xda   : > { %753 = vst [vmem:[#allocation4 + $0x28] sm:$0xff] %v13521_v0 }
  0xdb   : > { %754 = vst [vmem:[#allocation4 + $0x30] sm:$0xff] %v13521_v0 }
  0xdc   : > { %755 = vst [vmem:[#allocation4 + $0x38] sm:$0xff] %v13521_v0 }
  0xdd   : > { %756 = vst [vmem:[#allocation4 + $0x40] sm:$0xff] %v13521_v0 }
  0xde   : > { %757 = vst [vmem:[#allocation4 + $0x48] sm:$0xff] %v13521_v0 }
  0xdf   : > { %758 = vst [vmem:[#allocation4 + $0x50] sm:$0xff] %v13521_v0 }
  0xe0   : > { %759 = vst [vmem:[#allocation4 + $0x58] sm:$0xff] %v13521_v0 }
  0xe1   : > { %760 = vst [vmem:[#allocation4 + $0x60] sm:$0xff] %v13521_v0 }
  0xe2   : > { %761 = vst [vmem:[#allocation4 + $0x68] sm:$0xff] %v13521_v0 }
  0xe3   : > { %762 = vst [vmem:[#allocation4 + $0x70] sm:$0xff] %v13521_v0 }
  0xe4   : > { %763 = vst [vmem:[#allocation4 + $0x78] sm:$0xff] %v13521_v0 }
  0xe5   : > { %764 = vst [vmem:[#allocation4 + $0x80] sm:$0xff] %v13521_v0 }
  0xe6   : > { %765 = vst [vmem:[#allocation4 + $0x88] sm:$0xff] %v13521_v0 }
  0xe7   : > { %766 = vst [vmem:[#allocation4 + $0x90] sm:$0xff] %v13521_v0 }
  0xe8   : > { %767 = vst [vmem:[#allocation4 + $0x98] sm:$0xff] %v13521_v0 }
  0xe9   : > { %768 = vst [vmem:[#allocation4 + $0xa0] sm:$0xff] %v13521_v0 }
  0xea   : > { %769 = vst [vmem:[#allocation4 + $0xa8] sm:$0xff] %v13521_v0 }
  0xeb   : > { %770 = vst [vmem:[#allocation4 + $0xb0] sm:$0xff] %v13521_v0 }
  0xec   : > { %771 = vst [vmem:[#allocation4 + $0xb8] sm:$0xff] %v13521_v0 }
  0xed   : > { %772 = vst [vmem:[#allocation4 + $0xc0] sm:$0xff] %v13521_v0 }
  0xee   : > { %773 = vst [vmem:[#allocation4 + $0xc8] sm:$0xff] %v13521_v0 }
  0xef   : > { %774 = vst [vmem:[#allocation4 + $0xd0] sm:$0xff] %v13521_v0 }
  0xf0   : > { %775 = vst [vmem:[#allocation4 + $0xd8] sm:$0xff] %v13521_v0 }
  0xf1   : > { %776 = vst [vmem:[#allocation4 + $0xe0] sm:$0xff] %v13521_v0 }
  0xf2   : > { %777 = vst [vmem:[#allocation4 + $0xe8] sm:$0xff] %v13521_v0 }
  0xf3   : > { %778 = vst [vmem:[#allocation4 + $0xf0] sm:$0xff] %v13521_v0 }
  0xf4   : > { %779 = vst [vmem:[#allocation4 + $0xf8] sm:$0xff] %v13521_v0 }
  0xf5   : > { %780 = vst [vmem:[#allocation5] sm:$0xff] %v13521_v0 }
  0xf6   : > { %781 = vst [vmem:[#allocation5 + $0x8] sm:$0xff] %v13521_v0 }
  0xf7   : > { %782 = vst [vmem:[#allocation5 + $0x10] sm:$0xff] %v13521_v0 }
  0xf8   : > { %783 = vst [vmem:[#allocation5 + $0x18] sm:$0xff] %v13521_v0 }
  0xf9   : > { %784 = vst [vmem:[#allocation5 + $0x20] sm:$0xff] %v13521_v0 }
  0xfa   : > { %785 = vst [vmem:[#allocation5 + $0x28] sm:$0xff] %v13521_v0 }
  0xfb   : > { %786 = vst [vmem:[#allocation5 + $0x30] sm:$0xff] %v13521_v0 }
  0xfc   : > { %787 = vst [vmem:[#allocation5 + $0x38] sm:$0xff] %v13521_v0 }
  0xfd   : > { %788 = vst [vmem:[#allocation5 + $0x40] sm:$0xff] %v13521_v0 }
  0xfe   : > { %789 = vst [vmem:[#allocation5 + $0x48] sm:$0xff] %v13521_v0 }
  0xff   : > { %790 = vst [vmem:[#allocation5 + $0x50] sm:$0xff] %v13521_v0 }
 0x100   : > { %791 = vst [vmem:[#allocation5 + $0x58] sm:$0xff] %v13521_v0 }
 0x101   : > { %792 = vst [vmem:[#allocation5 + $0x60] sm:$0xff] %v13521_v0 }
 0x102   : > { %793 = vst [vmem:[#allocation5 + $0x68] sm:$0xff] %v13521_v0 }
 0x103   : > { %794 = vst [vmem:[#allocation5 + $0x70] sm:$0xff] %v13521_v0 }
 0x104   : > { %795 = vst [vmem:[#allocation5 + $0x78] sm:$0xff] %v13521_v0 }
 0x105   : > { %796 = vst [vmem:[#allocation5 + $0x80] sm:$0xff] %v13521_v0 }
 0x106   : > { %797 = vst [vmem:[#allocation5 + $0x88] sm:$0xff] %v13521_v0 }
 0x107   : > { %798 = vst [vmem:[#allocation5 + $0x90] sm:$0xff] %v13521_v0 }
 0x108   : > { %799 = vst [vmem:[#allocation5 + $0x98] sm:$0xff] %v13521_v0 }
 0x109   : > { %800 = vst [vmem:[#allocation5 + $0xa0] sm:$0xff] %v13521_v0 }
 0x10a   : > { %801 = vst [vmem:[#allocation5 + $0xa8] sm:$0xff] %v13521_v0 }
 0x10b   : > { %802 = vst [vmem:[#allocation5 + $0xb0] sm:$0xff] %v13521_v0 }
 0x10c   : > { %803 = vst [vmem:[#allocation5 + $0xb8] sm:$0xff] %v13521_v0 }
 0x10d   : > { %804 = vst [vmem:[#allocation5 + $0xc0] sm:$0xff] %v13521_v0 }
 0x10e   : > { %805 = vst [vmem:[#allocation5 + $0xc8] sm:$0xff] %v13521_v0 }
 0x10f   : > { %806 = vst [vmem:[#allocation5 + $0xd0] sm:$0xff] %v13521_v0 }
 0x110   : > { %807 = vst [vmem:[#allocation5 + $0xd8] sm:$0xff] %v13521_v0 }
 0x111   : > { %808 = vst [vmem:[#allocation5 + $0xe0] sm:$0xff] %v13521_v0 }
 0x112   : > { %809 = vst [vmem:[#allocation5 + $0xe8] sm:$0xff] %v13521_v0 }
 0x113   : > { %810 = vst [vmem:[#allocation5 + $0xf0] sm:$0xff] %v13521_v0 }
 0x114   : > { %811 = vst [vmem:[#allocation5 + $0xf8] sm:$0xff] %v13521_v0 }
 0x115 PF: > { %v12579_v1 = vld [vmem:[%s13840_s6 + $0x38] sm:$0xff]  ;;  %v12578_v4 = vld [vmem:[%s13840_s6 + $0x30] sm:$0xff]  ;;  %v12577_v7 = vld [vmem:[%s13840_s6 + $0x28] sm:$0xff]  ;;  %vm2181_vm0 = vcmask 1045504   ;;  %vm5061_vm1 = vcmask 1041408   ;;  %s15807_s12 = sld [smem:[#allocation36_spill]] }
 0x116   : > { %v12601_v2 = vld [vmem:[%s13846_s26 + $0x38] sm:$0xff]  ;;  %1036 = vmatpush.bf16.msra.mxu0 %v12579_v1  ;;  %v12600_v5 = vld [vmem:[%s13846_s26 + $0x30] sm:$0xff]  ;;  %v12599_v8 = vld [vmem:[%s13846_s26 + $0x28] sm:$0xff] }
 0x117   : > { %v12645_v3 = vld [vmem:[%s13846_s26 + $0xb8] sm:$0xff]  ;;  %1365 = vmatpush.bf16.msra.mxu1 %v12601_v2  ;;  %12997 = vmatpush.bf16.msra.mxu2 %v12601_v2  ;;  %v12644_v6 = vld [vmem:[%s13846_s26 + $0xb0] sm:$0xff]  ;;  %v12643_v9 = vld [vmem:[%s13846_s26 + $0xa8] sm:$0xff] }
 0x118   : > { %2046 = vmatpush.bf16.msra.mxu3 %v12645_v3  ;;  %v12576_v10 = vld [vmem:[%s13840_s6 + $0x20] sm:$0xff]  ;;  %v12575_v13 = vld [vmem:[%s13840_s6 + $0x18] sm:$0xff]  ;;  %v12574_v16 = vld [vmem:[%s13840_s6 + $0x10] sm:$0xff] }
 0x119   : > { %v12598_v11 = vld [vmem:[%s13846_s26 + $0x20] sm:$0xff]  ;;  %v12597_v14 = vld [vmem:[%s13846_s26 + $0x18] sm:$0xff]  ;;  %v12596_v17 = vld [vmem:[%s13846_s26 + $0x10] sm:$0xff] }
 0x11a   : > { %1037 = vmatpush.bf16.msra.mxu0 %v12578_v4  ;;  %v12642_v12 = vld [vmem:[%s13846_s26 + $0xa0] sm:$0xff]  ;;  %v12641_v15 = vld [vmem:[%s13846_s26 + $0x98] sm:$0xff]  ;;  %v12640_v18 = vld [vmem:[%s13846_s26 + $0x90] sm:$0xff] }
 0x11b   : > { %1366 = vmatpush.bf16.msra.mxu1 %v12600_v5  ;;  %12998 = vmatpush.bf16.msra.mxu2 %v12600_v5  ;;  %v12573_v19 = vld [vmem:[%s13840_s6 + $0x8] sm:$0xff]  ;;  %v12572_v22 = vld [vmem:[%s13840_s6] sm:$0xff]  ;;  %v12623_v25 = vld [vmem:[%s13846_s26 + $0x78] sm:$0xff]  ;;  %p12418_p12 = scmp.ne.s32.totalorder %s15807_s12, 1 }
 0x11c   : > { %2047 = vmatpush.bf16.msra.mxu3 %v12644_v6  ;;  %v12595_v20 = vld [vmem:[%s13846_s26 + $0x8] sm:$0xff]  ;;  %v12594_v23 = vld [vmem:[%s13846_s26] sm:$0xff]  ;;  %v12669_v26 = vld [vmem:[%s13846_s26 + $0x178] sm:$0xff]  ;;  %s15808_s17 = sld [smem:[#allocation50_spill]] (!%p12418_p12) }
 0x11d   : > { %v12639_v21 = vld [vmem:[%s13846_s26 + $0x88] sm:$0xff]  ;;  %v12638_v24 = vld [vmem:[%s13846_s26 + $0x80] sm:$0xff]  ;;  %v12653_v31 = vld [vmem:[%s13846_s26 + $0xf8] sm:$0xff]  ;;  %s15810_s8 = sld [smem:[#allocation51_spill]] (!%p12418_p12) }
 0x11e   : > { %1038 = vmatpush.bf16.msra.mxu0 %v12577_v7  ;;  %v14021_v27 = vld [vmem:[%s13832_s23] sm:$0xff]  ;;  %v12691_v32 = vld [vmem:[%s13846_s26 + $0x1b8] sm:$0xff]  ;;  %v12622_v33 = vld [vmem:[%s13846_s26 + $0x70] sm:$0xff]  ;;  %s15811_s16 = sld [smem:[#allocation52_spill]] (!%p12418_p12) }
 0x11f   : > { %1367 = vmatpush.bf16.msra.mxu1 %v12599_v8  ;;  %12999 = vmatpush.bf16.msra.mxu2 %v12599_v8  ;;  %v12580_v28 = vld [vmem:[%s13832_s23] sm:$0xff]  ;;  %v12668_v34 = vld [vmem:[%s13846_s26 + $0x170] sm:$0xff]  ;;  %v12621_v37 = vld [vmem:[%s13846_s26 + $0x68] sm:$0xff]  ;;  %s15814_s10 = sld [smem:[#allocation54_spill]] (!%p12418_p12) }
 0x120   : > { %2048 = vmatpush.bf16.msra.mxu3 %v12643_v9  ;;  %v12592_v29 = vld [vmem:[%s13832_s23 + $0x60] sm:$0xff]  ;;  %v12652_v35 = vld [vmem:[%s13846_s26 + $0xf0] sm:$0xff]  ;;  %v12619_v39 = vld [vmem:[%s13846_s26 + $0x58] sm:$0xff] }
 0x121   : > { %v12624_v30 = vld [vmem:[%s13832_s23] sm:$0xff]  ;;  %v12690_v36 = vld [vmem:[%s13846_s26 + $0x1b0] sm:$0xff]  ;;  %v14037_v40 = vld [vmem:[%s13832_s23 + $0x8] sm:$0xff] }
 0x122   : > { %1039 = vmatpush.bf16.msra.mxu0 %v12576_v10  ;;  %v12620_v38 = vld [vmem:[%s13846_s26 + $0x60] sm:$0xff]  ;;  %v12581_v41 = vld [vmem:[%s13832_s23 + $0x8] sm:$0xff]  ;;  %v12618_v44 = vld [vmem:[%s13846_s26 + $0x50] sm:$0xff]  ;;  %s15809_s0 = smov (!%p12418_p12), %s15808_s17 }
 0x123   : > { %1368 = vmatpush.bf16.msra.mxu1 %v12598_v11  ;;  %13000 = vmatpush.bf16.msra.mxu2 %v12598_v11  ;;  %v12593_v42 = vld [vmem:[%s13832_s23 + $0x68] sm:$0xff]  ;;  %v12616_v48 = vld [vmem:[%s13846_s26 + $0x40] sm:$0xff]  ;;  %v12661_v49 = vld [vmem:[%s13846_s26 + $0x138] sm:$0xff] }
 0x124   : > { %2049 = vmatpush.bf16.msra.mxu3 %v12642_v12  ;;  %v12625_v43 = vld [vmem:[%s13832_s23 + $0x8] sm:$0xff]  ;;  %v14050_v50 = vld [vmem:[%s13832_s23 + $0x10] sm:$0xff]  ;;  %v12602_v52 = vld [vmem:[%s13832_s23] sm:$0xff] }
 0x125   : > { %v12651_v45 = vld [vmem:[%s13846_s26 + $0xe8] sm:$0xff]  ;;  %v12582_v51 = vld [vmem:[%s13832_s23 + $0x10] sm:$0xff]  ;;  %v12650_v56 = vld [vmem:[%s13846_s26 + $0xe0] sm:$0xff] }
 0x126   : > { %1040 = vmatpush.bf16.msra.mxu0 %v12575_v13  ;;  %v12667_v46 = vld [vmem:[%s13846_s26 + $0x168] sm:$0xff]  ;;  %v12626_v53 = vld [vmem:[%s13832_s23 + $0x10] sm:$0xff]  ;;  %v14060_v57 = vld [vmem:[%s13832_s23 + $0x18] sm:$0xff] }
 0x127   : > { %1369 = vmatpush.bf16.msra.mxu1 %v12597_v14  ;;  %13001 = vmatpush.bf16.msra.mxu2 %v12597_v14  ;;  %v12617_v47 = vld [vmem:[%s13846_s26 + $0x48] sm:$0xff]  ;;  %v12660_v54 = vld [vmem:[%s13846_s26 + $0x130] sm:$0xff]  ;;  %v12583_v58 = vld [vmem:[%s13832_s23 + $0x18] sm:$0xff] }
 0x128   : > { %2050 = vmatpush.bf16.msra.mxu3 %v12641_v15  ;;  %v12689_v55 = vld [vmem:[%s13846_s26 + $0x1a8] sm:$0xff]  ;;  %v12627_v60 = vld [vmem:[%s13832_s23 + $0x18] sm:$0xff]  ;;  %v12666_v61 = vld [vmem:[%s13846_s26 + $0x160] sm:$0xff] }
 0x129   : > { %v12603_v59 = vld [vmem:[%s13832_s23 + $0x8] sm:$0xff]  ;;  %v14069_v63 = vld [vmem:[%s13832_s23 + $0x20] sm:$0xff]  ;;  %v12604_v1 = vld [vmem:[%s13832_s23 + $0x10] sm:$0xff] }
 0x12a   : > { %1041 = vmatpush.bf16.msra.mxu0 %v12574_v16  ;;  %v12659_v62 = vld [vmem:[%s13846_s26 + $0x128] sm:$0xff]  ;;  %v12584_v0 = vld [vmem:[%s13832_s23 + $0x20] sm:$0xff]  ;;  %v12649_v3 = vld [vmem:[%s13846_s26 + $0xd8] sm:$0xff] }
 0x12b   : > { %1370 = vmatpush.bf16.msra.mxu1 %v12596_v17  ;;  %13002 = vmatpush.bf16.msra.mxu2 %v12596_v17  ;;  %v12628_v2 = vld [vmem:[%s13832_s23 + $0x20] sm:$0xff]  ;;  %v14078_v5 = vld [vmem:[%s13832_s23 + $0x28] sm:$0xff]  ;;  %v12605_v7 = vld [vmem:[%s13832_s23 + $0x18] sm:$0xff] }
 0x12c   : > { %2051 = vmatpush.bf16.msra.mxu3 %v12640_v18  ;;  %v12688_v4 = vld [vmem:[%s13846_s26 + $0x1a0] sm:$0xff]  ;;  %v12585_v6 = vld [vmem:[%s13832_s23 + $0x28] sm:$0xff]  ;;  %v12665_v9 = vld [vmem:[%s13846_s26 + $0x158] sm:$0xff] }
 0x12d   : > { %v12629_v8 = vld [vmem:[%s13832_s23 + $0x28] sm:$0xff]  ;;  %v12658_v10 = vld [vmem:[%s13846_s26 + $0x120] sm:$0xff]  ;;  %v14087_v11 = vld [vmem:[%s13832_s23 + $0x30] sm:$0xff] }
 0x12e   : > { %1042 = vmatpush.bf16.msra.mxu0 %v12573_v19  ;;  %v12586_v12 = vld [vmem:[%s13832_s23 + $0x30] sm:$0xff]  ;;  %v12606_v13 = vld [vmem:[%s13832_s23 + $0x20] sm:$0xff]  ;;  %v12687_v16 = vld [vmem:[%s13846_s26 + $0x198] sm:$0xff] }
 0x12f   : > { %1371 = vmatpush.bf16.msra.mxu1 %v12595_v20  ;;  %13003 = vmatpush.bf16.msra.mxu2 %v12595_v20  ;;  %v12630_v14 = vld [vmem:[%s13832_s23 + $0x30] sm:$0xff]  ;;  %v14096_v17 = vld [vmem:[%s13832_s23 + $0x38] sm:$0xff]  ;;  %v12607_v19 = vld [vmem:[%s13832_s23 + $0x28] sm:$0xff] }
 0x130   : > { %2052 = vmatpush.bf16.msra.mxu3 %v12639_v21  ;;  %v12648_v15 = vld [vmem:[%s13846_s26 + $0xd0] sm:$0xff]  ;;  %v12587_v18 = vld [vmem:[%s13832_s23 + $0x38] sm:$0xff] }
 0x131   : > { %v12631_v20 = vld [vmem:[%s13832_s23 + $0x38] sm:$0xff]  ;;  %v12664_v21 = vld [vmem:[%s13846_s26 + $0x150] sm:$0xff] }
 0x132   : > { %1043 = vmatpush.bf16.msra.mxu0 %v12572_v22  ;;  %v12657_v22 = vld [vmem:[%s13846_s26 + $0x118] sm:$0xff] }
 0x133   : > { %1372 = vmatpush.bf16.msra.mxu1 %v12594_v23  ;;  %13004 = vmatpush.bf16.msra.mxu2 %v12594_v23  ;;  %v12647_v23 = vld [vmem:[%s13846_s26 + $0xc8] sm:$0xff] }
 0x134   : > { %2053 = vmatpush.bf16.msra.mxu3 %v12638_v24  ;;  %v844_v24 = vld [vmem:[#allocation2 + $0xb0] sm:$0xff] }
 0x135   : > { %1044 = vmatmul.bf16.vlgmr.msra.gmra.mxu0 %v14021_v27 }
 0x136   : > { %1373 = vmatmul.bf16.vlgmr.msra.gmra.mxu1 %v12580_v28  ;;  %1433 = vmatmul.bf16.vlgmr.msra.gmra.mxu2 %v12592_v29  ;;  %v12588_v28 = vld [vmem:[%s13832_s23 + $0x40] sm:$0xff] }
 0x137   : > { %1706 = vmatpush.bf16.msrb.mxu2 %v12623_v25  ;;  %2054 = vmatmul.bf16.vlgmr.msra.gmra.mxu3 %v12624_v30  ;;  %v1445_v25 = vld [vmem:[#allocation3 + $0x22] sm:$0xff] }
 0x138   : > { %2873 = vmatpush.bf16.msrb.mxu3 %v12669_v26  ;;  %2373 = vmatpush.bf16.msrb.mxu1 %v12653_v31  ;;  %v12564_v26 = vld [vmem:[%s13832_s23 + $0x40] sm:$0xff]  ;;  %v12608_v31 = vld [vmem:[%s13832_s23 + $0x30] sm:$0xff] }
 0x139   : > { %3348 = vmatpush.bf16.msrb.mxu0 %v12691_v32  ;;  %v12632_v32 = vld [vmem:[%s13832_s23 + $0x40] sm:$0xff] }
 0x13b   : > { %1707 = vmatpush.bf16.msrb.mxu2 %v12622_v33 }
 0x13c   : > { %2874 = vmatpush.bf16.msrb.mxu3 %v12668_v34  ;;  %2374 = vmatpush.bf16.msrb.mxu1 %v12652_v35  ;;  %v1469_v35 = vld [vmem:[#allocation3 + $0xe2] sm:$0xff] }
 0x13d   : > { %3349 = vmatpush.bf16.msrb.mxu0 %v12690_v36  ;;  %v845_v36 = vld [vmem:[#allocation2] sm:$0xff] }
 0x13f   : > { %1708 = vmatpush.bf16.msrb.mxu2 %v12621_v37  ;;  %v1446_v37 = vld [vmem:[#allocation3 + $0x2a] sm:$0x3f] }
 0x140   : > { %2375 = vmatpush.bf16.msrb.mxu1 %v12651_v45  ;;  %2875 = vmatpush.bf16.msrb.mxu3 %v12667_v46  ;;  %v1470_v46 = vld [vmem:[#allocation3 + $0xea] sm:$0x3f] }
 0x141   : > { %3350 = vmatpush.bf16.msrb.mxu0 %v12689_v55  ;;  %v12589_v55 = vld [vmem:[%s13832_s23 + $0x48] sm:$0xff] }
 0x143   : > { %1709 = vmatpush.bf16.msrb.mxu2 %v12620_v38 }
 0x144   : > { %2376 = vmatpush.bf16.msrb.mxu1 %v12650_v56  ;;  %2876 = vmatpush.bf16.msrb.mxu3 %v12666_v61  ;;  %v12633_v61 = vld [vmem:[%s13832_s23 + $0x48] sm:$0xff] }
 0x145   : > { %1049 = vmatmul.bf16.gmra.mxu0 %v14037_v40 }
 0x146   : > { %1378 = vmatmul.bf16.gmra.mxu1 %v12581_v41  ;;  %1438 = vmatmul.bf16.gmra.mxu2 %v12593_v42 }
 0x147   : > { %1710 = vmatpush.bf16.msrb.mxu2 %v12619_v39  ;;  %2059 = vmatmul.bf16.gmra.mxu3 %v12625_v43 }
 0x148   : > { %2377 = vmatpush.bf16.msrb.mxu1 %v12649_v3  ;;  %3351 = vmatpush.bf16.msrb.mxu0 %v12688_v4  ;;  %v1448_v3 = vld [vmem:[#allocation3 + $0x3a] sm:$0x3f] }
 0x149   : > { %2877 = vmatpush.bf16.msrb.mxu3 %v12665_v9 }
 0x14b   : > { %1711 = vmatpush.bf16.msrb.mxu2 %v12618_v44 }
 0x14c   : > { %2378 = vmatpush.bf16.msrb.mxu1 %v12648_v15  ;;  %3352 = vmatpush.bf16.msrb.mxu0 %v12687_v16  ;;  %v1472_v15 = vld [vmem:[#allocation3 + $0xfa] sm:$0x3f]  ;;  %v848_v16 = vld [vmem:[#allocation2 + $0x50] sm:$0xff] }
 0x14d   : > { %2878 = vmatpush.bf16.msrb.mxu3 %v12664_v21  ;;  %v12566_v21 = vld [vmem:[%s13832_s23 + $0x50] sm:$0xff] }
 0x14f   : > { %1712 = vmatpush.bf16.msrb.mxu2 %v12617_v47  ;;  %v12686_v47 = vld [vmem:[%s13846_s26 + $0x190] sm:$0xff] }
 0x150   : > { %2379 = vmatpush.bf16.msrb.mxu1 %v12647_v23  ;;  %3353 = vmatpush.bf16.msrb.mxu0 %v12686_v47  ;;  %v1451_v47 = vld [vmem:[#allocation3 + $0x52] sm:$0xff] }
 0x153   : > { %1713 = vmatpush.bf16.msrb.mxu2 %v12616_v48  ;;  %v12663_v48 = vld [vmem:[%s13846_s26 + $0x148] sm:$0xff] }
 0x154   : > { %2879 = vmatpush.bf16.msrb.mxu3 %v12663_v48  ;;  %v12662_v48 = vld [vmem:[%s13846_s26 + $0x140] sm:$0xff] }
 0x155   : > { %1054 = vmatmul.bf16.gmra.mxu0 %v14050_v50 }
 0x156   : > { %1383 = vmatmul.bf16.gmra.mxu1 %v12582_v51  ;;  %1714 = vmatmul.bf16.vlgmr.msrb.gmra.mxu2 %v12602_v52  ;;  %v1447_v51 = vld [vmem:[#allocation3 + $0x32] sm:$0xff] }
 0x157   : > { %2623 = vmatpush.bf16.msra.mxu2 %v12661_v49  ;;  %2064 = vmatmul.bf16.gmra.mxu3 %v12626_v53  ;;  %v846_v49 = vld [vmem:[#allocation2 + $0xd8] sm:$0xff] }
 0x158   : > { %2880 = vmatpush.bf16.msrb.mxu3 %v12662_v48 }
 0x15b   : > { %2624 = vmatpush.bf16.msra.mxu2 %v12660_v54  ;;  %v12565_v54 = vld [vmem:[%s13832_s23 + $0x48] sm:$0xff] }
 0x15f   : > { %2625 = vmatpush.bf16.msra.mxu2 %v12659_v62 }
 0x163   : > { %2626 = vmatpush.bf16.msra.mxu2 %v12658_v10 }
 0x165   : > { %1059 = vmatmul.bf16.gmra.mxu0 %v14060_v57 }
 0x166   : > { %1388 = vmatmul.bf16.gmra.mxu1 %v12583_v58  ;;  %1719 = vmatmul.bf16.gmra.mxu2 %v12603_v59 }
 0x167   : > { %2069 = vmatmul.bf16.gmra.mxu3 %v12627_v60  ;;  %2627 = vmatpush.bf16.msra.mxu2 %v12657_v22  ;;  %v12609_v60 = vld [vmem:[%s13832_s23 + $0x38] sm:$0xff]  ;;  %v12590_v22 = vld [vmem:[%s13832_s23 + $0x50] sm:$0xff] }
 0x175   : > { %1064 = vmatmul.bf16.gmra.mxu0 %v14069_v63 }
 0x176   : > { %1393 = vmatmul.bf16.gmra.mxu1 %v12584_v0  ;;  %1724 = vmatmul.bf16.gmra.mxu2 %v12604_v1  ;;  %v1471_v1 = vld [vmem:[#allocation3 + $0xf2] sm:$0xff] }
 0x177   : > { %2074 = vmatmul.bf16.gmra.mxu3 %v12628_v2  ;;  %v847_v2 = vld [vmem:[#allocation2 + $0x18] sm:$0xff] }
 0x185   : > { %1069 = vmatmul.bf16.gmra.mxu0 %v14078_v5 }
 0x186   : > { %1398 = vmatmul.bf16.gmra.mxu1 %v12585_v6  ;;  %1729 = vmatmul.bf16.gmra.mxu2 %v12605_v7 }
 0x187   : > { %2079 = vmatmul.bf16.gmra.mxu3 %v12629_v8 }
 0x195   : > { %1074 = vmatmul.bf16.gmra.mxu0 %v14087_v11 }
 0x196   : > { %1403 = vmatmul.bf16.gmra.mxu1 %v12586_v12  ;;  %1734 = vmatmul.bf16.gmra.mxu2 %v12606_v13  ;;  %v12656_v13 = vld [vmem:[%s13846_s26 + $0x110] sm:$0xff] }
 0x197   : > { %2084 = vmatmul.bf16.gmra.mxu3 %v12630_v14  ;;  %v12646_v14 = vld [vmem:[%s13846_s26 + $0xc0] sm:$0xff]  ;;  %2628 = vmatpush.bf16.msra.mxu2 %v12656_v13 }
 0x198   : > { %2380 = vmatpush.bf16.msrb.mxu1 %v12646_v14 }
 0x1a5   : > { %1079 = vmatmul.bf16.gmra.mxu0 %v14096_v17 }
 0x1a6   : > { %1408 = vmatmul.bf16.gmra.mxu1 %v12587_v18  ;;  %1739 = vmatmul.bf16.gmra.mxu2 %v12607_v19  ;;  %v1449_v18 = vld [vmem:[#allocation3 + $0x42] sm:$0xff] }
 0x1a7   : > { %2089 = vmatmul.bf16.gmra.mxu3 %v12631_v20 }
 0x1b2   : > { %v1045_v29 = vpop.f32.mrf.mxu0 }
 0x1b3   : > { %v1374_v30 = vpop.f32.mrf.mxu1  ;;  %v1125_v33 = vadd.f32 %v1045_v29, %v844_v24 }
 0x1b4   : > { %v1473_v34 = vadd.f32 %v1445_v25, %v1374_v30 }
 0x1b5   : > { %1157 = vst [vmem:[#allocation2 + $0xb0] sm:$0xff] %v1125_v33  ;;  %1084 = vmatmul.bf16.gmra.mxu0 %v12564_v26  ;;  %v12610_v26 = vld [vmem:[%s13832_s23 + $0x40] sm:$0xff]  ;;  %v1450_v33 = vld [vmem:[#allocation3 + $0x4a] sm:$0x3f] }
 0x1b6   : > { %1413 = vmatmul.bf16.gmra.mxu1 %v12588_v28  ;;  %1501 = vst [vmem:[#allocation3 + $0x22] sm:$0xff] %v1473_v34  ;;  %1744 = vmatmul.bf16.gmra.mxu2 %v12608_v31  ;;  %v12634_v28 = vld [vmem:[%s13832_s23 + $0x50] sm:$0xff] }
 0x1b7   : > { %2094 = vmatmul.bf16.gmra.mxu3 %v12632_v32  ;;  %v849_v32 = vld [vmem:[#allocation2 + $0x68] sm:$0xff] }
 0x1b9   : > { %v1434_v38 = vpop.f32.mrf.mxu2 }
 0x1ba   : > { %v14109_v39 = vpop.f32.mrf.mxu3  ;;  %v1497_v41 = vadd.f32 %v1469_v35, %v1434_v38  ;;  %v1047_v42 = vpop.f32.mrf.mxu0 }
 0x1bb   : > { %v1376_v43 = vpop.f32.mrf.mxu1  ;;  %v1126_v44 = vadd.f32 %v1047_v42, %v845_v36  ;;  %v2182_v34 = vrot.slane %v14109_v39, 2  ;;  %v850_v39 = vld [vmem:[#allocation2 + $0x30] sm:$0xff] }
 0x1bc   : > { %v1474_v45 = vadd.f32 %v1446_v37, %v1376_v43  ;;  %1525 = vst [vmem:[#allocation3 + $0xe2] sm:$0xff] %v1497_v41 }
 0x1bd   : > { %1158 = vst [vmem:[#allocation2] sm:$0xff] %v1126_v44  ;;  %v1785_v36 = vld [vmem:[#allocation3 + $0x20] sm:$0xff] }
 0x1be   : > { %1502 = vst [vmem:[#allocation3 + $0x2a] sm:$0x3f] %v1474_v45 }
 0x1c1   : > { %v1436_v52 = vpop.f32.mrf.mxu2 }
 0x1c2   : > { %v14113_v53 = vpop.f32.mrf.mxu3  ;;  %v1498_v56 = vadd.f32 %v1470_v46, %v1436_v52  ;;  %v1050_v58 = vpop.f32.mrf.mxu0  ;;  %v12655_v52 = vld [vmem:[%s13846_s26 + $0x108] sm:$0xff] }
 0x1c3   : > { %v1379_v59 = vpop.f32.mrf.mxu1  ;;  %v1127_v62 = vadd.f32 %v1050_v58, %v846_v49  ;;  %v2183_v31 = vrot.slane %v14113_v53, 2  ;;  %v12685_v49 = vld [vmem:[%s13846_s26 + $0x188] sm:$0xff]  ;;  %v12591_v58 = vld [vmem:[%s13832_s23 + $0x58] sm:$0xff]  ;;  %2629 = vmatpush.bf16.msra.mxu2 %v12655_v52 }
 0x1c4   : > { %v1475_v0 = vadd.f32 %v1447_v51, %v1379_v59  ;;  %1526 = vst [vmem:[#allocation3 + $0xea] sm:$0x3f] %v1498_v56  ;;  %v12735_v51 = vld [vmem:[%s13846_s26 + $0x238] sm:$0xff]  ;;  %3354 = vmatpush.bf16.msrb.mxu0 %v12685_v49 }
 0x1c5   : > { %1159 = vst [vmem:[#allocation2 + $0xd8] sm:$0xff] %v1127_v62  ;;  %1089 = vmatmul.bf16.gmra.mxu0 %v12565_v54  ;;  %v2184_v43 = vsel %vm2181_vm0, %v2182_v34, %v2183_v31  ;;  %v1786_v54 = vld [vmem:[#allocation3 + $0x28] sm:$0xff]  ;;  %v12567_v56 = vld [vmem:[%s13832_s23 + $0x58] sm:$0xff]  ;;  %4028 = vmatpush.bf16.msra.mxu1 %v12735_v51 }
 0x1c6   : > { %1418 = vmatmul.bf16.gmra.mxu1 %v12589_v55  ;;  %1503 = vst [vmem:[#allocation3 + $0x32] sm:$0xff] %v1475_v0  ;;  %1749 = vmatmul.bf16.gmra.mxu2 %v12609_v60  ;;  %v12611_v62 = vld [vmem:[%s13832_s23 + $0x48] sm:$0xff]  ;;  %v12635_v0 = vld [vmem:[%s13832_s23 + $0x58] sm:$0xff] }
 0x1c7   : > { %2099 = vmatmul.bf16.gmra.mxu3 %v12633_v61 }
 0x1c9   : > { %v1439_v4 = vpop.f32.mrf.mxu2 }
 0x1ca   : > { %v14119_v6 = vpop.f32.mrf.mxu3  ;;  %v1499_v7 = vadd.f32 %v1471_v1, %v1439_v4  ;;  %v1052_v8 = vpop.f32.mrf.mxu0  ;;  %v851_v4 = vld [vmem:[#allocation2 + $0x48] sm:$0xff] }
 0x1cb   : > { %v1381_v9 = vpop.f32.mrf.mxu1  ;;  %v1128_v10 = vadd.f32 %v1052_v8, %v847_v2 }
 0x1cc   : > { %v1476_v12 = vadd.f32 %v1448_v3, %v1381_v9  ;;  %1527 = vst [vmem:[#allocation3 + $0xf2] sm:$0xff] %v1499_v7  ;;  %v2185_v7 = vrot.slane %v14119_v6, 2  ;;  %v852_v6 = vld [vmem:[#allocation2 + $0x80] sm:$0xff] }
 0x1cd   : > { %1160 = vst [vmem:[#allocation2 + $0x18] sm:$0xff] %v1128_v10  ;;  %v1787_v9 = vld [vmem:[#allocation3 + $0x30] sm:$0xff] }
 0x1ce   : > { %1504 = vst [vmem:[#allocation3 + $0x3a] sm:$0x3f] %v1476_v12  ;;  %v1452_v12 = vld [vmem:[#allocation3 + $0x5a] sm:$0x3f] }
 0x1d1   : > { %v1441_v19 = vpop.f32.mrf.mxu2 }
 0x1d2   : > { %v14123_v20 = vpop.f32.mrf.mxu3  ;;  %v1500_v23 = vadd.f32 %v1472_v15, %v1441_v19  ;;  %v1055_v24 = vpop.f32.mrf.mxu0 }
 0x1d3   : > { %v1384_v25 = vpop.f32.mrf.mxu1  ;;  %v1129_v29 = vadd.f32 %v1055_v24, %v848_v16  ;;  %v2186_v3 = vrot.slane %v14123_v20, 2 }
 0x1d4   : > { %v1477_v30 = vadd.f32 %v1449_v18, %v1384_v25  ;;  %1528 = vst [vmem:[#allocation3 + $0xfa] sm:$0x3f] %v1500_v23  ;;  %v1453_v23 = vld [vmem:[#allocation3 + $0x62] sm:$0xff] }
 0x1d5   : > { %1161 = vst [vmem:[#allocation2 + $0x50] sm:$0xff] %v1129_v29  ;;  %1094 = vmatmul.bf16.gmra.mxu0 %v12566_v21  ;;  %v2187_v16 = vsel %vm2181_vm0, %v2185_v7, %v2186_v3  ;;  %v1788_v25 = vld [vmem:[#allocation3 + $0x38] sm:$0xff] }
 0x1d6   : > { %1423 = vmatmul.bf16.gmra.mxu1 %v12590_v22  ;;  %1505 = vst [vmem:[#allocation3 + $0x42] sm:$0xff] %v1477_v30  ;;  %1754 = vmatmul.bf16.gmra.mxu2 %v12610_v26  ;;  %v12613_v7 = vld [vmem:[%s13832_s23 + $0x58] sm:$0xff] }
 0x1d7   : > { %2104 = vmatmul.bf16.gmra.mxu3 %v12634_v28  ;;  %v12568_v28 = vld [vmem:[%s13832_s23 + $0x60] sm:$0xff] }
 0x1d9   : > { %v1715_v35 = vpop.f32.mrf.mxu2 }
 0x1da   : > { %v14131_v37 = vpop.f32.mrf.mxu3  ;;  %v1813_v38 = vadd.f32 %v1785_v36, %v1715_v35  ;;  %v1057_v41 = vpop.f32.mrf.mxu0 }
 0x1db   : > { %v1386_v42 = vpop.f32.mrf.mxu1  ;;  %v1130_v44 = vadd.f32 %v1057_v41, %v849_v32  ;;  %v2188_v41 = vrot.slane %v14131_v37, 2 }
 0x1dc   : > { %v1478_v45 = vadd.f32 %v1450_v33, %v1386_v42  ;;  %v2252_v46 = vadd.f32 %v2184_v43, %v1813_v38  ;;  %v12612_v33 = vld [vmem:[%s13832_s23 + $0x50] sm:$0xff]  ;;  %v853_v38 = vld [vmem:[#allocation2 + $0x88] sm:$0xff] }
 0x1dd   : > { %1162 = vst [vmem:[#allocation2 + $0x68] sm:$0xff] %v1130_v44  ;;  %v1789_v43 = vld [vmem:[#allocation3 + $0x40] sm:$0xff] }
 0x1de   : > { %2280 = vst [vmem:[#allocation3 + $0x20] sm:$0xff] %v2252_v46 }
 0x1df   : > { %1506 = vst [vmem:[#allocation3 + $0x4a] sm:$0x3f] %v1478_v45  ;;  %v1454_v45 = vld [vmem:[#allocation3 + $0x6a] sm:$0x3f] }
 0x1e1   : > { %v1717_v53 = vpop.f32.mrf.mxu2 }
 0x1e2   : > { %v14138_v55 = vpop.f32.mrf.mxu3  ;;  %v1814_v59 = vadd.f32 %v1786_v54, %v1717_v53  ;;  %v1060_v60 = vpop.f32.mrf.mxu0  ;;  %v12771_v54 = vld [vmem:[%s13848_s29 + $0x78] sm:$0xff] }
 0x1e3   : > { %v1389_v61 = vpop.f32.mrf.mxu1  ;;  %v1131_v1 = vadd.f32 %v1060_v60, %v850_v39  ;;  %v2189_v36 = vrot.slane %v14138_v55, 2  ;;  %v854_v55 = vld [vmem:[#allocation2 + $0xe8] sm:$0xff]  ;;  %4698 = vmatpush.bf16.msra.mxu3 %v12771_v54  ;;  %v12734_v60 = vld [vmem:[%s13846_s26 + $0x230] sm:$0xff] }
 0x1e4   : > { %v1479_v2 = vadd.f32 %v1451_v47, %v1389_v61  ;;  %1842 = vst [vmem:[#allocation3 + $0x28] sm:$0xff] %v1814_v59  ;;  %v12684_v59 = vld [vmem:[%s13846_s26 + $0x180] sm:$0xff]  ;;  %4029 = vmatpush.bf16.msra.mxu1 %v12734_v60 }
 0x1e5   : > { %1163 = vst [vmem:[#allocation2 + $0x30] sm:$0xff] %v1131_v1  ;;  %1099 = vmatmul.bf16.gmra.mxu0 %v12567_v56  ;;  %v2190_v48 = vsel %vm2181_vm0, %v2188_v41, %v2189_v36  ;;  %v12654_v56 = vld [vmem:[%s13846_s26 + $0x100] sm:$0xff]  ;;  %v14167_v1 = vld [vmem:[%s13832_s23 + $0x68] sm:$0xff] }
 0x1e6   : > { %1428 = vmatmul.bf16.gmra.mxu1 %v12591_v58  ;;  %1507 = vst [vmem:[#allocation3 + $0x52] sm:$0xff] %v1479_v2  ;;  %1759 = vmatmul.bf16.gmra.mxu2 %v12611_v62  ;;  %v1455_v58 = vld [vmem:[#allocation3 + $0x72] sm:$0xff]  ;;  %v1790_v62 = vld [vmem:[#allocation3 + $0x48] sm:$0xff] }
 0x1e7   : > { %2109 = vmatmul.bf16.gmra.mxu3 %v12635_v0  ;;  %2630 = vmatpush.bf16.msra.mxu2 %v12654_v56 }
 0x1e8   : > { %3355 = vmatpush.bf16.msrb.mxu0 %v12684_v59 }
 0x1e9   : > { %v1720_v8 = vpop.f32.mrf.mxu2 }
 0x1ea   : > { %v14146_v10 = vpop.f32.mrf.mxu3  ;;  %v1815_v13 = vadd.f32 %v1787_v9, %v1720_v8  ;;  %v1062_v14 = vpop.f32.mrf.mxu0  ;;  %v12637_v8 = vld [vmem:[%s13832_s23 + $0x68] sm:$0xff] }
 0x1eb   : > { %v1391_v15 = vpop.f32.mrf.mxu1  ;;  %v2126_v18 = vld [vmem:[#allocation3 + $0x28] sm:$0x3f]  ;;  %v1132_v19 = vadd.f32 %v1062_v14, %v851_v4  ;;  %v855_v14 = vld [vmem:[#allocation2 + $0xb8] sm:$0xff] }
 0x1ec   : > { %v2253_v21 = vadd.f32 %v2183_v31, %v2126_v18  ;;  %v2254_v22 = vadd.f32 %v2187_v16, %v1815_v13  ;;  %v1480_v20 = vadd.f32 %v1452_v12, %v1391_v15  ;;  %v12636_v31 = vld [vmem:[%s13832_s23 + $0x60] sm:$0xff]  ;;  %v2191_v15 = vrot.slane %v14146_v10, 2 }
 0x1ed   : > { %1164 = vst [vmem:[#allocation2 + $0x48] sm:$0xff] %v1132_v19  ;;  %v1791_v18 = vld [vmem:[#allocation3 + $0x50] sm:$0xff]  ;;  %v856_v10 = vld [vmem:[#allocation2 + $0x60] sm:$0xff] }
 0x1ee   : > { %2281 = vst [vmem:[#allocation3 + $0x28] sm:$0x3f] %v2253_v21  ;;  %v1456_v21 = vld [vmem:[#allocation3 + $0x7a] sm:$0x3f] }
 0x1ef   : > { %2282 = vst [vmem:[#allocation3 + $0x30] sm:$0xff] %v2254_v22 }
 0x1f0   : > { %1508 = vst [vmem:[#allocation3 + $0x5a] sm:$0x3f] %v1480_v20 }
 0x1f1   : > { %v1722_v24 = vpop.f32.mrf.mxu2 }
 0x1f2   : > { %v14149_v26 = vpop.f32.mrf.mxu3  ;;  %v1816_v29 = vadd.f32 %v1788_v25, %v1722_v24  ;;  %v1065_v30 = vpop.f32.mrf.mxu0 }
 0x1f3   : > { %v1394_v32 = vpop.f32.mrf.mxu1  ;;  %v1133_v34 = vadd.f32 %v1065_v30, %v852_v6  ;;  %v2192_v13 = vrot.slane %v14149_v26, 2  ;;  %v1457_v30 = vld [vmem:[#allocation3 + $0x82] sm:$0xff] }
 0x1f4   : > { %v1481_v35 = vadd.f32 %v1453_v23, %v1394_v32  ;;  %1844 = vst [vmem:[#allocation3 + $0x38] sm:$0xff] %v1816_v29 }
 0x1f5   : > { %1165 = vst [vmem:[#allocation2 + $0x80] sm:$0xff] %v1133_v34  ;;  %1104 = vmatmul.bf16.gmra.mxu0 %v12568_v28  ;;  %v2193_v23 = vsel %vm2181_vm0, %v2191_v15, %v2192_v13  ;;  %v14181_v34 = vld [vmem:[%s13832_s23 + $0x70] sm:$0xff]  ;;  %v12615_v15 = vld [vmem:[%s13832_s23 + $0x68] sm:$0xff] }
 0x1f6   : > { %2381 = vmatmul.bf16.vlgmr.msrb.gmra.mxu1 %v14021_v27  ;;  %1509 = vst [vmem:[#allocation3 + $0x62] sm:$0xff] %v1481_v35  ;;  %1764 = vmatmul.bf16.gmra.mxu2 %v12612_v33 }
 0x1f7   : > { %2114 = vmatmul.bf16.gmra.mxu3 %v12636_v31  ;;  %v1792_v33 = vld [vmem:[#allocation3 + $0x58] sm:$0xff] }
 0x1f9   : > { %v1725_v42 = vpop.f32.mrf.mxu2 }
 0x1fa   : > { %v14157_v44 = vpop.f32.mrf.mxu3  ;;  %v1817_v46 = vadd.f32 %v1789_v43, %v1725_v42  ;;  %v1067_v39 = vpop.f32.mrf.mxu0  ;;  %v12614_v42 = vld [vmem:[%s13832_s23 + $0x60] sm:$0xff] }
 0x1fb   : > { %v1396_v47 = vpop.f32.mrf.mxu1  ;;  %v2128_v49 = vld [vmem:[#allocation3 + $0x38] sm:$0x3f]  ;;  %v1134_v51 = vadd.f32 %v1067_v39, %v853_v38  ;;  %v2194_v39 = vrot.slane %v14157_v44, 2 }
 0x1fc   : > { %v2255_v52 = vadd.f32 %v2186_v3, %v2128_v49  ;;  %v2256_v53 = vadd.f32 %v2190_v48, %v1817_v46  ;;  %v1482_v37 = vadd.f32 %v1454_v45, %v1396_v47  ;;  %v857_v46 = vld [vmem:[#allocation2 + $0xf0] sm:$0xff]  ;;  %v12753_v44 = vld [vmem:[%s13848_s29 + $0x38] sm:$0xff] }
 0x1fd   : > { %1166 = vst [vmem:[#allocation2 + $0x88] sm:$0xff] %v1134_v51  ;;  %v1793_v48 = vld [vmem:[#allocation3 + $0x60] sm:$0xff]  ;;  %v1458_v51 = vld [vmem:[#allocation3 + $0x8a] sm:$0x3f]  ;;  %4433 = vmatpush.bf16.msrb.mxu2 %v12753_v44 }
 0x1fe   : > { %2283 = vst [vmem:[#allocation3 + $0x38] sm:$0x3f] %v2255_v52 }
 0x1ff   : > { %2284 = vst [vmem:[#allocation3 + $0x40] sm:$0xff] %v2256_v53 }
 0x200   : > { %1510 = vst [vmem:[#allocation3 + $0x6a] sm:$0x3f] %v1482_v37 }
 0x201   : > { %v1727_v61 = vpop.f32.mrf.mxu2 }
 0x202   : > { %v14164_v0 = vpop.f32.mrf.mxu3  ;;  %v1818_v2 = vadd.f32 %v1790_v62, %v1727_v61  ;;  %v1070_v3 = vpop.f32.mrf.mxu0  ;;  %v12770_v61 = vld [vmem:[%s13848_s29 + $0x70] sm:$0xff]  ;;  %v858_v62 = vld [vmem:[#allocation2 + $0x8] sm:$0xff] }
 0x203   : > { %v1399_v4 = vpop.f32.mrf.mxu1  ;;  %v1135_v9 = vadd.f32 %v1070_v3, %v854_v55  ;;  %v2195_v45 = vrot.slane %v14164_v0, 2  ;;  %v1459_v0 = vld [vmem:[#allocation3 + $0x92] sm:$0xff]  ;;  %4699 = vmatpush.bf16.msra.mxu3 %v12770_v61  ;;  %v12733_v3 = vld [vmem:[%s13846_s26 + $0x228] sm:$0xff] }
 0x204   : > { %v1483_v12 = vadd.f32 %v1455_v58, %v1399_v4  ;;  %1846 = vst [vmem:[#allocation3 + $0x48] sm:$0xff] %v1818_v2  ;;  %v12713_v2 = vld [vmem:[%s13846_s26 + $0x1f8] sm:$0xff]  ;;  %4030 = vmatpush.bf16.msra.mxu1 %v12733_v3  ;;  %v12769_v3 = vld [vmem:[%s13848_s29 + $0x68] sm:$0xff] }
 0x205   : > { %1167 = vst [vmem:[#allocation2 + $0xe8] sm:$0xff] %v1135_v9  ;;  %1109 = vmatmul.bf16.gmra.mxu0 %v14167_v1  ;;  %v2196_v54 = vsel %vm2181_vm0, %v2194_v39, %v2195_v45  ;;  %v14199_v9 = vld [vmem:[%s13832_s23 + $0x78] sm:$0xff] }
 0x206   : > { %2386 = vmatmul.bf16.gmra.mxu1 %v14037_v40  ;;  %1511 = vst [vmem:[#allocation3 + $0x72] sm:$0xff] %v1483_v12  ;;  %1769 = vmatmul.bf16.gmra.mxu2 %v12613_v7 }
 0x207   : > { %2119 = vmatmul.bf16.gmra.mxu3 %v12637_v8  ;;  %v1794_v7 = vld [vmem:[#allocation3 + $0x68] sm:$0xff]  ;;  %3688 = vmatpush.bf16.msra.mxu0 %v12713_v2 }
 0x208   : > { %4700 = vmatpush.bf16.msra.mxu3 %v12769_v3  ;;  %v866_v3 = vld [vmem:[#allocation2 + $0x70] sm:$0xff] }
 0x209   : > { %v1730_v16 = vpop.f32.mrf.mxu2 }
 0x20a   : > { %v14175_v19 = vpop.f32.mrf.mxu3  ;;  %v1819_v22 = vadd.f32 %v1791_v18, %v1730_v16  ;;  %v1072_v20 = vpop.f32.mrf.mxu0 }
 0x20b   : > { %v1401_v6 = vpop.f32.mrf.mxu1  ;;  %v2130_v24 = vld [vmem:[#allocation3 + $0x48] sm:$0x3f]  ;;  %v1136_v25 = vadd.f32 %v1072_v20, %v855_v14  ;;  %v2197_v20 = vrot.slane %v14175_v19, 2  ;;  %v860_v19 = vld [vmem:[#allocation2 + $0x38] sm:$0xff] }
 0x20c   : > { %v2257_v28 = vadd.f32 %v2189_v36, %v2130_v24  ;;  %v2258_v29 = vadd.f32 %v2193_v23, %v1819_v22  ;;  %v1484_v26 = vadd.f32 %v1456_v21, %v1401_v6  ;;  %v859_v22 = vld [vmem:[#allocation2 + $0x78] sm:$0xff] }
 0x20d   : > { %1168 = vst [vmem:[#allocation2 + $0xb8] sm:$0xff] %v1136_v25  ;;  %v1795_v23 = vld [vmem:[#allocation3 + $0x70] sm:$0xff]  ;;  %v1460_v25 = vld [vmem:[#allocation3 + $0x9a] sm:$0x3f] }
 0x20e   : > { %2285 = vst [vmem:[#allocation3 + $0x48] sm:$0x3f] %v2257_v28 }
 0x20f   : > { %2286 = vst [vmem:[#allocation3 + $0x50] sm:$0xff] %v2258_v29 }
 0x210   : > { %1512 = vst [vmem:[#allocation3 + $0x7a] sm:$0x3f] %v1484_v26 }
 0x211   : > { %v1732_v32 = vpop.f32.mrf.mxu2 }
 0x212   : > { %v14178_v31 = vpop.f32.mrf.mxu3  ;;  %v1820_v35 = vadd.f32 %v1792_v33, %v1732_v32  ;;  %v1075_v38 = vpop.f32.mrf.mxu0 }
 0x213   : > { %v1404_v41 = vpop.f32.mrf.mxu1  ;;  %v1137_v36 = vadd.f32 %v1075_v38, %v856_v10  ;;  %v2198_v21 = vrot.slane %v14178_v31, 2  ;;  %v1461_v31 = vld [vmem:[#allocation3 + $0xa2] sm:$0xff] }
 0x214   : > { %v1485_v43 = vadd.f32 %v1457_v30, %v1404_v41  ;;  %1848 = vst [vmem:[#allocation3 + $0x58] sm:$0xff] %v1820_v35 }
 0x215   : > { %1169 = vst [vmem:[#allocation2 + $0x60] sm:$0xff] %v1137_v36  ;;  %1114 = vmatmul.bf16.gmra.mxu0 %v14181_v34  ;;  %v2199_v10 = vsel %vm2181_vm0, %v2197_v20, %v2198_v21 }
 0x216   : > { %2391 = vmatmul.bf16.gmra.mxu1 %v14050_v50  ;;  %1513 = vst [vmem:[#allocation3 + $0x82] sm:$0xff] %v1485_v43  ;;  %1774 = vmatmul.bf16.gmra.mxu2 %v12614_v42  ;;  %v12670_v43 = vld [vmem:[%s13832_s23 + $0x10] sm:$0xff] }
 0x217   : > { %2881 = vmatmul.bf16.vlgmr.msrb.gmra.mxu3 %v14021_v27  ;;  %v1796_v42 = vld [vmem:[#allocation3 + $0x78] sm:$0xff] }
 0x219   : > { %v1735_v47 = vpop.f32.mrf.mxu2 }
 0x21a   : > { %v14189_v49 = vpop.f32.mrf.mxu3  ;;  %v1821_v52 = vadd.f32 %v1793_v48, %v1735_v47  ;;  %v1077_v53 = vpop.f32.mrf.mxu0 }
 0x21b   : > { %v1406_v37 = vpop.f32.mrf.mxu1  ;;  %v2132_v55 = vld [vmem:[#allocation3 + $0x58] sm:$0x3f]  ;;  %v1138_v56 = vadd.f32 %v1077_v53, %v857_v46  ;;  %v2200_v53 = vrot.slane %v14189_v49, 2  ;;  %v12752_v49 = vld [vmem:[%s13848_s29 + $0x30] sm:$0xff] }
 0x21c   : > { %v2259_v58 = vadd.f32 %v2192_v13, %v2132_v55  ;;  %v2260_v59 = vadd.f32 %v2196_v54, %v1821_v52  ;;  %v1486_v60 = vadd.f32 %v1458_v51, %v1406_v37  ;;  %v861_v52 = vld [vmem:[#allocation2 + $0x58] sm:$0xff]  ;;  %4434 = vmatpush.bf16.msrb.mxu2 %v12752_v49  ;;  %v12768_v49 = vld [vmem:[%s13848_s29 + $0x60] sm:$0xff] }
 0x21d   : > { %1170 = vst [vmem:[#allocation2 + $0xf0] sm:$0xff] %v1138_v56  ;;  %v1797_v54 = vld [vmem:[#allocation3 + $0x80] sm:$0xff]  ;;  %v1462_v56 = vld [vmem:[#allocation3 + $0xaa] sm:$0x3f]  ;;  %4701 = vmatpush.bf16.msra.mxu3 %v12768_v49 }
 0x21e   : > { %2287 = vst [vmem:[#allocation3 + $0x58] sm:$0x3f] %v2259_v58 }
 0x21f   : > { %2288 = vst [vmem:[#allocation3 + $0x60] sm:$0xff] %v2260_v59 }
 0x220   : > { %1514 = vst [vmem:[#allocation3 + $0x8a] sm:$0x3f] %v1486_v60 }
 0x221   : > { %v1737_v4 = vpop.f32.mrf.mxu2 }
 0x222   : > { %v14196_v8 = vpop.f32.mrf.mxu3  ;;  %v1822_v12 = vadd.f32 %v1794_v7, %v1737_v4  ;;  %v1080_v13 = vpop.f32.mrf.mxu0  ;;  %v12712_v4 = vld [vmem:[%s13846_s26 + $0x1f0] sm:$0xff]  ;;  %v862_v7 = vld [vmem:[#allocation2 + $0x40] sm:$0xff] }
 0x223   : > { %v1409_v14 = vpop.f32.mrf.mxu1  ;;  %v1139_v16 = vadd.f32 %v1080_v13, %v858_v62  ;;  %3689 = vmatpush.bf16.msra.mxu0 %v12712_v4  ;;  %v1467_v4 = vld [vmem:[#allocation3 + $0xd2] sm:$0xff] }
 0x224   : > { %v1487_v18 = vadd.f32 %v1459_v0, %v1409_v14  ;;  %1850 = vst [vmem:[#allocation3 + $0x68] sm:$0xff] %v1822_v12  ;;  %v12732_v12 = vld [vmem:[%s13846_s26 + $0x220] sm:$0xff] }
 0x225   : > { %1171 = vst [vmem:[#allocation2 + $0x8] sm:$0xff] %v1139_v16  ;;  %1119 = vmatmul.bf16.gmra.mxu0 %v14199_v9  ;;  %v12671_v16 = vld [vmem:[%s13832_s23 + $0x18] sm:$0xff]  ;;  %4031 = vmatpush.bf16.msra.mxu1 %v12732_v12 }
 0x226   : > { %2396 = vmatmul.bf16.gmra.mxu1 %v14060_v57  ;;  %1515 = vst [vmem:[#allocation3 + $0x92] sm:$0xff] %v1487_v18  ;;  %1779 = vmatmul.bf16.gmra.mxu2 %v12615_v15 }
 0x227   : > { %2886 = vmatmul.bf16.gmra.mxu3 %v14037_v40  ;;  %v1798_v14 = vld [vmem:[#allocation3 + $0x88] sm:$0xff] }
 0x229   : > { %v1740_v6 = vpop.f32.mrf.mxu2 }
 0x22a   : > { %v14207_v24 = vpop.f32.mrf.mxu3  ;;  %v1823_v28 = vadd.f32 %v1795_v23, %v1740_v6  ;;  %v1082_v29 = vpop.f32.mrf.mxu0 }
 0x22b   : > { %v1411_v26 = vpop.f32.mrf.mxu1  ;;  %v2134_v30 = vld [vmem:[#allocation3 + $0x68] sm:$0x3f]  ;;  %v1140_v32 = vadd.f32 %v1082_v29, %v859_v22 }
 0x22c   : > { %v2261_v33 = vadd.f32 %v2195_v45, %v2134_v30  ;;  %v2262_v35 = vadd.f32 %v2199_v10, %v1823_v28  ;;  %v1488_v38 = vadd.f32 %v1460_v25, %v1411_v26  ;;  %v2201_v45 = vrot.slane %v14196_v8, 2  ;;  %v1463_v8 = vld [vmem:[#allocation3 + $0xb2] sm:$0xff]  ;;  %v863_v25 = vld [vmem:[#allocation2 + $0xc8] sm:$0xff]  ;;  %v1464_v30 = vld [vmem:[#allocation3 + $0xba] sm:$0x3f] }
 0x22d   : > { %1172 = vst [vmem:[#allocation2 + $0x78] sm:$0xff] %v1140_v32  ;;  %v2203_v28 = vrot.slane %v14207_v24, 2  ;;  %v1799_v26 = vld [vmem:[#allocation3 + $0x90] sm:$0xff]  ;;  %v864_v24 = vld [vmem:[#allocation2 + $0xe0] sm:$0xff] }
 0x22e   : > { %2289 = vst [vmem:[#allocation3 + $0x68] sm:$0x3f] %v2261_v33 }
 0x22f   : > { %2290 = vst [vmem:[#allocation3 + $0x70] sm:$0xff] %v2262_v35 }
 0x230   : > { %1516 = vst [vmem:[#allocation3 + $0x9a] sm:$0x3f] %v1488_v38 }
 0x231   : > { %v1742_v41 = vpop.f32.mrf.mxu2 }
 0x232   : > { %v14210_v36 = vpop.f32.mrf.mxu3  ;;  %v1824_v46 = vadd.f32 %v1796_v42, %v1742_v41  ;;  %v1085_v39 = vpop.f32.mrf.mxu0  ;;  %v1465_v41 = vld [vmem:[#allocation3 + $0xc2] sm:$0xff] }
 0x233   : > { %v1414_v47 = vpop.f32.mrf.mxu1  ;;  %v1141_v48 = vadd.f32 %v1085_v39, %v860_v19  ;;  %v2204_v23 = vrot.slane %v14210_v36, 2 }
 0x234   : > { %v1489_v51 = vadd.f32 %v1461_v31, %v1414_v47  ;;  %1852 = vst [vmem:[#allocation3 + $0x78] sm:$0xff] %v1824_v46  ;;  %v12672_v46 = vld [vmem:[%s13832_s23 + $0x20] sm:$0xff] }
 0x235   : > { %1173 = vst [vmem:[#allocation2 + $0x38] sm:$0xff] %v1141_v48  ;;  %3356 = vmatmul.bf16.vlgmr.msrb.gmra.mxu0 %v12670_v43 }
 0x236   : > { %2401 = vmatmul.bf16.gmra.mxu1 %v14069_v63  ;;  %1517 = vst [vmem:[#allocation3 + $0xa2] sm:$0xff] %v1489_v51  ;;  %2631 = vmatmul.bf16.vlgmr.msra.gmra.mxu2 %v14021_v27  ;;  %v2202_v27 = vsel %vm2181_vm0, %v2200_v53, %v2201_v45  ;;  %v865_v53 = vld [vmem:[#allocation2 + $0x90] sm:$0xff] }
 0x237   : > { %2891 = vmatmul.bf16.gmra.mxu3 %v14050_v50  ;;  %v1800_v36 = vld [vmem:[#allocation3 + $0x98] sm:$0xff] }
 0x239   : > { %v1745_v37 = vpop.f32.mrf.mxu2 }
 0x23a   : > { %v14218_v55 = vpop.f32.mrf.mxu3  ;;  %v1825_v58 = vadd.f32 %v1797_v54, %v1745_v37  ;;  %v1087_v59 = vpop.f32.mrf.mxu0 }
 0x23b   : > { %v1416_v60 = vpop.f32.mrf.mxu1  ;;  %v2136_v44 = vld [vmem:[#allocation3 + $0x78] sm:$0x3f]  ;;  %v1142_v61 = vadd.f32 %v1087_v59, %v861_v52  ;;  %v2206_v37 = vrot.slane %v14218_v55, 2  ;;  %v1466_v59 = vld [vmem:[#allocation3 + $0xca] sm:$0x3f] }
 0x23c   : > { %v2263_v62 = vadd.f32 %v2198_v21, %v2136_v44  ;;  %v2264_v0 = vadd.f32 %v2202_v27, %v1825_v58  ;;  %v1490_v2 = vadd.f32 %v1462_v56, %v1416_v60  ;;  %v12711_v55 = vld [vmem:[%s13846_s26 + $0x1e8] sm:$0xff] }
 0x23d   : > { %1174 = vst [vmem:[#allocation2 + $0x58] sm:$0xff] %v1142_v61  ;;  %v1801_v56 = vld [vmem:[#allocation3 + $0xa0] sm:$0xff]  ;;  %3690 = vmatpush.bf16.msra.mxu0 %v12711_v55 }
 0x23e   : > { %2291 = vst [vmem:[#allocation3 + $0x78] sm:$0x3f] %v2263_v62 }
 0x23f   : > { %2292 = vst [vmem:[#allocation3 + $0x80] sm:$0xff] %v2264_v0 }
 0x240   : > { %1518 = vst [vmem:[#allocation3 + $0xaa] sm:$0x3f] %v1490_v2  ;;  %v12751_v2 = vld [vmem:[%s13848_s29 + $0x28] sm:$0xff] }
 0x241   : > { %v1747_v13 = vpop.f32.mrf.mxu2  ;;  %4435 = vmatpush.bf16.msrb.mxu2 %v12751_v2 }
 0x242   : > { %v14225_v15 = vpop.f32.mrf.mxu3  ;;  %v1826_v18 = vadd.f32 %v1798_v14, %v1747_v13  ;;  %v1090_v21 = vpop.f32.mrf.mxu0  ;;  %v12673_v14 = vld [vmem:[%s13832_s23 + $0x28] sm:$0xff] }
 0x243   : > { %v1419_v22 = vpop.f32.mrf.mxu1  ;;  %v1143_v20 = vadd.f32 %v1090_v21, %v862_v7  ;;  %v12731_v7 = vld [vmem:[%s13846_s26 + $0x218] sm:$0xff] }
 0x244   : > { %v1491_v6 = vadd.f32 %v1463_v8, %v1419_v22  ;;  %1854 = vst [vmem:[#allocation3 + $0x88] sm:$0xff] %v1826_v18  ;;  %4032 = vmatpush.bf16.msra.mxu1 %v12731_v7  ;;  %v870_v7 = vld [vmem:[#allocation2 + $0x10] sm:$0xff] }
 0x245   : > { %1175 = vst [vmem:[#allocation2 + $0x40] sm:$0xff] %v1143_v20  ;;  %3361 = vmatmul.bf16.gmra.mxu0 %v12671_v16  ;;  %v13196_v20 = vld [vmem:[%s13832_s23 + $0x18] sm:$0xff] }
 0x246   : > { %2406 = vmatmul.bf16.gmra.mxu1 %v14078_v5  ;;  %1519 = vst [vmem:[#allocation3 + $0xb2] sm:$0xff] %v1491_v6  ;;  %2636 = vmatmul.bf16.gmra.mxu2 %v14037_v40  ;;  %v2205_v5 = vsel %vm2181_vm0, %v2203_v28, %v2204_v23  ;;  %v14257_v6 = vld [vmem:[%s13832_s23 + $0x28] sm:$0xff] }
 0x247   : > { %2896 = vmatmul.bf16.gmra.mxu3 %v14060_v57  ;;  %v1802_v12 = vld [vmem:[#allocation3 + $0xa8] sm:$0xff] }
 0x249   : > { %v1750_v29 = vpop.f32.mrf.mxu2 }
 0x24a   : > { %v14233_v10 = vpop.f32.mrf.mxu3  ;;  %v1827_v32 = vadd.f32 %v1799_v26, %v1750_v29  ;;  %v1092_v33 = vpop.f32.mrf.mxu0 }
 0x24b   : > { %v1421_v35 = vpop.f32.mrf.mxu1  ;;  %v2138_v38 = vld [vmem:[#allocation3 + $0x88] sm:$0x3f]  ;;  %v1144_v40 = vadd.f32 %v1092_v33, %v863_v25  ;;  %v867_v25 = vld [vmem:[#allocation2 + $0xc0] sm:$0xff]  ;;  %v2209_v28 = vrot.slane %v14233_v10, 2 }
 0x24c   : > { %v2265_v19 = vadd.f32 %v2201_v45, %v2138_v38  ;;  %v2266_v57 = vadd.f32 %v2205_v5, %v1827_v32  ;;  %v1492_v31 = vadd.f32 %v1464_v30, %v1421_v35  ;;  %v2207_v45 = vrot.slane %v14225_v15, 2  ;;  %v1468_v32 = vld [vmem:[#allocation3 + $0xda] sm:$0x3f]  ;;  %v868_v10 = vld [vmem:[#allocation2 + $0xa8] sm:$0xff] }
 0x24d   : > { %1176 = vst [vmem:[#allocation2 + $0xc8] sm:$0xff] %v1144_v40  ;;  %v1803_v26 = vld [vmem:[#allocation3 + $0xb0] sm:$0xff] }
 0x24e   : > { %2293 = vst [vmem:[#allocation3 + $0x88] sm:$0x3f] %v2265_v19 }
 0x24f   : > { %2294 = vst [vmem:[#allocation3 + $0x90] sm:$0xff] %v2266_v57 }
 0x250   : > { %1520 = vst [vmem:[#allocation3 + $0xba] sm:$0x3f] %v1492_v31 }
 0x251   : > { %v1752_v42 = vpop.f32.mrf.mxu2 }
 0x252   : > { %v14236_v43 = vpop.f32.mrf.mxu3  ;;  %v1828_v39 = vadd.f32 %v1800_v36, %v1752_v42  ;;  %v1095_v47 = vpop.f32.mrf.mxu0 }
 0x253   : > { %v1424_v48 = vpop.f32.mrf.mxu1  ;;  %v1145_v51 = vadd.f32 %v1095_v47, %v864_v24  ;;  %v2462_v24 = vld [vmem:[#allocation3 + $0x2] sm:$0xff] }
 0x254   : > { %v1493_v52 = vadd.f32 %v1465_v41, %v1424_v48  ;;  %1856 = vst [vmem:[#allocation3 + $0x98] sm:$0xff] %v1828_v39  ;;  %v12710_v41 = vld [vmem:[%s13846_s26 + $0x1e0] sm:$0xff] }
 0x255   : > { %1177 = vst [vmem:[#allocation2 + $0xe0] sm:$0xff] %v1145_v51  ;;  %3366 = vmatmul.bf16.gmra.mxu0 %v12672_v46  ;;  %v12674_v46 = vld [vmem:[%s13832_s23 + $0x30] sm:$0xff] }
 0x256   : > { %2411 = vmatmul.bf16.gmra.mxu1 %v14087_v11  ;;  %1521 = vst [vmem:[#allocation3 + $0xc2] sm:$0xff] %v1493_v52  ;;  %2641 = vmatmul.bf16.gmra.mxu2 %v14050_v50  ;;  %v2208_v50 = vsel %vm2181_vm0, %v2206_v37, %v2207_v45  ;;  %v14275_v37 = vld [vmem:[%s13832_s23 + $0x30] sm:$0xff] }
 0x257   : > { %2901 = vmatmul.bf16.gmra.mxu3 %v14069_v63  ;;  %v1804_v36 = vld [vmem:[#allocation3 + $0xb8] sm:$0xff]  ;;  %3691 = vmatpush.bf16.msra.mxu0 %v12710_v41 }
 0x259   : > { %v1755_v54 = vpop.f32.mrf.mxu2 }
 0x25a   : > { %v14244_v58 = vpop.f32.mrf.mxu3  ;;  %v1829_v11 = vadd.f32 %v1801_v56, %v1755_v54  ;;  %v1097_v60 = vpop.f32.mrf.mxu0  ;;  %v869_v56 = vld [vmem:[#allocation2 + $0xd0] sm:$0xff] }
 0x25b   : > { %v1426_v27 = vpop.f32.mrf.mxu1  ;;  %v2140_v44 = vld [vmem:[#allocation3 + $0x98] sm:$0x3f]  ;;  %v1146_v63 = vadd.f32 %v1097_v60, %v865_v53  ;;  %v13199_v53 = vld [vmem:[%s13832_s23 + $0x20] sm:$0xff] }
 0x25c   : > { %v2267_v61 = vadd.f32 %v2204_v23, %v2140_v44  ;;  %v2268_v62 = vadd.f32 %v2208_v50, %v1829_v11  ;;  %v1494_v0 = vadd.f32 %v1466_v59, %v1426_v27  ;;  %v2210_v23 = vrot.slane %v14236_v43, 2  ;;  %v2463_v50 = vld [vmem:[#allocation3 + $0xa] sm:$0x3f] }
 0x25d   : > { %1178 = vst [vmem:[#allocation2 + $0x90] sm:$0xff] %v1146_v63  ;;  %v2212_v59 = vrot.slane %v14244_v58, 2  ;;  %v1805_v60 = vld [vmem:[#allocation3 + $0xc0] sm:$0xff] }
 0x25e   : > { %2295 = vst [vmem:[#allocation3 + $0x98] sm:$0x3f] %v2267_v61  ;;  %v2211_v5 = vsel %vm2181_vm0, %v2209_v28, %v2210_v23  ;;  %v12750_v58 = vld [vmem:[%s13848_s29 + $0x20] sm:$0xff]  ;;  %v14295_v28 = vld [vmem:[%s13832_s23 + $0x38] sm:$0xff] }
 0x25f   : > { %2296 = vst [vmem:[#allocation3 + $0xa0] sm:$0xff] %v2268_v62  ;;  %4436 = vmatpush.bf16.msrb.mxu2 %v12750_v58 }
 0x260   : > { %1522 = vst [vmem:[#allocation3 + $0xca] sm:$0x3f] %v1494_v0 }
 0x261   : > { %v1757_v8 = vpop.f32.mrf.mxu2 }
 0x262   : > { %v14251_v13 = vpop.f32.mrf.mxu3  ;;  %v1830_v15 = vadd.f32 %v1802_v12, %v1757_v8  ;;  %v1100_v16 = vpop.f32.mrf.mxu0  ;;  %v2464_v8 = vld [vmem:[#allocation3 + $0x12] sm:$0xff] }
 0x263   : > { %v1429_v18 = vpop.f32.mrf.mxu1  ;;  %v1147_v21 = vadd.f32 %v1100_v16, %v866_v3  ;;  %v2213_v54 = vrot.slane %v14251_v13, 2  ;;  %v12730_v12 = vld [vmem:[%s13846_s26 + $0x210] sm:$0xff]  ;;  %v12675_v16 = vld [vmem:[%s13832_s23 + $0x38] sm:$0xff] }
 0x264   : > { %v1495_v22 = vadd.f32 %v1467_v4, %v1429_v18  ;;  %1858 = vst [vmem:[#allocation3 + $0xa8] sm:$0xff] %v1830_v15  ;;  %v12767_v4 = vld [vmem:[%s13848_s29 + $0x58] sm:$0xff]  ;;  %4033 = vmatpush.bf16.msra.mxu1 %v12730_v12  ;;  %v874_v12 = vld [vmem:[#allocation2 + $0x20] sm:$0xff] }
 0x265   : > { %1179 = vst [vmem:[#allocation2 + $0x70] sm:$0xff] %v1147_v21  ;;  %3371 = vmatmul.bf16.gmra.mxu0 %v12673_v14  ;;  %v2214_v62 = vsel %vm2181_vm0, %v2212_v59, %v2213_v54  ;;  %4702 = vmatpush.bf16.msra.mxu3 %v12767_v4 }
 0x266   : > { %2416 = vmatmul.bf16.gmra.mxu1 %v14096_v17  ;;  %1523 = vst [vmem:[#allocation3 + $0xd2] sm:$0xff] %v1495_v22  ;;  %2646 = vmatmul.bf16.gmra.mxu2 %v13196_v20 }
 0x267   : > { %2906 = vmatmul.bf16.gmra.mxu3 %v14257_v6  ;;  %v1806_v14 = vld [vmem:[#allocation3 + $0xc8] sm:$0xff] }
 0x269   : > { %v1760_v29 = vpop.f32.mrf.mxu2 }
 0x26a   : > { %v14262_v30 = vpop.f32.mrf.mxu3  ;;  %v1831_v17 = vadd.f32 %v1803_v26, %v1760_v29  ;;  %v1102_v33 = vpop.f32.mrf.mxu0  ;;  %v871_v26 = vld [vmem:[#allocation2 + $0x28] sm:$0xff] }
 0x26b   : > { %v1431_v35 = vpop.f32.mrf.mxu1  ;;  %v2142_v38 = vld [vmem:[#allocation3 + $0xa8] sm:$0x3f]  ;;  %v1148_v40 = vadd.f32 %v1102_v33, %v867_v25 }
 0x26c   : > { %v2269_v19 = vadd.f32 %v2207_v45, %v2142_v38  ;;  %v2270_v57 = vadd.f32 %v2211_v5, %v1831_v17  ;;  %v1496_v31 = vadd.f32 %v1468_v32, %v1431_v35  ;;  %v14270_v45 = vld [vmem:[%s13832_s23 + $0x40] sm:$0xff]  ;;  %v14290_v25 = vld [vmem:[%s13832_s23 + $0x48] sm:$0xff]  ;;  %v2215_v32 = vrot.slane %v14262_v30, 2  ;;  %v2465_v5 = vld [vmem:[#allocation3 + $0x1a] sm:$0x3f] }
 0x26d   : > { %1180 = vst [vmem:[#allocation2 + $0xc0] sm:$0xff] %v1148_v40  ;;  %v1807_v33 = vld [vmem:[#allocation3 + $0xd0] sm:$0xff]  ;;  %v872_v30 = vld [vmem:[#allocation2 + $0xa0] sm:$0xff] }
 0x26e   : > { %2297 = vst [vmem:[#allocation3 + $0xa8] sm:$0x3f] %v2269_v19 }
 0x26f   : > { %2298 = vst [vmem:[#allocation3 + $0xb0] sm:$0xff] %v2270_v57 }
 0x270   : > { %1524 = vst [vmem:[#allocation3 + $0xda] sm:$0x3f] %v1496_v31 }
 0x271   : > { %v1762_v42 = vpop.f32.mrf.mxu2 }
 0x272   : > { %v14266_v43 = vpop.f32.mrf.mxu3  ;;  %v1832_v39 = vadd.f32 %v1804_v36, %v1762_v42  ;;  %v1105_v47 = vpop.f32.mrf.mxu0  ;;  %v12709_v42 = vld [vmem:[%s13846_s26 + $0x1d8] sm:$0xff] }
 0x273   : > { %v2382_v48 = vpop.f32.mrf.mxu1  ;;  %v1149_v51 = vadd.f32 %v1105_v47, %v868_v10  ;;  %v2216_v29 = vrot.slane %v14266_v43, 2  ;;  %3692 = vmatpush.bf16.msra.mxu0 %v12709_v42 }
 0x274   : > { %v2494_v52 = vadd.f32 %v2462_v24, %v2382_v48  ;;  %1860 = vst [vmem:[#allocation3 + $0xb8] sm:$0xff] %v1832_v39  ;;  %v12676_v39 = vld [vmem:[%s13832_s23 + $0x40] sm:$0xff] }
 0x275   : > { %1181 = vst [vmem:[#allocation2 + $0xa8] sm:$0xff] %v1149_v51  ;;  %3376 = vmatmul.bf16.gmra.mxu0 %v12674_v46 }
 0x276   : > { %2421 = vmatmul.bf16.gmra.mxu1 %v14270_v45  ;;  %2526 = vst [vmem:[#allocation3 + $0x2] sm:$0xff] %v2494_v52  ;;  %2651 = vmatmul.bf16.gmra.mxu2 %v13199_v53  ;;  %v2466_v52 = vld [vmem:[#allocation3 + $0x22] sm:$0xff] }
 0x277   : > { %2911 = vmatmul.bf16.gmra.mxu3 %v14275_v37  ;;  %v1808_v43 = vld [vmem:[#allocation3 + $0xd8] sm:$0xff] }
 0x279   : > { %v1765_v11 = vpop.f32.mrf.mxu2 }
 0x27a   : > { %v14280_v27 = vpop.f32.mrf.mxu3  ;;  %v1833_v44 = vadd.f32 %v1805_v60, %v1765_v11  ;;  %v1107_v63 = vpop.f32.mrf.mxu0  ;;  %v873_v11 = vld [vmem:[#allocation2 + $0xf8] sm:$0xff] }
 0x27b   : > { %v2384_v61 = vpop.f32.mrf.mxu1  ;;  %v2144_v0 = vld [vmem:[#allocation3 + $0xb8] sm:$0x3f]  ;;  %v1150_v55 = vadd.f32 %v1107_v63, %v869_v56  ;;  %v14308_v56 = vld [vmem:[%s13832_s23 + $0x50] sm:$0xff]  ;;  %v2218_v60 = vrot.slane %v14280_v27, 2 }
 0x27c   : > { %v2271_v2 = vadd.f32 %v2210_v23, %v2144_v0  ;;  %v2272_v49 = vadd.f32 %v2214_v62, %v1833_v44  ;;  %v2495_v3 = vadd.f32 %v2463_v50, %v2384_v61  ;;  %v1809_v44 = vld [vmem:[#allocation3 + $0xe0] sm:$0xff]  ;;  %v12749_v27 = vld [vmem:[%s13848_s29 + $0x18] sm:$0xff] }
 0x27d   : > { %1182 = vst [vmem:[#allocation2 + $0xd0] sm:$0xff] %v1150_v55  ;;  %4437 = vmatpush.bf16.msrb.mxu2 %v12749_v27  ;;  %v12679_v27 = vld [vmem:[%s13832_s23 + $0x58] sm:$0xff] }
 0x27e   : > { %2299 = vst [vmem:[#allocation3 + $0xb8] sm:$0x3f] %v2271_v2 }
 0x27f   : > { %2300 = vst [vmem:[#allocation3 + $0xc0] sm:$0xff] %v2272_v49  ;;  %v2467_v49 = vld [vmem:[#allocation3 + $0x2a] sm:$0x3f] }
 0x280   : > { %2527 = vst [vmem:[#allocation3 + $0xa] sm:$0x3f] %v2495_v3 }
 0x281   : > { %v1767_v13 = vpop.f32.mrf.mxu2 }
 0x282   : > { %v14286_v15 = vpop.f32.mrf.mxu3  ;;  %v1834_v18 = vadd.f32 %v1806_v14, %v1767_v13  ;;  %v1110_v21 = vpop.f32.mrf.mxu0  ;;  %v1810_v14 = vld [vmem:[#allocation3 + $0xe8] sm:$0xff] }
 0x283   : > { %v2387_v22 = vpop.f32.mrf.mxu1  ;;  %v1151_v20 = vadd.f32 %v1110_v21, %v870_v7  ;;  %v2219_v59 = vrot.slane %v14286_v15, 2  ;;  %v12766_v7 = vld [vmem:[%s13848_s29 + $0x50] sm:$0xff] }
 0x284   : > { %v2496_v23 = vadd.f32 %v2464_v8, %v2387_v22  ;;  %1862 = vst [vmem:[#allocation3 + $0xc8] sm:$0xff] %v1834_v18  ;;  %v12729_v8 = vld [vmem:[%s13846_s26 + $0x208] sm:$0xff]  ;;  %4703 = vmatpush.bf16.msra.mxu3 %v12766_v7 }
 0x285   : > { %1183 = vst [vmem:[#allocation2 + $0x10] sm:$0xff] %v1151_v20  ;;  %3381 = vmatmul.bf16.gmra.mxu0 %v12675_v16  ;;  %v2220_v55 = vsel %vm2181_vm0, %v2218_v60, %v2219_v59  ;;  %v12677_v16 = vld [vmem:[%s13832_s23 + $0x48] sm:$0xff]  ;;  %4034 = vmatpush.bf16.msra.mxu1 %v12729_v8  ;;  %v2468_v20 = vld [vmem:[#allocation3 + $0x32] sm:$0xff] }
 0x286   : > { %2426 = vmatmul.bf16.gmra.mxu1 %v14290_v25  ;;  %2528 = vst [vmem:[#allocation3 + $0x12] sm:$0xff] %v2496_v23  ;;  %2656 = vmatmul.bf16.gmra.mxu2 %v14257_v6  ;;  %v2217_v6 = vsel %vm2181_vm0, %v2215_v32, %v2216_v29 }
 0x287   : > { %2916 = vmatmul.bf16.gmra.mxu3 %v14295_v28 }
 0x289   : > { %v1770_v17 = vpop.f32.mrf.mxu2 }
 0x28a   : > { %v14300_v35 = vpop.f32.mrf.mxu3  ;;  %v1835_v38 = vadd.f32 %v1807_v33, %v1770_v17  ;;  %v1112_v40 = vpop.f32.mrf.mxu0  ;;  %v875_v17 = vld [vmem:[#allocation2 + $0x98] sm:$0xff] }
 0x28b   : > { %v2389_v19 = vpop.f32.mrf.mxu1  ;;  %v2146_v57 = vld [vmem:[#allocation3 + $0xc8] sm:$0x3f]  ;;  %v1152_v31 = vadd.f32 %v1112_v40, %v871_v26  ;;  %v14325_v26 = vld [vmem:[%s13832_s23 + $0x58] sm:$0xff]  ;;  %v2221_v33 = vrot.slane %v14300_v35, 2 }
 0x28c   : > { %v2273_v10 = vadd.f32 %v2213_v54, %v2146_v57  ;;  %v2274_v24 = vadd.f32 %v2217_v6, %v1835_v38  ;;  %v2497_v41 = vadd.f32 %v2465_v5, %v2389_v19  ;;  %v1811_v38 = vld [vmem:[#allocation3 + $0xf0] sm:$0xff] }
 0x28d   : > { %1184 = vst [vmem:[#allocation2 + $0x28] sm:$0xff] %v1152_v31 }
 0x28e   : > { %2301 = vst [vmem:[#allocation3 + $0xc8] sm:$0x3f] %v2273_v10 }
 0x28f   : > { %2302 = vst [vmem:[#allocation3 + $0xd0] sm:$0xff] %v2274_v24 }
 0x290   : > { %2529 = vst [vmem:[#allocation3 + $0x1a] sm:$0x3f] %v2497_v41 }
 0x291   : > { %v1772_v36 = vpop.f32.mrf.mxu2 }
 0x292   : > { %v14304_v46 = vpop.f32.mrf.mxu3  ;;  %v1836_v47 = vadd.f32 %v1808_v43, %v1772_v36  ;;  %v1115_v48 = vpop.f32.mrf.mxu0  ;;  %v1812_v36 = vld [vmem:[#allocation3 + $0xf8] sm:$0xff] }
 0x293   : > { %v2392_v51 = vpop.f32.mrf.mxu1  ;;  %v1153_v53 = vadd.f32 %v1115_v48, %v872_v30  ;;  %v2222_v32 = vrot.slane %v14304_v46, 2  ;;  %v12678_v46 = vld [vmem:[%s13832_s23 + $0x50] sm:$0xff]  ;;  %v2470_v48 = vld [vmem:[#allocation3 + $0x42] sm:$0xff] }
 0x294   : > { %v2498_v54 = vadd.f32 %v2466_v52, %v2392_v51  ;;  %1864 = vst [vmem:[#allocation3 + $0xd8] sm:$0xff] %v1836_v47 }
 0x295   : > { %1185 = vst [vmem:[#allocation2 + $0xa0] sm:$0xff] %v1153_v53  ;;  %3386 = vmatmul.bf16.gmra.mxu0 %v12676_v39  ;;  %v2223_v31 = vsel %vm2181_vm0, %v2221_v33, %v2222_v32  ;;  %v14341_v53 = vld [vmem:[%s13832_s23 + $0x60] sm:$0xff] }
 0x296   : > { %2431 = vmatmul.bf16.gmra.mxu1 %v14308_v56  ;;  %2530 = vst [vmem:[#allocation3 + $0x22] sm:$0xff] %v2498_v54  ;;  %2661 = vmatmul.bf16.gmra.mxu2 %v14275_v37 }
 0x297   : > { %2921 = vmatmul.bf16.gmra.mxu3 %v14270_v45 }
 0x299   : > { %v1775_v50 = vpop.f32.mrf.mxu2 }
 0x29a   : > { %v14315_v63 = vpop.f32.mrf.mxu3  ;;  %v1837_v61 = vadd.f32 %v1809_v44, %v1775_v50  ;;  %v1117_v62 = vpop.f32.mrf.mxu0  ;;  %v2712_v50 = vld [vmem:[#allocation3] sm:$0xff] }
 0x29b   : > { %v2394_v0 = vpop.f32.mrf.mxu1  ;;  %v2148_v37 = vld [vmem:[#allocation3 + $0xd8] sm:$0x3f]  ;;  %v1154_v2 = vadd.f32 %v1117_v62, %v873_v11  ;;  %v3026_v11 = vrot.slane %v14315_v63, 2 }
 0x29c   : > { %v2275_v3 = vadd.f32 %v2216_v29, %v2148_v37  ;;  %v2276_v58 = vadd.f32 %v2220_v55, %v1837_v61  ;;  %v2499_v4 = vadd.f32 %v2467_v49, %v2394_v0  ;;  %v2471_v0 = vld [vmem:[#allocation3 + $0x4a] sm:$0x3f] }
 0x29d   : > { %1186 = vst [vmem:[#allocation2 + $0xf8] sm:$0xff] %v1154_v2 }
 0x29e   : > { %2303 = vst [vmem:[#allocation3 + $0xd8] sm:$0x3f] %v2275_v3 }
 0x29f   : > { %2304 = vst [vmem:[#allocation3 + $0xe0] sm:$0xff] %v2276_v58  ;;  %v2713_v58 = vld [vmem:[#allocation3 + $0x8] sm:$0xff] }
 0x2a0   : > { %2531 = vst [vmem:[#allocation3 + $0x2a] sm:$0x3f] %v2499_v4 }
 0x2a1   : > { %v1777_v13 = vpop.f32.mrf.mxu2 }
 0x2a2   : > { %v14321_v15 = vpop.f32.mrf.mxu3  ;;  %v1838_v18 = vadd.f32 %v1810_v14, %v1777_v13  ;;  %v1120_v21 = vpop.f32.mrf.mxu0 }
 0x2a3   : > { %v2397_v22 = vpop.f32.mrf.mxu1  ;;  %v1155_v23 = vadd.f32 %v1120_v21, %v874_v12  ;;  %v3027_v54 = vrot.slane %v14321_v15, 2  ;;  %v2472_v12 = vld [vmem:[#allocation3 + $0x52] sm:$0xff]  ;;  %v12728_v21 = vld [vmem:[%s13846_s26 + $0x200] sm:$0xff] }
 0x2a4   : > { %v2500_v29 = vadd.f32 %v2468_v20, %v2397_v22  ;;  %1866 = vst [vmem:[#allocation3 + $0xe8] sm:$0xff] %v1838_v18  ;;  %v12765_v18 = vld [vmem:[%s13848_s29 + $0x48] sm:$0xff]  ;;  %4035 = vmatpush.bf16.msra.mxu1 %v12728_v21 }
 0x2a5   : > { %1187 = vst [vmem:[#allocation2 + $0x20] sm:$0xff] %v1155_v23  ;;  %3391 = vmatmul.bf16.gmra.mxu0 %v12677_v16  ;;  %v12748_v16 = vld [vmem:[%s13848_s29 + $0x10] sm:$0xff]  ;;  %4704 = vmatpush.bf16.msra.mxu3 %v12765_v18 }
 0x2a6   : > { %2436 = vmatmul.bf16.gmra.mxu1 %v14325_v26  ;;  %2532 = vst [vmem:[#allocation3 + $0x32] sm:$0xff] %v2500_v29  ;;  %2666 = vmatmul.bf16.gmra.mxu2 %v14295_v28  ;;  %v2469_v28 = vld [vmem:[#allocation3 + $0x3a] sm:$0x3f]  ;;  %v2714_v23 = vld [vmem:[#allocation3 + $0x10] sm:$0xff] }
 0x2a7   : > { %2926 = vmatmul.bf16.gmra.mxu3 %v14290_v25  ;;  %4438 = vmatpush.bf16.msrb.mxu2 %v12748_v16  ;;  %v14403_v16 = vld [vmem:[%s13832_s23 + $0x68] sm:$0xff] }
 0x2a9   : > { %v1780_v5 = vpop.f32.mrf.mxu2 }
 0x2aa   : > { %v14332_v40 = vpop.f32.mrf.mxu3  ;;  %v1839_v19 = vadd.f32 %v1811_v38, %v1780_v5  ;;  %v1122_v6 = vpop.f32.mrf.mxu0 }
 0x2ab   : > { %v2399_v57 = vpop.f32.mrf.mxu1  ;;  %v2150_v10 = vld [vmem:[#allocation3 + $0xe8] sm:$0x3f]  ;;  %v1156_v24 = vadd.f32 %v1122_v6, %v875_v17  ;;  %v3029_v22 = vrot.slane %v14332_v40, 2 }
 0x2ac   : > { %v2277_v41 = vadd.f32 %v2219_v59, %v2150_v10  ;;  %v2278_v30 = vadd.f32 %v2223_v31, %v1839_v19  ;;  %v2501_v42 = vadd.f32 %v2469_v28, %v2399_v57  ;;  %v12708_v59 = vld [vmem:[%s13846_s26 + $0x1d0] sm:$0xff]  ;;  %v2715_v31 = vld [vmem:[#allocation3 + $0x18] sm:$0xff] }
 0x2ad   : > { %1188 = vst [vmem:[#allocation2 + $0x98] sm:$0xff] %v1156_v24  ;;  %3693 = vmatpush.bf16.msra.mxu0 %v12708_v59  ;;  %v12680_v24 = vld [vmem:[%s13832_s23 + $0x60] sm:$0xff] }
 0x2ae   : > { %2305 = vst [vmem:[#allocation3 + $0xe8] sm:$0x3f] %v2277_v41 }
 0x2af   : > { %2306 = vst [vmem:[#allocation3 + $0xf0] sm:$0xff] %v2278_v30  ;;  %v2474_v30 = vld [vmem:[#allocation3 + $0x62] sm:$0xff] }
 0x2b0   : > { %2533 = vst [vmem:[#allocation3 + $0x3a] sm:$0x3f] %v2501_v42 }
 0x2b1   : > { %v1782_v35 = vpop.f32.mrf.mxu2 }
 0x2b2   : > { %v14335_v43 = vpop.f32.mrf.mxu3  ;;  %v1840_v39 = vadd.f32 %v1812_v36, %v1782_v35  ;;  %v14338_v51 = vpop.f32.mrf.mxu0 }
 0x2b3   : > { %v2402_v47 = vpop.f32.mrf.mxu1  ;;  %v3030_v15 = vrot.slane %v14335_v43, 2 }
 0x2b4   : > { %v2502_v52 = vadd.f32 %v2470_v48, %v2402_v47  ;;  %1868 = vst [vmem:[#allocation3 + $0xf8] sm:$0xff] %v1840_v39  ;;  %v12747_v39 = vld [vmem:[%s13848_s29 + $0x8] sm:$0xff] }
 0x2b5   : > { %3396 = vmatmul.bf16.gmra.mxu0 %v12678_v46  ;;  %4439 = vmatpush.bf16.msrb.mxu2 %v12747_v39 }
 0x2b6   : > { %2534 = vst [vmem:[#allocation3 + $0x42] sm:$0xff] %v2502_v52  ;;  %2441 = vmatmul.bf16.gmra.mxu1 %v14341_v53  ;;  %2671 = vmatmul.bf16.gmra.mxu2 %v14270_v45  ;;  %v3028_v45 = vsel %vm2181_vm0, %v3026_v11, %v3027_v54  ;;  %v12764_v52 = vld [vmem:[%s13848_s29 + $0x40] sm:$0xff] }
 0x2b7   : > { %2931 = vmatmul.bf16.gmra.mxu3 %v14308_v56 }
 0x2b8   : > { %4705 = vmatpush.bf16.msra.mxu3 %v12764_v52 }
 0x2b9   : > { %v2632_v60 = vpop.f32.mrf.mxu2 }
 0x2ba   : > { %v14349_v44 = vpop.f32.mrf.mxu3  ;;  %v2744_v61 = vadd.f32 %v2712_v50, %v2632_v60  ;;  %v14351_v55 = vpop.f32.mrf.mxu0  ;;  %v2475_v50 = vld [vmem:[#allocation3 + $0x6a] sm:$0x3f] }
 0x2bb   : > { %v2404_v62 = vpop.f32.mrf.mxu1  ;;  %v2152_v37 = vld [vmem:[#allocation3 + $0xf8] sm:$0x3f] }
 0x2bc   : > { %v2503_v2 = vadd.f32 %v2471_v0, %v2404_v62  ;;  %v2279_v49 = vadd.f32 %v2222_v32, %v2152_v37  ;;  %v3106_v3 = vadd.f32 %v3028_v45, %v2744_v61  ;;  %v12707_v32 = vld [vmem:[%s13846_s26 + $0x1c8] sm:$0xff]  ;;  %v12813_v45 = vld [vmem:[%s13848_s29 + $0x178] sm:$0xff]  ;;  %v12706_v37 = vld [vmem:[%s13846_s26 + $0x1c0] sm:$0xff]  ;;  %s15812_s26 = sld [smem:[#allocation53_spill]] (!%p12418_p12) }
 0x2bd   : > { %3694 = vmatpush.bf16.msra.mxu0 %v12707_v32  ;;  %5717 = vmatpush.bf16.msrb.mxu1 %v12813_v45 }
 0x2be   : > { %2535 = vst [vmem:[#allocation3 + $0x4a] sm:$0x3f] %v2503_v2 }
 0x2bf   : > { %2307 = vst [vmem:[#allocation3 + $0xf8] sm:$0x3f] %v2279_v49  ;;  %v2717_v49 = vld [vmem:[#allocation3 + $0x28] sm:$0xff] }
 0x2c0   : > { %3138 = vst [vmem:[#allocation3] sm:$0xff] %v3106_v3 }
 0x2c1   : > { %v2634_v63 = vpop.f32.mrf.mxu2  ;;  %3695 = vmatpush.bf16.msra.mxu0 %v12706_v37 }
 0x2c2   : > { %v14354_v4 = vpop.f32.mrf.mxu3  ;;  %v2745_v7 = vadd.f32 %v2713_v58, %v2634_v63  ;;  %v14357_v13 = vpop.f32.mrf.mxu0  ;;  %v12681_v63 = vld [vmem:[%s13832_s23 + $0x68] sm:$0xff]  ;;  %s15813_s14 = smov (!%p12418_p12), %s15812_s26 }
 0x2c3   : > { %v2407_v8 = vpop.f32.mrf.mxu1  ;;  %v3033_v48 = vrot.slane %v14354_v4, 2 }
 0x2c4   : > { %v2504_v14 = vadd.f32 %v2472_v12, %v2407_v8  ;;  %2777 = vst [vmem:[#allocation3 + $0x8] sm:$0xff] %v2745_v7 }
 0x2c5   : > { %3401 = vmatmul.bf16.gmra.mxu0 %v12679_v27  ;;  %v2476_v27 = vld [vmem:[#allocation3 + $0x72] sm:$0xff]  ;;  %v2721_v45 = vld [vmem:[#allocation3 + $0x48] sm:$0xff] }
 0x2c6   : > { %2536 = vst [vmem:[#allocation3 + $0x52] sm:$0xff] %v2504_v14  ;;  %2446 = vmatmul.bf16.gmra.mxu1 %v14167_v1  ;;  %2676 = vmatmul.bf16.gmra.mxu2 %v14290_v25  ;;  %v2473_v1 = vld [vmem:[#allocation3 + $0x5a] sm:$0x3f]  ;;  %v3031_v25 = vsel %vm2181_vm0, %v3029_v22, %v3030_v15 }
 0x2c7   : > { %2936 = vmatmul.bf16.gmra.mxu3 %v14325_v26 }
 0x2c9   : > { %v2637_v20 = vpop.f32.mrf.mxu2 }
 0x2ca   : > { %v14367_v29 = vpop.f32.mrf.mxu3  ;;  %v2746_v17 = vadd.f32 %v2714_v23, %v2637_v20  ;;  %v14370_v5 = vpop.f32.mrf.mxu0  ;;  %v2718_v23 = vld [vmem:[#allocation3 + $0x30] sm:$0xff] }
 0x2cb   : > { %v2409_v33 = vpop.f32.mrf.mxu1  ;;  %v2963_v38 = vld [vmem:[#allocation3 + $0x8] sm:$0x3f]  ;;  %v3035_v22 = vrot.slane %v14367_v29, 2 }
 0x2cc   : > { %v2505_v19 = vadd.f32 %v2473_v1, %v2409_v33  ;;  %v3107_v40 = vadd.f32 %v3027_v54, %v2963_v38  ;;  %v3108_v6 = vadd.f32 %v3031_v25, %v2746_v17  ;;  %v3032_v54 = vrot.slane %v14349_v44, 2  ;;  %v2477_v17 = vld [vmem:[#allocation3 + $0x7a] sm:$0x3f] }
 0x2ce   : > { %2537 = vst [vmem:[#allocation3 + $0x5a] sm:$0x3f] %v2505_v19  ;;  %v2719_v19 = vld [vmem:[#allocation3 + $0x38] sm:$0xff] }
 0x2cf   : > { %3139 = vst [vmem:[#allocation3 + $0x8] sm:$0x3f] %v3107_v40 }
 0x2d0   : > { %3140 = vst [vmem:[#allocation3 + $0x10] sm:$0xff] %v3108_v6  ;;  %v12682_v6 = vld [vmem:[%s13832_s23 + $0x70] sm:$0xff] }
 0x2d1   : > { %v2639_v57 = vpop.f32.mrf.mxu2 }
 0x2d2   : > { %v14373_v10 = vpop.f32.mrf.mxu3  ;;  %v2747_v28 = vadd.f32 %v2715_v31, %v2639_v57  ;;  %v14376_v42 = vpop.f32.mrf.mxu0  ;;  %v12714_v57 = vld [vmem:[%s13832_s23 + $0x10] sm:$0xff] }
 0x2d3   : > { %v2412_v41 = vpop.f32.mrf.mxu1  ;;  %v3036_v21 = vrot.slane %v14373_v10, 2 }
 0x2d4   : > { %v2506_v35 = vadd.f32 %v2474_v30, %v2412_v41  ;;  %2779 = vst [vmem:[#allocation3 + $0x18] sm:$0xff] %v2747_v28  ;;  %v14422_v30 = vld [vmem:[%s13832_s23 + $0x70] sm:$0xff] }
 0x2d5   : > { %3406 = vmatmul.bf16.gmra.mxu0 %v12680_v24  ;;  %v3037_v1 = vsel %vm2181_vm0, %v3035_v22, %v3036_v21  ;;  %v2478_v24 = vld [vmem:[#allocation3 + $0x82] sm:$0xff] }
 0x2d6   : > { %v3428_v36 = vld [vmem:[#allocation3 + $0xa] sm:$0x3f]  ;;  %2538 = vst [vmem:[#allocation3 + $0x62] sm:$0xff] %v2506_v35  ;;  %2451 = vmatmul.bf16.gmra.mxu1 %v14181_v34  ;;  %v3427_v43 = vld [vmem:[#allocation3 + $0x2] sm:$0xff]  ;;  %2681 = vmatmul.bf16.gmra.mxu2 %v14308_v56 }
 0x2d7   : > { %v3456_v46 = vadd.f32 %v3428_v36, %v14351_v55  ;;  %2941 = vmatmul.bf16.gmra.mxu3 %v14341_v53  ;;  %v3455_v47 = vadd.f32 %v3427_v43, %v14338_v51  ;;  %v2716_v34 = vld [vmem:[#allocation3 + $0x20] sm:$0xff]  ;;  %v3034_v51 = vsel %vm2181_vm0, %v3032_v54, %v3033_v48  ;;  %v12797_v43 = vld [vmem:[%s13848_s29 + $0xf8] sm:$0xff] }
 0x2d8   : > { %v12746_v35 = vld [vmem:[%s13848_s29] sm:$0xff]  ;;  %5217 = vmatpush.bf16.msrb.mxu3 %v12797_v43  ;;  %v12811_v43 = vld [vmem:[%s13848_s29 + $0x168] sm:$0xff] }
 0x2d9   : > { %3484 = vst [vmem:[#allocation3 + $0xa] sm:$0x3f] %v3456_v46  ;;  %v2642_v59 = vpop.f32.mrf.mxu2  ;;  %v12812_v46 = vld [vmem:[%s13848_s29 + $0x170] sm:$0xff]  ;;  %4440 = vmatpush.bf16.msrb.mxu2 %v12746_v35  ;;  %v2720_v54 = vld [vmem:[#allocation3 + $0x40] sm:$0xff] }
 0x2da   : > { %v14387_v11 = vpop.f32.mrf.mxu3  ;;  %3483 = vst [vmem:[#allocation3 + $0x2] sm:$0xff] %v3455_v47  ;;  %v2748_v56 = vadd.f32 %v2716_v34, %v2642_v59  ;;  %v14389_v61 = vpop.f32.mrf.mxu0  ;;  %5718 = vmatpush.bf16.msrb.mxu1 %v12812_v46  ;;  %v12754_v35 = vld [vmem:[%s13832_s23] sm:$0xff]  ;;  %v12789_v46 = vld [vmem:[%s13848_s29 + $0xb8] sm:$0xff] }
 0x2db   : > { %v2414_v60 = vpop.f32.mrf.mxu1  ;;  %v2965_v62 = vld [vmem:[#allocation3 + $0x18] sm:$0x3f] }
 0x2dc   : > { %v2507_v0 = vadd.f32 %v2475_v50, %v2414_v60  ;;  %v3109_v55 = vadd.f32 %v3030_v15, %v2965_v62  ;;  %v3110_v44 = vadd.f32 %v3034_v51, %v2748_v56  ;;  %v2479_v50 = vld [vmem:[#allocation3 + $0x8a] sm:$0x3f] }
 0x2dd   : > { %4962 = vmatpush.bf16.msra.mxu2 %v12789_v46  ;;  %v12756_v46 = vld [vmem:[%s13832_s23 + $0x10] sm:$0xff] }
 0x2de   : > { %2539 = vst [vmem:[#allocation3 + $0x6a] sm:$0x3f] %v2507_v0  ;;  %5719 = vmatpush.bf16.msrb.mxu1 %v12811_v43  ;;  %v12736_v43 = vld [vmem:[%s13832_s23] sm:$0xff] }
 0x2df   : > { %3141 = vst [vmem:[#allocation3 + $0x18] sm:$0x3f] %v3109_v55 }
 0x2e0   : > { %3142 = vst [vmem:[#allocation3 + $0x20] sm:$0xff] %v3110_v44 }
 0x2e1   : > { %v2644_v2 = vpop.f32.mrf.mxu2 }
 0x2e2   : > { %v14394_v3 = vpop.f32.mrf.mxu3  ;;  %v2749_v58 = vadd.f32 %v2717_v49, %v2644_v2  ;;  %v14397_v7 = vpop.f32.mrf.mxu0  ;;  %v12683_v2 = vld [vmem:[%s13832_s23 + $0x78] sm:$0xff] }
 0x2e3   : > { %v2417_v4 = vpop.f32.mrf.mxu1  ;;  %v3039_v36 = vrot.slane %v14394_v3, 2  ;;  %v12715_v49 = vld [vmem:[%s13832_s23 + $0x18] sm:$0xff] }
 0x2e4   : > { %v2508_v8 = vadd.f32 %v2476_v27, %v2417_v4  ;;  %2781 = vst [vmem:[#allocation3 + $0x28] sm:$0xff] %v2749_v58  ;;  %v2480_v4 = vld [vmem:[#allocation3 + $0x92] sm:$0xff] }
 0x2e5   : > { %3411 = vmatmul.bf16.gmra.mxu0 %v12681_v63 }
 0x2e6   : > { %v3430_v12 = vld [vmem:[#allocation3 + $0x1a] sm:$0x3f]  ;;  %2540 = vst [vmem:[#allocation3 + $0x72] sm:$0xff] %v2508_v8  ;;  %2456 = vmatmul.bf16.gmra.mxu1 %v14199_v9  ;;  %v3429_v14 = vld [vmem:[#allocation3 + $0x12] sm:$0xff]  ;;  %2686 = vmatmul.bf16.gmra.mxu2 %v14325_v26 }
 0x2e7   : > { %v3458_v15 = vadd.f32 %v3430_v12, %v14370_v5  ;;  %2946 = vmatmul.bf16.gmra.mxu3 %v14403_v16  ;;  %v3457_v18 = vadd.f32 %v3429_v14, %v14357_v13  ;;  %v14448_v12 = vld [vmem:[%s13832_s23 + $0x78] sm:$0xff] }
 0x2e9   : > { %3486 = vst [vmem:[#allocation3 + $0x1a] sm:$0x3f] %v3458_v15  ;;  %v2647_v20 = vpop.f32.mrf.mxu2 }
 0x2ea   : > { %v14409_v9 = vpop.f32.mrf.mxu3  ;;  %3485 = vst [vmem:[#allocation3 + $0x12] sm:$0xff] %v3457_v18  ;;  %v2750_v32 = vadd.f32 %v2718_v23, %v2647_v20  ;;  %v14411_v33 = vpop.f32.mrf.mxu0 }
 0x2eb   : > { %v2419_v26 = vpop.f32.mrf.mxu1  ;;  %v2967_v5 = vld [vmem:[#allocation3 + $0x28] sm:$0x3f]  ;;  %v3041_v20 = vrot.slane %v14409_v9, 2 }
 0x2ec   : > { %v2509_v13 = vadd.f32 %v2477_v17, %v2419_v26  ;;  %v3112_v25 = vadd.f32 %v3037_v1, %v2750_v32  ;;  %v3111_v38 = vadd.f32 %v3033_v48, %v2967_v5  ;;  %v3038_v48 = vrot.slane %v14387_v11, 2  ;;  %v2722_v32 = vld [vmem:[#allocation3 + $0x50] sm:$0xff]  ;;  %v2481_v1 = vld [vmem:[#allocation3 + $0x9a] sm:$0x3f] }
 0x2ee   : > { %2541 = vst [vmem:[#allocation3 + $0x7a] sm:$0x3f] %v2509_v13  ;;  %v3040_v11 = vsel %vm2181_vm0, %v3038_v48, %v3039_v36 }
 0x2ef   : > { %3144 = vst [vmem:[#allocation3 + $0x30] sm:$0xff] %v3112_v25 }
 0x2f0   : > { %3143 = vst [vmem:[#allocation3 + $0x28] sm:$0x3f] %v3111_v38  ;;  %v12796_v38 = vld [vmem:[%s13848_s29 + $0xf0] sm:$0xff] }
 0x2f1   : > { %v2649_v29 = vpop.f32.mrf.mxu2  ;;  %5218 = vmatpush.bf16.msrb.mxu3 %v12796_v38  ;;  %v12788_v38 = vld [vmem:[%s13848_s29 + $0xb0] sm:$0xff] }
 0x2f2   : > { %v14414_v40 = vpop.f32.mrf.mxu3  ;;  %v2751_v31 = vadd.f32 %v2719_v19, %v2649_v29  ;;  %v14418_v28 = vpop.f32.mrf.mxu0  ;;  %v2723_v19 = vld [vmem:[#allocation3 + $0x58] sm:$0xff]  ;;  %4963 = vmatpush.bf16.msra.mxu2 %v12788_v38 }
 0x2f3   : > { %v2422_v10 = vpop.f32.mrf.mxu1  ;;  %v3042_v14 = vrot.slane %v14414_v40, 2 }
 0x2f4   : > { %v2510_v41 = vadd.f32 %v2478_v24, %v2422_v10  ;;  %2783 = vst [vmem:[#allocation3 + $0x38] sm:$0xff] %v2751_v31  ;;  %v12716_v31 = vld [vmem:[%s13832_s23 + $0x20] sm:$0xff] }
 0x2f5   : > { %3416 = vmatmul.bf16.gmra.mxu0 %v12682_v6 }
 0x2f6   : > { %2542 = vst [vmem:[#allocation3 + $0x82] sm:$0xff] %v2510_v41  ;;  %4036 = vmatmul.bf16.vlgmr.msra.gmra.mxu1 %v12714_v57  ;;  %2691 = vmatmul.bf16.gmra.mxu2 %v14341_v53  ;;  %v12692_v57 = vld [vmem:[%s13832_s23 + $0x10] sm:$0xff]  ;;  %v2482_v41 = vld [vmem:[#allocation3 + $0xa2] sm:$0xff] }
 0x2f7   : > { %2951 = vmatmul.bf16.gmra.mxu3 %v14422_v30  ;;  %v3431_v39 = vld [vmem:[#allocation3 + $0x22] sm:$0xff]  ;;  %v3432_v47 = vld [vmem:[#allocation3 + $0x2a] sm:$0x3f] }
 0x2f8   : > { %v3459_v53 = vadd.f32 %v3431_v39, %v14376_v42  ;;  %v3460_v34 = vadd.f32 %v3432_v47, %v14389_v61  ;;  %v12805_v42 = vld [vmem:[%s13848_s29 + $0x138] sm:$0xff]  ;;  %v12804_v47 = vld [vmem:[%s13848_s29 + $0x130] sm:$0xff] }
 0x2f9   : > { %v2652_v52 = vpop.f32.mrf.mxu2  ;;  %5467 = vmatpush.bf16.msrb.mxu0 %v12805_v42  ;;  %v12795_v42 = vld [vmem:[%s13848_s29 + $0xe8] sm:$0xff] }
 0x2fa   : > { %v14430_v59 = vpop.f32.mrf.mxu3  ;;  %v2752_v56 = vadd.f32 %v2720_v54, %v2652_v52  ;;  %v14434_v51 = vpop.f32.mrf.mxu0  ;;  %3487 = vst [vmem:[#allocation3 + $0x22] sm:$0xff] %v3459_v53  ;;  %5219 = vmatpush.bf16.msrb.mxu3 %v12795_v42 }
 0x2fb   : > { %v2424_v60 = vpop.f32.mrf.mxu1  ;;  %v2969_v0 = vld [vmem:[#allocation3 + $0x38] sm:$0x3f]  ;;  %3488 = vst [vmem:[#allocation3 + $0x2a] sm:$0x3f] %v3460_v34  ;;  %v3044_v34 = vrot.slane %v14430_v59, 2 }
 0x2fc   : > { %v2511_v62 = vadd.f32 %v2479_v50, %v2424_v60  ;;  %v3114_v55 = vadd.f32 %v3040_v11, %v2752_v56  ;;  %v3113_v44 = vadd.f32 %v3036_v21, %v2969_v0  ;;  %v2724_v60 = vld [vmem:[#allocation3 + $0x60] sm:$0xff] }
 0x2fd   : > { %5468 = vmatpush.bf16.msrb.mxu0 %v12804_v47  ;;  %v12794_v47 = vld [vmem:[%s13848_s29 + $0xe0] sm:$0xff] }
 0x2fe   : > { %2543 = vst [vmem:[#allocation3 + $0x8a] sm:$0x3f] %v2511_v62  ;;  %v2483_v62 = vld [vmem:[#allocation3 + $0xaa] sm:$0x3f]  ;;  %5220 = vmatpush.bf16.msrb.mxu3 %v12794_v47 }
 0x2ff   : > { %3146 = vst [vmem:[#allocation3 + $0x40] sm:$0xff] %v3114_v55 }
 0x300   : > { %3145 = vst [vmem:[#allocation3 + $0x38] sm:$0x3f] %v3113_v44 }
 0x301   : > { %v2654_v61 = vpop.f32.mrf.mxu2 }
 0x302   : > { %v14440_v37 = vpop.f32.mrf.mxu3  ;;  %v2753_v63 = vadd.f32 %v2721_v45, %v2654_v61  ;;  %v14444_v27 = vpop.f32.mrf.mxu0  ;;  %v2725_v45 = vld [vmem:[#allocation3 + $0x68] sm:$0xff] }
 0x303   : > { %v2427_v58 = vpop.f32.mrf.mxu1  ;;  %v3045_v39 = vrot.slane %v14440_v37, 2 }
 0x304   : > { %v2512_v8 = vadd.f32 %v2480_v4, %v2427_v58  ;;  %2785 = vst [vmem:[#allocation3 + $0x48] sm:$0xff] %v2753_v63  ;;  %v12717_v63 = vld [vmem:[%s13832_s23 + $0x28] sm:$0xff] }
 0x305   : > { %3421 = vmatmul.bf16.gmra.mxu0 %v12683_v2 }
 0x306   : > { %2544 = vst [vmem:[#allocation3 + $0x92] sm:$0xff] %v2512_v8  ;;  %4041 = vmatmul.bf16.gmra.mxu1 %v12715_v49  ;;  %2696 = vmatmul.bf16.gmra.mxu2 %v14403_v16  ;;  %v12693_v49 = vld [vmem:[%s13832_s23 + $0x18] sm:$0xff] }
 0x307   : > { %2956 = vmatmul.bf16.gmra.mxu3 %v14448_v12  ;;  %v3433_v15 = vld [vmem:[#allocation3 + $0x32] sm:$0xff]  ;;  %v3434_v18 = vld [vmem:[#allocation3 + $0x3a] sm:$0x3f] }
 0x308   : > { %v3461_v21 = vadd.f32 %v3433_v15, %v14397_v7  ;;  %v3462_v22 = vadd.f32 %v3434_v18, %v14411_v33  ;;  %v3043_v7 = vsel %vm2181_vm0, %v3041_v20, %v3042_v14  ;;  %v2484_v8 = vld [vmem:[#allocation3 + $0xb2] sm:$0xff]  ;;  %v12755_v18 = vld [vmem:[%s13832_s23 + $0x8] sm:$0xff] }
 0x309   : > { %v2657_v23 = vpop.f32.mrf.mxu2 }
 0x30a   : > { %v14455_v26 = vpop.f32.mrf.mxu3  ;;  %v2754_v16 = vadd.f32 %v2722_v32, %v2657_v23  ;;  %v14457_v13 = vpop.f32.mrf.mxu0  ;;  %3489 = vst [vmem:[#allocation3 + $0x32] sm:$0xff] %v3461_v21 }
 0x30b   : > { %v2429_v17 = vpop.f32.mrf.mxu1  ;;  %3490 = vst [vmem:[#allocation3 + $0x3a] sm:$0x3f] %v3462_v22  ;;  %v2971_v9 = vld [vmem:[#allocation3 + $0x48] sm:$0x3f]  ;;  %v3047_v32 = vrot.slane %v14455_v26, 2 }
 0x30c   : > { %v2513_v33 = vadd.f32 %v2481_v1, %v2429_v17  ;;  %v3116_v5 = vadd.f32 %v3043_v7, %v2754_v16  ;;  %v3115_v25 = vadd.f32 %v3039_v36, %v2971_v9  ;;  %v2726_v17 = vld [vmem:[#allocation3 + $0x70] sm:$0xff] }
 0x30e   : > { %2545 = vst [vmem:[#allocation3 + $0x9a] sm:$0x3f] %v2513_v33  ;;  %v2485_v33 = vld [vmem:[#allocation3 + $0xba] sm:$0x3f] }
 0x30f   : > { %3148 = vst [vmem:[#allocation3 + $0x50] sm:$0xff] %v3116_v5 }
 0x310   : > { %3147 = vst [vmem:[#allocation3 + $0x48] sm:$0x3f] %v3115_v25 }
 0x311   : > { %v2659_v29 = vpop.f32.mrf.mxu2 }
 0x312   : > { %v14465_v6 = vpop.f32.mrf.mxu3  ;;  %v2755_v10 = vadd.f32 %v2723_v19, %v2659_v29  ;;  %v14469_v3 = vpop.f32.mrf.mxu0  ;;  %v12810_v29 = vld [vmem:[%s13848_s29 + $0x160] sm:$0xff] }
 0x313   : > { %v2432_v24 = vpop.f32.mrf.mxu1  ;;  %v3048_v22 = vrot.slane %v14465_v6, 2  ;;  %5720 = vmatpush.bf16.msrb.mxu1 %v12810_v29  ;;  %v12737_v6 = vld [vmem:[%s13832_s23 + $0x8] sm:$0xff] }
 0x314   : > { %v2514_v36 = vadd.f32 %v2482_v41, %v2432_v24  ;;  %2787 = vst [vmem:[#allocation3 + $0x58] sm:$0xff] %v2755_v10  ;;  %v12694_v10 = vld [vmem:[%s13832_s23 + $0x20] sm:$0xff]  ;;  %v12718_v24 = vld [vmem:[%s13832_s23 + $0x30] sm:$0xff] }
 0x315   : > { %3696 = vmatmul.bf16.vlgmr.msra.gmra.mxu0 %v12692_v57  ;;  %v2727_v57 = vld [vmem:[#allocation3 + $0x78] sm:$0xff] }
 0x316   : > { %2546 = vst [vmem:[#allocation3 + $0xa2] sm:$0xff] %v2514_v36  ;;  %4046 = vmatmul.bf16.gmra.mxu1 %v12716_v31  ;;  %2701 = vmatmul.bf16.gmra.mxu2 %v14422_v30 }
 0x317   : > { %4706 = vmatmul.bf16.vlgmr.msra.gmra.mxu3 %v12754_v35  ;;  %v3435_v48 = vld [vmem:[#allocation3 + $0x42] sm:$0xff]  ;;  %v3436_v52 = vld [vmem:[#allocation3 + $0x4a] sm:$0x3f] }
 0x318   : > { %v3463_v54 = vadd.f32 %v3435_v48, %v14418_v28  ;;  %v3464_v53 = vadd.f32 %v3436_v52, %v14434_v51  ;;  %v3046_v28 = vsel %vm2181_vm0, %v3044_v34, %v3045_v39  ;;  %v2486_v35 = vld [vmem:[#allocation3 + $0xc2] sm:$0xff] }
 0x319   : > { %v2662_v56 = vpop.f32.mrf.mxu2  ;;  %v12803_v48 = vld [vmem:[%s13848_s29 + $0x128] sm:$0xff] }
 0x31a   : > { %v14480_v50 = vpop.f32.mrf.mxu3  ;;  %v2756_v30 = vadd.f32 %v2724_v60, %v2662_v56  ;;  %v14482_v0 = vpop.f32.mrf.mxu0  ;;  %3491 = vst [vmem:[#allocation3 + $0x42] sm:$0xff] %v3463_v54  ;;  %5469 = vmatpush.bf16.msrb.mxu0 %v12803_v48  ;;  %v12738_v48 = vld [vmem:[%s13832_s23 + $0x10] sm:$0xff] }
 0x31b   : > { %v2434_v11 = vpop.f32.mrf.mxu1  ;;  %3492 = vst [vmem:[#allocation3 + $0x4a] sm:$0x3f] %v3464_v53  ;;  %v2973_v59 = vld [vmem:[#allocation3 + $0x58] sm:$0x3f]  ;;  %v3050_v60 = vrot.slane %v14480_v50, 2 }
 0x31c   : > { %v2515_v51 = vadd.f32 %v2483_v62, %v2434_v11  ;;  %v3118_v55 = vadd.f32 %v3046_v28, %v2756_v30  ;;  %v3117_v44 = vadd.f32 %v3042_v14, %v2973_v59  ;;  %v2728_v11 = vld [vmem:[#allocation3 + $0x80] sm:$0xff]  ;;  %v2487_v59 = vld [vmem:[#allocation3 + $0xca] sm:$0x3f] }
 0x31e   : > { %2547 = vst [vmem:[#allocation3 + $0xaa] sm:$0x3f] %v2515_v51 }
 0x31f   : > { %3150 = vst [vmem:[#allocation3 + $0x60] sm:$0xff] %v3118_v55 }
 0x320   : > { %3149 = vst [vmem:[#allocation3 + $0x58] sm:$0x3f] %v3117_v44 }
 0x321   : > { %v2664_v61 = vpop.f32.mrf.mxu2 }
 0x322   : > { %v14490_v2 = vpop.f32.mrf.mxu3  ;;  %v2757_v58 = vadd.f32 %v2725_v45, %v2664_v61  ;;  %v14494_v15 = vpop.f32.mrf.mxu0  ;;  %v12787_v61 = vld [vmem:[%s13848_s29 + $0xa8] sm:$0xff] }
 0x323   : > { %v2437_v4 = vpop.f32.mrf.mxu1  ;;  %v3051_v54 = vrot.slane %v14490_v2, 2  ;;  %4964 = vmatpush.bf16.msra.mxu2 %v12787_v61  ;;  %v2490_v2 = vld [vmem:[#allocation3 + $0xe2] sm:$0xff] }
 0x324   : > { %v2516_v40 = vadd.f32 %v2484_v8, %v2437_v4  ;;  %2789 = vst [vmem:[#allocation3 + $0x68] sm:$0xff] %v2757_v58  ;;  %v12695_v58 = vld [vmem:[%s13832_s23 + $0x28] sm:$0xff]  ;;  %v12719_v4 = vld [vmem:[%s13832_s23 + $0x38] sm:$0xff] }
 0x325   : > { %3701 = vmatmul.bf16.gmra.mxu0 %v12693_v49  ;;  %v2729_v49 = vld [vmem:[#allocation3 + $0x88] sm:$0xff] }
 0x326   : > { %2548 = vst [vmem:[#allocation3 + $0xb2] sm:$0xff] %v2516_v40  ;;  %4051 = vmatmul.bf16.gmra.mxu1 %v12717_v63  ;;  %2706 = vmatmul.bf16.gmra.mxu2 %v14448_v12  ;;  %v2488_v40 = vld [vmem:[#allocation3 + $0xd2] sm:$0xff] }
 0x327   : > { %4711 = vmatmul.bf16.gmra.mxu3 %v12755_v18  ;;  %v3437_v14 = vld [vmem:[#allocation3 + $0x52] sm:$0xff]  ;;  %v3438_v21 = vld [vmem:[#allocation3 + $0x5a] sm:$0x3f] }
 0x328   : > { %v3465_v20 = vadd.f32 %v3437_v14, %v14444_v27  ;;  %v3466_v23 = vadd.f32 %v3438_v21, %v14457_v13  ;;  %v3049_v27 = vsel %vm2181_vm0, %v3047_v32, %v3048_v22  ;;  %v12757_v21 = vld [vmem:[%s13832_s23 + $0x18] sm:$0xff] }
 0x329   : > { %v2667_v16 = vpop.f32.mrf.mxu2 }
 0x32a   : > { %v14502_v1 = vpop.f32.mrf.mxu3  ;;  %3493 = vst [vmem:[#allocation3 + $0x52] sm:$0xff] %v3465_v20  ;;  %v2758_v7 = vadd.f32 %v2726_v17, %v2667_v16  ;;  %v14504_v9 = vpop.f32.mrf.mxu0  ;;  %v12793_v20 = vld [vmem:[%s13848_s29 + $0xd8] sm:$0xff] }
 0x32b   : > { %v2439_v12 = vpop.f32.mrf.mxu1  ;;  %3494 = vst [vmem:[#allocation3 + $0x5a] sm:$0x3f] %v3466_v23  ;;  %v2975_v13 = vld [vmem:[#allocation3 + $0x68] sm:$0x3f]  ;;  %5221 = vmatpush.bf16.msrb.mxu3 %v12793_v20  ;;  %v12739_v20 = vld [vmem:[%s13832_s23 + $0x18] sm:$0xff] }
 0x32c   : > { %v2517_v26 = vadd.f32 %v2485_v33, %v2439_v12  ;;  %v3120_v5 = vadd.f32 %v3049_v27, %v2758_v7  ;;  %v3119_v25 = vadd.f32 %v3045_v39, %v2975_v13  ;;  %v3053_v12 = vrot.slane %v14502_v1, 2  ;;  %v2730_v27 = vld [vmem:[#allocation3 + $0x90] sm:$0xff] }
 0x32e   : > { %2549 = vst [vmem:[#allocation3 + $0xba] sm:$0x3f] %v2517_v26 }
 0x32f   : > { %3152 = vst [vmem:[#allocation3 + $0x70] sm:$0xff] %v3120_v5 }
 0x330   : > { %3151 = vst [vmem:[#allocation3 + $0x68] sm:$0x3f] %v3119_v25  ;;  %v2489_v25 = vld [vmem:[#allocation3 + $0xda] sm:$0x3f] }
 0x331   : > { %v2669_v19 = vpop.f32.mrf.mxu2 }
 0x332   : > { %v14513_v31 = vpop.f32.mrf.mxu3  ;;  %v2759_v41 = vadd.f32 %v2727_v57, %v2669_v19  ;;  %v14517_v36 = vpop.f32.mrf.mxu0  ;;  %v12809_v57 = vld [vmem:[%s13848_s29 + $0x158] sm:$0xff] }
 0x333   : > { %v2442_v37 = vpop.f32.mrf.mxu1  ;;  %v3054_v32 = vrot.slane %v14513_v31, 2  ;;  %5721 = vmatpush.bf16.msrb.mxu1 %v12809_v57 }
 0x334   : > { %v2518_v39 = vadd.f32 %v2486_v35, %v2442_v37  ;;  %2791 = vst [vmem:[#allocation3 + $0x78] sm:$0xff] %v2759_v41  ;;  %v2731_v41 = vld [vmem:[#allocation3 + $0x98] sm:$0xff]  ;;  %v12696_v35 = vld [vmem:[%s13832_s23 + $0x30] sm:$0xff] }
 0x335   : > { %3706 = vmatmul.bf16.gmra.mxu0 %v12694_v10  ;;  %v12802_v10 = vld [vmem:[%s13848_s29 + $0x120] sm:$0xff] }
 0x336   : > { %2550 = vst [vmem:[#allocation3 + $0xc2] sm:$0xff] %v2518_v39  ;;  %4056 = vmatmul.bf16.gmra.mxu1 %v12718_v24  ;;  %4441 = vmatmul.bf16.vlgmr.msrb.gmra.mxu2 %v12736_v43  ;;  %v12720_v43 = vld [vmem:[%s13832_s23 + $0x40] sm:$0xff] }
 0x337   : > { %4716 = vmatmul.bf16.gmra.mxu3 %v12756_v46  ;;  %v3439_v52 = vld [vmem:[#allocation3 + $0x62] sm:$0xff]  ;;  %v3440_v53 = vld [vmem:[#allocation3 + $0x6a] sm:$0x3f]  ;;  %5470 = vmatpush.bf16.msrb.mxu0 %v12802_v10 }
 0x338   : > { %v3467_v34 = vadd.f32 %v3439_v52, %v14469_v3  ;;  %v3468_v56 = vadd.f32 %v3440_v53, %v14482_v0  ;;  %v3052_v3 = vsel %vm2181_vm0, %v3050_v60, %v3051_v54  ;;  %v12758_v52 = vld [vmem:[%s13832_s23 + $0x20] sm:$0xff] }
 0x339   : > { %v2672_v30 = vpop.f32.mrf.mxu2  ;;  %v12786_v53 = vld [vmem:[%s13848_s29 + $0xa0] sm:$0xff] }
 0x33a   : > { %v14527_v62 = vpop.f32.mrf.mxu3  ;;  %3495 = vst [vmem:[#allocation3 + $0x62] sm:$0xff] %v3467_v34  ;;  %v2760_v28 = vadd.f32 %v2728_v11, %v2672_v30  ;;  %v14529_v55 = vpop.f32.mrf.mxu0  ;;  %4965 = vmatpush.bf16.msra.mxu2 %v12786_v53  ;;  %v12760_v53 = vld [vmem:[%s13832_s23 + $0x30] sm:$0xff] }
 0x33b   : > { %v2444_v51 = vpop.f32.mrf.mxu1  ;;  %3496 = vst [vmem:[#allocation3 + $0x6a] sm:$0x3f] %v3468_v56  ;;  %v2977_v50 = vld [vmem:[#allocation3 + $0x78] sm:$0x3f] }
 0x33c   : > { %v2519_v0 = vadd.f32 %v2487_v59, %v2444_v51  ;;  %v3122_v44 = vadd.f32 %v3052_v3, %v2760_v28  ;;  %v3121_v42 = vadd.f32 %v3048_v22, %v2977_v50  ;;  %v3056_v28 = vrot.slane %v14527_v62, 2  ;;  %v2732_v59 = vld [vmem:[#allocation3 + $0xa0] sm:$0xff] }
 0x33e   : > { %2551 = vst [vmem:[#allocation3 + $0xca] sm:$0x3f] %v2519_v0 }
 0x33f   : > { %3154 = vst [vmem:[#allocation3 + $0x80] sm:$0xff] %v3122_v44  ;;  %v2491_v44 = vld [vmem:[#allocation3 + $0xea] sm:$0x3f] }
 0x340   : > { %3153 = vst [vmem:[#allocation3 + $0x78] sm:$0x3f] %v3121_v42 }
 0x341   : > { %v2674_v45 = vpop.f32.mrf.mxu2 }
 0x342   : > { %v14537_v63 = vpop.f32.mrf.mxu3  ;;  %v2761_v8 = vadd.f32 %v2729_v49, %v2674_v45  ;;  %v14541_v14 = vpop.f32.mrf.mxu0  ;;  %v12792_v49 = vld [vmem:[%s13848_s29 + $0xd0] sm:$0xff] }
 0x343   : > { %v2447_v18 = vpop.f32.mrf.mxu1  ;;  %v3057_v60 = vrot.slane %v14537_v63, 2  ;;  %5222 = vmatpush.bf16.msrb.mxu3 %v12792_v49 }
 0x344   : > { %v2520_v22 = vadd.f32 %v2488_v40, %v2447_v18  ;;  %2793 = vst [vmem:[#allocation3 + $0x88] sm:$0xff] %v2761_v8  ;;  %v12697_v18 = vld [vmem:[%s13832_s23 + $0x38] sm:$0xff]  ;;  %v12721_v40 = vld [vmem:[%s13832_s23 + $0x48] sm:$0xff] }
 0x345   : > { %3711 = vmatmul.bf16.gmra.mxu0 %v12695_v58 }
 0x346   : > { %2552 = vst [vmem:[#allocation3 + $0xd2] sm:$0xff] %v2520_v22  ;;  %4061 = vmatmul.bf16.gmra.mxu1 %v12719_v4  ;;  %4446 = vmatmul.bf16.gmra.mxu2 %v12737_v6  ;;  %v2733_v4 = vld [vmem:[#allocation3 + $0xa8] sm:$0xff]  ;;  %v2492_v22 = vld [vmem:[#allocation3 + $0xf2] sm:$0xff] }
 0x347   : > { %4721 = vmatmul.bf16.gmra.mxu3 %v12757_v21  ;;  %v3441_v23 = vld [vmem:[#allocation3 + $0x72] sm:$0xff]  ;;  %v3442_v16 = vld [vmem:[#allocation3 + $0x7a] sm:$0x3f] }
 0x348   : > { %v3469_v17 = vadd.f32 %v3441_v23, %v14494_v15  ;;  %v3470_v7 = vadd.f32 %v3442_v16, %v14504_v9  ;;  %v3055_v15 = vsel %vm2181_vm0, %v3053_v12, %v3054_v32  ;;  %v12759_v23 = vld [vmem:[%s13832_s23 + $0x28] sm:$0xff]  ;;  %v12785_v16 = vld [vmem:[%s13848_s29 + $0x98] sm:$0xff] }
 0x349   : > { %v2677_v33 = vpop.f32.mrf.mxu2  ;;  %4966 = vmatpush.bf16.msra.mxu2 %v12785_v16 }
 0x34a   : > { %v14550_v26 = vpop.f32.mrf.mxu3  ;;  %3497 = vst [vmem:[#allocation3 + $0x72] sm:$0xff] %v3469_v17  ;;  %v2762_v13 = vadd.f32 %v2730_v27, %v2677_v33  ;;  %v14552_v38 = vpop.f32.mrf.mxu0  ;;  %v12808_v17 = vld [vmem:[%s13848_s29 + $0x150] sm:$0xff] }
 0x34b   : > { %v2449_v5 = vpop.f32.mrf.mxu1  ;;  %3498 = vst [vmem:[#allocation3 + $0x7a] sm:$0x3f] %v3470_v7  ;;  %v2979_v9 = vld [vmem:[#allocation3 + $0x88] sm:$0x3f]  ;;  %5722 = vmatpush.bf16.msrb.mxu1 %v12808_v17 }
 0x34c   : > { %v2521_v1 = vadd.f32 %v2489_v25, %v2449_v5  ;;  %v3124_v29 = vadd.f32 %v3055_v15, %v2762_v13  ;;  %v3123_v19 = vadd.f32 %v3051_v54, %v2979_v9  ;;  %v3059_v5 = vrot.slane %v14550_v26, 2  ;;  %v2734_v15 = vld [vmem:[#allocation3 + $0xb0] sm:$0xff] }
 0x34e   : > { %2553 = vst [vmem:[#allocation3 + $0xda] sm:$0x3f] %v2521_v1 }
 0x34f   : > { %3156 = vst [vmem:[#allocation3 + $0x90] sm:$0xff] %v3124_v29 }
 0x350   : > { %3155 = vst [vmem:[#allocation3 + $0x88] sm:$0x3f] %v3123_v19  ;;  %v2493_v19 = vld [vmem:[#allocation3 + $0xfa] sm:$0x3f] }
 0x351   : > { %v2679_v24 = vpop.f32.mrf.mxu2 }
 0x352   : > { %v14561_v37 = vpop.f32.mrf.mxu3  ;;  %v2763_v46 = vadd.f32 %v2731_v41, %v2679_v24  ;;  %v14565_v47 = vpop.f32.mrf.mxu0  ;;  %v12801_v41 = vld [vmem:[%s13848_s29 + $0x118] sm:$0xff] }
 0x353   : > { %v2452_v39 = vpop.f32.mrf.mxu1  ;;  %v3060_v7 = vrot.slane %v14561_v37, 2  ;;  %v12791_v37 = vld [vmem:[%s13848_s29 + $0xc8] sm:$0xff]  ;;  %5471 = vmatpush.bf16.msrb.mxu0 %v12801_v41 }
 0x354   : > { %v2522_v54 = vadd.f32 %v2490_v2, %v2452_v39  ;;  %2795 = vst [vmem:[#allocation3 + $0x98] sm:$0xff] %v2763_v46  ;;  %5223 = vmatpush.bf16.msrb.mxu3 %v12791_v37  ;;  %v12698_v39 = vld [vmem:[%s13832_s23 + $0x40] sm:$0xff]  ;;  %v12722_v2 = vld [vmem:[%s13832_s23 + $0x50] sm:$0xff] }
 0x355   : > { %3716 = vmatmul.bf16.gmra.mxu0 %v12696_v35  ;;  %v3061_v10 = vsel %vm2181_vm0, %v3059_v5, %v3060_v7 }
 0x356   : > { %2554 = vst [vmem:[#allocation3 + $0xe2] sm:$0xff] %v2522_v54  ;;  %4066 = vmatmul.bf16.gmra.mxu1 %v12720_v43  ;;  %4451 = vmatmul.bf16.gmra.mxu2 %v12738_v48  ;;  %v2735_v43 = vld [vmem:[#allocation3 + $0xb8] sm:$0xff]  ;;  %v12740_v54 = vld [vmem:[%s13832_s23 + $0x20] sm:$0xff] }
 0x357   : > { %4726 = vmatmul.bf16.gmra.mxu3 %v12758_v52  ;;  %v3443_v34 = vld [vmem:[#allocation3 + $0x82] sm:$0xff]  ;;  %v3444_v56 = vld [vmem:[#allocation3 + $0x8a] sm:$0x3f] }
 0x358   : > { %v3471_v30 = vadd.f32 %v3443_v34, %v14517_v36  ;;  %v3472_v11 = vadd.f32 %v3444_v56, %v14529_v55  ;;  %v3058_v36 = vsel %vm2181_vm0, %v3056_v28, %v3057_v60 }
 0x359   : > { %v2682_v51 = vpop.f32.mrf.mxu2 }
 0x35a   : > { %v14574_v3 = vpop.f32.mrf.mxu3  ;;  %3499 = vst [vmem:[#allocation3 + $0x82] sm:$0xff] %v3471_v30  ;;  %v2764_v0 = vadd.f32 %v2732_v59, %v2682_v51  ;;  %v14576_v42 = vpop.f32.mrf.mxu0  ;;  %v2736_v59 = vld [vmem:[#allocation3 + $0xc0] sm:$0xff] }
 0x35b   : > { %v2454_v50 = vpop.f32.mrf.mxu1  ;;  %3500 = vst [vmem:[#allocation3 + $0x8a] sm:$0x3f] %v3472_v11  ;;  %v2981_v62 = vld [vmem:[#allocation3 + $0x98] sm:$0x3f]  ;;  %v3062_v28 = vrot.slane %v14574_v3, 2 }
 0x35c   : > { %v2523_v55 = vadd.f32 %v2491_v44, %v2454_v50  ;;  %v3126_v61 = vadd.f32 %v3058_v36, %v2764_v0  ;;  %v3125_v45 = vadd.f32 %v3054_v32, %v2981_v62  ;;  %v12784_v62 = vld [vmem:[%s13848_s29 + $0x90] sm:$0xff] }
 0x35d   : > { %4967 = vmatpush.bf16.msra.mxu2 %v12784_v62 }
 0x35e   : > { %2555 = vst [vmem:[#allocation3 + $0xea] sm:$0x3f] %v2523_v55 }
 0x35f   : > { %3158 = vst [vmem:[#allocation3 + $0xa0] sm:$0xff] %v3126_v61 }
 0x360   : > { %3157 = vst [vmem:[#allocation3 + $0x98] sm:$0x3f] %v3125_v45  ;;  %v2737_v45 = vld [vmem:[#allocation3 + $0xc8] sm:$0xff] }
 0x361   : > { %v2684_v58 = vpop.f32.mrf.mxu2 }
 0x362   : > { %v14584_v8 = vpop.f32.mrf.mxu3  ;;  %v2765_v6 = vadd.f32 %v2733_v4, %v2684_v58  ;;  %v14588_v31 = vpop.f32.mrf.mxu0  ;;  %v12699_v58 = vld [vmem:[%s13832_s23 + $0x48] sm:$0xff]  ;;  %v12723_v4 = vld [vmem:[%s13832_s23 + $0x58] sm:$0xff] }
 0x363   : > { %v2457_v21 = vpop.f32.mrf.mxu1  ;;  %v3063_v34 = vrot.slane %v14584_v8, 2 }
 0x364   : > { %v2524_v32 = vadd.f32 %v2492_v22, %v2457_v21  ;;  %2797 = vst [vmem:[#allocation3 + $0xa8] sm:$0xff] %v2765_v6  ;;  %v12741_v6 = vld [vmem:[%s13832_s23 + $0x28] sm:$0xff]  ;;  %v12761_v21 = vld [vmem:[%s13832_s23 + $0x38] sm:$0xff] }
 0x365   : > { %3721 = vmatmul.bf16.gmra.mxu0 %v12697_v18  ;;  %v3064_v55 = vsel %vm2181_vm0, %v3062_v28, %v3063_v34 }
 0x366   : > { %2556 = vst [vmem:[#allocation3 + $0xf2] sm:$0xff] %v2524_v32  ;;  %4071 = vmatmul.bf16.gmra.mxu1 %v12721_v40  ;;  %4456 = vmatmul.bf16.gmra.mxu2 %v12739_v20 }
 0x367   : > { %4731 = vmatmul.bf16.gmra.mxu3 %v12759_v23  ;;  %v3445_v12 = vld [vmem:[#allocation3 + $0x92] sm:$0xff]  ;;  %v3446_v33 = vld [vmem:[#allocation3 + $0x9a] sm:$0x3f] }
 0x368   : > { %v3473_v27 = vadd.f32 %v3445_v12, %v14541_v14  ;;  %v3474_v13 = vadd.f32 %v3446_v33, %v14552_v38  ;;  %v2738_v12 = vld [vmem:[#allocation3 + $0xd0] sm:$0xff] }
 0x369   : > { %v2687_v25 = vpop.f32.mrf.mxu2 }
 0x36a   : > { %v14598_v1 = vpop.f32.mrf.mxu3  ;;  %v2766_v9 = vadd.f32 %v2734_v15, %v2687_v25  ;;  %v14600_v57 = vpop.f32.mrf.mxu0  ;;  %3501 = vst [vmem:[#allocation3 + $0x92] sm:$0xff] %v3473_v27 }
 0x36b   : > { %v2459_v29 = vpop.f32.mrf.mxu1  ;;  %3502 = vst [vmem:[#allocation3 + $0x9a] sm:$0x3f] %v3474_v13  ;;  %v2983_v38 = vld [vmem:[#allocation3 + $0xa8] sm:$0x3f]  ;;  %v3065_v17 = vrot.slane %v14598_v1, 2 }
 0x36c   : > { %v2525_v14 = vadd.f32 %v2493_v19, %v2459_v29  ;;  %v3128_v26 = vadd.f32 %v3061_v10, %v2766_v9  ;;  %v3127_v24 = vadd.f32 %v3057_v60, %v2983_v38  ;;  %v12790_v9 = vld [vmem:[%s13848_s29 + $0xc0] sm:$0xff]  ;;  %v12807_v29 = vld [vmem:[%s13848_s29 + $0x148] sm:$0xff]  ;;  %v12800_v19 = vld [vmem:[%s13848_s29 + $0x110] sm:$0xff] }
 0x36d   : > { %5224 = vmatpush.bf16.msrb.mxu3 %v12790_v9  ;;  %5723 = vmatpush.bf16.msrb.mxu1 %v12807_v29 }
 0x36e   : > { %2557 = vst [vmem:[#allocation3 + $0xfa] sm:$0x3f] %v2525_v14  ;;  %v2739_v14 = vld [vmem:[#allocation3 + $0xd8] sm:$0xff]  ;;  %5472 = vmatpush.bf16.msrb.mxu0 %v12800_v19  ;;  %v12806_v19 = vld [vmem:[%s13848_s29 + $0x140] sm:$0xff] }
 0x36f   : > { %3160 = vst [vmem:[#allocation3 + $0xb0] sm:$0xff] %v3128_v26  ;;  %v12700_v26 = vld [vmem:[%s13832_s23 + $0x50] sm:$0xff] }
 0x370   : > { %3159 = vst [vmem:[#allocation3 + $0xa8] sm:$0x3f] %v3127_v24  ;;  %v12724_v24 = vld [vmem:[%s13832_s23 + $0x60] sm:$0xff] }
 0x371   : > { %v2689_v35 = vpop.f32.mrf.mxu2  ;;  %5724 = vmatpush.bf16.msrb.mxu1 %v12806_v19 }
 0x372   : > { %v14607_v46 = vpop.f32.mrf.mxu3  ;;  %v2767_v48 = vadd.f32 %v2735_v43, %v2689_v35  ;;  %v14611_v52 = vpop.f32.mrf.mxu0  ;;  %v3767_v43 = vld [vmem:[#allocation3] sm:$0xff] }
 0x373   : > { %v14613_v63 = vpop.f32.mrf.mxu1  ;;  %v3066_v22 = vrot.slane %v14607_v46, 2 }
 0x374   : > { %2799 = vst [vmem:[#allocation3 + $0xb8] sm:$0xff] %v2767_v48  ;;  %v4163_v41 = vrot.slane %v14613_v63, 2  ;;  %v12762_v48 = vld [vmem:[%s13832_s23 + $0x40] sm:$0xff] }
 0x375   : > { %3726 = vmatmul.bf16.gmra.mxu0 %v12698_v39 }
 0x376   : > { %4076 = vmatmul.bf16.gmra.mxu1 %v12722_v2  ;;  %4461 = vmatmul.bf16.gmra.mxu2 %v12740_v54  ;;  %v12742_v2 = vld [vmem:[%s13832_s23 + $0x30] sm:$0xff] }
 0x377   : > { %4736 = vmatmul.bf16.gmra.mxu3 %v12760_v53  ;;  %v3447_v56 = vld [vmem:[#allocation3 + $0xa2] sm:$0xff]  ;;  %v3448_v60 = vld [vmem:[#allocation3 + $0xaa] sm:$0x3f] }
 0x378   : > { %v3475_v30 = vadd.f32 %v3447_v56, %v14565_v47  ;;  %v3476_v11 = vadd.f32 %v3448_v60, %v14576_v42 }
 0x379   : > { %v2692_v51 = vpop.f32.mrf.mxu2 }
 0x37a   : > { %v14621_v0 = vpop.f32.mrf.mxu3  ;;  %v2768_v50 = vadd.f32 %v2736_v59, %v2692_v51  ;;  %v14623_v44 = vpop.f32.mrf.mxu0  ;;  %3503 = vst [vmem:[#allocation3 + $0xa2] sm:$0xff] %v3475_v30  ;;  %v12783_v30 = vld [vmem:[%s13848_s29 + $0x88] sm:$0xff] }
 0x37b   : > { %v14625_v36 = vpop.f32.mrf.mxu1  ;;  %3504 = vst [vmem:[#allocation3 + $0xaa] sm:$0x3f] %v3476_v11  ;;  %v2985_v47 = vld [vmem:[#allocation3 + $0xb8] sm:$0x3f]  ;;  %v3068_v51 = vrot.slane %v14621_v0, 2  ;;  %4968 = vmatpush.bf16.msra.mxu2 %v12783_v30 }
 0x37c   : > { %v3130_v42 = vadd.f32 %v3064_v55, %v2768_v50  ;;  %v3129_v3 = vadd.f32 %v3060_v7, %v2985_v47  ;;  %v2740_v50 = vld [vmem:[#allocation3 + $0xe0] sm:$0xff] }
 0x37e   : > { %3162 = vst [vmem:[#allocation3 + $0xc0] sm:$0xff] %v3130_v42 }
 0x37f   : > { %3161 = vst [vmem:[#allocation3 + $0xb8] sm:$0x3f] %v3129_v3  ;;  %v3768_v3 = vld [vmem:[#allocation3 + $0x8] sm:$0xff] }
 0x381   : > { %v2694_v61 = vpop.f32.mrf.mxu2 }
 0x382   : > { %v14629_v49 = vpop.f32.mrf.mxu3  ;;  %v2769_v8 = vadd.f32 %v2737_v45, %v2694_v61  ;;  %v14633_v18 = vpop.f32.mrf.mxu0 }
 0x383   : > { %v14635_v40 = vpop.f32.mrf.mxu1  ;;  %v3069_v60 = vrot.slane %v14629_v49, 2 }
 0x384   : > { %2801 = vst [vmem:[#allocation3 + $0xc8] sm:$0xff] %v2769_v8 }
 0x385   : > { %3731 = vmatmul.bf16.gmra.mxu0 %v12699_v58  ;;  %v12849_v58 = vld [vmem:[%s13848_s29 + $0x1f8] sm:$0xff] }
 0x386   : > { %4081 = vmatmul.bf16.gmra.mxu1 %v12723_v4  ;;  %4466 = vmatmul.bf16.gmra.mxu2 %v12741_v6  ;;  %v3449_v20 = vld [vmem:[#allocation3 + $0xb2] sm:$0xff]  ;;  %v3450_v23 = vld [vmem:[#allocation3 + $0xba] sm:$0x3f]  ;;  %v2741_v6 = vld [vmem:[#allocation3 + $0xe8] sm:$0xff] }
 0x387   : > { %4741 = vmatmul.bf16.gmra.mxu3 %v12761_v21  ;;  %v3477_v32 = vadd.f32 %v3449_v20, %v14588_v31  ;;  %v3478_v16 = vadd.f32 %v3450_v23, %v14600_v57  ;;  %v3067_v31 = vsel %vm2181_vm0, %v3065_v17, %v3066_v22  ;;  %v4164_v57 = vrot.slane %v14625_v36, 2  ;;  %v12701_v20 = vld [vmem:[%s13832_s23 + $0x58] sm:$0xff]  ;;  %v12725_v23 = vld [vmem:[%s13832_s23 + $0x68] sm:$0xff] }
 0x388   : > { %6424 = vmatpush.bf16.msra.mxu3 %v12849_v58 }
 0x389   : > { %v2697_v7 = vpop.f32.mrf.mxu2  ;;  %3505 = vst [vmem:[#allocation3 + $0xb2] sm:$0xff] %v3477_v32  ;;  %v4165_v53 = vsel %vm2181_vm0, %v4163_v41, %v4164_v57  ;;  %v4166_v32 = vrot.slane %v14635_v40, 2 }
 0x38a   : > { %v14643_v33 = vpop.f32.mrf.mxu3  ;;  %v2770_v27 = vadd.f32 %v2738_v12, %v2697_v7  ;;  %v14645_v13 = vpop.f32.mrf.mxu0  ;;  %3506 = vst [vmem:[#allocation3 + $0xba] sm:$0x3f] %v3478_v16  ;;  %v12743_v7 = vld [vmem:[%s13832_s23 + $0x38] sm:$0xff]  ;;  %v12763_v12 = vld [vmem:[%s13832_s23 + $0x48] sm:$0xff] }
 0x38b   : > { %v14647_v5 = vpop.f32.mrf.mxu1  ;;  %v2987_v25 = vld [vmem:[#allocation3 + $0xc8] sm:$0x3f] }
 0x38c   : > { %v3132_v15 = vadd.f32 %v3067_v31, %v2770_v27  ;;  %v3131_v1 = vadd.f32 %v3063_v34, %v2987_v25  ;;  %v4167_v4 = vrot.slane %v14647_v5, 2  ;;  %v3772_v5 = vld [vmem:[#allocation3 + $0x28] sm:$0xff] }
 0x38e   : > { %3164 = vst [vmem:[#allocation3 + $0xd0] sm:$0xff] %v3132_v15  ;;  %v4168_v31 = vsel %vm2181_vm0, %v4166_v32, %v4167_v4  ;;  %v12831_v32 = vld [vmem:[%s13848_s29 + $0x1b8] sm:$0xff] }
 0x38f   : > { %3163 = vst [vmem:[#allocation3 + $0xc8] sm:$0x3f] %v3131_v1 }
 0x391   : > { %v2699_v10 = vpop.f32.mrf.mxu2 }
 0x392   : > { %v14656_v38 = vpop.f32.mrf.mxu3  ;;  %v2771_v37 = vadd.f32 %v2739_v14, %v2699_v10  ;;  %v3697_v35 = vpop.f32.mrf.mxu0 }
 0x393   : > { %v14661_v39 = vpop.f32.mrf.mxu1  ;;  %v3795_v54 = vadd.f32 %v3767_v43, %v3697_v35  ;;  %v3072_v29 = vrot.slane %v14656_v38, 2  ;;  %v3770_v35 = vld [vmem:[#allocation3 + $0x18] sm:$0xff] }
 0x394   : > { %2803 = vst [vmem:[#allocation3 + $0xd8] sm:$0xff] %v2771_v37  ;;  %v4169_v49 = vrot.slane %v14661_v39, 2  ;;  %v4493_v39 = vld [vmem:[#allocation4 + $0x66] sm:$0xff] }
 0x395   : > { %v4233_v34 = vadd.f32 %v4165_v53, %v3795_v54  ;;  %3736 = vmatmul.bf16.gmra.mxu0 %v12700_v26  ;;  %v3071_v26 = vrot.slane %v14643_v33, 2  ;;  %v12782_v54 = vld [vmem:[%s13848_s29 + $0x80] sm:$0xff]  ;;  %v12799_v53 = vld [vmem:[%s13848_s29 + $0x108] sm:$0xff] }
 0x396   : > { %4086 = vmatmul.bf16.gmra.mxu1 %v12724_v24  ;;  %4471 = vmatmul.bf16.gmra.mxu2 %v12742_v2  ;;  %v3451_v63 = vld [vmem:[#allocation3 + $0xc2] sm:$0xff]  ;;  %v3452_v56 = vld [vmem:[#allocation3 + $0xca] sm:$0x3f] }
 0x397   : > { %4746 = vmatmul.bf16.gmra.mxu3 %v12762_v48  ;;  %4261 = vst [vmem:[#allocation3] sm:$0xff] %v4233_v34  ;;  %v3479_v11 = vadd.f32 %v3451_v63, %v14611_v52  ;;  %v3480_v28 = vadd.f32 %v3452_v56, %v14623_v44  ;;  %v3070_v52 = vsel %vm2181_vm0, %v3068_v51, %v3069_v60  ;;  %v2743_v56 = vld [vmem:[#allocation3 + $0xf8] sm:$0xff] }
 0x398   : > { %4969 = vmatpush.bf16.msra.mxu2 %v12782_v54  ;;  %5473 = vmatpush.bf16.msrb.mxu0 %v12799_v53 }
 0x399   : > { %v2702_v59 = vpop.f32.mrf.mxu2  ;;  %3507 = vst [vmem:[#allocation3 + $0xc2] sm:$0xff] %v3479_v11  ;;  %v12702_v11 = vld [vmem:[%s13832_s23 + $0x60] sm:$0xff] }
 0x39a   : > { %v14673_v55 = vpop.f32.mrf.mxu3  ;;  %v2772_v47 = vadd.f32 %v2740_v50, %v2702_v59  ;;  %v3699_v42 = vpop.f32.mrf.mxu0  ;;  %3508 = vst [vmem:[#allocation3 + $0xca] sm:$0x3f] %v3480_v28  ;;  %v12726_v28 = vld [vmem:[%s13832_s23 + $0x70] sm:$0xff]  ;;  %v3771_v59 = vld [vmem:[#allocation3 + $0x20] sm:$0xff] }
 0x39b   : > { %v14675_v62 = vpop.f32.mrf.mxu1  ;;  %v3796_v0 = vadd.f32 %v3768_v3, %v3699_v42  ;;  %v2989_v44 = vld [vmem:[#allocation3 + $0xd8] sm:$0x3f] }
 0x39c   : > { %v3134_v61 = vadd.f32 %v3070_v52, %v2772_v47  ;;  %v3133_v45 = vadd.f32 %v3066_v22, %v2989_v44  ;;  %v3769_v22 = vld [vmem:[#allocation3 + $0x10] sm:$0xff]  ;;  %v4170_v34 = vrot.slane %v14675_v62, 2  ;;  %v12744_v47 = vld [vmem:[%s13832_s23 + $0x40] sm:$0xff]  ;;  %6160 = vmatpush.bf16.msrb.mxu2 %v12831_v32 }
 0x39d   : > { %3824 = vst [vmem:[#allocation3 + $0x8] sm:$0xff] %v3796_v0  ;;  %v14727_v44 = vld [vmem:[%s13832_s23] sm:$0xff] }
 0x39e   : > { %3166 = vst [vmem:[#allocation3 + $0xe0] sm:$0xff] %v3134_v61  ;;  %v4171_v3 = vsel %vm2181_vm0, %v4169_v49, %v4170_v34  ;;  %v12704_v49 = vld [vmem:[%s13832_s23 + $0x70] sm:$0xff] }
 0x39f   : > { %3165 = vst [vmem:[#allocation3 + $0xd8] sm:$0x3f] %v3133_v45 }
 0x3a1   : > { %v2704_v8 = vpop.f32.mrf.mxu2 }
 0x3a2   : > { %v14684_v21 = vpop.f32.mrf.mxu3  ;;  %v2773_v16 = vadd.f32 %v2741_v6, %v2704_v8  ;;  %v3702_v46 = vpop.f32.mrf.mxu0 }
 0x3a3   : > { %v14689_v17 = vpop.f32.mrf.mxu1  ;;  %v3797_v27 = vadd.f32 %v3769_v22, %v3702_v46  ;;  %v4494_v46 = vld [vmem:[#allocation4 + $0x6e] sm:$0x3] }
 0x3a4   : > { %v4108_v25 = vld [vmem:[#allocation3 + $0x8] sm:$0x3f]  ;;  %2805 = vst [vmem:[#allocation3 + $0xe8] sm:$0xff] %v2773_v16  ;;  %v12848_v16 = vld [vmem:[%s13848_s29 + $0x1f0] sm:$0xff] }
 0x3a5   : > { %v4234_v15 = vadd.f32 %v4164_v57, %v4108_v25  ;;  %v4235_v1 = vadd.f32 %v4168_v31, %v3797_v27  ;;  %3741 = vmatmul.bf16.gmra.mxu0 %v12701_v20  ;;  %v2742_v57 = vld [vmem:[#allocation3 + $0xf0] sm:$0xff]  ;;  %6425 = vmatpush.bf16.msra.mxu3 %v12848_v16  ;;  %v12703_v27 = vld [vmem:[%s13832_s23 + $0x68] sm:$0xff]  ;;  %v12727_v31 = vld [vmem:[%s13832_s23 + $0x78] sm:$0xff]  ;;  %v4172_v25 = vrot.slane %v14689_v17, 2 }
 0x3a6   : > { %4091 = vmatmul.bf16.gmra.mxu1 %v12725_v23  ;;  %4476 = vmatmul.bf16.gmra.mxu2 %v12743_v7  ;;  %v3453_v40 = vld [vmem:[#allocation3 + $0xd2] sm:$0xff]  ;;  %v3454_v9 = vld [vmem:[#allocation3 + $0xda] sm:$0x3f] }
 0x3a7   : > { %4751 = vmatmul.bf16.gmra.mxu3 %v12763_v12  ;;  %4262 = vst [vmem:[#allocation3 + $0x8] sm:$0x3f] %v4234_v15  ;;  %v3481_v10 = vadd.f32 %v3453_v40, %v14633_v18  ;;  %v3482_v14 = vadd.f32 %v3454_v9, %v14645_v13  ;;  %v3073_v18 = vsel %vm2181_vm0, %v3071_v26, %v3072_v29  ;;  %v12745_v9 = vld [vmem:[%s13832_s23 + $0x48] sm:$0xff] }
 0x3a8   : > { %4263 = vst [vmem:[#allocation3 + $0x10] sm:$0xff] %v4235_v1  ;;  %v3773_v1 = vld [vmem:[#allocation3 + $0x30] sm:$0xff] }
 0x3a9   : > { %v2707_v36 = vpop.f32.mrf.mxu2  ;;  %3509 = vst [vmem:[#allocation3 + $0xd2] sm:$0xff] %v3481_v10 }
 0x3aa   : > { %v14703_v24 = vpop.f32.mrf.mxu3  ;;  %v2774_v41 = vadd.f32 %v2742_v57, %v2707_v36  ;;  %v3704_v37 = vpop.f32.mrf.mxu0  ;;  %3510 = vst [vmem:[#allocation3 + $0xda] sm:$0x3f] %v3482_v14  ;;  %v14752_v57 = vld [vmem:[%s13832_s23 + $0x8] sm:$0xff] }
 0x3ab   : > { %v14705_v43 = vpop.f32.mrf.mxu1  ;;  %v2991_v33 = vld [vmem:[#allocation3 + $0xe8] sm:$0x3f]  ;;  %v3798_v13 = vadd.f32 %v3770_v35, %v3704_v37  ;;  %v12879_v37 = vld [vmem:[%s13854_s18 + $0x38] sm:$0xff]  ;;  %v12798_v35 = vld [vmem:[%s13848_s29 + $0x100] sm:$0xff] }
 0x3ac   : > { %v3135_v2 = vadd.f32 %v3069_v60, %v2991_v33  ;;  %v3136_v48 = vadd.f32 %v3073_v18, %v2774_v41  ;;  %v4173_v22 = vrot.slane %v14705_v43, 2  ;;  %v4495_v41 = vld [vmem:[#allocation4 + $0x76] sm:$0xff]  ;;  %6973 = vmatpush.bf16.msra.mxu1 %v12879_v37  ;;  %5474 = vmatpush.bf16.msrb.mxu0 %v12798_v35 }
 0x3ad   : > { %3826 = vst [vmem:[#allocation3 + $0x18] sm:$0xff] %v3798_v13  ;;  %v14798_v37 = vld [vmem:[%s13832_s23 + $0x18] sm:$0xff] }
 0x3ae   : > { %3167 = vst [vmem:[#allocation3 + $0xe8] sm:$0x3f] %v3135_v2  ;;  %v4174_v10 = vsel %vm2181_vm0, %v4172_v25, %v4173_v22  ;;  %v3774_v2 = vld [vmem:[#allocation3 + $0x38] sm:$0xff] }
 0x3af   : > { %3168 = vst [vmem:[#allocation3 + $0xf0] sm:$0xff] %v3136_v48  ;;  %v4499_v35 = vld [vmem:[#allocation4 + $0x96] sm:$0xff] }
 0x3b1   : > { %v2709_v63 = vpop.f32.mrf.mxu2 }
 0x3b2   : > { %v14715_v30 = vpop.f32.mrf.mxu3  ;;  %v2775_v60 = vadd.f32 %v2743_v56, %v2709_v63  ;;  %v3707_v51 = vpop.f32.mrf.mxu0  ;;  %v4496_v63 = vld [vmem:[#allocation4 + $0x7e] sm:$0x3] }
 0x3b3   : > { %v14720_v50 = vpop.f32.mrf.mxu1  ;;  %v3799_v42 = vadd.f32 %v3771_v59, %v3707_v51 }
 0x3b4   : > { %v4110_v62 = vld [vmem:[#allocation3 + $0x18] sm:$0x3f]  ;;  %2807 = vst [vmem:[#allocation3 + $0xf8] sm:$0xff] %v2775_v60  ;;  %v4175_v60 = vrot.slane %v14720_v50, 2 }
 0x3b5   : > { %v4236_v52 = vadd.f32 %v4167_v4, %v4110_v62  ;;  %v4237_v0 = vadd.f32 %v4171_v3, %v3799_v42  ;;  %3746 = vmatmul.bf16.gmra.mxu0 %v12702_v11 }
 0x3b6   : > { %4096 = vmatmul.bf16.gmra.mxu1 %v12726_v28  ;;  %4481 = vmatmul.bf16.gmra.mxu2 %v12744_v47  ;;  %v3775_v47 = vld [vmem:[#allocation3 + $0x40] sm:$0xff] }
 0x3b7   : > { %5225 = vmatmul.bf16.vlgmr.msrb.gmra.mxu3 %v14727_v44  ;;  %4264 = vst [vmem:[#allocation3 + $0x18] sm:$0x3f] %v4236_v52 }
 0x3b8   : > { %4265 = vst [vmem:[#allocation3 + $0x20] sm:$0xff] %v4237_v0 }
 0x3b9   : > { %v4442_v61 = vpop.f32.mrf.mxu2 }
 0x3ba   : > { %v14730_v45 = vpop.f32.mrf.mxu3  ;;  %v4513_v58 = vadd.f32 %v4493_v39, %v4442_v61  ;;  %v3709_v8 = vpop.f32.mrf.mxu0 }
 0x3bb   : > { %v14732_v4 = vpop.f32.mrf.mxu1  ;;  %v2993_v6 = vld [vmem:[#allocation3 + $0xf8] sm:$0x3f]  ;;  %v3800_v20 = vadd.f32 %v3772_v5, %v3709_v8  ;;  %v12830_v8 = vld [vmem:[%s13848_s29 + $0x1b0] sm:$0xff]  ;;  %v4497_v5 = vld [vmem:[#allocation4 + $0x86] sm:$0xff] }
 0x3bc   : > { %v3137_v23 = vadd.f32 %v3072_v29, %v2993_v6  ;;  %4533 = vst [vmem:[#allocation4 + $0x66] sm:$0xff] %v4513_v58  ;;  %v4176_v56 = vrot.slane %v14732_v4, 2  ;;  %v14776_v58 = vld [vmem:[%s13832_s23 + $0x10] sm:$0xff]  ;;  %6161 = vmatpush.bf16.msrb.mxu2 %v12830_v8 }
 0x3bd   : > { %3828 = vst [vmem:[#allocation3 + $0x28] sm:$0xff] %v3800_v20  ;;  %v3776_v20 = vld [vmem:[#allocation3 + $0x48] sm:$0xff] }
 0x3be   : > { %3169 = vst [vmem:[#allocation3 + $0xf8] sm:$0x3f] %v3137_v23  ;;  %v4177_v52 = vsel %vm2181_vm0, %v4175_v60, %v4176_v56 }
 0x3c1   : > { %v4444_v7 = vpop.f32.mrf.mxu2 }
 0x3c2   : > { %v14739_v12 = vpop.f32.mrf.mxu3  ;;  %v4514_v38 = vadd.f32 %v4494_v46, %v4444_v7  ;;  %v3712_v15 = vpop.f32.mrf.mxu0  ;;  %v4498_v7 = vld [vmem:[#allocation4 + $0x8e] sm:$0x3] }
 0x3c3   : > { %v14744_v40 = vpop.f32.mrf.mxu1  ;;  %v4757_v29 = vld [vmem:[#allocation4 + $0x60] sm:$0xff]  ;;  %v3801_v19 = vadd.f32 %v3773_v1, %v3712_v15 }
 0x3c4   : > { %v4777_v14 = vadd.f32 %v4757_v29, %v14673_v55  ;;  %v4112_v26 = vld [vmem:[#allocation3 + $0x28] sm:$0x3f]  ;;  %4534 = vst [vmem:[#allocation4 + $0x6e] sm:$0x3] %v4514_v38  ;;  %v12705_v38 = vld [vmem:[%s13832_s23 + $0x78] sm:$0xff]  ;;  %v4178_v15 = vrot.slane %v14744_v40, 2 }
 0x3c5   : > { %v4238_v17 = vadd.f32 %v4170_v34, %v4112_v26  ;;  %v4239_v36 = vadd.f32 %v4174_v10, %v3801_v19  ;;  %3751 = vmatmul.bf16.gmra.mxu0 %v12703_v27  ;;  %v3777_v29 = vld [vmem:[#allocation3 + $0x50] sm:$0xff]  ;;  %v12773_v19 = vld [vmem:[%s13832_s23 + $0x8] sm:$0xff] }
 0x3c6   : > { %4101 = vmatmul.bf16.gmra.mxu1 %v12727_v31  ;;  %4797 = vst [vmem:[#allocation4 + $0x60] sm:$0xff] %v4777_v14  ;;  %4486 = vmatmul.bf16.gmra.mxu2 %v12745_v9 }
 0x3c7   : > { %5230 = vmatmul.bf16.gmra.mxu3 %v14752_v57  ;;  %4266 = vst [vmem:[#allocation3 + $0x28] sm:$0x3f] %v4238_v17 }
 0x3c8   : > { %4267 = vst [vmem:[#allocation3 + $0x30] sm:$0xff] %v4239_v36 }
 0x3c9   : > { %v4447_v18 = vpop.f32.mrf.mxu2 }
 0x3ca   : > { %v14757_v33 = vpop.f32.mrf.mxu3  ;;  %v4515_v55 = vadd.f32 %v4495_v41, %v4447_v18  ;;  %v3714_v13 = vpop.f32.mrf.mxu0  ;;  %v12867_v18 = vld [vmem:[%s13848_s29 + $0x238] sm:$0xff] }
 0x3cb   : > { %v14759_v48 = vpop.f32.mrf.mxu1  ;;  %v4758_v54 = vld [vmem:[#allocation4 + $0x68] sm:$0xff]  ;;  %v3802_v53 = vadd.f32 %v3774_v2, %v3714_v13  ;;  %6688 = vmatpush.bf16.msra.mxu0 %v12867_v18 }
 0x3cc   : > { %v4778_v34 = vadd.f32 %v4758_v54, %v14684_v21  ;;  %4535 = vst [vmem:[#allocation4 + $0x76] sm:$0xff] %v4515_v55  ;;  %v12772_v21 = vld [vmem:[%s13832_s23] sm:$0xff]  ;;  %v4179_v27 = vrot.slane %v14759_v48, 2  ;;  %v12878_v55 = vld [vmem:[%s13854_s18 + $0x30] sm:$0xff]  ;;  %v12829_v13 = vld [vmem:[%s13848_s29 + $0x1a8] sm:$0xff] }
 0x3cd   : > { %3830 = vst [vmem:[#allocation3 + $0x38] sm:$0xff] %v3802_v53  ;;  %6974 = vmatpush.bf16.msra.mxu1 %v12878_v55  ;;  %v3778_v53 = vld [vmem:[#allocation3 + $0x58] sm:$0xff]  ;;  %6162 = vmatpush.bf16.msrb.mxu2 %v12829_v13  ;;  %v12866_v13 = vld [vmem:[%s13848_s29 + $0x230] sm:$0xff] }
 0x3ce   : > { %4798 = vst [vmem:[#allocation4 + $0x68] sm:$0xff] %v4778_v34  ;;  %v4180_v26 = vsel %vm2181_vm0, %v4178_v15, %v4179_v27  ;;  %v4503_v55 = vld [vmem:[#allocation4 + $0xb6] sm:$0xff] }
 0x3cf   : > { %6689 = vmatpush.bf16.msra.mxu0 %v12866_v13  ;;  %v12826_v13 = vld [vmem:[%s13848_s29 + $0x190] sm:$0xff] }
 0x3d1   : > { %v4449_v11 = vpop.f32.mrf.mxu2 }
 0x3d2   : > { %v14763_v28 = vpop.f32.mrf.mxu3  ;;  %v4516_v51 = vadd.f32 %v4496_v63, %v4449_v11  ;;  %v3717_v59 = vpop.f32.mrf.mxu0 }
 0x3d3   : > { %v14767_v42 = vpop.f32.mrf.mxu1  ;;  %v4759_v3 = vld [vmem:[#allocation4 + $0x70] sm:$0xff]  ;;  %v3803_v62 = vadd.f32 %v3775_v47, %v3717_v59 }
 0x3d4   : > { %v4779_v0 = vadd.f32 %v4759_v3, %v14703_v24  ;;  %v4114_v39 = vld [vmem:[#allocation3 + $0x38] sm:$0x3f]  ;;  %4536 = vst [vmem:[#allocation4 + $0x7e] sm:$0x3] %v4516_v51  ;;  %v4181_v47 = vrot.slane %v14767_v42, 2  ;;  %v14821_v42 = vld [vmem:[%s13832_s23 + $0x20] sm:$0xff] }
 0x3d5   : > { %v4240_v61 = vadd.f32 %v4173_v22, %v4114_v39  ;;  %v4241_v50 = vadd.f32 %v4177_v52, %v3803_v62  ;;  %3756 = vmatmul.bf16.gmra.mxu0 %v12704_v49  ;;  %v12847_v22 = vld [vmem:[%s13848_s29 + $0x1e8] sm:$0xff]  ;;  %v4500_v49 = vld [vmem:[#allocation4 + $0x9e] sm:$0x3]  ;;  %v3779_v62 = vld [vmem:[#allocation3 + $0x60] sm:$0xff] }
 0x3d6   : > { %5725 = vmatmul.bf16.vlgmr.msrb.gmra.mxu1 %v14727_v44  ;;  %4799 = vst [vmem:[#allocation4 + $0x70] sm:$0xff] %v4779_v0  ;;  %4970 = vmatmul.bf16.vlgmr.msra.gmra.mxu2 %v12772_v21  ;;  %v12774_v0 = vld [vmem:[%s13832_s23 + $0x10] sm:$0xff] }
 0x3d7   : > { %5235 = vmatmul.bf16.gmra.mxu3 %v14776_v58  ;;  %4268 = vst [vmem:[#allocation3 + $0x38] sm:$0x3f] %v4240_v61 }
 0x3d8   : > { %4269 = vst [vmem:[#allocation3 + $0x40] sm:$0xff] %v4241_v50  ;;  %6426 = vmatpush.bf16.msra.mxu3 %v12847_v22 }
 0x3d9   : > { %v4452_v24 = vpop.f32.mrf.mxu2 }
 0x3da   : > { %v14780_v4 = vpop.f32.mrf.mxu3  ;;  %v4517_v43 = vadd.f32 %v4497_v5, %v4452_v24  ;;  %v3719_v6 = vpop.f32.mrf.mxu0 }
 0x3db   : > { %v14782_v23 = vpop.f32.mrf.mxu1  ;;  %v4760_v32 = vld [vmem:[#allocation4 + $0x78] sm:$0xff]  ;;  %v3804_v16 = vadd.f32 %v3776_v20, %v3719_v6 }
 0x3dc   : > { %v4780_v46 = vadd.f32 %v4760_v32, %v14715_v30  ;;  %4537 = vst [vmem:[#allocation4 + $0x86] sm:$0xff] %v4517_v43  ;;  %v4182_v60 = vrot.slane %v14782_v23, 2  ;;  %v4501_v43 = vld [vmem:[#allocation4 + $0xa6] sm:$0xff] }
 0x3dd   : > { %3832 = vst [vmem:[#allocation3 + $0x48] sm:$0xff] %v3804_v16  ;;  %v3780_v32 = vld [vmem:[#allocation3 + $0x68] sm:$0xff] }
 0x3de   : > { %4800 = vst [vmem:[#allocation4 + $0x78] sm:$0xff] %v4780_v46  ;;  %v4183_v61 = vsel %vm2181_vm0, %v4181_v47, %v4182_v60 }
 0x3e1   : > { %v4454_v31 = vpop.f32.mrf.mxu2 }
 0x3e2   : > { %v14787_v25 = vpop.f32.mrf.mxu3  ;;  %v4518_v1 = vadd.f32 %v4498_v7, %v4454_v31  ;;  %v3722_v9 = vpop.f32.mrf.mxu0  ;;  %v12828_v7 = vld [vmem:[%s13848_s29 + $0x1a0] sm:$0xff]  ;;  %v4502_v31 = vld [vmem:[#allocation4 + $0xae] sm:$0x3] }
 0x3e3   : > { %v14791_v30 = vpop.f32.mrf.mxu1  ;;  %v4761_v10 = vld [vmem:[#allocation4 + $0x80] sm:$0xff]  ;;  %v3805_v14 = vadd.f32 %v3777_v29, %v3722_v9  ;;  %6163 = vmatpush.bf16.msrb.mxu2 %v12828_v7 }
 0x3e4   : > { %v4781_v17 = vadd.f32 %v4761_v10, %v14730_v45  ;;  %v4116_v36 = vld [vmem:[#allocation3 + $0x48] sm:$0x3f]  ;;  %4538 = vst [vmem:[#allocation4 + $0x8e] sm:$0x3] %v4518_v1  ;;  %v4184_v9 = vrot.slane %v14791_v30, 2 }
 0x3e5   : > { %v4242_v41 = vadd.f32 %v4176_v56, %v4116_v36  ;;  %v4243_v40 = vadd.f32 %v4180_v26, %v3805_v14  ;;  %3761 = vmatmul.bf16.gmra.mxu0 %v12705_v38  ;;  %v12775_v14 = vld [vmem:[%s13832_s23 + $0x18] sm:$0xff]  ;;  %v14843_v30 = vld [vmem:[%s13832_s23 + $0x28] sm:$0xff] }
 0x3e6   : > { %5730 = vmatmul.bf16.gmra.mxu1 %v14752_v57  ;;  %4801 = vst [vmem:[#allocation4 + $0x80] sm:$0xff] %v4781_v17  ;;  %4975 = vmatmul.bf16.gmra.mxu2 %v12773_v19 }
 0x3e7   : > { %5240 = vmatmul.bf16.gmra.mxu3 %v14798_v37  ;;  %4270 = vst [vmem:[#allocation3 + $0x48] sm:$0x3f] %v4242_v41 }
 0x3e8   : > { %4271 = vst [vmem:[#allocation3 + $0x50] sm:$0xff] %v4243_v40 }
 0x3e9   : > { %v4457_v45 = vpop.f32.mrf.mxu2 }
 0x3ea   : > { %v14804_v2 = vpop.f32.mrf.mxu3  ;;  %v4519_v48 = vadd.f32 %v4499_v35, %v4457_v45  ;;  %v3724_v54 = vpop.f32.mrf.mxu0  ;;  %v12877_v45 = vld [vmem:[%s13854_s18 + $0x28] sm:$0xff] }
 0x3eb   : > { %v14806_v34 = vpop.f32.mrf.mxu1  ;;  %v4762_v63 = vld [vmem:[#allocation4 + $0x88] sm:$0xff]  ;;  %v3806_v56 = vadd.f32 %v3778_v53, %v3724_v54  ;;  %6975 = vmatpush.bf16.msra.mxu1 %v12877_v45  ;;  %v3782_v53 = vld [vmem:[#allocation3 + $0x78] sm:$0xff] }
 0x3ec   : > { %v4782_v11 = vadd.f32 %v4762_v63, %v14739_v12  ;;  %4539 = vst [vmem:[#allocation4 + $0x96] sm:$0xff] %v4519_v48  ;;  %v4185_v38 = vrot.slane %v14806_v34, 2  ;;  %v4507_v45 = vld [vmem:[#allocation4 + $0xd6] sm:$0xff] }
 0x3ed   : > { %3834 = vst [vmem:[#allocation3 + $0x58] sm:$0xff] %v3806_v56 }
 0x3ee   : > { %4802 = vst [vmem:[#allocation4 + $0x88] sm:$0xff] %v4782_v11  ;;  %v4186_v36 = vsel %vm2181_vm0, %v4184_v9, %v4185_v38 }
 0x3f1   : > { %v4459_v51 = vpop.f32.mrf.mxu2 }
 0x3f2   : > { %v14810_v59 = vpop.f32.mrf.mxu3  ;;  %v4520_v21 = vadd.f32 %v4500_v49, %v4459_v51  ;;  %v3727_v3 = vpop.f32.mrf.mxu0  ;;  %v12827_v49 = vld [vmem:[%s13848_s29 + $0x198] sm:$0xff] }
 0x3f3   : > { %v14813_v52 = vpop.f32.mrf.mxu1  ;;  %v4763_v39 = vld [vmem:[#allocation4 + $0x90] sm:$0xff]  ;;  %v3807_v12 = vadd.f32 %v3779_v62, %v3727_v3  ;;  %6164 = vmatpush.bf16.msrb.mxu2 %v12827_v49 }
 0x3f4   : > { %v4783_v50 = vadd.f32 %v4763_v39, %v14757_v33  ;;  %v4118_v8 = vld [vmem:[#allocation3 + $0x58] sm:$0x3f]  ;;  %4540 = vst [vmem:[#allocation4 + $0x9e] sm:$0x3] %v4520_v21  ;;  %v4187_v3 = vrot.slane %v14813_v52, 2  ;;  %v3783_v39 = vld [vmem:[#allocation3 + $0x80] sm:$0xff] }
 0x3f5   : > { %v4244_v5 = vadd.f32 %v4179_v27, %v4118_v8  ;;  %v4245_v24 = vadd.f32 %v4183_v61, %v3807_v12  ;;  %5475 = vmatmul.bf16.vlgmr.msrb.gmra.mxu0 %v14727_v44  ;;  %v12846_v27 = vld [vmem:[%s13848_s29 + $0x1e0] sm:$0xff]  ;;  %v14866_v52 = vld [vmem:[%s13832_s23 + $0x30] sm:$0xff] }
 0x3f6   : > { %5735 = vmatmul.bf16.gmra.mxu1 %v14776_v58  ;;  %4803 = vst [vmem:[#allocation4 + $0x90] sm:$0xff] %v4783_v50  ;;  %4980 = vmatmul.bf16.gmra.mxu2 %v12774_v0 }
 0x3f7   : > { %5245 = vmatmul.bf16.gmra.mxu3 %v14821_v42  ;;  %4272 = vst [vmem:[#allocation3 + $0x58] sm:$0x3f] %v4244_v5  ;;  %6165 = vmatpush.bf16.msrb.mxu2 %v12826_v13 }
 0x3f8   : > { %4273 = vst [vmem:[#allocation3 + $0x60] sm:$0xff] %v4245_v24  ;;  %6427 = vmatpush.bf16.msra.mxu3 %v12846_v27  ;;  %v12845_v27 = vld [vmem:[%s13848_s29 + $0x1d8] sm:$0xff] }
 0x3f9   : > { %v4462_v33 = vpop.f32.mrf.mxu2 }
 0x3fa   : > { %v14824_v6 = vpop.f32.mrf.mxu3  ;;  %v4521_v20 = vadd.f32 %v4501_v43, %v4462_v33  ;;  %v3729_v23 = vpop.f32.mrf.mxu0 }
 0x3fb   : > { %v14826_v44 = vpop.f32.mrf.mxu1  ;;  %v4764_v16 = vld [vmem:[#allocation4 + $0x98] sm:$0xff]  ;;  %v3808_v46 = vadd.f32 %v3780_v32, %v3729_v23 }
 0x3fc   : > { %v4784_v22 = vadd.f32 %v4764_v16, %v14763_v28  ;;  %4541 = vst [vmem:[#allocation4 + $0xa6] sm:$0xff] %v4521_v20  ;;  %v3781_v28 = vld [vmem:[#allocation3 + $0x70] sm:$0xff]  ;;  %v4188_v51 = vrot.slane %v14826_v44, 2  ;;  %v4505_v20 = vld [vmem:[#allocation4 + $0xc6] sm:$0xff]  ;;  %6428 = vmatpush.bf16.msra.mxu3 %v12845_v27 }
 0x3fd   : > { %3836 = vst [vmem:[#allocation3 + $0x68] sm:$0xff] %v3808_v46  ;;  %v3784_v16 = vld [vmem:[#allocation3 + $0x88] sm:$0xff] }
 0x3fe   : > { %4804 = vst [vmem:[#allocation4 + $0x98] sm:$0xff] %v4784_v22  ;;  %v4189_v8 = vsel %vm2181_vm0, %v4187_v3, %v4188_v51 }
 0x401   : > { %v4464_v15 = vpop.f32.mrf.mxu2 }
 0x402   : > { %v14832_v1 = vpop.f32.mrf.mxu3  ;;  %v4522_v29 = vadd.f32 %v4502_v31, %v4464_v15  ;;  %v3732_v19 = vpop.f32.mrf.mxu0  ;;  %v4506_v31 = vld [vmem:[#allocation4 + $0xce] sm:$0x3] }
 0x403   : > { %v14835_v10 = vpop.f32.mrf.mxu1  ;;  %v4765_v26 = vld [vmem:[#allocation4 + $0xa0] sm:$0xff]  ;;  %v3809_v17 = vadd.f32 %v3781_v28, %v3732_v19 }
 0x404   : > { %v4785_v41 = vadd.f32 %v4765_v26, %v14780_v4  ;;  %v4120_v40 = vld [vmem:[#allocation3 + $0x68] sm:$0x3f]  ;;  %4542 = vst [vmem:[#allocation4 + $0xae] sm:$0x3] %v4522_v29  ;;  %v4190_v29 = vrot.slane %v14835_v10, 2 }
 0x405   : > { %v4246_v35 = vadd.f32 %v4182_v60, %v4120_v40  ;;  %v4247_v18 = vadd.f32 %v4186_v36, %v3809_v17  ;;  %5480 = vmatmul.bf16.gmra.mxu0 %v14752_v57  ;;  %v4504_v60 = vld [vmem:[#allocation4 + $0xbe] sm:$0x3] }
 0x406   : > { %5740 = vmatmul.bf16.gmra.mxu1 %v14798_v37  ;;  %4805 = vst [vmem:[#allocation4 + $0xa0] sm:$0xff] %v4785_v41  ;;  %4985 = vmatmul.bf16.gmra.mxu2 %v12775_v14  ;;  %v3785_v14 = vld [vmem:[#allocation3 + $0x90] sm:$0xff] }
 0x407   : > { %5250 = vmatmul.bf16.gmra.mxu3 %v14843_v30  ;;  %4274 = vst [vmem:[#allocation3 + $0x68] sm:$0x3f] %v4246_v35 }
 0x408   : > { %4275 = vst [vmem:[#allocation3 + $0x70] sm:$0xff] %v4247_v18 }
 0x409   : > { %v4467_v4 = vpop.f32.mrf.mxu2 }
 0x40a   : > { %v14848_v48 = vpop.f32.mrf.mxu3  ;;  %v4523_v57 = vadd.f32 %v4503_v55, %v4467_v4  ;;  %v3734_v54 = vpop.f32.mrf.mxu0  ;;  %v14887_v55 = vld [vmem:[%s13832_s23 + $0x38] sm:$0xff] }
 0x40b   : > { %v14850_v34 = vpop.f32.mrf.mxu1  ;;  %v4766_v63 = vld [vmem:[#allocation4 + $0xa8] sm:$0xff]  ;;  %v3810_v56 = vadd.f32 %v3782_v53, %v3734_v54  ;;  %v12876_v54 = vld [vmem:[%s13854_s18 + $0x20] sm:$0xff] }
 0x40c   : > { %v4786_v11 = vadd.f32 %v4766_v63, %v14787_v25  ;;  %4543 = vst [vmem:[#allocation4 + $0xb6] sm:$0xff] %v4523_v57  ;;  %v12776_v25 = vld [vmem:[%s13832_s23 + $0x20] sm:$0xff]  ;;  %v12865_v57 = vld [vmem:[%s13848_s29 + $0x228] sm:$0xff]  ;;  %6976 = vmatpush.bf16.msra.mxu1 %v12876_v54 }
 0x40d   : > { %3838 = vst [vmem:[#allocation3 + $0x78] sm:$0xff] %v3810_v56  ;;  %6690 = vmatpush.bf16.msra.mxu0 %v12865_v57 }
 0x40e   : > { %4806 = vst [vmem:[#allocation4 + $0xa8] sm:$0xff] %v4786_v11 }
 0x411   : > { %v4469_v47 = vpop.f32.mrf.mxu2 }
 0x412   : > { %v14855_v21 = vpop.f32.mrf.mxu3  ;;  %v4524_v62 = vadd.f32 %v4504_v60, %v4469_v47  ;;  %v3737_v0 = vpop.f32.mrf.mxu0  ;;  %v4508_v60 = vld [vmem:[#allocation4 + $0xde] sm:$0x3] }
 0x413   : > { %v14858_v12 = vpop.f32.mrf.mxu1  ;;  %v4767_v61 = vld [vmem:[#allocation4 + $0xb0] sm:$0xff]  ;;  %v3811_v50 = vadd.f32 %v3783_v39, %v3737_v0 }
 0x414   : > { %v4787_v5 = vadd.f32 %v4767_v61, %v14804_v2  ;;  %v4122_v24 = vld [vmem:[#allocation3 + $0x78] sm:$0x3f]  ;;  %4544 = vst [vmem:[#allocation4 + $0xbe] sm:$0x3] %v4524_v62  ;;  %v4193_v62 = vrot.slane %v14858_v12, 2 }
 0x415   : > { %v4248_v43 = vadd.f32 %v4185_v38, %v4122_v24  ;;  %v4249_v33 = vadd.f32 %v4189_v8, %v3811_v50  ;;  %5485 = vmatmul.bf16.gmra.mxu0 %v14776_v58  ;;  %v4191_v38 = vrot.slane %v14850_v34, 2  ;;  %v3786_v34 = vld [vmem:[#allocation3 + $0x98] sm:$0xff]  ;;  %v12778_v50 = vld [vmem:[%s13832_s23 + $0x30] sm:$0xff] }
 0x416   : > { %5745 = vmatmul.bf16.gmra.mxu1 %v14821_v42  ;;  %4807 = vst [vmem:[#allocation4 + $0xb0] sm:$0xff] %v4787_v5  ;;  %4990 = vmatmul.bf16.gmra.mxu2 %v12776_v25  ;;  %v3787_v25 = vld [vmem:[#allocation3 + $0xa0] sm:$0xff] }
 0x417   : > { %5255 = vmatmul.bf16.gmra.mxu3 %v14866_v52  ;;  %4276 = vst [vmem:[#allocation3 + $0x78] sm:$0x3f] %v4248_v43  ;;  %v4192_v41 = vsel %vm2181_vm0, %v4190_v29, %v4191_v38  ;;  %v12844_v29 = vld [vmem:[%s13848_s29 + $0x1d0] sm:$0xff] }
 0x418   : > { %4277 = vst [vmem:[#allocation3 + $0x80] sm:$0xff] %v4249_v33  ;;  %6429 = vmatpush.bf16.msra.mxu3 %v12844_v29 }
 0x419   : > { %v4472_v23 = vpop.f32.mrf.mxu2 }
 0x41a   : > { %v14869_v2 = vpop.f32.mrf.mxu3  ;;  %v4525_v32 = vadd.f32 %v4505_v20, %v4472_v23  ;;  %v3739_v44 = vpop.f32.mrf.mxu0  ;;  %v14912_v20 = vld [vmem:[%s13832_s23 + $0x40] sm:$0xff] }
 0x41b   : > { %v14871_v46 = vpop.f32.mrf.mxu1  ;;  %v4768_v58 = vld [vmem:[#allocation4 + $0xb8] sm:$0xff]  ;;  %v3812_v22 = vadd.f32 %v3784_v16, %v3739_v44  ;;  %v4509_v23 = vld [vmem:[#allocation4 + $0xe6] sm:$0xff] }
 0x41c   : > { %v4788_v7 = vadd.f32 %v4768_v58, %v14810_v59  ;;  %4545 = vst [vmem:[#allocation4 + $0xc6] sm:$0xff] %v4525_v32  ;;  %v12777_v59 = vld [vmem:[%s13832_s23 + $0x28] sm:$0xff] }
 0x41d   : > { %3840 = vst [vmem:[#allocation3 + $0x88] sm:$0xff] %v3812_v22  ;;  %v5306_v32 = vld [vmem:[#allocation4 + $0x6] sm:$0xff] }
 0x41e   : > { %4808 = vst [vmem:[#allocation4 + $0xb8] sm:$0xff] %v4788_v7  ;;  %v12825_v16 = vld [vmem:[%s13848_s29 + $0x188] sm:$0xff] }
 0x41f   : > { %6166 = vmatpush.bf16.msrb.mxu2 %v12825_v16 }
 0x421   : > { %v4474_v15 = vpop.f32.mrf.mxu2 }
 0x422   : > { %v14876_v9 = vpop.f32.mrf.mxu3  ;;  %v4526_v19 = vadd.f32 %v4506_v31, %v4474_v15  ;;  %v3742_v28 = vpop.f32.mrf.mxu0 }
 0x423   : > { %v14879_v26 = vpop.f32.mrf.mxu1  ;;  %v4769_v17 = vld [vmem:[#allocation4 + $0xc0] sm:$0xff]  ;;  %v3813_v36 = vadd.f32 %v3785_v14, %v3742_v28  ;;  %v5307_v28 = vld [vmem:[#allocation4 + $0xe] sm:$0x3] }
 0x424   : > { %v4789_v40 = vadd.f32 %v4769_v17, %v14824_v6  ;;  %v4124_v35 = vld [vmem:[#allocation3 + $0x88] sm:$0x3f]  ;;  %4546 = vst [vmem:[#allocation4 + $0xce] sm:$0x3] %v4526_v19  ;;  %v4510_v19 = vld [vmem:[#allocation4 + $0xee] sm:$0x3] }
 0x425   : > { %v4250_v18 = vadd.f32 %v4188_v51, %v4124_v35  ;;  %v4251_v10 = vadd.f32 %v4192_v41, %v3813_v36  ;;  %5490 = vmatmul.bf16.gmra.mxu0 %v14798_v37  ;;  %v4194_v51 = vrot.slane %v14871_v46, 2  ;;  %v4196_v36 = vrot.slane %v14879_v26, 2 }
 0x426   : > { %5750 = vmatmul.bf16.gmra.mxu1 %v14843_v30  ;;  %4809 = vst [vmem:[#allocation4 + $0xc0] sm:$0xff] %v4789_v40  ;;  %4995 = vmatmul.bf16.gmra.mxu2 %v12777_v59 }
 0x427   : > { %5260 = vmatmul.bf16.gmra.mxu3 %v14887_v55  ;;  %4278 = vst [vmem:[#allocation3 + $0x88] sm:$0x3f] %v4250_v18  ;;  %v4195_v5 = vsel %vm2181_vm0, %v4193_v62, %v4194_v51 }
 0x428   : > { %4279 = vst [vmem:[#allocation3 + $0x90] sm:$0xff] %v4251_v10  ;;  %v12779_v10 = vld [vmem:[%s13832_s23 + $0x38] sm:$0xff] }
 0x429   : > { %v4477_v6 = vpop.f32.mrf.mxu2 }
 0x42a   : > { %v14891_v4 = vpop.f32.mrf.mxu3  ;;  %v4527_v53 = vadd.f32 %v4507_v45, %v4477_v6  ;;  %v3744_v37 = vpop.f32.mrf.mxu0 }
 0x42b   : > { %v14895_v63 = vpop.f32.mrf.mxu1  ;;  %v4770_v56 = vld [vmem:[#allocation4 + $0xc8] sm:$0xff]  ;;  %v3814_v11 = vadd.f32 %v3786_v34, %v3744_v37  ;;  %v4511_v37 = vld [vmem:[#allocation4 + $0xf6] sm:$0xff] }
 0x42c   : > { %v4790_v49 = vadd.f32 %v4770_v56, %v14832_v1  ;;  %4547 = vst [vmem:[#allocation4 + $0xd6] sm:$0xff] %v4527_v53  ;;  %v4197_v14 = vrot.slane %v14895_v63, 2  ;;  %v14932_v53 = vld [vmem:[%s13832_s23 + $0x48] sm:$0xff]  ;;  %v5308_v34 = vld [vmem:[#allocation4 + $0x16] sm:$0xff]  ;;  %v12864_v56 = vld [vmem:[%s13848_s29 + $0x220] sm:$0xff] }
 0x42d   : > { %3842 = vst [vmem:[#allocation3 + $0x98] sm:$0xff] %v3814_v11  ;;  %v12875_v11 = vld [vmem:[%s13854_s18 + $0x18] sm:$0xff]  ;;  %6691 = vmatpush.bf16.msra.mxu0 %v12864_v56 }
 0x42e   : > { %4810 = vst [vmem:[#allocation4 + $0xc8] sm:$0xff] %v4790_v49  ;;  %v4198_v6 = vsel %vm2181_vm0, %v4196_v36, %v4197_v14  ;;  %v12824_v49 = vld [vmem:[%s13848_s29 + $0x180] sm:$0xff]  ;;  %6977 = vmatpush.bf16.msra.mxu1 %v12875_v11 }
 0x42f   : > { %6167 = vmatpush.bf16.msrb.mxu2 %v12824_v49  ;;  %v5021_v49 = vld [vmem:[#allocation4 + $0x60] sm:$0xff] }
 0x431   : > { %v4479_v47 = vpop.f32.mrf.mxu2 }
 0x432   : > { %v14899_v3 = vpop.f32.mrf.mxu3  ;;  %v4528_v0 = vadd.f32 %v4508_v60, %v4479_v47  ;;  %v3747_v39 = vpop.f32.mrf.mxu0 }
 0x433   : > { %v14902_v61 = vpop.f32.mrf.mxu1  ;;  %v4771_v8 = vld [vmem:[#allocation4 + $0xd0] sm:$0xff]  ;;  %v3815_v1 = vadd.f32 %v3787_v25, %v3747_v39  ;;  %v3790_v39 = vld [vmem:[#allocation3 + $0xb8] sm:$0xff] }
 0x434   : > { %v4791_v24 = vadd.f32 %v4771_v8, %v14848_v48  ;;  %v4126_v43 = vld [vmem:[#allocation3 + $0x98] sm:$0x3f]  ;;  %4548 = vst [vmem:[#allocation4 + $0xde] sm:$0x3] %v4528_v0  ;;  %v4512_v8 = vld [vmem:[#allocation4 + $0xfe] sm:$0x3] }
 0x435   : > { %v4252_v33 = vadd.f32 %v4191_v38, %v4126_v43  ;;  %v4253_v12 = vadd.f32 %v4195_v5, %v3815_v1  ;;  %5495 = vmatmul.bf16.gmra.mxu0 %v14821_v42  ;;  %v3788_v42 = vld [vmem:[#allocation3 + $0xa8] sm:$0xff]  ;;  %v5309_v1 = vld [vmem:[#allocation4 + $0x1e] sm:$0x3] }
 0x436   : > { %5755 = vmatmul.bf16.gmra.mxu1 %v14866_v52  ;;  %4811 = vst [vmem:[#allocation4 + $0xd0] sm:$0xff] %v4791_v24  ;;  %5000 = vmatmul.bf16.gmra.mxu2 %v12778_v50 }
 0x437   : > { %5265 = vmatmul.bf16.gmra.mxu3 %v14912_v20  ;;  %4280 = vst [vmem:[#allocation3 + $0x98] sm:$0x3f] %v4252_v33  ;;  %v4199_v33 = vrot.slane %v14902_v61, 2 }
 0x438   : > { %4281 = vst [vmem:[#allocation3 + $0xa0] sm:$0xff] %v4253_v12 }
 0x439   : > { %v4482_v48 = vpop.f32.mrf.mxu2 }
 0x43a   : > { %v5226_v44 = vpop.f32.mrf.mxu3  ;;  %v4529_v58 = vadd.f32 %v4509_v23, %v4482_v48  ;;  %v3749_v7 = vpop.f32.mrf.mxu0  ;;  %v3791_v48 = vld [vmem:[#allocation3 + $0xc0] sm:$0xff] }
 0x43b   : > { %v5338_v22 = vadd.f32 %v5306_v32, %v5226_v44  ;;  %v14916_v27 = vpop.f32.mrf.mxu1  ;;  %v4772_v31 = vld [vmem:[#allocation4 + $0xd8] sm:$0xff]  ;;  %v3816_v38 = vadd.f32 %v3788_v42, %v3749_v7 }
 0x43c   : > { %v4792_v15 = vadd.f32 %v4772_v31, %v14855_v21  ;;  %4549 = vst [vmem:[#allocation4 + $0xe6] sm:$0xff] %v4529_v58  ;;  %v3789_v21 = vld [vmem:[#allocation3 + $0xb0] sm:$0xff]  ;;  %v4200_v5 = vrot.slane %v14916_v27, 2 }
 0x43d   : > { %5370 = vst [vmem:[#allocation4 + $0x6] sm:$0xff] %v5338_v22  ;;  %v14955_v31 = vld [vmem:[%s13832_s23 + $0x50] sm:$0xff] }
 0x43e   : > { %4812 = vst [vmem:[#allocation4 + $0xd8] sm:$0xff] %v4792_v15  ;;  %v4201_v22 = vsel %vm2181_vm0, %v4199_v33, %v4200_v5  ;;  %v5313_v33 = vld [vmem:[#allocation4 + $0x3e] sm:$0x3] }
 0x43f   : > { %3844 = vst [vmem:[#allocation3 + $0xa8] sm:$0xff] %v3816_v38 }
 0x441   : > { %v4484_v59 = vpop.f32.mrf.mxu2 }
 0x442   : > { %v5228_v17 = vpop.f32.mrf.mxu3  ;;  %v4530_v41 = vadd.f32 %v4510_v19, %v4484_v59  ;;  %v3752_v35 = vpop.f32.mrf.mxu0  ;;  %v12843_v19 = vld [vmem:[%s13848_s29 + $0x1c8] sm:$0xff] }
 0x443   : > { %v5339_v40 = vadd.f32 %v5307_v28, %v5228_v17  ;;  %v14922_v18 = vpop.f32.mrf.mxu1  ;;  %v4773_v13 = vld [vmem:[#allocation4 + $0xe0] sm:$0xff]  ;;  %v3817_v45 = vadd.f32 %v3789_v21, %v3752_v35  ;;  %v12891_v28 = vld [vmem:[%s13854_s18 + $0x78] sm:$0xff]  ;;  %v3792_v17 = vld [vmem:[#allocation3 + $0xc8] sm:$0xff]  ;;  %6430 = vmatpush.bf16.msra.mxu3 %v12843_v19 }
 0x444   : > { %v4793_v57 = vadd.f32 %v4773_v13, %v14869_v2  ;;  %4550 = vst [vmem:[#allocation4 + $0xee] sm:$0x3] %v4530_v41  ;;  %7108 = vmatpush.bf16.msra.mxu2 %v12891_v28  ;;  %v4202_v13 = vrot.slane %v14922_v18, 2  ;;  %v5023_v19 = vld [vmem:[#allocation4 + $0x70] sm:$0xff] }
 0x445   : > { %5371 = vst [vmem:[#allocation4 + $0xe] sm:$0x3] %v5339_v40  ;;  %v4255_v26 = vadd.f32 %v4198_v6, %v3817_v45  ;;  %5500 = vmatmul.bf16.gmra.mxu0 %v14843_v30 }
 0x446   : > { %5760 = vmatmul.bf16.gmra.mxu1 %v14887_v55  ;;  %4813 = vst [vmem:[#allocation4 + $0xe0] sm:$0xff] %v4793_v57  ;;  %v4128_v54 = vld [vmem:[#allocation3 + $0xa8] sm:$0x3f]  ;;  %5005 = vmatmul.bf16.gmra.mxu2 %v12779_v10 }
 0x447   : > { %5270 = vmatmul.bf16.gmra.mxu3 %v14932_v53  ;;  %v4254_v2 = vadd.f32 %v4194_v51, %v4128_v54  ;;  %4283 = vst [vmem:[#allocation3 + $0xb0] sm:$0xff] %v4255_v26  ;;  %v3793_v54 = vld [vmem:[#allocation3 + $0xd0] sm:$0xff] }
 0x449   : > { %4282 = vst [vmem:[#allocation3 + $0xa8] sm:$0x3f] %v4254_v2  ;;  %v4487_v30 = vpop.f32.mrf.mxu2  ;;  %v12781_v2 = vld [vmem:[%s13832_s23 + $0x48] sm:$0xff] }
 0x44a   : > { %v5231_v60 = vpop.f32.mrf.mxu3  ;;  %v4531_v47 = vadd.f32 %v4511_v37, %v4487_v30  ;;  %v3754_v0 = vpop.f32.mrf.mxu0 }
 0x44b   : > { %v5340_v62 = vadd.f32 %v5308_v34, %v5231_v60  ;;  %v14940_v25 = vpop.f32.mrf.mxu1  ;;  %v4774_v50 = vld [vmem:[#allocation4 + $0xe8] sm:$0xff]  ;;  %v3818_v46 = vadd.f32 %v3790_v39, %v3754_v0  ;;  %v14979_v0 = vld [vmem:[%s13832_s23 + $0x58] sm:$0xff] }
 0x44c   : > { %v4794_v51 = vadd.f32 %v4774_v50, %v14876_v9  ;;  %4551 = vst [vmem:[#allocation4 + $0xf6] sm:$0xff] %v4531_v47  ;;  %v12780_v9 = vld [vmem:[%s13832_s23 + $0x40] sm:$0xff]  ;;  %v4203_v35 = vrot.slane %v14940_v25, 2  ;;  %v5312_v39 = vld [vmem:[#allocation4 + $0x36] sm:$0xff] }
 0x44d   : > { %5372 = vst [vmem:[#allocation4 + $0x16] sm:$0xff] %v5340_v62  ;;  %v12863_v50 = vld [vmem:[%s13848_s29 + $0x218] sm:$0xff] }
 0x44e   : > { %4814 = vst [vmem:[#allocation4 + $0xe8] sm:$0xff] %v4794_v51  ;;  %v4204_v56 = vsel %vm2181_vm0, %v4202_v13, %v4203_v35  ;;  %6692 = vmatpush.bf16.msra.mxu0 %v12863_v50 }
 0x44f   : > { %3846 = vst [vmem:[#allocation3 + $0xb8] sm:$0xff] %v3818_v46  ;;  %v12874_v46 = vld [vmem:[%s13854_s18 + $0x10] sm:$0xff] }
 0x450   : > { %6978 = vmatpush.bf16.msra.mxu1 %v12874_v46 }
 0x451   : > { %v4489_v24 = vpop.f32.mrf.mxu2 }
 0x452   : > { %v5233_v43 = vpop.f32.mrf.mxu3  ;;  %v4532_v12 = vadd.f32 %v4512_v8, %v4489_v24  ;;  %v3757_v32 = vpop.f32.mrf.mxu0 }
 0x453   : > { %v5341_v23 = vadd.f32 %v5309_v1, %v5233_v43  ;;  %v14945_v44 = vpop.f32.mrf.mxu1  ;;  %v4775_v16 = vld [vmem:[#allocation4 + $0xf0] sm:$0xff]  ;;  %v3819_v58 = vadd.f32 %v3791_v48, %v3757_v32  ;;  %v3794_v1 = vld [vmem:[#allocation3 + $0xd8] sm:$0xff] }
 0x454   : > { %v4795_v7 = vadd.f32 %v4775_v16, %v14891_v4  ;;  %4552 = vst [vmem:[#allocation4 + $0xfe] sm:$0x3] %v4532_v12  ;;  %v5310_v4 = vld [vmem:[#allocation4 + $0x26] sm:$0xff]  ;;  %v12890_v43 = vld [vmem:[%s13854_s18 + $0x70] sm:$0xff]  ;;  %v5870_v48 = vrot.slane %v14945_v44, 6 }
 0x455   : > { %5373 = vst [vmem:[#allocation4 + $0x1e] sm:$0x3] %v5341_v23  ;;  %v4257_v61 = vadd.f32 %v4201_v22, %v3819_v58  ;;  %5505 = vmatmul.bf16.gmra.mxu0 %v14866_v52  ;;  %7109 = vmatpush.bf16.msra.mxu2 %v12890_v43  ;;  %v12889_v43 = vld [vmem:[%s13854_s18 + $0x68] sm:$0xff] }
 0x456   : > { %5765 = vmatmul.bf16.gmra.mxu1 %v14912_v20  ;;  %4815 = vst [vmem:[#allocation4 + $0xf0] sm:$0xff] %v4795_v7  ;;  %v4130_v42 = vld [vmem:[#allocation3 + $0xb8] sm:$0x3f]  ;;  %5010 = vmatmul.bf16.gmra.mxu2 %v12780_v9  ;;  %v5556_v7 = vld [vmem:[#allocation4] sm:$0xff] }
 0x457   : > { %5275 = vmatmul.bf16.gmra.mxu3 %v14955_v31  ;;  %v4256_v38 = vadd.f32 %v4197_v14, %v4130_v42  ;;  %4285 = vst [vmem:[#allocation3 + $0xc0] sm:$0xff] %v4257_v61  ;;  %v5311_v14 = vld [vmem:[#allocation4 + $0x2e] sm:$0x3]  ;;  %v12814_v42 = vld [vmem:[%s13832_s23 + $0x30] sm:$0xff] }
 0x459   : > { %4284 = vst [vmem:[#allocation3 + $0xb8] sm:$0x3f] %v4256_v38  ;;  %v4971_v15 = vpop.f32.mrf.mxu2  ;;  %v5024_v38 = vld [vmem:[#allocation4 + $0x78] sm:$0x3]  ;;  %7110 = vmatpush.bf16.msra.mxu2 %v12889_v43 }
 0x45a   : > { %v5236_v29 = vpop.f32.mrf.mxu3  ;;  %v3759_v59 = vpop.f32.mrf.mxu0  ;;  %v5062_v45 = vrot.slane %v4971_v15, 6 }
 0x45b   : > { %v5342_v52 = vadd.f32 %v5310_v4, %v5236_v29  ;;  %v14962_v36 = vpop.f32.mrf.mxu1  ;;  %v4776_v41 = vld [vmem:[#allocation4 + $0xf8] sm:$0xff]  ;;  %v3820_v40 = vadd.f32 %v3792_v17, %v3759_v59 }
 0x45c   : > { %v4796_v63 = vadd.f32 %v4776_v41, %v14899_v3  ;;  %v5022_v3 = vld [vmem:[#allocation4 + $0x68] sm:$0x3]  ;;  %v5871_v12 = vrot.slane %v14962_v36, 6  ;;  %v15001_v41 = vld [vmem:[%s13832_s23 + $0x60] sm:$0xff] }
 0x45d   : > { %5374 = vst [vmem:[#allocation4 + $0x26] sm:$0xff] %v5342_v52 }
 0x45e   : > { %3848 = vst [vmem:[#allocation3 + $0xc8] sm:$0xff] %v3820_v40  ;;  %v5872_v15 = vsel %vm5061_vm1, %v5870_v48, %v5871_v12  ;;  %v5314_v40 = vld [vmem:[#allocation4 + $0x46] sm:$0xff] }
 0x45f   : > { %4816 = vst [vmem:[#allocation4 + $0xf8] sm:$0xff] %v4796_v63 }
 0x461   : > { %v4973_v21 = vpop.f32.mrf.mxu2 }
 0x462   : > { %v5238_v10 = vpop.f32.mrf.mxu3  ;;  %v5063_v6 = vrot.slane %v4973_v21, 6  ;;  %v3762_v26 = vpop.f32.mrf.mxu0 }
 0x463   : > { %v5343_v57 = vadd.f32 %v5311_v14, %v5238_v10  ;;  %v14967_v37 = vpop.f32.mrf.mxu1  ;;  %v3821_v34 = vadd.f32 %v3793_v54, %v3762_v26  ;;  %v12842_v14 = vld [vmem:[%s13848_s29 + $0x1c0] sm:$0xff]  ;;  %v5557_v10 = vld [vmem:[#allocation4 + $0x8] sm:$0xff] }
 0x464   : > { %v5064_v18 = vsel %vm5061_vm1, %v5062_v45, %v5063_v6  ;;  %v5113_v30 = vadd.f32 %v5063_v6, %v5022_v3  ;;  %6431 = vmatpush.bf16.msra.mxu3 %v12842_v14  ;;  %v5315_v45 = vld [vmem:[#allocation4 + $0x4e] sm:$0x3]  ;;  %v5873_v54 = vrot.slane %v14967_v37, 6 }
 0x465   : > { %v4132_v11 = vld [vmem:[#allocation3 + $0xc8] sm:$0x3f]  ;;  %5375 = vst [vmem:[#allocation4 + $0x2e] sm:$0x3] %v5343_v57  ;;  %v5112_v47 = vadd.f32 %v5064_v18, %v5021_v49  ;;  %v4259_v62 = vadd.f32 %v4204_v56, %v3821_v34  ;;  %5510 = vmatmul.bf16.gmra.mxu0 %v14887_v55  ;;  %v12815_v18 = vld [vmem:[%s13832_s23 + $0x38] sm:$0xff] }
 0x466   : > { %v4258_v60 = vadd.f32 %v4200_v5, %v4132_v11  ;;  %5770 = vmatmul.bf16.gmra.mxu1 %v14932_v53  ;;  %5133 = vst [vmem:[#allocation4 + $0x68] sm:$0x3] %v5113_v30  ;;  %5015 = vmatmul.bf16.gmra.mxu2 %v12781_v2  ;;  %v5558_v11 = vld [vmem:[#allocation4 + $0x10] sm:$0xff]  ;;  %v5026_v30 = vld [vmem:[#allocation4 + $0x88] sm:$0x3] }
 0x467   : > { %5280 = vmatmul.bf16.gmra.mxu3 %v14979_v0  ;;  %5132 = vst [vmem:[#allocation4 + $0x60] sm:$0xff] %v5112_v47 }
 0x468   : > { %4286 = vst [vmem:[#allocation3 + $0xc8] sm:$0x3f] %v4258_v60 }
 0x469   : > { %4287 = vst [vmem:[#allocation3 + $0xd0] sm:$0xff] %v4259_v62  ;;  %v4976_v27 = vpop.f32.mrf.mxu2 }
 0x46a   : > { %v5241_v51 = vpop.f32.mrf.mxu3  ;;  %v3764_v8 = vpop.f32.mrf.mxu0  ;;  %v5065_v9 = vrot.slane %v4976_v27, 6 }
 0x46b   : > { %v5344_v55 = vadd.f32 %v5312_v39, %v5241_v51  ;;  %v14984_v5 = vpop.f32.mrf.mxu1  ;;  %v3822_v24 = vadd.f32 %v3794_v1, %v3764_v8  ;;  %v5025_v39 = vld [vmem:[#allocation4 + $0x80] sm:$0xff]  ;;  %v5316_v8 = vld [vmem:[#allocation4 + $0x56] sm:$0xff] }
 0x46c   : > { %v5874_v6 = vrot.slane %v14984_v5, 6  ;;  %v12862_v1 = vld [vmem:[%s13848_s29 + $0x210] sm:$0xff] }
 0x46d   : > { %5376 = vst [vmem:[#allocation4 + $0x36] sm:$0xff] %v5344_v55  ;;  %v15021_v55 = vld [vmem:[%s13832_s23 + $0x68] sm:$0xff]  ;;  %6693 = vmatpush.bf16.msra.mxu0 %v12862_v1  ;;  %v5029_v1 = vld [vmem:[#allocation4 + $0xa0] sm:$0xff] }
 0x46e   : > { %3850 = vst [vmem:[#allocation3 + $0xd8] sm:$0xff] %v3822_v24  ;;  %v5875_v47 = vsel %vm5061_vm1, %v5873_v54, %v5874_v6  ;;  %v12873_v24 = vld [vmem:[%s13854_s18 + $0x8] sm:$0xff] }
 0x46f   : > { %6979 = vmatpush.bf16.msra.mxu1 %v12873_v24  ;;  %v5561_v54 = vld [vmem:[#allocation4 + $0x28] sm:$0xff] }
 0x471   : > { %v4978_v23 = vpop.f32.mrf.mxu2 }
 0x472   : > { %v5243_v32 = vpop.f32.mrf.mxu3  ;;  %v5066_v16 = vrot.slane %v4978_v23, 6  ;;  %v5476_v22 = vpop.f32.mrf.mxu0  ;;  %v5559_v23 = vld [vmem:[#allocation4 + $0x18] sm:$0xff] }
 0x473   : > { %v5345_v58 = vadd.f32 %v5313_v33, %v5243_v32  ;;  %v14989_v61 = vpop.f32.mrf.mxu1  ;;  %v5588_v4 = vadd.f32 %v5556_v7, %v5476_v22 }
 0x474   : > { %v5067_v28 = vsel %vm5061_vm1, %v5065_v9, %v5066_v16  ;;  %v5115_v44 = vadd.f32 %v5066_v16, %v5024_v38  ;;  %v5317_v9 = vld [vmem:[#allocation4 + $0x5e] sm:$0x3]  ;;  %v5876_v7 = vrot.slane %v14989_v61, 6 }
 0x475   : > { %v4134_v29 = vld [vmem:[#allocation3 + $0xd8] sm:$0x3f]  ;;  %5377 = vst [vmem:[#allocation4 + $0x3e] sm:$0x3] %v5345_v58  ;;  %v5114_v59 = vadd.f32 %v5067_v28, %v5023_v19  ;;  %v5950_v17 = vadd.f32 %v5872_v15, %v5588_v4  ;;  %5515 = vmatmul.bf16.gmra.mxu0 %v14912_v20  ;;  %v12816_v28 = vld [vmem:[%s13832_s23 + $0x40] sm:$0xff] }
 0x476   : > { %v4260_v52 = vadd.f32 %v4203_v35, %v4134_v29  ;;  %5775 = vmatmul.bf16.gmra.mxu1 %v14955_v31  ;;  %5135 = vst [vmem:[#allocation4 + $0x78] sm:$0x3] %v5115_v44  ;;  %6168 = vmatmul.bf16.vlgmr.msrb.gmra.mxu2 %v12814_v42  ;;  %v5560_v29 = vld [vmem:[#allocation4 + $0x20] sm:$0xff]  ;;  %v5028_v44 = vld [vmem:[#allocation4 + $0x98] sm:$0x3] }
 0x477   : > { %5285 = vmatmul.bf16.gmra.mxu3 %v15001_v41  ;;  %5134 = vst [vmem:[#allocation4 + $0x70] sm:$0xff] %v5114_v59 }
 0x478   : > { %4288 = vst [vmem:[#allocation3 + $0xd8] sm:$0x3f] %v4260_v52 }
 0x479   : > { %5982 = vst [vmem:[#allocation4] sm:$0xff] %v5950_v17  ;;  %v4981_v63 = vpop.f32.mrf.mxu2 }
 0x47a   : > { %v5246_v25 = vpop.f32.mrf.mxu3  ;;  %v5478_v21 = vpop.f32.mrf.mxu0  ;;  %v5068_v2 = vrot.slane %v4981_v63, 6 }
 0x47b   : > { %v5346_v35 = vadd.f32 %v5314_v40, %v5246_v25  ;;  %v15005_v13 = vpop.f32.mrf.mxu1  ;;  %v5589_v20 = vadd.f32 %v5557_v10, %v5478_v21  ;;  %v5027_v40 = vld [vmem:[#allocation4 + $0x90] sm:$0xff]  ;;  %v12888_v10 = vld [vmem:[%s13854_s18 + $0x60] sm:$0xff] }
 0x47c   : > { %v5877_v16 = vrot.slane %v15005_v13, 6  ;;  %v15043_v21 = vld [vmem:[%s13832_s23 + $0x70] sm:$0xff]  ;;  %7111 = vmatpush.bf16.msra.mxu2 %v12888_v10 }
 0x47d   : > { %5378 = vst [vmem:[#allocation4 + $0x46] sm:$0xff] %v5346_v35 }
 0x47e   : > { %5621 = vst [vmem:[#allocation4 + $0x8] sm:$0xff] %v5589_v20  ;;  %v5878_v59 = vsel %vm5061_vm1, %v5876_v7, %v5877_v16 }
 0x481   : > { %v4983_v57 = vpop.f32.mrf.mxu2 }
 0x482   : > { %v5248_v26 = vpop.f32.mrf.mxu3  ;;  %v5069_v3 = vrot.slane %v4983_v57, 6  ;;  %v5481_v56 = vpop.f32.mrf.mxu0 }
 0x483   : > { %v5347_v34 = vadd.f32 %v5315_v45, %v5248_v26  ;;  %v15009_v49 = vpop.f32.mrf.mxu1  ;;  %v5590_v60 = vadd.f32 %v5558_v11, %v5481_v56  ;;  %v5318_v45 = vld [vmem:[#allocation4 + $0x66] sm:$0xff]  ;;  %v5319_v11 = vld [vmem:[#allocation4 + $0x6e] sm:$0x3] }
 0x484   : > { %v5070_v37 = vsel %vm5061_vm1, %v5068_v2, %v5069_v3  ;;  %v5117_v50 = vadd.f32 %v5069_v3, %v5026_v30 }
 0x485   : > { %v5807_v62 = vld [vmem:[#allocation4 + $0x8] sm:$0x3]  ;;  %5379 = vst [vmem:[#allocation4 + $0x4e] sm:$0x3] %v5347_v34  ;;  %v5116_v27 = vadd.f32 %v5070_v37, %v5025_v39  ;;  %v5952_v51 = vadd.f32 %v5875_v47, %v5590_v60  ;;  %5520 = vmatmul.bf16.gmra.mxu0 %v14932_v53  ;;  %v5562_v39 = vld [vmem:[#allocation4 + $0x30] sm:$0xff] }
 0x486   : > { %v5951_v46 = vadd.f32 %v5871_v12, %v5807_v62  ;;  %5780 = vmatmul.bf16.gmra.mxu1 %v14979_v0  ;;  %5137 = vst [vmem:[#allocation4 + $0x88] sm:$0x3] %v5117_v50  ;;  %6173 = vmatmul.bf16.gmra.mxu2 %v12815_v18  ;;  %v5879_v18 = vrot.slane %v15009_v49, 6  ;;  %v12817_v50 = vld [vmem:[%s13832_s23 + $0x48] sm:$0xff] }
 0x487   : > { %5290 = vmatmul.bf16.gmra.mxu3 %v15021_v55  ;;  %5136 = vst [vmem:[#allocation4 + $0x80] sm:$0xff] %v5116_v27 }
 0x488   : > { %5983 = vst [vmem:[#allocation4 + $0x8] sm:$0x3] %v5951_v46  ;;  %v5030_v46 = vld [vmem:[#allocation4 + $0xa8] sm:$0x3] }
 0x489   : > { %5984 = vst [vmem:[#allocation4 + $0x10] sm:$0xff] %v5952_v51  ;;  %v4986_v36 = vpop.f32.mrf.mxu2 }
 0x48a   : > { %v5251_v33 = vpop.f32.mrf.mxu3  ;;  %v5483_v12 = vpop.f32.mrf.mxu0  ;;  %v5071_v42 = vrot.slane %v4986_v36, 6 }
 0x48b   : > { %v5348_v53 = vadd.f32 %v5316_v8, %v5251_v33  ;;  %v15027_v32 = vpop.f32.mrf.mxu1  ;;  %v5591_v48 = vadd.f32 %v5559_v23, %v5483_v12  ;;  %v12861_v12 = vld [vmem:[%s13848_s29 + $0x208] sm:$0xff]  ;;  %v12872_v23 = vld [vmem:[%s13854_s18] sm:$0xff] }
 0x48c   : > { %v5880_v3 = vrot.slane %v15027_v32, 6  ;;  %6694 = vmatpush.bf16.msra.mxu0 %v12861_v12  ;;  %6980 = vmatpush.bf16.msra.mxu1 %v12872_v23  ;;  %v5565_v32 = vld [vmem:[#allocation4 + $0x48] sm:$0xff] }
 0x48d   : > { %5380 = vst [vmem:[#allocation4 + $0x56] sm:$0xff] %v5348_v53  ;;  %v15064_v53 = vld [vmem:[%s13832_s23 + $0x78] sm:$0xff] }
 0x48e   : > { %5623 = vst [vmem:[#allocation4 + $0x18] sm:$0xff] %v5591_v48  ;;  %v5881_v51 = vsel %vm5061_vm1, %v5879_v18, %v5880_v3 }
 0x491   : > { %v4988_v58 = vpop.f32.mrf.mxu2 }
 0x492   : > { %v5253_v22 = vpop.f32.mrf.mxu3  ;;  %v5072_v38 = vrot.slane %v4988_v58, 6  ;;  %v5486_v15 = vpop.f32.mrf.mxu0 }
 0x493   : > { %v5349_v4 = vadd.f32 %v5317_v9, %v5253_v22  ;;  %v15031_v19 = vpop.f32.mrf.mxu1  ;;  %v5592_v52 = vadd.f32 %v5560_v29, %v5486_v15  ;;  %v5320_v9 = vld [vmem:[#allocation4 + $0x76] sm:$0xff] }
 0x494   : > { %v5073_v61 = vsel %vm5061_vm1, %v5071_v42, %v5072_v38  ;;  %v5119_v63 = vadd.f32 %v5072_v38, %v5028_v44  ;;  %v5563_v22 = vld [vmem:[#allocation4 + $0x38] sm:$0xff]  ;;  %v12918_v38 = vld [vmem:[%s13854_s18 + $0x130] sm:$0xff]  ;;  %v5882_v44 = vrot.slane %v15031_v19, 6 }
 0x495   : > { %v5809_v17 = vld [vmem:[#allocation4 + $0x18] sm:$0x3]  ;;  %5381 = vst [vmem:[#allocation4 + $0x5e] sm:$0x3] %v5349_v4  ;;  %v5118_v14 = vadd.f32 %v5073_v61, %v5027_v40  ;;  %v5954_v35 = vadd.f32 %v5878_v59, %v5592_v52  ;;  %5525 = vmatmul.bf16.gmra.mxu0 %v14955_v31  ;;  %v5564_v61 = vld [vmem:[#allocation4 + $0x40] sm:$0xff] }
 0x496   : > { %v5953_v25 = vadd.f32 %v5874_v6, %v5809_v17  ;;  %5785 = vmatmul.bf16.gmra.mxu1 %v15001_v41  ;;  %5139 = vst [vmem:[#allocation4 + $0x98] sm:$0x3] %v5119_v63  ;;  %6178 = vmatmul.bf16.gmra.mxu2 %v12816_v28  ;;  %v12919_v6 = vld [vmem:[%s13854_s18 + $0x138] sm:$0xff] }
 0x497   : > { %5295 = vmatmul.bf16.gmra.mxu3 %v15043_v21  ;;  %5138 = vst [vmem:[#allocation4 + $0x90] sm:$0xff] %v5118_v14  ;;  %v5321_v28 = vld [vmem:[#allocation4 + $0x7e] sm:$0x3]  ;;  %v12832_v14 = vld [vmem:[%s13832_s23 + $0x30] sm:$0xff] }
 0x498   : > { %5985 = vst [vmem:[#allocation4 + $0x18] sm:$0x3] %v5953_v25  ;;  %7558 = vmatpush.bf16.msrb.mxu3 %v12919_v6  ;;  %v12818_v25 = vld [vmem:[%s13832_s23 + $0x50] sm:$0xff] }
 0x499   : > { %5986 = vst [vmem:[#allocation4 + $0x20] sm:$0xff] %v5954_v35  ;;  %v4991_v20 = vpop.f32.mrf.mxu2  ;;  %v5032_v35 = vld [vmem:[#allocation4 + $0xb8] sm:$0x3] }
 0x49a   : > { %v5256_v5 = vpop.f32.mrf.mxu3  ;;  %v5488_v26 = vpop.f32.mrf.mxu0  ;;  %v5074_v30 = vrot.slane %v4991_v20, 6 }
 0x49b   : > { %v5350_v57 = vadd.f32 %v5318_v45, %v5256_v5  ;;  %v15048_v31 = vpop.f32.mrf.mxu1  ;;  %v5593_v2 = vadd.f32 %v5561_v54, %v5488_v26  ;;  %v5031_v45 = vld [vmem:[#allocation4 + $0xb0] sm:$0xff] }
 0x49c   : > { %7559 = vmatpush.bf16.msrb.mxu3 %v12918_v38  ;;  %v5883_v4 = vrot.slane %v15048_v31, 6 }
 0x49d   : > { %5382 = vst [vmem:[#allocation4 + $0x66] sm:$0xff] %v5350_v57 }
 0x49e   : > { %5625 = vst [vmem:[#allocation4 + $0x28] sm:$0xff] %v5593_v2  ;;  %v5884_v20 = vsel %vm5061_vm1, %v5882_v44, %v5883_v4  ;;  %v5324_v31 = vld [vmem:[#allocation4 + $0x96] sm:$0xff] }
 0x4a1   : > { %v4993_v34 = vpop.f32.mrf.mxu2 }
 0x4a2   : > { %v5258_v56 = vpop.f32.mrf.mxu3  ;;  %v5075_v60 = vrot.slane %v4993_v34, 6  ;;  %v5491_v62 = vpop.f32.mrf.mxu0 }
 0x4a3   : > { %v5351_v47 = vadd.f32 %v5319_v11, %v5258_v56  ;;  %v15052_v37 = vpop.f32.mrf.mxu1  ;;  %v5594_v27 = vadd.f32 %v5562_v39, %v5491_v62  ;;  %v5322_v56 = vld [vmem:[#allocation4 + $0x86] sm:$0xff]  ;;  %v5323_v39 = vld [vmem:[#allocation4 + $0x8e] sm:$0x3] }
 0x4a4   : > { %v5076_v49 = vsel %vm5061_vm1, %v5074_v30, %v5075_v60  ;;  %v5121_v24 = vadd.f32 %v5075_v60, %v5030_v46 }
 0x4a5   : > { %v5811_v8 = vld [vmem:[#allocation4 + $0x28] sm:$0x3]  ;;  %5383 = vst [vmem:[#allocation4 + $0x6e] sm:$0x3] %v5351_v47  ;;  %v5120_v36 = vadd.f32 %v5076_v49, %v5029_v1  ;;  %v5956_v33 = vadd.f32 %v5881_v51, %v5594_v27  ;;  %5530 = vmatmul.bf16.gmra.mxu0 %v14979_v0  ;;  %v12887_v0 = vld [vmem:[%s13854_s18 + $0x58] sm:$0xff]  ;;  %v5566_v1 = vld [vmem:[#allocation4 + $0x50] sm:$0xff] }
 0x4a6   : > { %v5955_v43 = vadd.f32 %v5877_v16, %v5811_v8  ;;  %5790 = vmatmul.bf16.gmra.mxu1 %v15021_v55  ;;  %5141 = vst [vmem:[#allocation4 + $0xa8] sm:$0x3] %v5121_v24  ;;  %6183 = vmatmul.bf16.gmra.mxu2 %v12817_v50  ;;  %v5885_v50 = vrot.slane %v15052_v37, 6  ;;  %v12819_v24 = vld [vmem:[%s13832_s23 + $0x58] sm:$0xff]  ;;  %v5033_v37 = vld [vmem:[#allocation4 + $0xc0] sm:$0xff] }
 0x4a7   : > { %5300 = vmatmul.bf16.gmra.mxu3 %v15064_v53  ;;  %5140 = vst [vmem:[#allocation4 + $0xa0] sm:$0xff] %v5120_v36  ;;  %7112 = vmatpush.bf16.msra.mxu2 %v12887_v0  ;;  %v5034_v36 = vld [vmem:[#allocation4 + $0xc8] sm:$0x3] }
 0x4a8   : > { %5987 = vst [vmem:[#allocation4 + $0x28] sm:$0x3] %v5955_v43  ;;  %v12833_v43 = vld [vmem:[%s13832_s23 + $0x38] sm:$0xff] }
 0x4a9   : > { %5988 = vst [vmem:[#allocation4 + $0x30] sm:$0xff] %v5956_v33  ;;  %v4996_v13 = vpop.f32.mrf.mxu2 }
 0x4aa   : > { %v5261_v48 = vpop.f32.mrf.mxu3  ;;  %v5493_v58 = vpop.f32.mrf.mxu0  ;;  %v5077_v52 = vrot.slane %v4996_v13, 6 }
 0x4ab   : > { %v5352_v16 = vadd.f32 %v5320_v9, %v5261_v48  ;;  %v15070_v7 = vpop.f32.mrf.mxu1  ;;  %v5595_v42 = vadd.f32 %v5563_v22, %v5493_v58  ;;  %v12860_v58 = vld [vmem:[%s13848_s29 + $0x200] sm:$0xff]  ;;  %v12903_v22 = vld [vmem:[%s13854_s18 + $0xb8] sm:$0xff] }
 0x4ac   : > { %v5886_v60 = vrot.slane %v15070_v7, 6  ;;  %6695 = vmatpush.bf16.msra.mxu0 %v12860_v58  ;;  %7258 = vmatpush.bf16.msrb.mxu1 %v12903_v22  ;;  %v12900_v7 = vld [vmem:[%s13854_s18 + $0xa0] sm:$0xff]  ;;  %v12835_v58 = vld [vmem:[%s13832_s23 + $0x48] sm:$0xff] }
 0x4ad   : > { %5384 = vst [vmem:[#allocation4 + $0x76] sm:$0xff] %v5352_v16  ;;  %v5038_v22 = vld [vmem:[#allocation4 + $0xe8] sm:$0x3] }
 0x4ae   : > { %5627 = vst [vmem:[#allocation4 + $0x38] sm:$0xff] %v5595_v42  ;;  %v5887_v12 = vsel %vm5061_vm1, %v5885_v50, %v5886_v60  ;;  %v12917_v42 = vld [vmem:[%s13854_s18 + $0x128] sm:$0xff] }
 0x4af   : > { %7560 = vmatpush.bf16.msrb.mxu3 %v12917_v42 }
 0x4b1   : > { %v4998_v15 = vpop.f32.mrf.mxu2 }
 0x4b2   : > { %v5263_v29 = vpop.f32.mrf.mxu3  ;;  %v5078_v59 = vrot.slane %v4998_v15, 6  ;;  %v5496_v40 = vpop.f32.mrf.mxu0 }
 0x4b3   : > { %v5353_v17 = vadd.f32 %v5321_v28, %v5263_v29  ;;  %v15075_v63 = vpop.f32.mrf.mxu1  ;;  %v5596_v10 = vadd.f32 %v5564_v61, %v5496_v40  ;;  %v5567_v28 = vld [vmem:[#allocation4 + $0x58] sm:$0xff] }
 0x4b4   : > { %v5079_v6 = vsel %vm5061_vm1, %v5077_v52, %v5078_v59  ;;  %v5123_v19 = vadd.f32 %v5078_v59, %v5032_v35  ;;  %v5325_v61 = vld [vmem:[#allocation4 + $0x9e] sm:$0x3] }
 0x4b5   : > { %v5813_v5 = vld [vmem:[#allocation4 + $0x38] sm:$0x3]  ;;  %5385 = vst [vmem:[#allocation4 + $0x7e] sm:$0x3] %v5353_v17  ;;  %v5122_v26 = vadd.f32 %v5079_v6, %v5031_v45  ;;  %v5958_v54 = vadd.f32 %v5884_v20, %v5596_v10  ;;  %5535 = vmatmul.bf16.gmra.mxu0 %v15001_v41  ;;  %v12886_v41 = vld [vmem:[%s13854_s18 + $0x50] sm:$0xff]  ;;  %v5568_v45 = vld [vmem:[#allocation4 + $0x60] sm:$0xff] }
 0x4b6   : > { %v5957_v57 = vadd.f32 %v5880_v3, %v5813_v5  ;;  %5795 = vmatmul.bf16.gmra.mxu1 %v15043_v21  ;;  %5143 = vst [vmem:[#allocation4 + $0xb8] sm:$0x3] %v5123_v19  ;;  %6188 = vmatmul.bf16.gmra.mxu2 %v12818_v25  ;;  %v12868_v25 = vld [vmem:[%s13832_s23] sm:$0xff] }
 0x4b7   : > { %6432 = vmatmul.bf16.vlgmr.msra.gmra.mxu3 %v12832_v14  ;;  %5142 = vst [vmem:[#allocation4 + $0xb0] sm:$0xff] %v5122_v26  ;;  %7113 = vmatpush.bf16.msra.mxu2 %v12886_v41  ;;  %v5888_v14 = vrot.slane %v15075_v63, 6  ;;  %v12820_v19 = vld [vmem:[%s13832_s23 + $0x60] sm:$0xff]  ;;  %v5036_v26 = vld [vmem:[#allocation4 + $0xd8] sm:$0x3]  ;;  %v12901_v41 = vld [vmem:[%s13854_s18 + $0xa8] sm:$0xff] }
 0x4b8   : > { %5989 = vst [vmem:[#allocation4 + $0x38] sm:$0x3] %v5957_v57  ;;  %v12834_v57 = vld [vmem:[%s13832_s23 + $0x40] sm:$0xff] }
 0x4b9   : > { %5990 = vst [vmem:[#allocation4 + $0x40] sm:$0xff] %v5958_v54  ;;  %v5001_v2 = vpop.f32.mrf.mxu2 }
 0x4ba   : > { %v5266_v34 = vpop.f32.mrf.mxu3  ;;  %v5498_v18 = vpop.f32.mrf.mxu0  ;;  %v5080_v46 = vrot.slane %v5001_v2, 6 }
 0x4bb   : > { %v5354_v11 = vadd.f32 %v5322_v56, %v5266_v34  ;;  %v15087_v3 = vpop.f32.mrf.mxu1  ;;  %v5597_v30 = vadd.f32 %v5565_v32, %v5498_v18  ;;  %v5035_v56 = vld [vmem:[#allocation4 + $0xd0] sm:$0xff] }
 0x4bc   : > { %v5889_v59 = vrot.slane %v15087_v3, 6 }
 0x4bd   : > { %5386 = vst [vmem:[#allocation4 + $0x86] sm:$0xff] %v5354_v11 }
 0x4be   : > { %5629 = vst [vmem:[#allocation4 + $0x48] sm:$0xff] %v5597_v30  ;;  %v5890_v2 = vsel %vm5061_vm1, %v5888_v14, %v5889_v59  ;;  %v5328_v3 = vld [vmem:[#allocation4 + $0xb6] sm:$0xff] }
 0x4c1   : > { %v5003_v47 = vpop.f32.mrf.mxu2 }
 0x4c2   : > { %v5268_v62 = vpop.f32.mrf.mxu3  ;;  %v5081_v27 = vrot.slane %v5003_v47, 6  ;;  %v5501_v8 = vpop.f32.mrf.mxu0  ;;  %v12885_v47 = vld [vmem:[%s13854_s18 + $0x48] sm:$0xff] }
 0x4c3   : > { %v5355_v51 = vadd.f32 %v5323_v39, %v5268_v62  ;;  %v15092_v49 = vpop.f32.mrf.mxu1  ;;  %v5598_v33 = vadd.f32 %v5566_v1, %v5501_v8  ;;  %v12916_v62 = vld [vmem:[%s13854_s18 + $0x120] sm:$0xff]  ;;  %7114 = vmatpush.bf16.msra.mxu2 %v12885_v47  ;;  %v12822_v47 = vld [vmem:[%s13832_s23 + $0x70] sm:$0xff] }
 0x4c4   : > { %v5082_v13 = vsel %vm5061_vm1, %v5080_v46, %v5081_v27  ;;  %v5125_v48 = vadd.f32 %v5081_v27, %v5034_v36  ;;  %v5326_v46 = vld [vmem:[#allocation4 + $0xa6] sm:$0xff]  ;;  %7561 = vmatpush.bf16.msrb.mxu3 %v12916_v62  ;;  %v5327_v36 = vld [vmem:[#allocation4 + $0xae] sm:$0x3]  ;;  %v12836_v62 = vld [vmem:[%s13832_s23 + $0x50] sm:$0xff] }
 0x4c5   : > { %v5815_v23 = vld [vmem:[#allocation4 + $0x48] sm:$0x3]  ;;  %5387 = vst [vmem:[#allocation4 + $0x8e] sm:$0x3] %v5355_v51  ;;  %v5124_v0 = vadd.f32 %v5082_v13, %v5033_v37  ;;  %v5960_v16 = vadd.f32 %v5887_v12, %v5598_v33  ;;  %5540 = vmatmul.bf16.gmra.mxu0 %v15021_v55  ;;  %v5891_v12 = vrot.slane %v15092_v49, 6 }
 0x4c6   : > { %v5959_v9 = vadd.f32 %v5883_v4, %v5815_v23  ;;  %5800 = vmatmul.bf16.gmra.mxu1 %v15064_v53  ;;  %5145 = vst [vmem:[#allocation4 + $0xc8] sm:$0x3] %v5125_v48  ;;  %6193 = vmatmul.bf16.gmra.mxu2 %v12819_v24  ;;  %v12902_v4 = vld [vmem:[%s13854_s18 + $0xb0] sm:$0xff]  ;;  %v5569_v27 = vld [vmem:[#allocation4 + $0x68] sm:$0xff] }
 0x4c7   : > { %6437 = vmatmul.bf16.gmra.mxu3 %v12833_v43  ;;  %5144 = vst [vmem:[#allocation4 + $0xc0] sm:$0xff] %v5124_v0  ;;  %7259 = vmatpush.bf16.msrb.mxu1 %v12902_v4  ;;  %v12869_v33 = vld [vmem:[%s13832_s23 + $0x8] sm:$0xff] }
 0x4c8   : > { %5991 = vst [vmem:[#allocation4 + $0x48] sm:$0x3] %v5959_v9  ;;  %v5570_v9 = vld [vmem:[#allocation4 + $0x70] sm:$0xff] }
 0x4c9   : > { %5992 = vst [vmem:[#allocation4 + $0x50] sm:$0xff] %v5960_v16  ;;  %v5006_v38 = vpop.f32.mrf.mxu2  ;;  %v12821_v16 = vld [vmem:[%s13832_s23 + $0x68] sm:$0xff] }
 0x4ca   : > { %v5271_v15 = vpop.f32.mrf.mxu3  ;;  %v5503_v29 = vpop.f32.mrf.mxu0  ;;  %v5083_v35 = vrot.slane %v5006_v38, 6 }
 0x4cb   : > { %v5356_v55 = vadd.f32 %v5324_v31, %v5271_v15  ;;  %v15108_v44 = vpop.f32.mrf.mxu1  ;;  %v5599_v52 = vadd.f32 %v5567_v28, %v5503_v29  ;;  %7260 = vmatpush.bf16.msrb.mxu1 %v12901_v41  ;;  %v5037_v31 = vld [vmem:[#allocation4 + $0xe0] sm:$0xff] }
 0x4cc   : > { %v5892_v1 = vrot.slane %v15108_v44, 6  ;;  %v6219_v44 = vld [vmem:[#allocation4 + $0x6] sm:$0xff] }
 0x4cd   : > { %5388 = vst [vmem:[#allocation4 + $0x96] sm:$0xff] %v5356_v55 }
 0x4ce   : > { %5631 = vst [vmem:[#allocation4 + $0x58] sm:$0xff] %v5599_v52  ;;  %v5893_v38 = vsel %vm5061_vm1, %v5891_v12, %v5892_v1  ;;  %v12899_v52 = vld [vmem:[%s13854_s18 + $0x98] sm:$0xff]  ;;  %v5330_v12 = vld [vmem:[#allocation4 + $0xc6] sm:$0xff] }
 0x4cf   : > { %7261 = vmatpush.bf16.msrb.mxu1 %v12900_v7 }
 0x4d1   : > { %v5008_v17 = vpop.f32.mrf.mxu2 }
 0x4d2   : > { %v5273_v40 = vpop.f32.mrf.mxu3  ;;  %v5084_v10 = vrot.slane %v5008_v17, 6  ;;  %v5506_v5 = vpop.f32.mrf.mxu0  ;;  %v12939_v17 = vld [vmem:[%s13854_s18 + $0x1b8] sm:$0xff] }
 0x4d3   : > { %v5357_v20 = vadd.f32 %v5325_v61, %v5273_v40  ;;  %v15113_v6 = vpop.f32.mrf.mxu1  ;;  %v5600_v54 = vadd.f32 %v5568_v45, %v5506_v5  ;;  %v12884_v40 = vld [vmem:[%s13854_s18 + $0x40] sm:$0xff]  ;;  %7262 = vmatpush.bf16.msrb.mxu1 %v12899_v52  ;;  %8075 = vmatpush.bf16.msrb.mxu0 %v12939_v17 }
 0x4d4   : > { %v5085_v63 = vsel %vm5061_vm1, %v5083_v35, %v5084_v10  ;;  %v5127_v11 = vadd.f32 %v5084_v10, %v5036_v26  ;;  %v5571_v35 = vld [vmem:[#allocation4 + $0x78] sm:$0xff]  ;;  %v12898_v10 = vld [vmem:[%s13854_s18 + $0x90] sm:$0xff]  ;;  %7115 = vmatpush.bf16.msra.mxu2 %v12884_v40 }
 0x4d5   : > { %v5817_v34 = vld [vmem:[#allocation4 + $0x58] sm:$0x3]  ;;  %5389 = vst [vmem:[#allocation4 + $0x9e] sm:$0x3] %v5357_v20  ;;  %v5126_v32 = vadd.f32 %v5085_v63, %v5035_v56  ;;  %v5962_v30 = vadd.f32 %v5890_v2, %v5600_v54  ;;  %5545 = vmatmul.bf16.gmra.mxu0 %v15043_v21  ;;  %v12850_v54 = vld [vmem:[%s13832_s23 + $0x30] sm:$0xff]  ;;  %v5894_v56 = vrot.slane %v15113_v6, 6 }
 0x4d6   : > { %v5961_v18 = vadd.f32 %v5886_v60, %v5817_v34  ;;  %6981 = vmatmul.bf16.vlgmr.msra.gmra.mxu1 %v12868_v25  ;;  %5147 = vst [vmem:[#allocation4 + $0xd8] sm:$0x3] %v5127_v11  ;;  %6198 = vmatmul.bf16.gmra.mxu2 %v12820_v19  ;;  %v12915_v20 = vld [vmem:[%s13854_s18 + $0x118] sm:$0xff]  ;;  %v12870_v2 = vld [vmem:[%s13832_s23 + $0x10] sm:$0xff]  ;;  %v12897_v34 = vld [vmem:[%s13854_s18 + $0x88] sm:$0xff] }
 0x4d7   : > { %6442 = vmatmul.bf16.gmra.mxu3 %v12834_v57  ;;  %5146 = vst [vmem:[#allocation4 + $0xd0] sm:$0xff] %v5126_v32  ;;  %7263 = vmatpush.bf16.msrb.mxu1 %v12898_v10  ;;  %v5329_v19 = vld [vmem:[#allocation4 + $0xbe] sm:$0x3]  ;;  %v5574_v40 = vld [vmem:[#allocation4 + $0x90] sm:$0xff] }
 0x4d8   : > { %5993 = vst [vmem:[#allocation4 + $0x58] sm:$0x3] %v5961_v18  ;;  %7562 = vmatpush.bf16.msrb.mxu3 %v12915_v20  ;;  %v12927_v20 = vld [vmem:[%s13854_s18 + $0x178] sm:$0xff] }
 0x4d9   : > { %5994 = vst [vmem:[#allocation4 + $0x60] sm:$0xff] %v5962_v30  ;;  %v5011_v39 = vpop.f32.mrf.mxu2  ;;  %v5572_v30 = vld [vmem:[#allocation4 + $0x80] sm:$0xff] }
 0x4da   : > { %v5276_v50 = vpop.f32.mrf.mxu3  ;;  %v5508_v21 = vpop.f32.mrf.mxu0  ;;  %v5086_v23 = vrot.slane %v5011_v39, 6  ;;  %v5040_v39 = vld [vmem:[#allocation4 + $0xf8] sm:$0x3] }
 0x4db   : > { %v5358_v60 = vadd.f32 %v5326_v46, %v5276_v50  ;;  %v15128_v51 = vpop.f32.mrf.mxu1  ;;  %v5601_v8 = vadd.f32 %v5569_v27, %v5508_v21  ;;  %7264 = vmatpush.bf16.msrb.mxu1 %v12897_v34 }
 0x4dc   : > { %v5895_v45 = vrot.slane %v15128_v51, 6  ;;  %v12926_v51 = vld [vmem:[%s13854_s18 + $0x170] sm:$0xff] }
 0x4dd   : > { %5390 = vst [vmem:[#allocation4 + $0xa6] sm:$0xff] %v5358_v60  ;;  %v5039_v60 = vld [vmem:[#allocation4 + $0xf0] sm:$0xff] }
 0x4de   : > { %5633 = vst [vmem:[#allocation4 + $0x68] sm:$0xff] %v5601_v8  ;;  %v5896_v46 = vsel %vm5061_vm1, %v5894_v56, %v5895_v45 }
 0x4e1   : > { %v5013_v24 = vpop.f32.mrf.mxu2 }
 0x4e2   : > { %v5278_v43 = vpop.f32.mrf.mxu3  ;;  %v5087_v37 = vrot.slane %v5013_v24, 6  ;;  %v5511_v48 = vpop.f32.mrf.mxu0 }
 0x4e3   : > { %v5359_v13 = vadd.f32 %v5327_v36, %v5278_v43  ;;  %v15133_v0 = vpop.f32.mrf.mxu1  ;;  %v5602_v42 = vadd.f32 %v5570_v9, %v5511_v48  ;;  %v12896_v43 = vld [vmem:[%s13854_s18 + $0x80] sm:$0xff]  ;;  %v12938_v36 = vld [vmem:[%s13854_s18 + $0x1b0] sm:$0xff]  ;;  %v5573_v9 = vld [vmem:[#allocation4 + $0x88] sm:$0xff] }
 0x4e4   : > { %v5088_v49 = vsel %vm5061_vm1, %v5086_v23, %v5087_v37  ;;  %v5129_v4 = vadd.f32 %v5087_v37, %v5038_v22  ;;  %7265 = vmatpush.bf16.msrb.mxu1 %v12896_v43  ;;  %8076 = vmatpush.bf16.msrb.mxu0 %v12938_v36  ;;  %v12914_v22 = vld [vmem:[%s13854_s18 + $0x110] sm:$0xff]  ;;  %v12838_v43 = vld [vmem:[%s13832_s23 + $0x60] sm:$0xff] }
 0x4e5   : > { %v5819_v15 = vld [vmem:[#allocation4 + $0x68] sm:$0x3]  ;;  %5391 = vst [vmem:[#allocation4 + $0xae] sm:$0x3] %v5359_v13  ;;  %v5128_v29 = vadd.f32 %v5088_v49, %v5037_v31  ;;  %v5964_v28 = vadd.f32 %v5893_v38, %v5602_v42  ;;  %5550 = vmatmul.bf16.gmra.mxu0 %v15064_v53  ;;  %7563 = vmatpush.bf16.msrb.mxu3 %v12914_v22  ;;  %v5331_v38 = vld [vmem:[#allocation4 + $0xce] sm:$0x3] }
 0x4e6   : > { %v5963_v55 = vadd.f32 %v5889_v59, %v5819_v15  ;;  %6985 = vmatmul.bf16.gmra.mxu1 %v12869_v33  ;;  %5149 = vst [vmem:[#allocation4 + $0xe8] sm:$0x3] %v5129_v4  ;;  %6203 = vmatmul.bf16.gmra.mxu2 %v12821_v16  ;;  %v6220_v49 = vld [vmem:[#allocation4 + $0xe] sm:$0x3]  ;;  %v12851_v4 = vld [vmem:[%s13832_s23 + $0x38] sm:$0xff]  ;;  %v12880_v36 = vld [vmem:[%s13832_s23] sm:$0xff] }
 0x4e7   : > { %6447 = vmatmul.bf16.gmra.mxu3 %v12835_v58  ;;  %5148 = vst [vmem:[#allocation4 + $0xe0] sm:$0xff] %v5128_v29  ;;  %v5897_v29 = vrot.slane %v15133_v0, 6  ;;  %v6223_v22 = vld [vmem:[#allocation4 + $0x26] sm:$0xff] }
 0x4e8   : > { %5995 = vst [vmem:[#allocation4 + $0x68] sm:$0x3] %v5963_v55  ;;  %v12871_v55 = vld [vmem:[%s13832_s23 + $0x18] sm:$0xff]  ;;  %7808 = vmatpush.bf16.msra.mxu1 %v12927_v20 }
 0x4e9   : > { %5996 = vst [vmem:[#allocation4 + $0x70] sm:$0xff] %v5964_v28  ;;  %v5016_v61 = vpop.f32.mrf.mxu2 }
 0x4ea   : > { %v5281_v25 = vpop.f32.mrf.mxu3  ;;  %v5513_v14 = vpop.f32.mrf.mxu0  ;;  %v5089_v63 = vrot.slane %v5016_v61, 6 }
 0x4eb   : > { %v5360_v59 = vadd.f32 %v5328_v3, %v5281_v25  ;;  %v15147_v53 = vpop.f32.mrf.mxu1  ;;  %v5603_v5 = vadd.f32 %v5571_v35, %v5513_v14  ;;  %v12823_v25 = vld [vmem:[%s13832_s23 + $0x78] sm:$0xff] }
 0x4ec   : > { %v5898_v42 = vrot.slane %v15147_v53, 6  ;;  %v12837_v3 = vld [vmem:[%s13832_s23 + $0x58] sm:$0xff]  ;;  %7809 = vmatpush.bf16.msra.mxu1 %v12926_v51 }
 0x4ed   : > { %5392 = vst [vmem:[#allocation4 + $0xb6] sm:$0xff] %v5360_v59  ;;  %v6225_v51 = vld [vmem:[#allocation4 + $0x36] sm:$0xff] }
 0x4ee   : > { %5635 = vst [vmem:[#allocation4 + $0x78] sm:$0xff] %v5603_v5  ;;  %v5899_v14 = vsel %vm5061_vm1, %v5897_v29, %v5898_v42  ;;  %v12910_v5 = vld [vmem:[%s13854_s18 + $0xf0] sm:$0xff]  ;;  %v12936_v29 = vld [vmem:[%s13854_s18 + $0x1a0] sm:$0xff] }
 0x4f1   : > { %v5018_v57 = vpop.f32.mrf.mxu2 }
 0x4f2   : > { %v5283_v26 = vpop.f32.mrf.mxu3  ;;  %v5090_v11 = vrot.slane %v5018_v57, 6  ;;  %v5516_v32 = vpop.f32.mrf.mxu0  ;;  %v5332_v57 = vld [vmem:[#allocation4 + $0xd6] sm:$0xff] }
 0x4f3   : > { %v5361_v18 = vadd.f32 %v5329_v19, %v5283_v26  ;;  %v15156_v41 = vpop.f32.mrf.mxu1  ;;  %v5604_v50 = vadd.f32 %v5572_v30, %v5516_v32 }
 0x4f4   : > { %v5091_v6 = vsel %vm5061_vm1, %v5089_v63, %v5090_v11  ;;  %v5131_v21 = vadd.f32 %v5090_v11, %v5040_v39  ;;  %v5575_v11 = vld [vmem:[#allocation4 + $0x98] sm:$0xff]  ;;  %v5578_v20 = vld [vmem:[#allocation4 + $0xb0] sm:$0xff] }
 0x4f5   : > { %v5821_v7 = vld [vmem:[#allocation4 + $0x78] sm:$0x3]  ;;  %5393 = vst [vmem:[#allocation4 + $0xbe] sm:$0x3] %v5361_v18  ;;  %v5130_v8 = vadd.f32 %v5091_v6, %v5039_v60  ;;  %v5966_v24 = vadd.f32 %v5896_v46, %v5604_v50  ;;  %6696 = vmatmul.bf16.vlgmr.msra.gmra.mxu0 %v12850_v54  ;;  %v6222_v50 = vld [vmem:[#allocation4 + $0x1e] sm:$0x3] }
 0x4f6   : > { %v5965_v27 = vadd.f32 %v5892_v1, %v5821_v7  ;;  %6989 = vmatmul.bf16.gmra.mxu1 %v12870_v2  ;;  %5151 = vst [vmem:[#allocation4 + $0xf8] sm:$0x3] %v5131_v21  ;;  %6208 = vmatmul.bf16.gmra.mxu2 %v12822_v47  ;;  %v12911_v1 = vld [vmem:[%s13854_s18 + $0xf8] sm:$0xff]  ;;  %v12937_v2 = vld [vmem:[%s13854_s18 + $0x1a8] sm:$0xff]  ;;  %v12852_v46 = vld [vmem:[%s13832_s23 + $0x40] sm:$0xff]  ;;  %v5900_v60 = vrot.slane %v15156_v41, 6 }
 0x4f7   : > { %6452 = vmatmul.bf16.gmra.mxu3 %v12836_v62  ;;  %5150 = vst [vmem:[#allocation4 + $0xf0] sm:$0xff] %v5130_v8  ;;  %7372 = vmatpush.bf16.msrb.mxu2 %v12911_v1  ;;  %v6221_v54 = vld [vmem:[#allocation4 + $0x16] sm:$0xff]  ;;  %v5333_v47 = vld [vmem:[#allocation4 + $0xde] sm:$0x3]  ;;  %v12892_v7 = vld [vmem:[%s13832_s23] sm:$0xff] }
 0x4f8   : > { %5997 = vst [vmem:[#allocation4 + $0x78] sm:$0x3] %v5965_v27  ;;  %8077 = vmatpush.bf16.msrb.mxu0 %v12937_v2  ;;  %v5576_v8 = vld [vmem:[#allocation4 + $0xa0] sm:$0xff]  ;;  %v12925_v1 = vld [vmem:[%s13854_s18 + $0x168] sm:$0xff] }
 0x4f9   : > { %5998 = vst [vmem:[#allocation4 + $0x80] sm:$0xff] %v5966_v24  ;;  %v6169_v23 = vpop.f32.mrf.mxu2  ;;  %7810 = vmatpush.bf16.msra.mxu1 %v12925_v1 }
 0x4fa   : > { %v5286_v33 = vpop.f32.mrf.mxu3  ;;  %v6239_v13 = vadd.f32 %v6219_v44, %v6169_v23  ;;  %v5518_v48 = vpop.f32.mrf.mxu0 }
 0x4fb   : > { %v5362_v37 = vadd.f32 %v5330_v12, %v5286_v33  ;;  %v15169_v16 = vpop.f32.mrf.mxu1  ;;  %v5605_v58 = vadd.f32 %v5573_v9, %v5518_v48  ;;  %7373 = vmatpush.bf16.msrb.mxu2 %v12910_v5  ;;  %v5334_v9 = vld [vmem:[#allocation4 + $0xe6] sm:$0xff] }
 0x4fc   : > { %6259 = vst [vmem:[#allocation4 + $0x6] sm:$0xff] %v6239_v13  ;;  %v5901_v30 = vrot.slane %v15169_v16, 6  ;;  %v12913_v13 = vld [vmem:[%s13854_s18 + $0x108] sm:$0xff]  ;;  %8078 = vmatpush.bf16.msrb.mxu0 %v12936_v29 }
 0x4fd   : > { %5394 = vst [vmem:[#allocation4 + $0xc6] sm:$0xff] %v5362_v37  ;;  %v12908_v37 = vld [vmem:[%s13854_s18 + $0xe0] sm:$0xff]  ;;  %7564 = vmatpush.bf16.msrb.mxu3 %v12913_v13 }
 0x4fe   : > { %5637 = vst [vmem:[#allocation4 + $0x88] sm:$0xff] %v5605_v58  ;;  %v5902_v12 = vsel %vm5061_vm1, %v5900_v60, %v5901_v30 }
 0x501   : > { %v6171_v31 = vpop.f32.mrf.mxu2 }
 0x502   : > { %v5288_v15 = vpop.f32.mrf.mxu3  ;;  %v6240_v52 = vadd.f32 %v6220_v49, %v6171_v31  ;;  %v5521_v17 = vpop.f32.mrf.mxu0  ;;  %v5577_v49 = vld [vmem:[#allocation4 + $0xa8] sm:$0xff] }
 0x503   : > { %v5363_v28 = vadd.f32 %v5331_v38, %v5288_v15  ;;  %v15176_v61 = vpop.f32.mrf.mxu1  ;;  %v5606_v59 = vadd.f32 %v5574_v40, %v5521_v17 }
 0x504   : > { %6260 = vst [vmem:[#allocation4 + $0xe] sm:$0x3] %v6240_v52  ;;  %v5335_v52 = vld [vmem:[#allocation4 + $0xee] sm:$0x3] }
 0x505   : > { %5395 = vst [vmem:[#allocation4 + $0xce] sm:$0x3] %v5363_v28  ;;  %v5823_v35 = vld [vmem:[#allocation4 + $0x88] sm:$0x3]  ;;  %v5968_v0 = vadd.f32 %v5899_v14, %v5606_v59  ;;  %6701 = vmatmul.bf16.gmra.mxu0 %v12851_v4  ;;  %v12907_v4 = vld [vmem:[%s13854_s18 + $0xd8] sm:$0xff]  ;;  %v5903_v14 = vrot.slane %v15176_v61, 6 }
 0x506   : > { %6993 = vmatmul.bf16.gmra.mxu1 %v12871_v55  ;;  %v5967_v10 = vadd.f32 %v5895_v45, %v5823_v35  ;;  %6213 = vmatmul.bf16.gmra.mxu2 %v12823_v25  ;;  %v12909_v45 = vld [vmem:[%s13854_s18 + $0xe8] sm:$0xff] }
 0x507   : > { %6457 = vmatmul.bf16.gmra.mxu3 %v12837_v3  ;;  %6000 = vst [vmem:[#allocation4 + $0x90] sm:$0xff] %v5968_v0  ;;  %7374 = vmatpush.bf16.msrb.mxu2 %v12909_v45  ;;  %v6224_v25 = vld [vmem:[#allocation4 + $0x2e] sm:$0x3] }
 0x508   : > { %5999 = vst [vmem:[#allocation4 + $0x88] sm:$0x3] %v5967_v10  ;;  %v12853_v3 = vld [vmem:[%s13832_s23 + $0x48] sm:$0xff] }
 0x509   : > { %v6174_v26 = vpop.f32.mrf.mxu2  ;;  %v12893_v59 = vld [vmem:[%s13832_s23 + $0x8] sm:$0xff] }
 0x50a   : > { %v5291_v19 = vpop.f32.mrf.mxu3  ;;  %v6241_v56 = vadd.f32 %v6221_v54, %v6174_v26  ;;  %v5523_v63 = vpop.f32.mrf.mxu0 }
 0x50b   : > { %v5364_v34 = vadd.f32 %v5332_v57, %v5291_v19  ;;  %v15188_v18 = vpop.f32.mrf.mxu1  ;;  %v5607_v32 = vadd.f32 %v5575_v11, %v5523_v63  ;;  %7375 = vmatpush.bf16.msrb.mxu2 %v12908_v37  ;;  %v12839_v19 = vld [vmem:[%s13832_s23 + $0x68] sm:$0xff]  ;;  %v12906_v63 = vld [vmem:[%s13854_s18 + $0xd0] sm:$0xff]  ;;  %v12912_v11 = vld [vmem:[%s13854_s18 + $0x100] sm:$0xff] }
 0x50c   : > { %6261 = vst [vmem:[#allocation4 + $0x16] sm:$0xff] %v6241_v56  ;;  %v5904_v28 = vrot.slane %v15188_v18, 6  ;;  %v12881_v57 = vld [vmem:[%s13832_s23 + $0x8] sm:$0xff]  ;;  %v12923_v56 = vld [vmem:[%s13854_s18 + $0x158] sm:$0xff]  ;;  %7565 = vmatpush.bf16.msrb.mxu3 %v12912_v11  ;;  %v5580_v37 = vld [vmem:[#allocation4 + $0xc0] sm:$0xff] }
 0x50d   : > { %5396 = vst [vmem:[#allocation4 + $0xd6] sm:$0xff] %v5364_v34 }
 0x50e   : > { %5639 = vst [vmem:[#allocation4 + $0x98] sm:$0xff] %v5607_v32  ;;  %v5905_v54 = vsel %vm5061_vm1, %v5903_v14, %v5904_v28  ;;  %v5336_v32 = vld [vmem:[#allocation4 + $0xf6] sm:$0xff] }
 0x50f   : > { %7376 = vmatpush.bf16.msrb.mxu2 %v12907_v4 }
 0x511   : > { %v6176_v39 = vpop.f32.mrf.mxu2 }
 0x512   : > { %v5293_v62 = vpop.f32.mrf.mxu3  ;;  %v6242_v21 = vadd.f32 %v6222_v50, %v6176_v39  ;;  %v5526_v27 = vpop.f32.mrf.mxu0  ;;  %v12905_v39 = vld [vmem:[%s13854_s18 + $0xc8] sm:$0xff] }
 0x513   : > { %v5365_v6 = vadd.f32 %v5333_v47, %v5293_v62  ;;  %v15196_v24 = vpop.f32.mrf.mxu1  ;;  %v5608_v33 = vadd.f32 %v5576_v8, %v5526_v27  ;;  %7377 = vmatpush.bf16.msrb.mxu2 %v12906_v63  ;;  %v12922_v62 = vld [vmem:[%s13854_s18 + $0x150] sm:$0xff]  ;;  %v6226_v27 = vld [vmem:[#allocation4 + $0x3e] sm:$0x3] }
 0x514   : > { %6262 = vst [vmem:[#allocation4 + $0x1e] sm:$0x3] %v6242_v21  ;;  %v5337_v21 = vld [vmem:[#allocation4 + $0xfe] sm:$0x3] }
 0x515   : > { %5397 = vst [vmem:[#allocation4 + $0xde] sm:$0x3] %v5365_v6  ;;  %v5825_v23 = vld [vmem:[#allocation4 + $0x98] sm:$0x3]  ;;  %v5970_v41 = vadd.f32 %v5902_v12, %v5608_v33  ;;  %6706 = vmatmul.bf16.gmra.mxu0 %v12852_v46  ;;  %v12894_v33 = vld [vmem:[%s13832_s23 + $0x10] sm:$0xff]  ;;  %v12921_v12 = vld [vmem:[%s13854_s18 + $0x148] sm:$0xff] }
 0x516   : > { %7266 = vmatmul.bf16.vlgmr.msrb.gmra.mxu1 %v12892_v7  ;;  %v5969_v44 = vadd.f32 %v5898_v42, %v5825_v23  ;;  %7116 = vmatmul.bf16.vlgmr.msra.gmra.mxu2 %v12880_v36  ;;  %v12924_v42 = vld [vmem:[%s13854_s18 + $0x160] sm:$0xff]  ;;  %v12854_v36 = vld [vmem:[%s13832_s23 + $0x50] sm:$0xff]  ;;  %v5906_v23 = vrot.slane %v15196_v24, 6 }
 0x517   : > { %6462 = vmatmul.bf16.gmra.mxu3 %v12838_v43  ;;  %6002 = vst [vmem:[#allocation4 + $0xa0] sm:$0xff] %v5970_v41  ;;  %7811 = vmatpush.bf16.msra.mxu1 %v12924_v42  ;;  %v12935_v42 = vld [vmem:[%s13854_s18 + $0x198] sm:$0xff] }
 0x518   : > { %6001 = vst [vmem:[#allocation4 + $0x98] sm:$0x3] %v5969_v44  ;;  %7378 = vmatpush.bf16.msrb.mxu2 %v12905_v39  ;;  %8079 = vmatpush.bf16.msrb.mxu0 %v12935_v42 }
 0x519   : > { %v6179_v58 = vpop.f32.mrf.mxu2 }
 0x51a   : > { %v5296_v48 = vpop.f32.mrf.mxu3  ;;  %v6243_v15 = vadd.f32 %v6223_v22, %v6179_v58  ;;  %v5528_v31 = vpop.f32.mrf.mxu0 }
 0x51b   : > { %v5366_v38 = vadd.f32 %v5334_v9, %v5296_v48  ;;  %v15208_v53 = vpop.f32.mrf.mxu1  ;;  %v5609_v55 = vadd.f32 %v5577_v49, %v5528_v31  ;;  %7812 = vmatpush.bf16.msra.mxu1 %v12923_v56  ;;  %v12840_v48 = vld [vmem:[%s13832_s23 + $0x70] sm:$0xff]  ;;  %v12920_v31 = vld [vmem:[%s13854_s18 + $0x140] sm:$0xff] }
 0x51c   : > { %6263 = vst [vmem:[#allocation4 + $0x26] sm:$0xff] %v6243_v15  ;;  %v5907_v6 = vrot.slane %v15208_v53, 6  ;;  %v12882_v9 = vld [vmem:[%s13832_s23 + $0x10] sm:$0xff]  ;;  %v12904_v15 = vld [vmem:[%s13854_s18 + $0xc0] sm:$0xff] }
 0x51d   : > { %5398 = vst [vmem:[#allocation4 + $0xe6] sm:$0xff] %v5366_v38  ;;  %7379 = vmatpush.bf16.msrb.mxu2 %v12904_v15 }
 0x51e   : > { %5641 = vst [vmem:[#allocation4 + $0xa8] sm:$0xff] %v5609_v55  ;;  %v5908_v22 = vsel %vm5061_vm1, %v5906_v23, %v5907_v6  ;;  %v6227_v55 = vld [vmem:[#allocation4 + $0x46] sm:$0xff] }
 0x51f   : > { %7813 = vmatpush.bf16.msra.mxu1 %v12922_v62 }
 0x521   : > { %v6181_v40 = vpop.f32.mrf.mxu2 }
 0x522   : > { %v5298_v17 = vpop.f32.mrf.mxu3  ;;  %v6244_v0 = vadd.f32 %v6224_v25, %v6181_v40  ;;  %v5531_v10 = vpop.f32.mrf.mxu0  ;;  %v5581_v40 = vld [vmem:[#allocation4 + $0xc8] sm:$0xff] }
 0x523   : > { %v5367_v35 = vadd.f32 %v5335_v52, %v5298_v17  ;;  %v15217_v5 = vpop.f32.mrf.mxu1  ;;  %v5610_v26 = vadd.f32 %v5578_v20, %v5531_v10  ;;  %7814 = vmatpush.bf16.msra.mxu1 %v12921_v12  ;;  %v12895_v10 = vld [vmem:[%s13832_s23 + $0x18] sm:$0xff] }
 0x524   : > { %6264 = vst [vmem:[#allocation4 + $0x2e] sm:$0x3] %v6244_v0  ;;  %v12855_v0 = vld [vmem:[%s13832_s23 + $0x58] sm:$0xff]  ;;  %v5909_v20 = vrot.slane %v15217_v5, 6  ;;  %v12934_v5 = vld [vmem:[%s13854_s18 + $0x190] sm:$0xff]  ;;  %v5584_v23 = vld [vmem:[#allocation4 + $0xe0] sm:$0xff] }
 0x525   : > { %5399 = vst [vmem:[#allocation4 + $0xee] sm:$0x3] %v5367_v35  ;;  %v5827_v2 = vld [vmem:[#allocation4 + $0xa8] sm:$0x3]  ;;  %v5972_v61 = vadd.f32 %v5905_v54, %v5610_v26  ;;  %6711 = vmatmul.bf16.gmra.mxu0 %v12853_v3  ;;  %v6228_v3 = vld [vmem:[#allocation4 + $0x4e] sm:$0x3] }
 0x526   : > { %7270 = vmatmul.bf16.gmra.mxu1 %v12893_v59  ;;  %v5971_v34 = vadd.f32 %v5901_v30, %v5827_v2  ;;  %7121 = vmatmul.bf16.gmra.mxu2 %v12881_v57  ;;  %v5579_v30 = vld [vmem:[#allocation4 + $0xb8] sm:$0xff]  ;;  %v6484_v35 = vld [vmem:[#allocation4 + $0x8] sm:$0xff]  ;;  %v5582_v54 = vld [vmem:[#allocation4 + $0xd0] sm:$0xff] }
 0x527   : > { %6467 = vmatmul.bf16.gmra.mxu3 %v12839_v19  ;;  %6004 = vst [vmem:[#allocation4 + $0xb0] sm:$0xff] %v5972_v61  ;;  %7815 = vmatpush.bf16.msra.mxu1 %v12920_v31  ;;  %v12841_v61 = vld [vmem:[%s13832_s23 + $0x78] sm:$0xff] }
 0x528   : > { %6003 = vst [vmem:[#allocation4 + $0xa8] sm:$0x3] %v5971_v34  ;;  %v12883_v34 = vld [vmem:[%s13832_s23 + $0x18] sm:$0xff]  ;;  %8080 = vmatpush.bf16.msrb.mxu0 %v12934_v5 }
 0x529   : > { %v6184_v47 = vpop.f32.mrf.mxu2 }
 0x52a   : > { %v5301_v45 = vpop.f32.mrf.mxu3  ;;  %v6245_v46 = vadd.f32 %v6225_v51, %v6184_v47  ;;  %v5533_v16 = vpop.f32.mrf.mxu0  ;;  %v6229_v47 = vld [vmem:[#allocation4 + $0x56] sm:$0xff] }
 0x52b   : > { %v5368_v50 = vadd.f32 %v5336_v32, %v5301_v45  ;;  %v15231_v7 = vpop.f32.mrf.mxu1  ;;  %v5611_v60 = vadd.f32 %v5579_v30, %v5533_v16 }
 0x52c   : > { %6265 = vst [vmem:[#allocation4 + $0x36] sm:$0xff] %v6245_v46  ;;  %v5583_v46 = vld [vmem:[#allocation4 + $0xd8] sm:$0xff]  ;;  %v5585_v42 = vld [vmem:[#allocation4 + $0xe8] sm:$0xff] }
 0x52d   : > { %5400 = vst [vmem:[#allocation4 + $0xf6] sm:$0xff] %v5368_v50 }
 0x52e   : > { %5643 = vst [vmem:[#allocation4 + $0xb8] sm:$0xff] %v5611_v60 }
 0x531   : > { %v6186_v43 = vpop.f32.mrf.mxu2 }
 0x532   : > { %v5303_v8 = vpop.f32.mrf.mxu3  ;;  %v6246_v44 = vadd.f32 %v6226_v27, %v6186_v43  ;;  %v5536_v1 = vpop.f32.mrf.mxu0  ;;  %v6486_v27 = vld [vmem:[#allocation4 + $0x18] sm:$0xff] }
 0x533   : > { %v5369_v41 = vadd.f32 %v5337_v21, %v5303_v8  ;;  %v15238_v13 = vpop.f32.mrf.mxu1  ;;  %v5612_v58 = vadd.f32 %v5580_v37, %v5536_v1  ;;  %v12856_v8 = vld [vmem:[%s13832_s23 + $0x60] sm:$0xff] }
 0x534   : > { %6266 = vst [vmem:[#allocation4 + $0x3e] sm:$0x3] %v6246_v44  ;;  %v5912_v43 = vrot.slane %v15238_v13, 6  ;;  %v12933_v13 = vld [vmem:[%s13854_s18 + $0x188] sm:$0xff] }
 0x535   : > { %5401 = vst [vmem:[#allocation4 + $0xfe] sm:$0x3] %v5369_v41  ;;  %v5829_v38 = vld [vmem:[#allocation4 + $0xb8] sm:$0x3]  ;;  %v5974_v24 = vadd.f32 %v5908_v22, %v5612_v58  ;;  %6716 = vmatmul.bf16.gmra.mxu0 %v12854_v36  ;;  %v13225_v22 = vld [vmem:[%s13832_s23] sm:$0xff] }
 0x536   : > { %7274 = vmatmul.bf16.gmra.mxu1 %v12894_v33  ;;  %v5973_v49 = vadd.f32 %v5904_v28, %v5829_v38  ;;  %7126 = vmatmul.bf16.gmra.mxu2 %v12882_v9  ;;  %v5910_v28 = vrot.slane %v15231_v7, 6  ;;  %v6999_v7 = vld [vmem:[#allocation5 + $0xcc] sm:$0xf] }
 0x537   : > { %6472 = vmatmul.bf16.gmra.mxu3 %v12840_v48  ;;  %6006 = vst [vmem:[#allocation4 + $0xc0] sm:$0xff] %v5974_v24  ;;  %v6231_v24 = vld [vmem:[#allocation4 + $0x66] sm:$0xff]  ;;  %8081 = vmatpush.bf16.msrb.mxu0 %v12933_v13 }
 0x538   : > { %6005 = vst [vmem:[#allocation4 + $0xb8] sm:$0x3] %v5973_v49  ;;  %v5911_v63 = vsel %vm5061_vm1, %v5909_v20, %v5910_v28 }
 0x539   : > { %v6189_v4 = vpop.f32.mrf.mxu2 }
 0x53a   : > { %v15250_v29 = vpop.f32.mrf.mxu3  ;;  %v6247_v52 = vadd.f32 %v6227_v55, %v6189_v4  ;;  %v5538_v17 = vpop.f32.mrf.mxu0 }
 0x53b   : > { %v15252_v25 = vpop.f32.mrf.mxu1  ;;  %v5613_v18 = vadd.f32 %v5581_v40, %v5538_v17  ;;  %v7000_v17 = vld [vmem:[#allocation5 + $0xdc] sm:$0xf] }
 0x53c   : > { %6267 = vst [vmem:[#allocation4 + $0x46] sm:$0xff] %v6247_v52  ;;  %v5913_v30 = vrot.slane %v15252_v25, 6  ;;  %v6232_v25 = vld [vmem:[#allocation4 + $0x6e] sm:$0x3] }
 0x53d   : > { %5645 = vst [vmem:[#allocation4 + $0xc8] sm:$0xff] %v5613_v18 }
 0x53e   : > { %v5914_v37 = vsel %vm5061_vm1, %v5912_v43, %v5913_v30 }
 0x541   : > { %v6191_v59 = vpop.f32.mrf.mxu2 }
 0x542   : > { %v6435_v14 = vpop.f32.mrf.mxu3  ;;  %v6248_v19 = vadd.f32 %v6228_v3, %v6191_v59  ;;  %v5541_v26 = vpop.f32.mrf.mxu0  ;;  %v12857_v3 = vld [vmem:[%s13832_s23 + $0x68] sm:$0xff] }
 0x543   : > { %v6504_v57 = vadd.f32 %v6484_v35, %v6435_v14  ;;  %v15258_v2 = vpop.f32.mrf.mxu1  ;;  %v5614_v56 = vadd.f32 %v5582_v54, %v5541_v26 }
 0x544   : > { %v5831_v11 = vld [vmem:[#allocation4 + $0xc8] sm:$0x3]  ;;  %6268 = vst [vmem:[#allocation4 + $0x4e] sm:$0x3] %v6248_v19  ;;  %v5915_v59 = vrot.slane %v15258_v2, 6  ;;  %v12932_v2 = vld [vmem:[%s13854_s18 + $0x180] sm:$0xff] }
 0x545   : > { %v5975_v51 = vadd.f32 %v5907_v6, %v5831_v11  ;;  %6524 = vst [vmem:[#allocation4 + $0x8] sm:$0xff] %v6504_v57  ;;  %v5976_v45 = vadd.f32 %v5911_v63, %v5614_v56  ;;  %6721 = vmatmul.bf16.gmra.mxu0 %v12855_v0  ;;  %v6230_v6 = vld [vmem:[#allocation4 + $0x5e] sm:$0x3]  ;;  %v13226_v56 = vld [vmem:[%s13832_s23 + $0x8] sm:$0xff]  ;;  %v6233_v11 = vld [vmem:[#allocation4 + $0x76] sm:$0xff] }
 0x546   : > { %7278 = vmatmul.bf16.gmra.mxu1 %v12895_v10  ;;  %7131 = vmatmul.bf16.gmra.mxu2 %v12883_v34  ;;  %v5586_v10 = vld [vmem:[#allocation4 + $0xf0] sm:$0xff] }
 0x547   : > { %6477 = vmatmul.bf16.gmra.mxu3 %v12841_v61  ;;  %6007 = vst [vmem:[#allocation4 + $0xc8] sm:$0x3] %v5975_v51  ;;  %8082 = vmatpush.bf16.msrb.mxu0 %v12932_v2 }
 0x548   : > { %6008 = vst [vmem:[#allocation4 + $0xd0] sm:$0xff] %v5976_v45 }
 0x549   : > { %v6194_v32 = vpop.f32.mrf.mxu2 }
 0x54a   : > { %v15266_v62 = vpop.f32.mrf.mxu3  ;;  %v6249_v39 = vadd.f32 %v6229_v47, %v6194_v32  ;;  %v5543_v50 = vpop.f32.mrf.mxu0  ;;  %v5587_v32 = vld [vmem:[#allocation4 + $0xf8] sm:$0xff] }
 0x54b   : > { %v15268_v53 = vpop.f32.mrf.mxu1  ;;  %v5615_v16 = vadd.f32 %v5583_v46, %v5543_v50  ;;  %v7001_v50 = vld [vmem:[#allocation5 + $0xec] sm:$0xf] }
 0x54c   : > { %6269 = vst [vmem:[#allocation4 + $0x56] sm:$0xff] %v6249_v39  ;;  %v5916_v52 = vrot.slane %v15268_v53, 6  ;;  %v6234_v53 = vld [vmem:[#allocation4 + $0x7e] sm:$0x3]  ;;  %v6748_v13 = vld [vmem:[#allocation4 + $0x8] sm:$0x3] }
 0x54d   : > { %5647 = vst [vmem:[#allocation4 + $0xd8] sm:$0xff] %v5615_v16 }
 0x54e   : > { %v5917_v26 = vsel %vm5061_vm1, %v5915_v59, %v5916_v52  ;;  %v12951_v59 = vld [vmem:[%s13854_s18 + $0x1f8] sm:$0xff] }
 0x54f   : > { %8209 = vmatpush.bf16.msra.mxu0 %v12951_v59 }
 0x551   : > { %v6196_v60 = vpop.f32.mrf.mxu2 }
 0x552   : > { %v6440_v21 = vpop.f32.mrf.mxu3  ;;  %v6250_v36 = vadd.f32 %v6230_v6, %v6196_v60  ;;  %v5546_v12 = vpop.f32.mrf.mxu0 }
 0x553   : > { %v6506_v33 = vadd.f32 %v6486_v27, %v6440_v21  ;;  %v6982_v41 = vpop.f32.mrf.mxu1  ;;  %v5616_v44 = vadd.f32 %v5584_v23, %v5546_v12  ;;  %v6235_v23 = vld [vmem:[#allocation4 + $0x86] sm:$0xff] }
 0x554   : > { %v7003_v1 = vadd.f32 %v6999_v7, %v6982_v41  ;;  %v5833_v48 = vld [vmem:[#allocation4 + $0xd8] sm:$0x3]  ;;  %6270 = vst [vmem:[#allocation4 + $0x5e] sm:$0x3] %v6250_v36  ;;  %v12858_v7 = vld [vmem:[%s13832_s23 + $0x70] sm:$0xff] }
 0x555   : > { %v5977_v9 = vadd.f32 %v5910_v28, %v5833_v48  ;;  %6526 = vst [vmem:[#allocation4 + $0x18] sm:$0xff] %v6506_v33  ;;  %v5978_v58 = vadd.f32 %v5914_v37, %v5616_v44  ;;  %6726 = vmatmul.bf16.gmra.mxu0 %v12856_v8  ;;  %v6488_v28 = vld [vmem:[#allocation4 + $0x28] sm:$0xff]  ;;  %v13227_v33 = vld [vmem:[%s13832_s23 + $0x10] sm:$0xff]  ;;  %v6483_v48 = vld [vmem:[#allocation4] sm:$0xff] }
 0x556   : > { %7816 = vmatmul.bf16.vlgmr.msra.gmra.mxu1 %v13225_v22  ;;  %7007 = vst [vmem:[#allocation5 + $0xcc] sm:$0xf] %v7003_v1  ;;  %7380 = vmatmul.bf16.vlgmr.msrb.gmra.mxu2 %v13225_v22 }
 0x557   : > { %7566 = vmatmul.bf16.vlgmr.msrb.gmra.mxu3 %v13225_v22  ;;  %6009 = vst [vmem:[#allocation4 + $0xd8] sm:$0x3] %v5977_v9  ;;  %v6503_v22 = vadd.f32 %v6483_v48, %v15250_v29 }
 0x558   : > { %6010 = vst [vmem:[#allocation4 + $0xe0] sm:$0xff] %v5978_v58 }
 0x559   : > { %v6199_v38 = vpop.f32.mrf.mxu2 }
 0x55a   : > { %v15276_v15 = vpop.f32.mrf.mxu3  ;;  %v6251_v31 = vadd.f32 %v6231_v24, %v6199_v38  ;;  %v5548_v49 = vpop.f32.mrf.mxu0 }
 0x55b   : > { %v6984_v4 = vpop.f32.mrf.mxu1  ;;  %v5617_v55 = vadd.f32 %v5585_v42, %v5548_v49  ;;  %v7002_v49 = vld [vmem:[#allocation5 + $0xfc] sm:$0xf] }
 0x55c   : > { %6271 = vst [vmem:[#allocation4 + $0x66] sm:$0xff] %v6251_v31  ;;  %v6236_v4 = vld [vmem:[#allocation4 + $0x8e] sm:$0x3] }
 0x55d   : > { %5649 = vst [vmem:[#allocation4 + $0xe8] sm:$0xff] %v5617_v55 }
 0x561   : > { %v6201_v40 = vpop.f32.mrf.mxu2 }
 0x562   : > { %v6445_v18 = vpop.f32.mrf.mxu3  ;;  %v6252_v14 = vadd.f32 %v6232_v25, %v6201_v40  ;;  %v5551_v0 = vpop.f32.mrf.mxu0 }
 0x563   : > { %v6508_v35 = vadd.f32 %v6488_v28, %v6445_v18  ;;  %v6986_v20 = vpop.f32.mrf.mxu1  ;;  %v5618_v19 = vadd.f32 %v5586_v10, %v5551_v0  ;;  %v6237_v0 = vld [vmem:[#allocation4 + $0x96] sm:$0xff] }
 0x564   : > { %v7004_v57 = vadd.f32 %v7000_v17, %v6986_v20  ;;  %v5835_v54 = vld [vmem:[#allocation4 + $0xe8] sm:$0x3]  ;;  %6272 = vst [vmem:[#allocation4 + $0x6e] sm:$0x3] %v6252_v14  ;;  %v12859_v17 = vld [vmem:[%s13832_s23 + $0x78] sm:$0xff]  ;;  %v12950_v14 = vld [vmem:[%s13854_s18 + $0x1f0] sm:$0xff] }
 0x565   : > { %v5979_v61 = vadd.f32 %v5913_v30, %v5835_v54  ;;  %6528 = vst [vmem:[#allocation4 + $0x28] sm:$0xff] %v6508_v35  ;;  %v5980_v34 = vadd.f32 %v5917_v26, %v5618_v19  ;;  %6731 = vmatmul.bf16.gmra.mxu0 %v12857_v3  ;;  %v6490_v30 = vld [vmem:[#allocation4 + $0x38] sm:$0xff]  ;;  %v6485_v26 = vld [vmem:[#allocation4 + $0x10] sm:$0xff] }
 0x566   : > { %7820 = vmatmul.bf16.gmra.mxu1 %v13226_v56  ;;  %7008 = vst [vmem:[#allocation5 + $0xdc] sm:$0xf] %v7004_v57  ;;  %7384 = vmatmul.bf16.gmra.mxu2 %v13226_v56  ;;  %v13228_v3 = vld [vmem:[%s13832_s23 + $0x18] sm:$0xff] }
 0x567   : > { %7571 = vmatmul.bf16.gmra.mxu3 %v13226_v56  ;;  %6011 = vst [vmem:[#allocation4 + $0xe8] sm:$0x3] %v5979_v61  ;;  %v6750_v56 = vld [vmem:[#allocation4 + $0x18] sm:$0x3]  ;;  %8210 = vmatpush.bf16.msra.mxu0 %v12950_v14  ;;  %v6489_v14 = vld [vmem:[#allocation4 + $0x30] sm:$0xff] }
 0x568   : > { %6012 = vst [vmem:[#allocation4 + $0xf0] sm:$0xff] %v5980_v34  ;;  %v6505_v34 = vadd.f32 %v6485_v26, %v15266_v62 }
 0x569   : > { %v6204_v63 = vpop.f32.mrf.mxu2 }
 0x56a   : > { %v15284_v51 = vpop.f32.mrf.mxu3  ;;  %v6253_v45 = vadd.f32 %v6233_v11, %v6204_v63  ;;  %v5553_v5 = vpop.f32.mrf.mxu0 }
 0x56b   : > { %v6988_v47 = vpop.f32.mrf.mxu1  ;;  %v5619_v39 = vadd.f32 %v5587_v32, %v5553_v5  ;;  %v6238_v5 = vld [vmem:[#allocation4 + $0x9e] sm:$0x3] }
 0x56c   : > { %6273 = vst [vmem:[#allocation4 + $0x76] sm:$0xff] %v6253_v45  ;;  %v6494_v47 = vld [vmem:[#allocation4 + $0x58] sm:$0xff] }
 0x56d   : > { %5651 = vst [vmem:[#allocation4 + $0xf8] sm:$0xff] %v5619_v39  ;;  %v12928_v39 = vld [vmem:[%s13832_s23 + $0x60] sm:$0xff] }
 0x571   : > { %v6206_v46 = vpop.f32.mrf.mxu2 }
 0x572   : > { %v6450_v16 = vpop.f32.mrf.mxu3  ;;  %v6254_v60 = vadd.f32 %v6234_v53, %v6206_v46  ;;  %v6697_v21 = vpop.f32.mrf.mxu0 }
 0x573   : > { %v6510_v6 = vadd.f32 %v6490_v30, %v6450_v16  ;;  %v6990_v27 = vpop.f32.mrf.mxu1  ;;  %v6787_v9 = vrot.slane %v6697_v21, 6  ;;  %v13229_v16 = vld [vmem:[%s13832_s23 + $0x20] sm:$0xff]  ;;  %v12949_v30 = vld [vmem:[%s13854_s18 + $0x1e8] sm:$0xff] }
 0x574   : > { %v7005_v8 = vadd.f32 %v7001_v50, %v6990_v27  ;;  %v5837_v43 = vld [vmem:[#allocation4 + $0xf8] sm:$0x3]  ;;  %6274 = vst [vmem:[#allocation4 + $0x7e] sm:$0x3] %v6254_v60  ;;  %8211 = vmatpush.bf16.msra.mxu0 %v12949_v30  ;;  %v12948_v60 = vld [vmem:[%s13854_s18 + $0x1e0] sm:$0xff] }
 0x575   : > { %v5981_v36 = vadd.f32 %v5916_v52, %v5837_v43  ;;  %6530 = vst [vmem:[#allocation4 + $0x38] sm:$0xff] %v6510_v6  ;;  %6736 = vmatmul.bf16.gmra.mxu0 %v12858_v7  ;;  %v6492_v52 = vld [vmem:[#allocation4 + $0x48] sm:$0xff]  ;;  %v7137_v7 = vld [vmem:[#allocation5 + $0xc0] sm:$0xff] }
 0x576   : > { %7824 = vmatmul.bf16.gmra.mxu1 %v13227_v33  ;;  %7009 = vst [vmem:[#allocation5 + $0xec] sm:$0xf] %v7005_v8  ;;  %7388 = vmatmul.bf16.gmra.mxu2 %v13227_v33 }
 0x577   : > { %7576 = vmatmul.bf16.gmra.mxu3 %v13227_v33  ;;  %6013 = vst [vmem:[#allocation4 + $0xf8] sm:$0x3] %v5981_v36  ;;  %v6487_v36 = vld [vmem:[#allocation4 + $0x20] sm:$0xff] }
 0x578   : > { %8212 = vmatpush.bf16.msra.mxu0 %v12948_v60 }
 0x579   : > { %v6209_v12 = vpop.f32.mrf.mxu2 }
 0x57a   : > { %v15288_v41 = vpop.f32.mrf.mxu3  ;;  %v6255_v44 = vadd.f32 %v6235_v23, %v6209_v12  ;;  %v6699_v1 = vpop.f32.mrf.mxu0  ;;  %v6507_v23 = vadd.f32 %v6487_v36, %v15276_v15 }
 0x57b   : > { %v6992_v37 = vpop.f32.mrf.mxu1  ;;  %v6788_v58 = vrot.slane %v6699_v1, 6 }
 0x57c   : > { %6275 = vst [vmem:[#allocation4 + $0x86] sm:$0xff] %v6255_v44  ;;  %v6752_v44 = vld [vmem:[#allocation4 + $0x28] sm:$0x3] }
 0x57d   : > { %v6789_v38 = vsel %vm5061_vm1, %v6787_v9, %v6788_v58  ;;  %v6838_v24 = vadd.f32 %v6788_v58, %v6748_v13  ;;  %v6496_v58 = vld [vmem:[#allocation4 + $0x68] sm:$0xff] }
 0x57e   : > { %v6837_v31 = vadd.f32 %v6789_v38, %v6503_v22  ;;  %v7138_v13 = vld [vmem:[#allocation5 + $0xc8] sm:$0xff] }
 0x57f   : > { %6858 = vst [vmem:[#allocation4 + $0x8] sm:$0x3] %v6838_v24  ;;  %v12929_v38 = vld [vmem:[%s13832_s23 + $0x68] sm:$0xff] }
 0x580   : > { %6857 = vst [vmem:[#allocation4] sm:$0xff] %v6837_v31 }
 0x581   : > { %v6211_v42 = vpop.f32.mrf.mxu2 }
 0x582   : > { %v6455_v55 = vpop.f32.mrf.mxu3  ;;  %v6256_v40 = vadd.f32 %v6236_v4, %v6211_v42  ;;  %v6702_v29 = vpop.f32.mrf.mxu0 }
 0x583   : > { %v6512_v25 = vadd.f32 %v6492_v52, %v6455_v55  ;;  %v6994_v18 = vpop.f32.mrf.mxu1  ;;  %v6790_v54 = vrot.slane %v6702_v29, 6  ;;  %v13230_v52 = vld [vmem:[%s13832_s23 + $0x28] sm:$0xff] }
 0x584   : > { %v7006_v28 = vadd.f32 %v7002_v49, %v6994_v18  ;;  %6276 = vst [vmem:[#allocation4 + $0x8e] sm:$0x3] %v6256_v40  ;;  %v7139_v40 = vld [vmem:[#allocation5 + $0xd0] sm:$0xff] }
 0x585   : > { %6532 = vst [vmem:[#allocation4 + $0x48] sm:$0xff] %v6512_v25  ;;  %6741 = vmatmul.bf16.gmra.mxu0 %v12859_v17  ;;  %v12947_v17 = vld [vmem:[%s13854_s18 + $0x1d8] sm:$0xff]  ;;  %v12946_v25 = vld [vmem:[%s13854_s18 + $0x1d0] sm:$0xff] }
 0x586   : > { %7828 = vmatmul.bf16.gmra.mxu1 %v13228_v3  ;;  %7010 = vst [vmem:[#allocation5 + $0xfc] sm:$0xf] %v7006_v28  ;;  %7392 = vmatmul.bf16.gmra.mxu2 %v13228_v3 }
 0x587   : > { %7581 = vmatmul.bf16.gmra.mxu3 %v13228_v3  ;;  %8213 = vmatpush.bf16.msra.mxu0 %v12947_v17  ;;  %v12962_v17 = vld [vmem:[%s13854_s18 + $0x230] sm:$0xff] }
 0x589   : > { %v6214_v35 = vpop.f32.mrf.mxu2 }
 0x58a   : > { %v15296_v10 = vpop.f32.mrf.mxu3  ;;  %v6257_v20 = vadd.f32 %v6237_v0, %v6214_v35  ;;  %v6704_v19 = vpop.f32.mrf.mxu0 }
 0x58b   : > { %v6996_v57 = vpop.f32.mrf.mxu1  ;;  %v6791_v61 = vrot.slane %v6704_v19, 6  ;;  %v6754_v19 = vld [vmem:[#allocation4 + $0x38] sm:$0x3]  ;;  %8214 = vmatpush.bf16.msra.mxu0 %v12946_v25 }
 0x58c   : > { %6277 = vst [vmem:[#allocation4 + $0x96] sm:$0xff] %v6257_v20  ;;  %v6509_v20 = vadd.f32 %v6489_v14, %v15284_v51 }
 0x58d   : > { %v6792_v2 = vsel %vm5061_vm1, %v6790_v54, %v6791_v61  ;;  %v6840_v63 = vadd.f32 %v6791_v61, %v6750_v56  ;;  %v7140_v61 = vld [vmem:[#allocation5 + $0xd8] sm:$0xff] }
 0x58e   : > { %v6839_v11 = vadd.f32 %v6792_v2, %v6505_v34  ;;  %v6498_v56 = vld [vmem:[#allocation4 + $0x78] sm:$0xff] }
 0x58f   : > { %6860 = vst [vmem:[#allocation4 + $0x18] sm:$0x3] %v6840_v63  ;;  %v12930_v63 = vld [vmem:[%s13832_s23 + $0x70] sm:$0xff] }
 0x590   : > { %6859 = vst [vmem:[#allocation4 + $0x10] sm:$0xff] %v6839_v11  ;;  %v12945_v11 = vld [vmem:[%s13854_s18 + $0x1c8] sm:$0xff] }
 0x591   : > { %v6216_v45 = vpop.f32.mrf.mxu2  ;;  %8215 = vmatpush.bf16.msra.mxu0 %v12945_v11 }
 0x592   : > { %v6460_v32 = vpop.f32.mrf.mxu3  ;;  %v6258_v50 = vadd.f32 %v6238_v5, %v6216_v45  ;;  %v6707_v62 = vpop.f32.mrf.mxu0 }
 0x593   : > { %v6514_v46 = vadd.f32 %v6494_v47, %v6460_v32  ;;  %v7267_v53 = vpop.f32.mrf.mxu1  ;;  %v6793_v33 = vrot.slane %v6707_v62, 6  ;;  %v12944_v62 = vld [vmem:[%s13854_s18 + $0x1c0] sm:$0xff] }
 0x594   : > { %6278 = vst [vmem:[#allocation4 + $0x9e] sm:$0x3] %v6258_v50  ;;  %v7141_v53 = vld [vmem:[#allocation5 + $0xe0] sm:$0xff] }
 0x595   : > { %6534 = vst [vmem:[#allocation4 + $0x58] sm:$0xff] %v6514_v46  ;;  %8083 = vmatmul.bf16.vlgmr.msrb.gmra.mxu0 %v12928_v39  ;;  %v13231_v46 = vld [vmem:[%s13832_s23 + $0x30] sm:$0xff] }
 0x596   : > { %7832 = vmatmul.bf16.gmra.mxu1 %v13229_v16  ;;  %7396 = vmatmul.bf16.gmra.mxu2 %v13229_v16 }
 0x597   : > { %7586 = vmatmul.bf16.gmra.mxu3 %v13229_v16  ;;  %8216 = vmatpush.bf16.msra.mxu0 %v12944_v62  ;;  %v12960_v62 = vld [vmem:[%s13854_s18 + $0x220] sm:$0xff] }
 0x599   : > { %v7117_v21 = vpop.f32.mrf.mxu2 }
 0x59a   : > { %v15304_v6 = vpop.f32.mrf.mxu3  ;;  %v7145_v27 = vadd.f32 %v7137_v7, %v7117_v21  ;;  %v6709_v8 = vpop.f32.mrf.mxu0 }
 0x59b   : > { %v7268_v43 = vpop.f32.mrf.mxu1  ;;  %v6794_v12 = vrot.slane %v6709_v8, 6 }
 0x59c   : > { %7153 = vst [vmem:[#allocation5 + $0xc0] sm:$0xff] %v7145_v27  ;;  %v7291_v24 = vrot.slane %v7268_v43, 4  ;;  %v6491_v27 = vld [vmem:[#allocation4 + $0x40] sm:$0xff] }
 0x59d   : > { %v6795_v1 = vsel %vm5061_vm1, %v6793_v33, %v6794_v12  ;;  %v6842_v37 = vadd.f32 %v6794_v12, %v6752_v44  ;;  %v6511_v36 = vadd.f32 %v6491_v27, %v15288_v41  ;;  %v6756_v33 = vld [vmem:[#allocation4 + $0x48] sm:$0x3] }
 0x59e   : > { %v6841_v48 = vadd.f32 %v6795_v1, %v6507_v23 }
 0x59f   : > { %6862 = vst [vmem:[#allocation4 + $0x28] sm:$0x3] %v6842_v37  ;;  %v6500_v37 = vld [vmem:[#allocation4 + $0x88] sm:$0xff] }
 0x5a0   : > { %6861 = vst [vmem:[#allocation4 + $0x20] sm:$0xff] %v6841_v48 }
 0x5a1   : > { %v7119_v22 = vpop.f32.mrf.mxu2 }
 0x5a2   : > { %v6465_v9 = vpop.f32.mrf.mxu3  ;;  %v7146_v49 = vadd.f32 %v7138_v13, %v7119_v22  ;;  %v6712_v15 = vpop.f32.mrf.mxu0 }
 0x5a3   : > { %v6516_v31 = vadd.f32 %v6496_v58, %v6465_v9  ;;  %v7271_v42 = vpop.f32.mrf.mxu1  ;;  %v7283_v4 = vld [vmem:[#allocation5 + $0xc0] sm:$0xf]  ;;  %v6796_v35 = vrot.slane %v6712_v15, 6  ;;  %v7142_v9 = vld [vmem:[#allocation5 + $0xe8] sm:$0xff]  ;;  %v12931_v58 = vld [vmem:[%s13832_s23 + $0x78] sm:$0xff] }
 0x5a4   : > { %v7299_v55 = vadd.f32 %v7291_v24, %v7283_v4  ;;  %7154 = vst [vmem:[#allocation5 + $0xc8] sm:$0xff] %v7146_v49  ;;  %v13232_v15 = vld [vmem:[%s13832_s23 + $0x38] sm:$0xff]  ;;  %v7143_v42 = vld [vmem:[#allocation5 + $0xf0] sm:$0xff] }
 0x5a5   : > { %6536 = vst [vmem:[#allocation4 + $0x68] sm:$0xff] %v6516_v31  ;;  %8087 = vmatmul.bf16.gmra.mxu0 %v12929_v38  ;;  %v12963_v4 = vld [vmem:[%s13854_s18 + $0x238] sm:$0xff] }
 0x5a6   : > { %7836 = vmatmul.bf16.gmra.mxu1 %v13230_v52  ;;  %7303 = vst [vmem:[#allocation5 + $0xc0] sm:$0xf] %v7299_v55  ;;  %7400 = vmatmul.bf16.gmra.mxu2 %v13230_v52 }
 0x5a7   : > { %7591 = vmatmul.bf16.gmra.mxu3 %v13230_v52  ;;  %8359 = vmatpush.bf16.msrb.mxu0 %v12963_v4  ;;  %v12958_v4 = vld [vmem:[%s13854_s18 + $0x210] sm:$0xff] }
 0x5a9   : > { %v7122_v18 = vpop.f32.mrf.mxu2 }
 0x5aa   : > { %v15312_v29 = vpop.f32.mrf.mxu3  ;;  %v7147_v28 = vadd.f32 %v7139_v40, %v7122_v18  ;;  %v6714_v3 = vpop.f32.mrf.mxu0 }
 0x5ab   : > { %v7272_v59 = vpop.f32.mrf.mxu1  ;;  %v6797_v0 = vrot.slane %v6714_v3, 6  ;;  %8360 = vmatpush.bf16.msrb.mxu0 %v12962_v17 }
 0x5ac   : > { %7155 = vst [vmem:[#allocation5 + $0xd0] sm:$0xff] %v7147_v28  ;;  %v7292_v45 = vrot.slane %v7272_v59, 4  ;;  %v6493_v28 = vld [vmem:[#allocation4 + $0x50] sm:$0xff] }
 0x5ad   : > { %v6798_v57 = vsel %vm5061_vm1, %v6796_v35, %v6797_v0  ;;  %v6844_v26 = vadd.f32 %v6797_v0, %v6754_v19  ;;  %v6513_v14 = vadd.f32 %v6493_v28, %v15296_v10  ;;  %v6758_v35 = vld [vmem:[#allocation4 + $0x58] sm:$0x3] }
 0x5ae   : > { %v6843_v54 = vadd.f32 %v6798_v57, %v6509_v20 }
 0x5af   : > { %6864 = vst [vmem:[#allocation4 + $0x38] sm:$0x3] %v6844_v26  ;;  %v6502_v26 = vld [vmem:[#allocation4 + $0x98] sm:$0xff] }
 0x5b0   : > { %6863 = vst [vmem:[#allocation4 + $0x30] sm:$0xff] %v6843_v54 }
 0x5b1   : > { %v7124_v2 = vpop.f32.mrf.mxu2 }
 0x5b2   : > { %v6470_v34 = vpop.f32.mrf.mxu3  ;;  %v7148_v51 = vadd.f32 %v7140_v61, %v7124_v2  ;;  %v6717_v32 = vpop.f32.mrf.mxu0  ;;  %v7144_v61 = vld [vmem:[#allocation5 + $0xf8] sm:$0xff] }
 0x5b3   : > { %v6518_v5 = vadd.f32 %v6498_v56, %v6470_v34  ;;  %v7275_v47 = vpop.f32.mrf.mxu1  ;;  %v7284_v39 = vld [vmem:[#allocation5 + $0xd0] sm:$0xf]  ;;  %v6799_v8 = vrot.slane %v6717_v32, 6  ;;  %v12940_v34 = vld [vmem:[%s13832_s23 + $0x60] sm:$0xff]  ;;  %v7445_v32 = vld [vmem:[#allocation5 + $0xc] sm:$0xf] }
 0x5b4   : > { %v7300_v50 = vadd.f32 %v7292_v45, %v7284_v39  ;;  %7156 = vst [vmem:[#allocation5 + $0xd8] sm:$0xff] %v7148_v51  ;;  %v13233_v51 = vld [vmem:[%s13832_s23 + $0x40] sm:$0xff]  ;;  %v12961_v39 = vld [vmem:[%s13854_s18 + $0x228] sm:$0xff] }
 0x5b5   : > { %6538 = vst [vmem:[#allocation4 + $0x78] sm:$0xff] %v6518_v5  ;;  %8091 = vmatmul.bf16.gmra.mxu0 %v12930_v63  ;;  %v7647_v47 = vld [vmem:[#allocation5] sm:$0xff] }
 0x5b6   : > { %7840 = vmatmul.bf16.gmra.mxu1 %v13231_v46  ;;  %7304 = vst [vmem:[#allocation5 + $0xd0] sm:$0xf] %v7300_v50  ;;  %7404 = vmatmul.bf16.gmra.mxu2 %v13231_v46 }
 0x5b7   : > { %7596 = vmatmul.bf16.gmra.mxu3 %v13231_v46  ;;  %8361 = vmatpush.bf16.msrb.mxu0 %v12961_v39 }
 0x5b9   : > { %v7127_v30 = vpop.f32.mrf.mxu2 }
 0x5ba   : > { %v15320_v16 = vpop.f32.mrf.mxu3  ;;  %v7149_v7 = vadd.f32 %v7141_v53, %v7127_v30  ;;  %v6719_v60 = vpop.f32.mrf.mxu0 }
 0x5bb   : > { %v7276_v21 = vpop.f32.mrf.mxu1  ;;  %v6800_v43 = vrot.slane %v6719_v60, 6  ;;  %8362 = vmatpush.bf16.msrb.mxu0 %v12960_v62 }
 0x5bc   : > { %7157 = vst [vmem:[#allocation5 + $0xe0] sm:$0xff] %v7149_v7  ;;  %v7293_v22 = vrot.slane %v7276_v21, 4  ;;  %v6495_v21 = vld [vmem:[#allocation4 + $0x60] sm:$0xff] }
 0x5bd   : > { %v6801_v12 = vsel %vm5061_vm1, %v6799_v8, %v6800_v43  ;;  %v6846_v23 = vadd.f32 %v6800_v43, %v6756_v33  ;;  %v6515_v43 = vadd.f32 %v6495_v21, %v15304_v6 }
 0x5be   : > { %v6845_v44 = vadd.f32 %v6801_v12, %v6511_v36  ;;  %v6760_v36 = vld [vmem:[#allocation4 + $0x68] sm:$0x3] }
 0x5bf   : > { %6866 = vst [vmem:[#allocation4 + $0x48] sm:$0x3] %v6846_v23 }
 0x5c0   : > { %6865 = vst [vmem:[#allocation4 + $0x40] sm:$0xff] %v6845_v44 }
 0x5c1   : > { %v7129_v48 = vpop.f32.mrf.mxu2 }
 0x5c2   : > { %v6475_v1 = vpop.f32.mrf.mxu3  ;;  %v7150_v38 = vadd.f32 %v7142_v9, %v7129_v48  ;;  %v6722_v24 = vpop.f32.mrf.mxu0 }
 0x5c3   : > { %v6520_v13 = vadd.f32 %v6500_v37, %v6475_v1  ;;  %v7279_v41 = vpop.f32.mrf.mxu1  ;;  %v7285_v31 = vld [vmem:[#allocation5 + $0xe0] sm:$0xf]  ;;  %v6802_v3 = vrot.slane %v6722_v24, 6  ;;  %v12941_v37 = vld [vmem:[%s13832_s23 + $0x68] sm:$0xff] }
 0x5c4   : > { %v7301_v49 = vadd.f32 %v7293_v22, %v7285_v31  ;;  %7158 = vst [vmem:[#allocation5 + $0xe8] sm:$0xff] %v7150_v38  ;;  %v13234_v24 = vld [vmem:[%s13832_s23 + $0x48] sm:$0xff]  ;;  %v7446_v41 = vld [vmem:[#allocation5 + $0x1c] sm:$0xf]  ;;  %v7649_v31 = vld [vmem:[#allocation5 + $0x10] sm:$0xff] }
 0x5c5   : > { %6540 = vst [vmem:[#allocation4 + $0x88] sm:$0xff] %v6520_v13  ;;  %8095 = vmatmul.bf16.gmra.mxu0 %v12931_v58 }
 0x5c6   : > { %7844 = vmatmul.bf16.gmra.mxu1 %v13232_v15  ;;  %7305 = vst [vmem:[#allocation5 + $0xe0] sm:$0xf] %v7301_v49  ;;  %7408 = vmatmul.bf16.gmra.mxu2 %v13232_v15  ;;  %v12959_v49 = vld [vmem:[%s13854_s18 + $0x218] sm:$0xff] }
 0x5c7   : > { %7601 = vmatmul.bf16.gmra.mxu3 %v13232_v15  ;;  %8363 = vmatpush.bf16.msrb.mxu0 %v12959_v49 }
 0x5c9   : > { %v7132_v52 = vpop.f32.mrf.mxu2 }
 0x5ca   : > { %v15327_v55 = vpop.f32.mrf.mxu3  ;;  %v7151_v40 = vadd.f32 %v7143_v42, %v7132_v52  ;;  %v6724_v25 = vpop.f32.mrf.mxu0 }
 0x5cb   : > { %v7280_v18 = vpop.f32.mrf.mxu1  ;;  %v6803_v59 = vrot.slane %v6724_v25, 6  ;;  %8364 = vmatpush.bf16.msrb.mxu0 %v12958_v4 }
 0x5cc   : > { %7159 = vst [vmem:[#allocation5 + $0xf0] sm:$0xff] %v7151_v40  ;;  %v7294_v56 = vrot.slane %v7280_v18, 4  ;;  %v6497_v18 = vld [vmem:[#allocation4 + $0x70] sm:$0xff]  ;;  %v6764_v21 = vld [vmem:[#allocation4 + $0x88] sm:$0x3] }
 0x5cd   : > { %v6804_v0 = vsel %vm5061_vm1, %v6802_v3, %v6803_v59  ;;  %v6848_v20 = vadd.f32 %v6803_v59, %v6758_v35  ;;  %v6517_v59 = vadd.f32 %v6497_v18, %v15312_v29 }
 0x5ce   : > { %v6847_v19 = vadd.f32 %v6804_v0, %v6513_v14  ;;  %v6762_v14 = vld [vmem:[#allocation4 + $0x78] sm:$0x3] }
 0x5cf   : > { %6868 = vst [vmem:[#allocation4 + $0x58] sm:$0x3] %v6848_v20 }
 0x5d0   : > { %6867 = vst [vmem:[#allocation4 + $0x50] sm:$0xff] %v6847_v19 }
 0x5d1   : > { %v7134_v54 = vpop.f32.mrf.mxu2 }
 0x5d2   : > { %v6480_v57 = vpop.f32.mrf.mxu3  ;;  %v7152_v63 = vadd.f32 %v7144_v61, %v7134_v54  ;;  %v6727_v10 = vpop.f32.mrf.mxu0  ;;  %v12957_v54 = vld [vmem:[%s13854_s18 + $0x208] sm:$0xff] }
 0x5d3   : > { %v6522_v2 = vadd.f32 %v6502_v26, %v6480_v57  ;;  %v7817_v11 = vpop.f32.mrf.mxu1  ;;  %v7286_v45 = vld [vmem:[#allocation5 + $0xf0] sm:$0xf]  ;;  %v6805_v27 = vrot.slane %v6727_v10, 6  ;;  %8365 = vmatpush.bf16.msrb.mxu0 %v12957_v54 }
 0x5d4   : > { %v7302_v5 = vadd.f32 %v7294_v56, %v7286_v45  ;;  %7160 = vst [vmem:[#allocation5 + $0xf8] sm:$0xff] %v7152_v63  ;;  %v12942_v26 = vld [vmem:[%s13832_s23 + $0x70] sm:$0xff]  ;;  %v12956_v45 = vld [vmem:[%s13854_s18 + $0x200] sm:$0xff] }
 0x5d5   : > { %6542 = vst [vmem:[#allocation4 + $0x98] sm:$0xff] %v6522_v2  ;;  %8217 = vmatmul.bf16.vlgmr.msra.gmra.mxu0 %v12940_v34  ;;  %v13235_v11 = vld [vmem:[%s13832_s23 + $0x50] sm:$0xff] }
 0x5d6   : > { %7848 = vmatmul.bf16.gmra.mxu1 %v13233_v51  ;;  %7306 = vst [vmem:[#allocation5 + $0xf0] sm:$0xf] %v7302_v5  ;;  %7412 = vmatmul.bf16.gmra.mxu2 %v13233_v51  ;;  %v7447_v5 = vld [vmem:[#allocation5 + $0x2c] sm:$0xf] }
 0x5d7   : > { %7606 = vmatmul.bf16.gmra.mxu3 %v13233_v51  ;;  %v7651_v51 = vld [vmem:[#allocation5 + $0x20] sm:$0xff]  ;;  %8366 = vmatpush.bf16.msrb.mxu0 %v12956_v45 }
 0x5d9   : > { %v7381_v50 = vpop.f32.mrf.mxu2 }
 0x5da   : > { %v7567_v46 = vpop.f32.mrf.mxu3  ;;  %v7461_v53 = vadd.f32 %v7445_v32, %v7381_v50  ;;  %v6729_v7 = vpop.f32.mrf.mxu0 }
 0x5db   : > { %v7679_v30 = vadd.f32 %v7647_v47, %v7567_v46  ;;  %v7818_v60 = vpop.f32.mrf.mxu1  ;;  %v6806_v8 = vrot.slane %v6729_v7, 6 }
 0x5dc   : > { %7477 = vst [vmem:[#allocation5 + $0xc] sm:$0xf] %v7461_v53  ;;  %v7913_v58 = vrot.slane %v7818_v60, 4  ;;  %v6499_v53 = vld [vmem:[#allocation4 + $0x80] sm:$0xff] }
 0x5dd   : > { %7711 = vst [vmem:[#allocation5] sm:$0xff] %v7679_v30  ;;  %v6807_v33 = vsel %vm5061_vm1, %v6805_v27, %v6806_v8  ;;  %v6850_v12 = vadd.f32 %v6806_v8, %v6760_v36  ;;  %v6519_v60 = vadd.f32 %v6499_v53, %v15320_v16 }
 0x5de   : > { %v6849_v23 = vadd.f32 %v6807_v33, %v6515_v43 }
 0x5df   : > { %6870 = vst [vmem:[#allocation4 + $0x68] sm:$0x3] %v6850_v12  ;;  %v12943_v12 = vld [vmem:[%s13832_s23 + $0x78] sm:$0xff] }
 0x5e0   : > { %6869 = vst [vmem:[#allocation4 + $0x60] sm:$0xff] %v6849_v23 }
 0x5e1   : > { %v7383_v44 = vpop.f32.mrf.mxu2 }
 0x5e2   : > { %v7569_v1 = vpop.f32.mrf.mxu3  ;;  %v6732_v48 = vpop.f32.mrf.mxu0 }
 0x5e3   : > { %v7821_v9 = vpop.f32.mrf.mxu1  ;;  %v7648_v22 = vld [vmem:[#allocation5 + $0x8] sm:$0xff]  ;;  %v6808_v28 = vrot.slane %v6732_v48, 6 }
 0x5e4   : > { %v7881_v6 = vld [vmem:[#allocation5] sm:$0xf]  ;;  %v7680_v13 = vadd.f32 %v7648_v22, %v7569_v1  ;;  %v7448_v22 = vld [vmem:[#allocation5 + $0x3c] sm:$0xf] }
 0x5e5   : > { %v7945_v38 = vadd.f32 %v7913_v58, %v7881_v6  ;;  %8222 = vmatmul.bf16.gmra.mxu0 %v12941_v37  ;;  %v13236_v58 = vld [vmem:[%s13832_s23 + $0x58] sm:$0xff]  ;;  %v7653_v6 = vld [vmem:[#allocation5 + $0x30] sm:$0xff] }
 0x5e6   : > { %7852 = vmatmul.bf16.gmra.mxu1 %v13234_v24  ;;  %7712 = vst [vmem:[#allocation5 + $0x8] sm:$0xff] %v7680_v13  ;;  %7416 = vmatmul.bf16.gmra.mxu2 %v13234_v24 }
 0x5e7   : > { %7611 = vmatmul.bf16.gmra.mxu3 %v13234_v24  ;;  %7961 = vst [vmem:[#allocation5] sm:$0xf] %v7945_v38 }
 0x5e9   : > { %v7385_v15 = vpop.f32.mrf.mxu2 }
 0x5ea   : > { %v7572_v42 = vpop.f32.mrf.mxu3  ;;  %v7462_v52 = vadd.f32 %v7446_v41, %v7385_v15  ;;  %v6734_v40 = vpop.f32.mrf.mxu0  ;;  %v6501_v15 = vld [vmem:[#allocation4 + $0x90] sm:$0xff] }
 0x5eb   : > { %v7681_v17 = vadd.f32 %v7649_v31, %v7572_v42  ;;  %v7822_v25 = vpop.f32.mrf.mxu1  ;;  %v6809_v3 = vrot.slane %v6734_v40, 6 }
 0x5ec   : > { %7478 = vst [vmem:[#allocation5 + $0x1c] sm:$0xf] %v7462_v52  ;;  %v7914_v56 = vrot.slane %v7822_v25, 4  ;;  %v6521_v52 = vadd.f32 %v6501_v15, %v15327_v55  ;;  %v7659_v15 = vld [vmem:[#allocation5 + $0x60] sm:$0xff] }
 0x5ed   : > { %7713 = vst [vmem:[#allocation5 + $0x10] sm:$0xff] %v7681_v17  ;;  %v6810_v35 = vsel %vm5061_vm1, %v6808_v28, %v6809_v3  ;;  %v6852_v0 = vadd.f32 %v6809_v3, %v6762_v14  ;;  %v6766_v17 = vld [vmem:[#allocation4 + $0x98] sm:$0x3] }
 0x5ee   : > { %v6851_v20 = vadd.f32 %v6810_v35, %v6517_v59  ;;  %v12952_v59 = vld [vmem:[%s13832_s23 + $0x60] sm:$0xff] }
 0x5ef   : > { %6872 = vst [vmem:[#allocation4 + $0x78] sm:$0x3] %v6852_v0  ;;  %v8100_v0 = vld [vmem:[#allocation5 + $0xc] sm:$0xf] }
 0x5f0   : > { %6871 = vst [vmem:[#allocation4 + $0x70] sm:$0xff] %v6851_v20 }
 0x5f1   : > { %v7387_v19 = vpop.f32.mrf.mxu2 }
 0x5f2   : > { %v7574_v57 = vpop.f32.mrf.mxu3  ;;  %v6737_v61 = vpop.f32.mrf.mxu0 }
 0x5f3   : > { %v7825_v34 = vpop.f32.mrf.mxu1  ;;  %v7650_v29 = vld [vmem:[#allocation5 + $0x18] sm:$0xff]  ;;  %v6811_v30 = vrot.slane %v6737_v61, 6  ;;  %v13237_v61 = vld [vmem:[%s13832_s23 + $0x60] sm:$0xff] }
 0x5f4   : > { %v7882_v2 = vld [vmem:[#allocation5 + $0x10] sm:$0xf]  ;;  %v7682_v63 = vadd.f32 %v7650_v29, %v7574_v57  ;;  %v7449_v34 = vld [vmem:[#allocation5 + $0x4c] sm:$0xf] }
 0x5f5   : > { %v7946_v10 = vadd.f32 %v7914_v56, %v7882_v2  ;;  %8227 = vmatmul.bf16.gmra.mxu0 %v12942_v26  ;;  %v7655_v56 = vld [vmem:[#allocation5 + $0x40] sm:$0xff] }
 0x5f6   : > { %7856 = vmatmul.bf16.gmra.mxu1 %v13235_v11  ;;  %7714 = vst [vmem:[#allocation5 + $0x18] sm:$0xff] %v7682_v63  ;;  %7420 = vmatmul.bf16.gmra.mxu2 %v13235_v11 }
 0x5f7   : > { %7616 = vmatmul.bf16.gmra.mxu3 %v13235_v11  ;;  %7962 = vst [vmem:[#allocation5 + $0x10] sm:$0xf] %v7946_v10 }
 0x5f9   : > { %v7389_v32 = vpop.f32.mrf.mxu2 }
 0x5fa   : > { %v7577_v47 = vpop.f32.mrf.mxu3  ;;  %v7463_v39 = vadd.f32 %v7447_v5, %v7389_v32  ;;  %v6739_v46 = vpop.f32.mrf.mxu0  ;;  %v12953_v32 = vld [vmem:[%s13832_s23 + $0x68] sm:$0xff] }
 0x5fb   : > { %v7683_v50 = vadd.f32 %v7651_v51, %v7577_v47  ;;  %v7826_v62 = vpop.f32.mrf.mxu1  ;;  %v6812_v7 = vrot.slane %v6739_v46, 6 }
 0x5fc   : > { %7479 = vst [vmem:[#allocation5 + $0x2c] sm:$0xf] %v7463_v39  ;;  %v7915_v1 = vrot.slane %v7826_v62, 4 }
 0x5fd   : > { %7715 = vst [vmem:[#allocation5 + $0x20] sm:$0xff] %v7683_v50  ;;  %v6813_v27 = vsel %vm5061_vm1, %v6811_v30, %v6812_v7  ;;  %v6854_v8 = vadd.f32 %v6812_v7, %v6764_v21  ;;  %v8101_v50 = vld [vmem:[#allocation5 + $0x1c] sm:$0xf]  ;;  %v13238_v21 = vld [vmem:[%s13832_s23 + $0x68] sm:$0xff] }
 0x5fe   : > { %v6853_v43 = vadd.f32 %v6813_v27, %v6519_v60  ;;  %v7450_v27 = vld [vmem:[#allocation5 + $0x5c] sm:$0xf] }
 0x5ff   : > { %6874 = vst [vmem:[#allocation4 + $0x88] sm:$0x3] %v6854_v8  ;;  %v7657_v8 = vld [vmem:[#allocation5 + $0x50] sm:$0xff] }
 0x600   : > { %6873 = vst [vmem:[#allocation4 + $0x80] sm:$0xff] %v6853_v43 }
 0x601   : > { %v7391_v36 = vpop.f32.mrf.mxu2 }
 0x602   : > { %v7579_v33 = vpop.f32.mrf.mxu3  ;;  %v6742_v23 = vpop.f32.mrf.mxu0 }
 0x603   : > { %v7829_v44 = vpop.f32.mrf.mxu1  ;;  %v7652_v37 = vld [vmem:[#allocation5 + $0x28] sm:$0xff]  ;;  %v6814_v42 = vrot.slane %v6742_v23, 6 }
 0x604   : > { %v7883_v48 = vld [vmem:[#allocation5 + $0x20] sm:$0xf]  ;;  %v7684_v9 = vadd.f32 %v7652_v37, %v7579_v33 }
 0x605   : > { %v7947_v16 = vadd.f32 %v7915_v1, %v7883_v48  ;;  %8232 = vmatmul.bf16.gmra.mxu0 %v12943_v12  ;;  %v12954_v48 = vld [vmem:[%s13832_s23 + $0x70] sm:$0xff] }
 0x606   : > { %7860 = vmatmul.bf16.gmra.mxu1 %v13236_v58  ;;  %7716 = vst [vmem:[#allocation5 + $0x28] sm:$0xff] %v7684_v9  ;;  %7424 = vmatmul.bf16.gmra.mxu2 %v13236_v58 }
 0x607   : > { %7621 = vmatmul.bf16.gmra.mxu3 %v13236_v58  ;;  %7963 = vst [vmem:[#allocation5 + $0x20] sm:$0xf] %v7947_v16 }
 0x609   : > { %v7393_v13 = vpop.f32.mrf.mxu2 }
 0x60a   : > { %v7582_v38 = vpop.f32.mrf.mxu3  ;;  %v7464_v24 = vadd.f32 %v7448_v22, %v7393_v13  ;;  %v6744_v31 = vpop.f32.mrf.mxu0 }
 0x60b   : > { %v7685_v41 = vadd.f32 %v7653_v6, %v7582_v38  ;;  %v7830_v49 = vpop.f32.mrf.mxu1  ;;  %v6815_v4 = vrot.slane %v6744_v31, 6  ;;  %v13239_v31 = vld [vmem:[%s13832_s23 + $0x70] sm:$0xff] }
 0x60c   : > { %7480 = vst [vmem:[#allocation5 + $0x3c] sm:$0xf] %v7464_v24  ;;  %v7916_v20 = vrot.slane %v7830_v49, 4  ;;  %v7451_v49 = vld [vmem:[#allocation5 + $0x6c] sm:$0xf] }
 0x60d   : > { %7717 = vst [vmem:[#allocation5 + $0x30] sm:$0xff] %v7685_v41  ;;  %v6816_v40 = vsel %vm5061_vm1, %v6814_v42, %v6815_v4  ;;  %v6856_v25 = vadd.f32 %v6815_v4, %v6766_v17  ;;  %v8102_v58 = vld [vmem:[#allocation5 + $0x2c] sm:$0xf] }
 0x60e   : > { %v6855_v18 = vadd.f32 %v6816_v40, %v6521_v52 }
 0x60f   : > { %6876 = vst [vmem:[#allocation4 + $0x98] sm:$0x3] %v6856_v25 }
 0x610   : > { %6875 = vst [vmem:[#allocation4 + $0x90] sm:$0xff] %v6855_v18 }
 0x611   : > { %v7395_v28 = vpop.f32.mrf.mxu2 }
 0x612   : > { %v7584_v3 = vpop.f32.mrf.mxu3  ;;  %v8084_v35 = vpop.f32.mrf.mxu0 }
 0x613   : > { %v7833_v14 = vpop.f32.mrf.mxu1  ;;  %v7654_v19 = vld [vmem:[#allocation5 + $0x38] sm:$0xff]  ;;  %v8104_v57 = vadd.f32 %v8100_v0, %v8084_v35 }
 0x614   : > { %v7884_v55 = vld [vmem:[#allocation5 + $0x30] sm:$0xf]  ;;  %v7686_v26 = vadd.f32 %v7654_v19, %v7584_v3  ;;  %v12955_v3 = vld [vmem:[%s13832_s23 + $0x78] sm:$0xff] }
 0x615   : > { %v7948_v54 = vadd.f32 %v7916_v20, %v7884_v55  ;;  %8108 = vst [vmem:[#allocation5 + $0xc] sm:$0xf] %v8104_v57  ;;  %8367 = vmatmul.bf16.vlgmr.msrb.gmra.mxu0 %v12952_v59 }
 0x616   : > { %7864 = vmatmul.bf16.gmra.mxu1 %v13237_v61  ;;  %7718 = vst [vmem:[#allocation5 + $0x38] sm:$0xff] %v7686_v26  ;;  %7428 = vmatmul.bf16.gmra.mxu2 %v13237_v61 }
 0x617   : > { %7626 = vmatmul.bf16.gmra.mxu3 %v13237_v61  ;;  %7964 = vst [vmem:[#allocation5 + $0x30] sm:$0xf] %v7948_v54  ;;  %v13240_v54 = vld [vmem:[%s13832_s23 + $0x78] sm:$0xff] }
 0x618   : > { %v7452_v61 = vld [vmem:[#allocation5 + $0x7c] sm:$0xf] }
 0x619   : > { %v7397_v29 = vpop.f32.mrf.mxu2 }
 0x61a   : > { %v7587_v2 = vpop.f32.mrf.mxu3  ;;  %v7465_v63 = vadd.f32 %v7449_v34, %v7397_v29  ;;  %v8086_v45 = vpop.f32.mrf.mxu0  ;;  %v7661_v34 = vld [vmem:[#allocation5 + $0x70] sm:$0xff] }
 0x61b   : > { %v7687_v10 = vadd.f32 %v7655_v56, %v7587_v2  ;;  %v7834_v11 = vpop.f32.mrf.mxu1 }
 0x61c   : > { %7481 = vst [vmem:[#allocation5 + $0x4c] sm:$0xf] %v7465_v63  ;;  %v7917_v46 = vrot.slane %v7834_v11, 4 }
 0x61d   : > { %7719 = vst [vmem:[#allocation5 + $0x40] sm:$0xff] %v7687_v10  ;;  %v8103_v35 = vld [vmem:[#allocation5 + $0x3c] sm:$0xf] }
 0x621   : > { %v7399_v5 = vpop.f32.mrf.mxu2 }
 0x622   : > { %v7589_v51 = vpop.f32.mrf.mxu3  ;;  %v8088_v39 = vpop.f32.mrf.mxu0 }
 0x623   : > { %v7837_v47 = vpop.f32.mrf.mxu1  ;;  %v7656_v62 = vld [vmem:[#allocation5 + $0x48] sm:$0xff]  ;;  %v8105_v53 = vadd.f32 %v8101_v50, %v8088_v39 }
 0x624   : > { %v7885_v30 = vld [vmem:[#allocation5 + $0x40] sm:$0xf]  ;;  %v7688_v7 = vadd.f32 %v7656_v62, %v7589_v51 }
 0x625   : > { %v7949_v60 = vadd.f32 %v7917_v46, %v7885_v30  ;;  %8109 = vst [vmem:[#allocation5 + $0x1c] sm:$0xf] %v8105_v53  ;;  %8371 = vmatmul.bf16.gmra.mxu0 %v12953_v32  ;;  %v8238_v47 = vld [vmem:[#allocation5] sm:$0xff] }
 0x626   : > { %7868 = vmatmul.bf16.gmra.mxu1 %v13238_v21  ;;  %7720 = vst [vmem:[#allocation5 + $0x48] sm:$0xff] %v7688_v7  ;;  %7432 = vmatmul.bf16.gmra.mxu2 %v13238_v21  ;;  %v7453_v7 = vld [vmem:[#allocation5 + $0x8c] sm:$0xf] }
 0x627   : > { %7631 = vmatmul.bf16.gmra.mxu3 %v13238_v21  ;;  %7965 = vst [vmem:[#allocation5 + $0x40] sm:$0xf] %v7949_v60  ;;  %v7663_v60 = vld [vmem:[#allocation5 + $0x80] sm:$0xff] }
 0x629   : > { %v7401_v43 = vpop.f32.mrf.mxu2 }
 0x62a   : > { %v7592_v36 = vpop.f32.mrf.mxu3  ;;  %v7466_v33 = vadd.f32 %v7450_v27, %v7401_v43  ;;  %v8090_v44 = vpop.f32.mrf.mxu0 }
 0x62b   : > { %v7689_v12 = vadd.f32 %v7657_v8, %v7592_v36  ;;  %v7838_v23 = vpop.f32.mrf.mxu1 }
 0x62c   : > { %7482 = vst [vmem:[#allocation5 + $0x5c] sm:$0xf] %v7466_v33  ;;  %v7918_v22 = vrot.slane %v7838_v23, 4 }
 0x62d   : > { %7721 = vst [vmem:[#allocation5 + $0x50] sm:$0xff] %v7689_v12  ;;  %v8239_v12 = vld [vmem:[#allocation5 + $0x8] sm:$0xff] }
 0x631   : > { %v7403_v1 = vpop.f32.mrf.mxu2 }
 0x632   : > { %v7594_v37 = vpop.f32.mrf.mxu3  ;;  %v8092_v16 = vpop.f32.mrf.mxu0 }
 0x633   : > { %v7841_v9 = vpop.f32.mrf.mxu1  ;;  %v7658_v6 = vld [vmem:[#allocation5 + $0x58] sm:$0xff]  ;;  %v8106_v13 = vadd.f32 %v8102_v58, %v8092_v16 }
 0x634   : > { %v7886_v38 = vld [vmem:[#allocation5 + $0x50] sm:$0xf]  ;;  %v7690_v24 = vadd.f32 %v7658_v6, %v7594_v37 }
 0x635   : > { %v7950_v41 = vadd.f32 %v7918_v22, %v7886_v38  ;;  %8110 = vst [vmem:[#allocation5 + $0x2c] sm:$0xf] %v8106_v13  ;;  %8375 = vmatmul.bf16.gmra.mxu0 %v12954_v48  ;;  %v8240_v9 = vld [vmem:[#allocation5 + $0x10] sm:$0xff] }
 0x636   : > { %7872 = vmatmul.bf16.gmra.mxu1 %v13239_v31  ;;  %7722 = vst [vmem:[#allocation5 + $0x58] sm:$0xff] %v7690_v24  ;;  %7436 = vmatmul.bf16.gmra.mxu2 %v13239_v31  ;;  %v7454_v24 = vld [vmem:[#allocation5 + $0x9c] sm:$0xf] }
 0x637   : > { %7636 = vmatmul.bf16.gmra.mxu3 %v13239_v31  ;;  %7966 = vst [vmem:[#allocation5 + $0x50] sm:$0xf] %v7950_v41  ;;  %v7665_v41 = vld [vmem:[#allocation5 + $0x90] sm:$0xff] }
 0x639   : > { %v7405_v42 = vpop.f32.mrf.mxu2 }
 0x63a   : > { %v7597_v4 = vpop.f32.mrf.mxu3  ;;  %v7467_v52 = vadd.f32 %v7451_v49, %v7405_v42  ;;  %v8094_v25 = vpop.f32.mrf.mxu0 }
 0x63b   : > { %v7691_v17 = vadd.f32 %v7659_v15, %v7597_v4  ;;  %v7842_v40 = vpop.f32.mrf.mxu1 }
 0x63c   : > { %7483 = vst [vmem:[#allocation5 + $0x6c] sm:$0xf] %v7467_v52  ;;  %v7919_v0 = vrot.slane %v7842_v40, 4 }
 0x63d   : > { %7723 = vst [vmem:[#allocation5 + $0x60] sm:$0xff] %v7691_v17  ;;  %v8241_v17 = vld [vmem:[#allocation5 + $0x18] sm:$0xff] }
 0x641   : > { %v7407_v18 = vpop.f32.mrf.mxu2 }
 0x642   : > { %v7599_v28 = vpop.f32.mrf.mxu3  ;;  %v8096_v14 = vpop.f32.mrf.mxu0 }
 0x643   : > { %v7845_v59 = vpop.f32.mrf.mxu1  ;;  %v7660_v20 = vld [vmem:[#allocation5 + $0x68] sm:$0xff]  ;;  %v8107_v19 = vadd.f32 %v8103_v35, %v8096_v14 }
 0x644   : > { %v7887_v57 = vld [vmem:[#allocation5 + $0x60] sm:$0xf]  ;;  %v7692_v55 = vadd.f32 %v7660_v20, %v7599_v28 }
 0x645   : > { %v7951_v26 = vadd.f32 %v7919_v0, %v7887_v57  ;;  %8111 = vst [vmem:[#allocation5 + $0x3c] sm:$0xf] %v8107_v19  ;;  %8379 = vmatmul.bf16.gmra.mxu0 %v12955_v3  ;;  %v8242_v59 = vld [vmem:[#allocation5 + $0x20] sm:$0xff] }
 0x646   : > { %7876 = vmatmul.bf16.gmra.mxu1 %v13240_v54  ;;  %7724 = vst [vmem:[#allocation5 + $0x68] sm:$0xff] %v7692_v55  ;;  %7440 = vmatmul.bf16.gmra.mxu2 %v13240_v54  ;;  %v7455_v55 = vld [vmem:[#allocation5 + $0xac] sm:$0xf] }
 0x647   : > { %7641 = vmatmul.bf16.gmra.mxu3 %v13240_v54  ;;  %7967 = vst [vmem:[#allocation5 + $0x60] sm:$0xf] %v7951_v26  ;;  %v7667_v26 = vld [vmem:[#allocation5 + $0xa0] sm:$0xff] }
 0x649   : > { %v7409_v56 = vpop.f32.mrf.mxu2 }
 0x64a   : > { %v7602_v29 = vpop.f32.mrf.mxu3  ;;  %v7468_v2 = vadd.f32 %v7452_v61, %v7409_v56  ;;  %v8098_v11 = vpop.f32.mrf.mxu0 }
 0x64b   : > { %v7693_v63 = vadd.f32 %v7661_v34, %v7602_v29  ;;  %v7846_v10 = vpop.f32.mrf.mxu1 }
 0x64c   : > { %7484 = vst [vmem:[#allocation5 + $0x7c] sm:$0xf] %v7468_v2  ;;  %v7920_v39 = vrot.slane %v7846_v10, 4 }
 0x64d   : > { %7725 = vst [vmem:[#allocation5 + $0x70] sm:$0xff] %v7693_v63  ;;  %v8243_v63 = vld [vmem:[#allocation5 + $0x28] sm:$0xff] }
 0x651   : > { %v7411_v45 = vpop.f32.mrf.mxu2 }
 0x652   : > { %v7604_v5 = vpop.f32.mrf.mxu3  ;;  %v8218_v32 = vpop.f32.mrf.mxu0 }
 0x653   : > { %v7849_v51 = vpop.f32.mrf.mxu1  ;;  %v7662_v50 = vld [vmem:[#allocation5 + $0x78] sm:$0xff]  ;;  %v8246_v46 = vadd.f32 %v8238_v47, %v8218_v32  ;;  %v8244_v32 = vld [vmem:[#allocation5 + $0x30] sm:$0xff] }
 0x654   : > { %v7888_v62 = vld [vmem:[#allocation5 + $0x70] sm:$0xf]  ;;  %v7694_v53 = vadd.f32 %v7662_v50, %v7604_v5 }
 0x655   : > { %v7952_v30 = vadd.f32 %v7920_v39, %v7888_v62  ;;  %8254 = vst [vmem:[#allocation5] sm:$0xff] %v8246_v46 }
 0x656   : > { %7726 = vst [vmem:[#allocation5 + $0x78] sm:$0xff] %v7694_v53 }
 0x657   : > { %7968 = vst [vmem:[#allocation5 + $0x70] sm:$0xf] %v7952_v30  ;;  %v7456_v30 = vld [vmem:[#allocation5 + $0xbc] sm:$0xf] }
 0x659   : > { %v7413_v21 = vpop.f32.mrf.mxu2 }
 0x65a   : > { %v7607_v27 = vpop.f32.mrf.mxu3  ;;  %v7469_v8 = vadd.f32 %v7453_v7, %v7413_v21  ;;  %v8220_v33 = vpop.f32.mrf.mxu0  ;;  %v7669_v7 = vld [vmem:[#allocation5 + $0xb0] sm:$0xff] }
 0x65b   : > { %v7695_v43 = vadd.f32 %v7663_v60, %v7607_v27  ;;  %v7850_v36 = vpop.f32.mrf.mxu1  ;;  %v8247_v23 = vadd.f32 %v8239_v12, %v8220_v33  ;;  %v8245_v33 = vld [vmem:[#allocation5 + $0x38] sm:$0xff] }
 0x65c   : > { %7485 = vst [vmem:[#allocation5 + $0x8c] sm:$0xf] %v7469_v8  ;;  %v7921_v16 = vrot.slane %v7850_v36, 4 }
 0x65d   : > { %7727 = vst [vmem:[#allocation5 + $0x80] sm:$0xff] %v7695_v43 }
 0x65e   : > { %8255 = vst [vmem:[#allocation5 + $0x8] sm:$0xff] %v8247_v23 }
 0x661   : > { %v7415_v44 = vpop.f32.mrf.mxu2 }
 0x662   : > { %v7609_v1 = vpop.f32.mrf.mxu3  ;;  %v8223_v48 = vpop.f32.mrf.mxu0 }
 0x663   : > { %v7853_v37 = vpop.f32.mrf.mxu1  ;;  %v7664_v58 = vld [vmem:[#allocation5 + $0x88] sm:$0xff]  ;;  %v8248_v22 = vadd.f32 %v8240_v9, %v8223_v48 }
 0x664   : > { %v7889_v6 = vld [vmem:[#allocation5 + $0x80] sm:$0xf]  ;;  %v7696_v13 = vadd.f32 %v7664_v58, %v7609_v1 }
 0x665   : > { %v7953_v38 = vadd.f32 %v7921_v16, %v7889_v6  ;;  %8256 = vst [vmem:[#allocation5 + $0x10] sm:$0xff] %v8248_v22 }
 0x666   : > { %7728 = vst [vmem:[#allocation5 + $0x88] sm:$0xff] %v7696_v13  ;;  %v7457_v13 = vld [vmem:[#allocation5 + $0xcc] sm:$0xf] }
 0x667   : > { %7969 = vst [vmem:[#allocation5 + $0x80] sm:$0xf] %v7953_v38 }
 0x669   : > { %v7417_v31 = vpop.f32.mrf.mxu2 }
 0x66a   : > { %v7612_v49 = vpop.f32.mrf.mxu3  ;;  %v7470_v15 = vadd.f32 %v7454_v24, %v7417_v31  ;;  %v8225_v52 = vpop.f32.mrf.mxu0  ;;  %v7671_v24 = vld [vmem:[#allocation5 + $0xc0] sm:$0xff] }
 0x66b   : > { %v7697_v42 = vadd.f32 %v7665_v41, %v7612_v49  ;;  %v7854_v4 = vpop.f32.mrf.mxu1  ;;  %v8249_v40 = vadd.f32 %v8241_v17, %v8225_v52 }
 0x66c   : > { %7486 = vst [vmem:[#allocation5 + $0x9c] sm:$0xf] %v7470_v15  ;;  %v7922_v14 = vrot.slane %v7854_v4, 4  ;;  %v8384_v4 = vld [vmem:[#allocation5] sm:$0xf] }
 0x66d   : > { %7729 = vst [vmem:[#allocation5 + $0x90] sm:$0xff] %v7697_v42 }
 0x66e   : > { %8257 = vst [vmem:[#allocation5 + $0x18] sm:$0xff] %v8249_v40 }
 0x671   : > { %v7419_v25 = vpop.f32.mrf.mxu2 }
 0x672   : > { %v7614_v18 = vpop.f32.mrf.mxu3  ;;  %v8228_v3 = vpop.f32.mrf.mxu0 }
 0x673   : > { %v7857_v28 = vpop.f32.mrf.mxu1  ;;  %v7666_v35 = vld [vmem:[#allocation5 + $0x98] sm:$0xff]  ;;  %v8250_v0 = vadd.f32 %v8242_v59, %v8228_v3 }
 0x674   : > { %v7890_v20 = vld [vmem:[#allocation5 + $0x90] sm:$0xf]  ;;  %v7698_v19 = vadd.f32 %v7666_v35, %v7614_v18 }
 0x675   : > { %v7954_v57 = vadd.f32 %v7922_v14, %v7890_v20  ;;  %8258 = vst [vmem:[#allocation5 + $0x20] sm:$0xff] %v8250_v0  ;;  %v7458_v20 = vld [vmem:[#allocation5 + $0xdc] sm:$0xf] }
 0x676   : > { %7730 = vst [vmem:[#allocation5 + $0x98] sm:$0xff] %v7698_v19 }
 0x677   : > { %7970 = vst [vmem:[#allocation5 + $0x90] sm:$0xf] %v7954_v57  ;;  %v7673_v57 = vld [vmem:[#allocation5 + $0xd0] sm:$0xff] }
 0x679   : > { %v7421_v54 = vpop.f32.mrf.mxu2 }
 0x67a   : > { %v7617_v61 = vpop.f32.mrf.mxu3  ;;  %v7471_v34 = vadd.f32 %v7455_v55, %v7421_v54  ;;  %v8230_v2 = vpop.f32.mrf.mxu0 }
 0x67b   : > { %v7699_v56 = vadd.f32 %v7667_v26, %v7617_v61  ;;  %v7858_v29 = vpop.f32.mrf.mxu1  ;;  %v8251_v10 = vadd.f32 %v8243_v63, %v8230_v2 }
 0x67c   : > { %7487 = vst [vmem:[#allocation5 + $0xac] sm:$0xf] %v7471_v34  ;;  %v7923_v47 = vrot.slane %v7858_v29, 4 }
 0x67d   : > { %7731 = vst [vmem:[#allocation5 + $0xa0] sm:$0xff] %v7699_v56  ;;  %v8385_v56 = vld [vmem:[#allocation5 + $0x10] sm:$0xf] }
 0x67e   : > { %8259 = vst [vmem:[#allocation5 + $0x28] sm:$0xff] %v8251_v10 }
 0x681   : > { %v7423_v11 = vpop.f32.mrf.mxu2 }
 0x682   : > { %v7619_v45 = vpop.f32.mrf.mxu3  ;;  %v8233_v51 = vpop.f32.mrf.mxu0 }
 0x683   : > { %v7861_v5 = vpop.f32.mrf.mxu1  ;;  %v7668_v39 = vld [vmem:[#allocation5 + $0xa8] sm:$0xff]  ;;  %v8252_v50 = vadd.f32 %v8244_v32, %v8233_v51 }
 0x684   : > { %v7891_v46 = vld [vmem:[#allocation5 + $0xa0] sm:$0xf]  ;;  %v7700_v62 = vadd.f32 %v7668_v39, %v7619_v45 }
 0x685   : > { %v7955_v53 = vadd.f32 %v7923_v47, %v7891_v46  ;;  %8260 = vst [vmem:[#allocation5 + $0x30] sm:$0xff] %v8252_v50  ;;  %v7459_v50 = vld [vmem:[#allocation5 + $0xec] sm:$0xf] }
 0x686   : > { %7732 = vst [vmem:[#allocation5 + $0xa8] sm:$0xff] %v7700_v62  ;;  %v7675_v62 = vld [vmem:[#allocation5 + $0xe0] sm:$0xff] }
 0x687   : > { %7971 = vst [vmem:[#allocation5 + $0xa0] sm:$0xf] %v7955_v53 }
 0x689   : > { %v7425_v60 = vpop.f32.mrf.mxu2 }
 0x68a   : > { %v7622_v21 = vpop.f32.mrf.mxu3  ;;  %v7472_v27 = vadd.f32 %v7456_v30, %v7425_v60  ;;  %v8235_v36 = vpop.f32.mrf.mxu0 }
 0x68b   : > { %v7701_v8 = vadd.f32 %v7669_v7, %v7622_v21  ;;  %v7862_v43 = vpop.f32.mrf.mxu1  ;;  %v8253_v12 = vadd.f32 %v8245_v33, %v8235_v36 }
 0x68c   : > { %7488 = vst [vmem:[#allocation5 + $0xbc] sm:$0xf] %v7472_v27  ;;  %v7924_v48 = vrot.slane %v7862_v43, 4  ;;  %v8386_v27 = vld [vmem:[#allocation5 + $0x20] sm:$0xf] }
 0x68d   : > { %7733 = vst [vmem:[#allocation5 + $0xb0] sm:$0xff] %v7701_v8 }
 0x68e   : > { %8261 = vst [vmem:[#allocation5 + $0x38] sm:$0xff] %v8253_v12 }
 0x691   : > { %v7427_v23 = vpop.f32.mrf.mxu2 }
 0x692   : > { %v7624_v44 = vpop.f32.mrf.mxu3  ;;  %v8368_v37 = vpop.f32.mrf.mxu0 }
 0x693   : > { %v7865_v1 = vpop.f32.mrf.mxu1  ;;  %v7670_v9 = vld [vmem:[#allocation5 + $0xb8] sm:$0xff] }
 0x694   : > { %v7892_v16 = vld [vmem:[#allocation5 + $0xb0] sm:$0xf]  ;;  %v7702_v58 = vadd.f32 %v7670_v9, %v7624_v44 }
 0x695   : > { %v7956_v22 = vadd.f32 %v7924_v48, %v7892_v16  ;;  %v7460_v16 = vld [vmem:[#allocation5 + $0xfc] sm:$0xf] }
 0x696   : > { %7734 = vst [vmem:[#allocation5 + $0xb8] sm:$0xff] %v7702_v58 }
 0x697   : > { %7972 = vst [vmem:[#allocation5 + $0xb0] sm:$0xf] %v7956_v22  ;;  %v7677_v22 = vld [vmem:[#allocation5 + $0xf0] sm:$0xff] }
 0x699   : > { %v7429_v6 = vpop.f32.mrf.mxu2 }
 0x69a   : > { %v7627_v38 = vpop.f32.mrf.mxu3  ;;  %v7473_v41 = vadd.f32 %v7457_v13, %v7429_v6  ;;  %v8369_v15 = vpop.f32.mrf.mxu0 }
 0x69b   : > { %v7703_v31 = vadd.f32 %v7671_v24, %v7627_v38  ;;  %v7866_v49 = vpop.f32.mrf.mxu1  ;;  %v8392_v42 = vrot.slane %v8369_v15, 4 }
 0x69c   : > { %7489 = vst [vmem:[#allocation5 + $0xcc] sm:$0xf] %v7473_v41  ;;  %v7925_v28 = vrot.slane %v7866_v49, 4  ;;  %v8387_v41 = vld [vmem:[#allocation5 + $0x30] sm:$0xf] }
 0x69d   : > { %7735 = vst [vmem:[#allocation5 + $0xc0] sm:$0xff] %v7703_v31  ;;  %v8400_v52 = vadd.f32 %v8392_v42, %v8384_v4 }
 0x69f   : > { %8404 = vst [vmem:[#allocation5] sm:$0xf] %v8400_v52 }
 0x6a1   : > { %v7431_v17 = vpop.f32.mrf.mxu2 }
 0x6a2   : > { %v7629_v40 = vpop.f32.mrf.mxu3  ;;  %v8372_v18 = vpop.f32.mrf.mxu0 }
 0x6a3   : > { %v7869_v25 = vpop.f32.mrf.mxu1  ;;  %v7672_v3 = vld [vmem:[#allocation5 + $0xc8] sm:$0xff] }
 0x6a4   : > { %v7893_v59 = vld [vmem:[#allocation5 + $0xc0] sm:$0xf]  ;;  %v7704_v14 = vadd.f32 %v7672_v3, %v7629_v40 }
 0x6a5   : > { %v7957_v35 = vadd.f32 %v7925_v28, %v7893_v59 }
 0x6a6   : > { %7736 = vst [vmem:[#allocation5 + $0xc8] sm:$0xff] %v7704_v14 }
 0x6a7   : > { %7973 = vst [vmem:[#allocation5 + $0xc0] sm:$0xf] %v7957_v35 }
 0x6a9   : > { %v7433_v0 = vpop.f32.mrf.mxu2 }
 0x6aa   : > { %v7632_v19 = vpop.f32.mrf.mxu3  ;;  %v7474_v55 = vadd.f32 %v7458_v20, %v7433_v0  ;;  %v8373_v61 = vpop.f32.mrf.mxu0 }
 0x6ab   : > { %v7705_v26 = vadd.f32 %v7673_v57, %v7632_v19  ;;  %v7870_v54 = vpop.f32.mrf.mxu1  ;;  %v8393_v34 = vrot.slane %v8373_v61, 4 }
 0x6ac   : > { %7490 = vst [vmem:[#allocation5 + $0xdc] sm:$0xf] %v7474_v55  ;;  %v7926_v45 = vrot.slane %v7870_v54, 4 }
 0x6ad   : > { %7737 = vst [vmem:[#allocation5 + $0xd0] sm:$0xff] %v7705_v26  ;;  %v8401_v29 = vadd.f32 %v8393_v34, %v8385_v56 }
 0x6af   : > { %8405 = vst [vmem:[#allocation5 + $0x10] sm:$0xf] %v8401_v29 }
 0x6b1   : > { %v7435_v2 = vpop.f32.mrf.mxu2 }
 0x6b2   : > { %v7634_v63 = vpop.f32.mrf.mxu3  ;;  %v8376_v11 = vpop.f32.mrf.mxu0 }
 0x6b3   : > { %v7873_v10 = vpop.f32.mrf.mxu1  ;;  %v7674_v5 = vld [vmem:[#allocation5 + $0xd8] sm:$0xff] }
 0x6b4   : > { %v7894_v51 = vld [vmem:[#allocation5 + $0xd0] sm:$0xf]  ;;  %v7706_v32 = vadd.f32 %v7674_v5, %v7634_v63 }
 0x6b5   : > { %v7958_v47 = vadd.f32 %v7926_v45, %v7894_v51 }
 0x6b6   : > { %7738 = vst [vmem:[#allocation5 + $0xd8] sm:$0xff] %v7706_v32 }
 0x6b7   : > { %7974 = vst [vmem:[#allocation5 + $0xd0] sm:$0xf] %v7958_v47 }
 0x6b9   : > { %v7437_v39 = vpop.f32.mrf.mxu2 }
 0x6ba   : > { %v7637_v46 = vpop.f32.mrf.mxu3  ;;  %v7475_v53 = vadd.f32 %v7459_v50, %v7437_v39  ;;  %v8377_v60 = vpop.f32.mrf.mxu0 }
 0x6bb   : > { %v7707_v30 = vadd.f32 %v7675_v62, %v7637_v46  ;;  %v7874_v7 = vpop.f32.mrf.mxu1  ;;  %v8394_v21 = vrot.slane %v8377_v60, 4 }
 0x6bc   : > { %7491 = vst [vmem:[#allocation5 + $0xec] sm:$0xf] %v7475_v53  ;;  %v7927_v23 = vrot.slane %v7874_v7, 4 }
 0x6bd   : > { %7739 = vst [vmem:[#allocation5 + $0xe0] sm:$0xff] %v7707_v30  ;;  %v8402_v8 = vadd.f32 %v8394_v21, %v8386_v27 }
 0x6bf   : > { %8406 = vst [vmem:[#allocation5 + $0x20] sm:$0xf] %v8402_v8 }
 0x6c1   : > { %v7439_v43 = vpop.f32.mrf.mxu2 }
 0x6c2   : > { %v7639_v36 = vpop.f32.mrf.mxu3  ;;  %v8380_v12 = vpop.f32.mrf.mxu0 }
 0x6c3   : > { %v7877_v33 = vpop.f32.mrf.mxu1  ;;  %v7676_v44 = vld [vmem:[#allocation5 + $0xe8] sm:$0xff] }
 0x6c4   : > { %v7895_v1 = vld [vmem:[#allocation5 + $0xe0] sm:$0xf]  ;;  %v7708_v37 = vadd.f32 %v7676_v44, %v7639_v36 }
 0x6c5   : > { %v7959_v48 = vadd.f32 %v7927_v23, %v7895_v1 }
 0x6c6   : > { %7740 = vst [vmem:[#allocation5 + $0xe8] sm:$0xff] %v7708_v37 }
 0x6c7   : > { %7975 = vst [vmem:[#allocation5 + $0xe0] sm:$0xf] %v7959_v48 }
 0x6c9   : > { %v7441_v9 = vpop.f32.mrf.mxu2 }
 0x6ca   : > { %v7642_v58 = vpop.f32.mrf.mxu3  ;;  %v7476_v6 = vadd.f32 %v7460_v16, %v7441_v9  ;;  %v8381_v38 = vpop.f32.mrf.mxu0 }
 0x6cb   : > { %v7709_v13 = vadd.f32 %v7677_v22, %v7642_v58  ;;  %v8395_v24 = vrot.slane %v8381_v38, 4  ;;  %v7878_v49 = vpop.f32.mrf.mxu1 }
 0x6cc   : > { %7492 = vst [vmem:[#allocation5 + $0xfc] sm:$0xf] %v7476_v6  ;;  %v7928_v42 = vrot.slane %v7878_v49, 4 }
 0x6cd   : > { %7741 = vst [vmem:[#allocation5 + $0xf0] sm:$0xff] %v7709_v13  ;;  %v8403_v31 = vadd.f32 %v8395_v24, %v8387_v41 }
 0x6cf   : > { %8407 = vst [vmem:[#allocation5 + $0x30] sm:$0xf] %v8403_v31 }
 0x6d1   : > { %v7443_v15 = vpop.f32.mrf.mxu2 }
 0x6d2   : > { %v7644_v4 = vpop.f32.mrf.mxu3 }
 0x6d3   : > { %v7678_v52 = vld [vmem:[#allocation5 + $0xf8] sm:$0xff]  ;;  %8411 = sbr.rel (%p12418_p12) target bundleno = 2174 (0x87e), region = 96 }
 0x6d4   : > { %v7896_v17 = vld [vmem:[#allocation5 + $0xf0] sm:$0xf]  ;;  %v7710_v40 = vadd.f32 %v7678_v52, %v7644_v4 }
 0x6d5   : > { %v7960_v25 = vadd.f32 %v7928_v42, %v7896_v17 }
 0x6d6   : > { %7742 = vst [vmem:[#allocation5 + $0xf8] sm:$0xff] %v7710_v40 }
 0x6d7   : > { %7976 = vst [vmem:[#allocation5 + $0xf0] sm:$0xf] %v7960_v25 }
 0x6d8   : > { %v12971_v18 = vld [vmem:[#allocation15 + $0x38] sm:$0xff]  ;;  %v12970_v14 = vld [vmem:[#allocation15 + $0x30] sm:$0xff]  ;;  %v12969_v19 = vld [vmem:[#allocation15 + $0x28] sm:$0xff] }
 0x6d9   : > { %v12979_v28 = vld [vmem:[#allocation15 + $0x78] sm:$0xff]  ;;  %8657 = vmatpush.bf16.msra.mxu0 %v12971_v18  ;;  %v12978_v35 = vld [vmem:[#allocation15 + $0x70] sm:$0xff]  ;;  %v12977_v57 = vld [vmem:[#allocation15 + $0x68] sm:$0xff] }
 0x6da   : > { %v12987_v3 = vld [vmem:[#allocation15 + $0xb8] sm:$0xff]  ;;  %9026 = vmatpush.bf16.msra.mxu1 %v12979_v28  ;;  %v12986_v0 = vld [vmem:[#allocation15 + $0xb0] sm:$0xff]  ;;  %v12985_v55 = vld [vmem:[#allocation15 + $0xa8] sm:$0xff] }
 0x6db   : > { %v12995_v59 = vld [vmem:[#allocation15 + $0xf8] sm:$0xff]  ;;  %9392 = vmatpush.bf16.msra.mxu2 %v12987_v3  ;;  %v12994_v20 = vld [vmem:[#allocation15 + $0xf0] sm:$0xff]  ;;  %v12993_v26 = vld [vmem:[#allocation15 + $0xe8] sm:$0xff] }
 0x6dc   : > { %9758 = vmatpush.bf16.msra.mxu3 %v12995_v59  ;;  %v12968_v54 = vld [vmem:[#allocation15 + $0x20] sm:$0xff]  ;;  %v12967_v2 = vld [vmem:[#allocation15 + $0x18] sm:$0xff]  ;;  %v8413_v10 = vld [vmem:[#allocation2 + $0xb0] sm:$0xff] }
 0x6dd   : > { %8658 = vmatpush.bf16.msra.mxu0 %v12970_v14  ;;  %v12976_v61 = vld [vmem:[#allocation15 + $0x60] sm:$0xff]  ;;  %v12975_v63 = vld [vmem:[#allocation15 + $0x58] sm:$0xff]  ;;  %v8782_v50 = vld [vmem:[#allocation3 + $0x8] sm:$0xff] }
 0x6de   : > { %9027 = vmatpush.bf16.msra.mxu1 %v12978_v35  ;;  %v12984_v34 = vld [vmem:[#allocation15 + $0xa0] sm:$0xff]  ;;  %v12983_v11 = vld [vmem:[#allocation15 + $0x98] sm:$0xff]  ;;  %v9148_v53 = vld [vmem:[#allocation4 + $0x8] sm:$0xff] }
 0x6df   : > { %9393 = vmatpush.bf16.msra.mxu2 %v12986_v0  ;;  %v12992_v56 = vld [vmem:[#allocation15 + $0xe0] sm:$0xff]  ;;  %v12991_v47 = vld [vmem:[#allocation15 + $0xd8] sm:$0xff]  ;;  %v9514_v21 = vld [vmem:[#allocation5 + $0x8] sm:$0xff] }
 0x6e0   : > { %9759 = vmatpush.bf16.msra.mxu3 %v12994_v20  ;;  %v15366_v29 = vld [vmem:[%s15808_s17] ss:$0 sm:$0xff]  ;;  %v12966_v27 = vld [vmem:[#allocation15 + $0x10] sm:$0xff]  ;;  %v12965_v44 = vld [vmem:[#allocation15 + $0x8] sm:$0xff] }
 0x6e1   : > { %8659 = vmatpush.bf16.msra.mxu0 %v12969_v19  ;;  %v8414_v45 = vld [vmem:[#allocation2] sm:$0xff]  ;;  %v8449_v39 = vadd.f32 %v15366_v29, %v8413_v10  ;;  %v12974_v8 = vld [vmem:[#allocation15 + $0x50] sm:$0xff]  ;;  %v12973_v1 = vld [vmem:[#allocation15 + $0x48] sm:$0xff] }
 0x6e2   : > { %9028 = vmatpush.bf16.msra.mxu1 %v12977_v57  ;;  %v15371_v5 = vld [vmem:[%s15810_s8] ss:$0 sm:$0xff]  ;;  %v8450_v62 = vadd.f32 %v15366_v29, %v8414_v45  ;;  %v12982_v33 = vld [vmem:[#allocation15 + $0x90] sm:$0xff]  ;;  %v12981_v58 = vld [vmem:[#allocation15 + $0x88] sm:$0xff] }
 0x6e3   : > { %9394 = vmatpush.bf16.msra.mxu2 %v12985_v55  ;;  %v8781_v51 = vld [vmem:[#allocation3] sm:$0xff]  ;;  %v8818_v43 = vadd.f32 %v15371_v5, %v8782_v50  ;;  %v12990_v12 = vld [vmem:[#allocation15 + $0xd0] sm:$0xff]  ;;  %vm8481_vm2 = vcmp.gt.f32.partialorder %v8449_v39, 0.0  ;;  %v8513_v37 = vmul.f32 0.01, %v8449_v39  ;;  %v12989_v22 = vld [vmem:[#allocation15 + $0xc8] sm:$0xff] }
 0x6e4   : > { %9760 = vmatpush.bf16.msra.mxu3 %v12993_v26  ;;  %v15376_v32 = vld [vmem:[%s15811_s16] ss:$0 sm:$0xff]  ;;  %v8817_v7 = vadd.f32 %v15371_v5, %v8781_v51  ;;  %v8514_v48 = vmul.f32 0.01, %v8450_v62  ;;  %vm8482_vm3 = vcmp.gt.f32.partialorder %v8450_v62, 0.0  ;;  %v8415_v0 = vld [vmem:[#allocation2 + $0xd8] sm:$0xff] }
 0x6e5   : > { %8660 = vmatpush.bf16.msra.mxu0 %v12968_v54  ;;  %v9147_v46 = vld [vmem:[#allocation4] sm:$0xff]  ;;  %v9184_v23 = vadd.f32 %v15376_v32, %v9148_v53  ;;  %vm8850_vm5 = vcmp.gt.f32.partialorder %v8818_v43, 0.0  ;;  %v8882_v13 = vmul.f32 0.01, %v8818_v43  ;;  %v8545_v49 = vsel %vm8481_vm2, %v8449_v39, %v8513_v37  ;;  %v8416_v20 = vld [vmem:[#allocation2 + $0x18] sm:$0xff]  ;;  %v8783_v55 = vld [vmem:[#allocation3 + $0x10] sm:$0xff] }
 0x6e6   : > { %9029 = vmatpush.bf16.msra.mxu1 %v12976_v61  ;;  %v15383_v30 = vld [vmem:[%s15812_s26] ss:$0 sm:$0xff]  ;;  %v9183_v36 = vadd.f32 %v15376_v32, %v9147_v46  ;;  %vm8849_vm4 = vcmp.gt.f32.partialorder %v8817_v7, 0.0  ;;  %v8881_v6 = vmul.f32 0.01, %v8817_v7  ;;  %v8546_v15 = vsel %vm8482_vm3, %v8450_v62, %v8514_v48  ;;  %v8784_v26 = vld [vmem:[#allocation3 + $0x18] sm:$0xff] }
 0x6e7   : > { %9395 = vmatpush.bf16.msra.mxu2 %v12984_v34  ;;  %v9513_v60 = vld [vmem:[#allocation5] sm:$0xff]  ;;  %v9550_v16 = vadd.f32 %v15383_v30, %v9514_v21  ;;  %v9248_v24 = vmul.f32 0.01, %v9184_v23  ;;  %vm9216_vm7 = vcmp.gt.f32.partialorder %v9184_v23, 0.0  ;;  %v8914_v17 = vsel %vm8850_vm5, %v8818_v43, %v8882_v13  ;;  %v9149_v54 = vld [vmem:[#allocation4 + $0x10] sm:$0xff]  ;;  %v8786_v13 = vld [vmem:[#allocation3 + $0x28] sm:$0xff] }
 0x6e8   : > { %9761 = vmatpush.bf16.msra.mxu3 %v12992_v56  ;;  %v9549_v9 = vadd.f32 %v15383_v30, %v9513_v60  ;;  %vm9215_vm6 = vcmp.gt.f32.partialorder %v9183_v36, 0.0  ;;  %v9247_v38 = vmul.f32 0.01, %v9183_v36  ;;  %v12964_v42 = vld [vmem:[#allocation15] sm:$0xff]  ;;  %v8913_v52 = vsel %vm8849_vm4, %v8817_v7, %v8881_v6  ;;  %v9150_v56 = vld [vmem:[#allocation4 + $0x18] sm:$0xff] }
 0x6e9   : > { %8661 = vmatpush.bf16.msra.mxu0 %v12967_v2  ;;  %v9614_v31 = vmul.f32 0.01, %v9550_v16  ;;  %vm9582_vm9 = vcmp.gt.f32.partialorder %v9550_v16, 0.0  ;;  %v12972_v4 = vld [vmem:[#allocation15 + $0x40] sm:$0xff]  ;;  %v9280_v28 = vsel %vm9216_vm7, %v9184_v23, %v9248_v24  ;;  %v8577_v14 = vpack.c.bf16 %v8546_v15, %v8545_v49  ;;  %v9515_v2 = vld [vmem:[#allocation5 + $0x10] sm:$0xff]  ;;  %v9518_v49 = vld [vmem:[#allocation5 + $0x28] sm:$0xff] }
 0x6ea   : > { %9030 = vmatpush.bf16.msra.mxu1 %v12975_v63  ;;  %v9613_v41 = vmul.f32 0.01, %v9549_v9  ;;  %vm9581_vm8 = vcmp.gt.f32.partialorder %v9549_v9, 0.0  ;;  %v9279_v40 = vsel %vm9215_vm6, %v9183_v36, %v9247_v38  ;;  %v12980_v25 = vld [vmem:[#allocation15 + $0x80] sm:$0xff]  ;;  %v8945_v35 = vpack.c.bf16 %v8914_v17, %v8913_v52  ;;  %v9516_v63 = vld [vmem:[#allocation5 + $0x18] sm:$0xff] }
 0x6eb   : > { %9396 = vmatpush.bf16.msra.mxu2 %v12983_v11  ;;  %v12988_v18 = vld [vmem:[#allocation15 + $0xc0] sm:$0xff]  ;;  %v9646_v59 = vsel %vm9582_vm9, %v9550_v16, %v9614_v31  ;;  %v9311_v19 = vpack.c.bf16 %v9280_v28, %v9279_v40  ;;  %v8451_v61 = vadd.f32 %v15366_v29, %v8415_v0  ;;  %v8452_v34 = vadd.f32 %v15366_v29, %v8416_v20 }
 0x6ec   : > { %9762 = vmatpush.bf16.msra.mxu3 %v12991_v47  ;;  %v9645_v3 = vsel %vm9581_vm8, %v9549_v9, %v9613_v41  ;;  %v8819_v10 = vadd.f32 %v15371_v5, %v8783_v55  ;;  %v8820_v11 = vadd.f32 %v15371_v5, %v8784_v26  ;;  %v9185_v45 = vadd.f32 %v15376_v32, %v9149_v54  ;;  %v8417_v9 = vld [vmem:[#allocation2 + $0x50] sm:$0xff]  ;;  %v8785_v6 = vld [vmem:[#allocation3 + $0x20] sm:$0xff]  ;;  %v9152_v41 = vld [vmem:[#allocation4 + $0x28] sm:$0xff] }
 0x6ed   : > { %8662 = vmatpush.bf16.msra.mxu0 %v12966_v27  ;;  %v9677_v57 = vpack.c.bf16 %v9646_v59, %v9645_v3  ;;  %v9186_v51 = vadd.f32 %v15376_v32, %v9150_v56  ;;  %v9551_v47 = vadd.f32 %v15383_v30, %v9515_v2  ;;  %v9552_v39 = vadd.f32 %v15383_v30, %v9516_v63  ;;  %v9151_v38 = vld [vmem:[#allocation4 + $0x20] sm:$0xff] }
 0x6ee   : > { %9031 = vmatpush.bf16.msra.mxu1 %v12974_v8  ;;  %vm8483_vm10 = vcmp.gt.f32.partialorder %v8451_v61, 0.0  ;;  %vm8484_vm11 = vcmp.gt.f32.partialorder %v8452_v34, 0.0  ;;  %v8515_v50 = vmul.f32 0.01, %v8451_v61  ;;  %v8516_v46 = vmul.f32 0.01, %v8452_v34 }
 0x6ef   : > { %9397 = vmatpush.bf16.msra.mxu2 %v12982_v33  ;;  %vm8851_vm12 = vcmp.gt.f32.partialorder %v8819_v10, 0.0  ;;  %vm8852_vm13 = vcmp.gt.f32.partialorder %v8820_v11, 0.0  ;;  %v8883_v62 = vmul.f32 0.01, %v8819_v10  ;;  %v8884_v53 = vmul.f32 0.01, %v8820_v11 }
 0x6f0   : > { %9763 = vmatpush.bf16.msra.mxu3 %v12990_v12  ;;  %v9249_v7 = vmul.f32 0.01, %v9185_v45  ;;  %v9250_v60 = vmul.f32 0.01, %v9186_v51  ;;  %v9615_v21 = vmul.f32 0.01, %v9551_v47  ;;  %v8547_v8 = vsel %vm8483_vm10, %v8451_v61, %v8515_v50 }
 0x6f1   : > { %8663 = vmatpush.bf16.msra.mxu0 %v12965_v44  ;;  %v9616_v27 = vmul.f32 0.01, %v9552_v39  ;;  %vm9217_vm14 = vcmp.gt.f32.partialorder %v9185_v45, 0.0  ;;  %vm9218_vm15 = vcmp.gt.f32.partialorder %v9186_v51, 0.0  ;;  %vm9583_vm0 = vcmp.gt.f32.partialorder %v9551_v47, 0.0  ;;  %v9517_v31 = vld [vmem:[#allocation5 + $0x20] sm:$0xff] }
 0x6f2   : > { %9032 = vmatpush.bf16.msra.mxu1 %v12973_v1  ;;  %vm9584_vm1 = vcmp.gt.f32.partialorder %v9552_v39, 0.0  ;;  %v8548_v43 = vsel %vm8484_vm11, %v8452_v34, %v8516_v46  ;;  %v8915_v36 = vsel %vm8851_vm12, %v8819_v10, %v8883_v62  ;;  %v8916_v33 = vsel %vm8852_vm13, %v8820_v11, %v8884_v53  ;;  %v8419_v10 = vld [vmem:[#allocation2 + $0x30] sm:$0xff]  ;;  %v9154_v62 = vld [vmem:[#allocation4 + $0x38] sm:$0xff] }
 0x6f3   : > { %9398 = vmatpush.bf16.msra.mxu2 %v12981_v58  ;;  %v9281_v12 = vsel %vm9217_vm14, %v9185_v45, %v9249_v7  ;;  %v9282_v23 = vsel %vm9218_vm15, %v9186_v51, %v9250_v60  ;;  %v9647_v44 = vsel %vm9583_vm0, %v9551_v47, %v9615_v21  ;;  %v9648_v1 = vsel %vm9584_vm1, %v9552_v39, %v9616_v27  ;;  %v8420_v51 = vld [vmem:[#allocation2 + $0x48] sm:$0xff]  ;;  %v8787_v47 = vld [vmem:[#allocation3 + $0x30] sm:$0xff]  ;;  %v8788_v39 = vld [vmem:[#allocation3 + $0x38] sm:$0xff] }
 0x6f4   : > { %9764 = vmatpush.bf16.msra.mxu3 %v12989_v22  ;;  %v8578_v37 = vpack.c.bf16 %v8548_v43, %v8547_v8  ;;  %v8946_v48 = vpack.c.bf16 %v8916_v33, %v8915_v36  ;;  %v9312_v16 = vpack.c.bf16 %v9282_v23, %v9281_v12  ;;  %v9678_v58 = vpack.c.bf16 %v9648_v1, %v9647_v44  ;;  %v8418_v22 = vld [vmem:[#allocation2 + $0x68] sm:$0xff]  ;;  %v9153_v50 = vld [vmem:[#allocation4 + $0x30] sm:$0xff]  ;;  %v9520_v7 = vld [vmem:[#allocation5 + $0x38] sm:$0xff] }
 0x6f5   : > { %8664 = vmatpush.bf16.msra.mxu0 %v12964_v42  ;;  %v8453_v24 = vadd.f32 %v15366_v29, %v8417_v9  ;;  %v8454_v15 = vadd.f32 %v15366_v29, %v8418_v22  ;;  %v8821_v42 = vadd.f32 %v15371_v5, %v8785_v6  ;;  %v9187_v52 = vadd.f32 %v15376_v32, %v9151_v38  ;;  %v9519_v53 = vld [vmem:[#allocation5 + $0x30] sm:$0xff] }
 0x6f6   : > { %9033 = vmatpush.bf16.msra.mxu1 %v12972_v4  ;;  %v8822_v4 = vadd.f32 %v15371_v5, %v8786_v13  ;;  %v9188_v17 = vadd.f32 %v15376_v32, %v9152_v41  ;;  %v9553_v40 = vadd.f32 %v15383_v30, %v9517_v31  ;;  %v8455_v46 = vadd.f32 %v15366_v29, %v8419_v10 }
 0x6f7   : > { %9399 = vmatpush.bf16.msra.mxu2 %v12980_v25  ;;  %v9554_v25 = vadd.f32 %v15383_v30, %v9518_v49  ;;  %vm8485_vm2 = vcmp.gt.f32.partialorder %v8453_v24, 0.0  ;;  %vm8486_vm3 = vcmp.gt.f32.partialorder %v8454_v15, 0.0  ;;  %v8518_v28 = vmul.f32 0.01, %v8454_v15 }
 0x6f8   : > { %9765 = vmatpush.bf16.msra.mxu3 %v12988_v18  ;;  %8665 = vmatmul.bf16.vlgmr.msra.gmra.mxu0 %v8577_v14  ;;  %v8517_v18 = vmul.f32 0.01, %v8453_v24  ;;  %vm8853_vm4 = vcmp.gt.f32.partialorder %v8821_v42, 0.0  ;;  %vm8854_vm5 = vcmp.gt.f32.partialorder %v8822_v4, 0.0  ;;  %v8885_v3 = vmul.f32 0.01, %v8821_v42 }
 0x6f9   : > { %9034 = vmatmul.bf16.vlgmr.msra.gmra.mxu1 %v8945_v35  ;;  %v8886_v59 = vmul.f32 0.01, %v8822_v4  ;;  %v9251_v14 = vmul.f32 0.01, %v9187_v52  ;;  %v9252_v35 = vmul.f32 0.01, %v9188_v17  ;;  %v8456_v60 = vadd.f32 %v15366_v29, %v8420_v51 }
 0x6fa   : > { %9400 = vmatmul.bf16.vlgmr.msra.gmra.mxu2 %v9311_v19  ;;  %v9617_v0 = vmul.f32 0.01, %v9553_v40  ;;  %v9618_v20 = vmul.f32 0.01, %v9554_v25  ;;  %vm9219_vm6 = vcmp.gt.f32.partialorder %v9187_v52, 0.0  ;;  %vm9220_vm7 = vcmp.gt.f32.partialorder %v9188_v17, 0.0 }
 0x6fb   : > { %9766 = vmatmul.bf16.vlgmr.msra.gmra.mxu3 %v9677_v57  ;;  %vm9585_vm8 = vcmp.gt.f32.partialorder %v9553_v40, 0.0  ;;  %vm9586_vm9 = vcmp.gt.f32.partialorder %v9554_v25, 0.0  ;;  %v8549_v19 = vsel %vm8485_vm2, %v8453_v24, %v8517_v18  ;;  %v8550_v57 = vsel %vm8486_vm3, %v8454_v15, %v8518_v28  ;;  %v9155_v18 = vld [vmem:[#allocation4 + $0x40] sm:$0xff] }
 0x6fc   : > { %v8917_v55 = vsel %vm8853_vm4, %v8821_v42, %v8885_v3  ;;  %v8918_v26 = vsel %vm8854_vm5, %v8822_v4, %v8886_v59  ;;  %v9283_v54 = vsel %vm9219_vm6, %v9187_v52, %v9251_v14  ;;  %v9284_v61 = vsel %vm9220_vm7, %v9188_v17, %v9252_v35  ;;  %v8421_v42 = vld [vmem:[#allocation2 + $0x80] sm:$0xff]  ;;  %v8422_v17 = vld [vmem:[#allocation2 + $0x88] sm:$0xff] }
 0x6fd   : > { %v9649_v34 = vsel %vm9585_vm8, %v9553_v40, %v9617_v0  ;;  %v9650_v56 = vsel %vm9586_vm9, %v9554_v25, %v9618_v20  ;;  %v8579_v2 = vpack.c.bf16 %v8550_v57, %v8549_v19  ;;  %v8947_v63 = vpack.c.bf16 %v8918_v26, %v8917_v55  ;;  %v8789_v40 = vld [vmem:[#allocation3 + $0x40] sm:$0xff]  ;;  %v8790_v25 = vld [vmem:[#allocation3 + $0x48] sm:$0xff] }
 0x6fe   : > { %v9313_v11 = vpack.c.bf16 %v9284_v61, %v9283_v54  ;;  %v9679_v45 = vpack.c.bf16 %v9650_v56, %v9649_v34  ;;  %v8823_v21 = vadd.f32 %v15371_v5, %v8787_v47  ;;  %v8824_v27 = vadd.f32 %v15371_v5, %v8788_v39  ;;  %v9156_v3 = vld [vmem:[#allocation4 + $0x48] sm:$0xff]  ;;  %v9521_v59 = vld [vmem:[#allocation5 + $0x40] sm:$0xff] }
 0x6ff   : > { %v9189_v8 = vadd.f32 %v15376_v32, %v9153_v50  ;;  %v9190_v43 = vadd.f32 %v15376_v32, %v9154_v62  ;;  %v9555_v36 = vadd.f32 %v15383_v30, %v9519_v53  ;;  %v9556_v33 = vadd.f32 %v15383_v30, %v9520_v7  ;;  %v9522_v14 = vld [vmem:[#allocation5 + $0x48] sm:$0xff] }
 0x700   : > { %v8519_v12 = vmul.f32 0.01, %v8455_v46  ;;  %vm8487_vm10 = vcmp.gt.f32.partialorder %v8455_v46, 0.0  ;;  %vm8488_vm11 = vcmp.gt.f32.partialorder %v8456_v60, 0.0  ;;  %v8520_v23 = vmul.f32 0.01, %v8456_v60 }
 0x701   : > { %v8887_v44 = vmul.f32 0.01, %v8823_v21  ;;  %vm8855_vm12 = vcmp.gt.f32.partialorder %v8823_v21, 0.0  ;;  %vm8856_vm13 = vcmp.gt.f32.partialorder %v8824_v27, 0.0  ;;  %v8888_v1 = vmul.f32 0.01, %v8824_v27 }
 0x702   : > { %v9619_v9 = vmul.f32 0.01, %v9555_v36  ;;  %vm9221_vm14 = vcmp.gt.f32.partialorder %v9189_v8, 0.0  ;;  %vm9222_vm15 = vcmp.gt.f32.partialorder %v9190_v43, 0.0  ;;  %vm9587_vm0 = vcmp.gt.f32.partialorder %v9555_v36, 0.0 }
 0x703   : > { %vm9588_vm1 = vcmp.gt.f32.partialorder %v9556_v33, 0.0  ;;  %v8552_v22 = vsel %vm8488_vm11, %v8456_v60, %v8520_v23  ;;  %v8919_v6 = vsel %vm8855_vm12, %v8823_v21, %v8887_v44  ;;  %v8920_v13 = vsel %vm8856_vm13, %v8824_v27, %v8888_v1  ;;  %v8423_v21 = vld [vmem:[#allocation2 + $0xe8] sm:$0xff]  ;;  %v8424_v27 = vld [vmem:[#allocation2 + $0xb8] sm:$0xff] }
 0x704   : > { %v9651_v41 = vsel %vm9587_vm0, %v9555_v36, %v9619_v9  ;;  %v8948_v15 = vpack.c.bf16 %v8920_v13, %v8919_v6  ;;  %v8457_v28 = vadd.f32 %v15366_v29, %v8421_v42  ;;  %v8458_v35 = vadd.f32 %v15366_v29, %v8422_v17  ;;  %v8791_v36 = vld [vmem:[#allocation3 + $0x50] sm:$0xff]  ;;  %v9158_v1 = vld [vmem:[#allocation4 + $0x58] sm:$0xff] }
 0x705   : > { %v8825_v0 = vadd.f32 %v15371_v5, %v8789_v40  ;;  %v8826_v20 = vadd.f32 %v15371_v5, %v8790_v25  ;;  %v9191_v19 = vadd.f32 %v15376_v32, %v9155_v18  ;;  %v9192_v57 = vadd.f32 %v15376_v32, %v9156_v3 }
 0x706   : > { %v9557_v55 = vadd.f32 %v15383_v30, %v9521_v59  ;;  %v9558_v26 = vadd.f32 %v15383_v30, %v9522_v14  ;;  %v8521_v54 = vmul.f32 0.01, %v8457_v28  ;;  %vm8489_vm2 = vcmp.gt.f32.partialorder %v8457_v28, 0.0 }
 0x707   : > { %vm8490_vm3 = vcmp.gt.f32.partialorder %v8458_v35, 0.0  ;;  %v8522_v61 = vmul.f32 0.01, %v8458_v35  ;;  %v8889_v34 = vmul.f32 0.01, %v8825_v0  ;;  %vm8857_vm4 = vcmp.gt.f32.partialorder %v8825_v0, 0.0 }
 0x708   : > { %8670 = vmatmul.bf16.gmra.mxu0 %v8578_v37  ;;  %v9253_v37 = vmul.f32 0.01, %v9189_v8  ;;  %vm8858_vm5 = vcmp.gt.f32.partialorder %v8826_v20, 0.0  ;;  %v8890_v56 = vmul.f32 0.01, %v8826_v20  ;;  %vm9223_vm6 = vcmp.gt.f32.partialorder %v9191_v19, 0.0 }
 0x709   : > { %9039 = vmatmul.bf16.gmra.mxu1 %v8946_v48  ;;  %v9254_v48 = vmul.f32 0.01, %v9190_v43  ;;  %v9621_v10 = vmul.f32 0.01, %v9557_v55  ;;  %vm9224_vm7 = vcmp.gt.f32.partialorder %v9192_v57, 0.0  ;;  %vm9589_vm8 = vcmp.gt.f32.partialorder %v9557_v55, 0.0 }
 0x70a   : > { %9405 = vmatmul.bf16.gmra.mxu2 %v9312_v16  ;;  %v9620_v16 = vmul.f32 0.01, %v9556_v33  ;;  %v9285_v38 = vsel %vm9221_vm14, %v9189_v8, %v9253_v37  ;;  %vm9590_vm9 = vcmp.gt.f32.partialorder %v9558_v26, 0.0  ;;  %v8554_v51 = vsel %vm8490_vm3, %v8458_v35, %v8522_v61  ;;  %v9523_v37 = vld [vmem:[#allocation5 + $0x50] sm:$0xff] }
 0x70b   : > { %9771 = vmatmul.bf16.gmra.mxu3 %v9678_v58  ;;  %v8551_v58 = vsel %vm8487_vm10, %v8455_v46, %v8519_v12  ;;  %v9286_v24 = vsel %vm9222_vm15, %v9190_v43, %v9254_v48  ;;  %v8921_v47 = vsel %vm8857_vm4, %v8825_v0, %v8889_v34  ;;  %v8922_v39 = vsel %vm8858_vm5, %v8826_v20, %v8890_v56  ;;  %v9157_v12 = vld [vmem:[#allocation4 + $0x50] sm:$0xff]  ;;  %v9524_v48 = vld [vmem:[#allocation5 + $0x58] sm:$0xff]  ;;  %v8425_v0 = vld [vmem:[#allocation2 + $0x60] sm:$0xff] }
 0x70c   : > { %v9652_v31 = vsel %vm9588_vm1, %v9556_v33, %v9620_v16  ;;  %v8580_v49 = vpack.c.bf16 %v8552_v22, %v8551_v58  ;;  %v9314_v4 = vpack.c.bf16 %v9286_v24, %v9285_v38  ;;  %v9653_v62 = vsel %vm9589_vm8, %v9557_v55, %v9621_v10  ;;  %v8792_v33 = vld [vmem:[#allocation3 + $0x58] sm:$0xff]  ;;  %v8426_v20 = vld [vmem:[#allocation2 + $0xf0] sm:$0xff]  ;;  %v8793_v55 = vld [vmem:[#allocation3 + $0x60] sm:$0xff] }
 0x70d   : > { %v9680_v52 = vpack.c.bf16 %v9652_v31, %v9651_v41  ;;  %v8949_v60 = vpack.c.bf16 %v8922_v39, %v8921_v47  ;;  %v8459_v23 = vadd.f32 %v15366_v29, %v8423_v21  ;;  %v8460_v44 = vadd.f32 %v15366_v29, %v8424_v27  ;;  %v9160_v56 = vld [vmem:[#allocation4 + $0x68] sm:$0xff] }
 0x70e   : > { %v8827_v9 = vadd.f32 %v15371_v5, %v8791_v36  ;;  %v8828_v16 = vadd.f32 %v15371_v5, %v8792_v33  ;;  %v9193_v58 = vadd.f32 %v15376_v32, %v9157_v12  ;;  %v9194_v22 = vadd.f32 %v15376_v32, %v9158_v1 }
 0x70f   : > { %v9559_v6 = vadd.f32 %v15383_v30, %v9523_v37  ;;  %v9560_v13 = vadd.f32 %v15383_v30, %v9524_v48  ;;  %vm8491_vm10 = vcmp.gt.f32.partialorder %v8459_v23, 0.0  ;;  %vm8492_vm11 = vcmp.gt.f32.partialorder %v8460_v44, 0.0 }
 0x710   : > { %v8523_v38 = vmul.f32 0.01, %v8459_v23  ;;  %v8524_v24 = vmul.f32 0.01, %v8460_v44  ;;  %v8891_v41 = vmul.f32 0.01, %v8827_v9  ;;  %v8461_v61 = vadd.f32 %v15366_v29, %v8425_v0 }
 0x711   : > { %vm8859_vm12 = vcmp.gt.f32.partialorder %v8827_v9, 0.0  ;;  %vm8860_vm13 = vcmp.gt.f32.partialorder %v8828_v16, 0.0  ;;  %v8892_v31 = vmul.f32 0.01, %v8828_v16  ;;  %v9623_v42 = vmul.f32 0.01, %v9559_v6 }
 0x712   : > { %vm9225_vm14 = vcmp.gt.f32.partialorder %v9193_v58, 0.0  ;;  %vm9226_vm15 = vcmp.gt.f32.partialorder %v9194_v22, 0.0  ;;  %vm9591_vm0 = vcmp.gt.f32.partialorder %v9559_v6, 0.0  ;;  %vm9592_vm1 = vcmp.gt.f32.partialorder %v9560_v13, 0.0 }
 0x713   : > { %v8556_v17 = vsel %vm8492_vm11, %v8460_v44, %v8524_v24  ;;  %v8923_v40 = vsel %vm8859_vm12, %v8827_v9, %v8891_v41  ;;  %v8924_v25 = vsel %vm8860_vm13, %v8828_v16, %v8892_v31  ;;  %v9655_v3 = vsel %vm9591_vm0, %v9559_v6, %v9623_v42  ;;  %v8427_v9 = vld [vmem:[#allocation2 + $0x8] sm:$0xff]  ;;  %v8428_v16 = vld [vmem:[#allocation2 + $0x78] sm:$0xff]  ;;  %v8795_v6 = vld [vmem:[#allocation3 + $0x70] sm:$0xff] }
 0x714   : > { %v8950_v35 = vpack.c.bf16 %v8924_v25, %v8923_v40  ;;  %v8462_v34 = vadd.f32 %v15366_v29, %v8426_v20  ;;  %v8829_v10 = vadd.f32 %v15371_v5, %v8793_v55  ;;  %v8463_v24 = vadd.f32 %v15366_v29, %v8427_v9  ;;  %v9162_v31 = vld [vmem:[#allocation4 + $0x78] sm:$0xff] }
 0x715   : > { %v8464_v41 = vadd.f32 %v15366_v29, %v8428_v16  ;;  %v8831_v42 = vadd.f32 %v15371_v5, %v8795_v6 }
 0x716   : > { %vm8494_vm3 = vcmp.gt.f32.partialorder %v8462_v34, 0.0  ;;  %vm8861_vm4 = vcmp.gt.f32.partialorder %v8829_v10, 0.0 }
 0x717   : > { %vm8496_vm11 = vcmp.gt.f32.partialorder %v8464_v41, 0.0  ;;  %vm8863_vm12 = vcmp.gt.f32.partialorder %v8831_v42, 0.0 }
 0x718   : > { %8675 = vmatmul.bf16.gmra.mxu0 %v8579_v2  ;;  %v9255_v2 = vmul.f32 0.01, %v9191_v19 }
 0x719   : > { %9044 = vmatmul.bf16.gmra.mxu1 %v8947_v63  ;;  %v9256_v63 = vmul.f32 0.01, %v9192_v57 }
 0x71a   : > { %9410 = vmatmul.bf16.gmra.mxu2 %v9313_v11  ;;  %v9622_v11 = vmul.f32 0.01, %v9558_v26  ;;  %v9287_v50 = vsel %vm9223_vm6, %v9191_v19, %v9255_v2  ;;  %v9525_v2 = vld [vmem:[#allocation5 + $0x60] sm:$0xff] }
 0x71b   : > { %9776 = vmatmul.bf16.gmra.mxu3 %v9679_v45  ;;  %v8553_v45 = vsel %vm8489_vm2, %v8457_v28, %v8521_v54  ;;  %v9288_v46 = vsel %vm9224_vm7, %v9192_v57, %v9256_v63  ;;  %v9159_v54 = vld [vmem:[#allocation4 + $0x60] sm:$0xff]  ;;  %v9526_v63 = vld [vmem:[#allocation5 + $0x68] sm:$0xff]  ;;  %v9561_v47 = vadd.f32 %v15383_v30, %v9525_v2  ;;  %vm8493_vm2 = vcmp.gt.f32.partialorder %v8461_v61, 0.0 }
 0x71c   : > { %v9654_v53 = vsel %vm9590_vm9, %v9558_v26, %v9622_v11  ;;  %v8581_v7 = vpack.c.bf16 %v8554_v51, %v8553_v45  ;;  %v9315_v8 = vpack.c.bf16 %v9288_v46, %v9287_v50  ;;  %v8794_v26 = vld [vmem:[#allocation3 + $0x68] sm:$0xff]  ;;  %v9195_v45 = vadd.f32 %v15376_v32, %v9159_v54 }
 0x71d   : > { %v9681_v43 = vpack.c.bf16 %v9654_v53, %v9653_v62  ;;  %v8830_v11 = vadd.f32 %v15371_v5, %v8794_v26  ;;  %v9196_v51 = vadd.f32 %v15376_v32, %v9160_v56  ;;  %v9562_v39 = vadd.f32 %v15383_v30, %v9526_v63 }
 0x71e   : > { %v8525_v50 = vmul.f32 0.01, %v8461_v61  ;;  %v8526_v46 = vmul.f32 0.01, %v8462_v34  ;;  %v8893_v62 = vmul.f32 0.01, %v8829_v10 }
 0x71f   : > { %vm8862_vm5 = vcmp.gt.f32.partialorder %v8830_v11, 0.0  ;;  %v8894_v53 = vmul.f32 0.01, %v8830_v11  ;;  %v9625_v21 = vmul.f32 0.01, %v9561_v47  ;;  %vm9227_vm6 = vcmp.gt.f32.partialorder %v9195_v45, 0.0 }
 0x720   : > { %v9626_v27 = vmul.f32 0.01, %v9562_v39  ;;  %vm9228_vm7 = vcmp.gt.f32.partialorder %v9196_v51, 0.0  ;;  %vm9593_vm8 = vcmp.gt.f32.partialorder %v9561_v47, 0.0  ;;  %vm9594_vm9 = vcmp.gt.f32.partialorder %v9562_v39, 0.0 }
 0x721   : > { %v8925_v36 = vsel %vm8861_vm4, %v8829_v10, %v8893_v62  ;;  %v8926_v33 = vsel %vm8862_vm5, %v8830_v11, %v8894_v53  ;;  %v9657_v44 = vsel %vm9593_vm8, %v9561_v47, %v9625_v21  ;;  %v8429_v10 = vld [vmem:[#allocation2 + $0x38] sm:$0xff]  ;;  %v8797_v47 = vld [vmem:[#allocation3 + $0x80] sm:$0xff]  ;;  %v9164_v62 = vld [vmem:[#allocation4 + $0x88] sm:$0xff] }
 0x722   : > { %v9658_v1 = vsel %vm9594_vm9, %v9562_v39, %v9626_v27  ;;  %v8951_v48 = vpack.c.bf16 %v8926_v33, %v8925_v36  ;;  %v8798_v39 = vld [vmem:[#allocation3 + $0x88] sm:$0xff]  ;;  %v9529_v53 = vld [vmem:[#allocation5 + $0x80] sm:$0xff]  ;;  %v8833_v21 = vadd.f32 %v15371_v5, %v8797_v47 }
 0x723   : > { %v8834_v27 = vadd.f32 %v15371_v5, %v8798_v39  ;;  %v9565_v36 = vadd.f32 %v15383_v30, %v9529_v53 }
 0x724   : > { %vm8865_vm4 = vcmp.gt.f32.partialorder %v8833_v21, 0.0 }
 0x725   : > { %vm8866_vm5 = vcmp.gt.f32.partialorder %v8834_v27, 0.0  ;;  %v9629_v9 = vmul.f32 0.01, %v9565_v36  ;;  %vm9597_vm8 = vcmp.gt.f32.partialorder %v9565_v36, 0.0 }
 0x728   : > { %8680 = vmatmul.bf16.gmra.mxu0 %v8580_v49  ;;  %v9257_v49 = vmul.f32 0.01, %v9193_v58 }
 0x729   : > { %9049 = vmatmul.bf16.gmra.mxu1 %v8948_v15  ;;  %v9258_v15 = vmul.f32 0.01, %v9194_v22 }
 0x72a   : > { %9415 = vmatmul.bf16.gmra.mxu2 %v9314_v4  ;;  %v9624_v4 = vmul.f32 0.01, %v9560_v13  ;;  %v9289_v18 = vsel %vm9225_vm14, %v9193_v58, %v9257_v49  ;;  %v9527_v49 = vld [vmem:[#allocation5 + $0x70] sm:$0xff] }
 0x72b   : > { %9781 = vmatmul.bf16.gmra.mxu3 %v9680_v52  ;;  %v8555_v52 = vsel %vm8491_vm10, %v8459_v23, %v8523_v38  ;;  %v9290_v28 = vsel %vm9226_vm15, %v9194_v22, %v9258_v15  ;;  %v9683_v22 = vpack.c.bf16 %v9658_v1, %v9657_v44  ;;  %v9161_v38 = vld [vmem:[#allocation4 + $0x70] sm:$0xff]  ;;  %v9528_v15 = vld [vmem:[#allocation5 + $0x78] sm:$0xff]  ;;  %v9563_v40 = vadd.f32 %v15383_v30, %v9527_v49 }
 0x72c   : > { %v9656_v59 = vsel %vm9592_vm1, %v9560_v13, %v9624_v4  ;;  %v8582_v14 = vpack.c.bf16 %v8556_v17, %v8555_v52  ;;  %v9316_v19 = vpack.c.bf16 %v9290_v28, %v9289_v18  ;;  %v8796_v13 = vld [vmem:[#allocation3 + $0x78] sm:$0xff]  ;;  %v9197_v52 = vadd.f32 %v15376_v32, %v9161_v38  ;;  %v15475_v38 = vld [vmem:[%s15814_s10] ss:$0 sm:$0xff] }
 0x72d   : > { %v9682_v57 = vpack.c.bf16 %v9656_v59, %v9655_v3  ;;  %v8832_v4 = vadd.f32 %v15371_v5, %v8796_v13  ;;  %v9198_v17 = vadd.f32 %v15376_v32, %v9162_v31  ;;  %v9564_v25 = vadd.f32 %v15383_v30, %v9528_v15  ;;  %v8431_v15 = vld [vmem:[#allocation2 + $0x40] sm:$0xff] }
 0x72e   : > { %vm8495_vm10 = vcmp.gt.f32.partialorder %v8463_v24, 0.0  ;;  %v8527_v18 = vmul.f32 0.01, %v8463_v24  ;;  %v8528_v28 = vmul.f32 0.01, %v8464_v41  ;;  %vm9229_vm14 = vcmp.gt.f32.partialorder %v9197_v52, 0.0 }
 0x72f   : > { %v8895_v3 = vmul.f32 0.01, %v8831_v42  ;;  %vm8864_vm13 = vcmp.gt.f32.partialorder %v8832_v4, 0.0  ;;  %v8896_v59 = vmul.f32 0.01, %v8832_v4  ;;  %vm9230_vm15 = vcmp.gt.f32.partialorder %v9198_v17, 0.0 }
 0x730   : > { %v9627_v0 = vmul.f32 0.01, %v9563_v40  ;;  %v9628_v20 = vmul.f32 0.01, %v9564_v25  ;;  %vm9595_vm0 = vcmp.gt.f32.partialorder %v9563_v40, 0.0  ;;  %vm9596_vm1 = vcmp.gt.f32.partialorder %v9564_v25, 0.0 }
 0x731   : > { %v8927_v55 = vsel %vm8863_vm12, %v8831_v42, %v8895_v3  ;;  %v8928_v26 = vsel %vm8864_vm13, %v8832_v4, %v8896_v59  ;;  %v8897_v44 = vmul.f32 0.01, %v8833_v21  ;;  %v8898_v1 = vmul.f32 0.01, %v8834_v27  ;;  %v8800_v3 = vld [vmem:[#allocation3 + $0x98] sm:$0xff] }
 0x732   : > { %v9660_v56 = vsel %vm9596_vm1, %v9564_v25, %v9628_v20  ;;  %v8952_v63 = vpack.c.bf16 %v8928_v26, %v8927_v55  ;;  %v9661_v31 = vsel %vm9597_vm8, %v9565_v36, %v9629_v9  ;;  %v9532_v55 = vld [vmem:[#allocation5 + $0x98] sm:$0xff]  ;;  %v8836_v26 = vadd.f32 %v15371_v5, %v8800_v3  ;;  %v9533_v3 = vld [vmem:[#allocation5 + $0xa0] sm:$0xff] }
 0x733   : > { %v8929_v6 = vsel %vm8865_vm4, %v8833_v21, %v8897_v44  ;;  %v8930_v13 = vsel %vm8866_vm5, %v8834_v27, %v8898_v1  ;;  %v8433_v1 = vld [vmem:[#allocation2 + $0xe0] sm:$0xff] }
 0x734   : > { %v8953_v4 = vpack.c.bf16 %v8930_v13, %v8929_v6  ;;  %vm8868_vm13 = vcmp.gt.f32.partialorder %v8836_v26, 0.0 }
 0x738   : > { %8685 = vmatmul.bf16.gmra.mxu0 %v8581_v7  ;;  %v9259_v7 = vmul.f32 0.01, %v9195_v45 }
 0x739   : > { %9054 = vmatmul.bf16.gmra.mxu1 %v8949_v60  ;;  %v9260_v60 = vmul.f32 0.01, %v9196_v51 }
 0x73a   : > { %9420 = vmatmul.bf16.gmra.mxu2 %v9315_v8  ;;  %v8557_v8 = vsel %vm8493_vm2, %v8461_v61, %v8525_v50  ;;  %v9291_v12 = vsel %vm9227_vm6, %v9195_v45, %v9259_v7  ;;  %v9163_v50 = vld [vmem:[#allocation4 + $0x80] sm:$0xff]  ;;  %v9530_v7 = vld [vmem:[#allocation5 + $0x88] sm:$0xff] }
 0x73b   : > { %9786 = vmatmul.bf16.gmra.mxu3 %v9681_v43  ;;  %v8558_v43 = vsel %vm8494_vm3, %v8462_v34, %v8526_v46  ;;  %v9292_v23 = vsel %vm9228_vm7, %v9196_v51, %v9260_v60  ;;  %v9659_v34 = vsel %vm9595_vm0, %v9563_v40, %v9627_v0  ;;  %v8430_v51 = vld [vmem:[#allocation2 + $0x58] sm:$0xff]  ;;  %v8465_v46 = vadd.f32 %v15366_v29, %v8429_v10 }
 0x73c   : > { %v8583_v37 = vpack.c.bf16 %v8558_v43, %v8557_v8  ;;  %v9317_v58 = vpack.c.bf16 %v9292_v23, %v9291_v12  ;;  %v9684_v45 = vpack.c.bf16 %v9660_v56, %v9659_v34  ;;  %v8466_v60 = vadd.f32 %v15366_v29, %v8430_v51  ;;  %v9166_v0 = vld [vmem:[#allocation4 + $0x98] sm:$0xff] }
 0x73d   : > { %v9199_v8 = vadd.f32 %v15376_v32, %v9163_v50  ;;  %v9200_v43 = vadd.f32 %v15376_v32, %v9164_v62  ;;  %v9566_v33 = vadd.f32 %v15383_v30, %v9530_v7  ;;  %v8529_v12 = vmul.f32 0.01, %v8465_v46 }
 0x73e   : > { %vm8497_vm2 = vcmp.gt.f32.partialorder %v8465_v46, 0.0  ;;  %vm8498_vm3 = vcmp.gt.f32.partialorder %v8466_v60, 0.0  ;;  %v8530_v23 = vmul.f32 0.01, %v8466_v60  ;;  %v9202_v34 = vadd.f32 %v15376_v32, %v9166_v0 }
 0x73f   : > { %v9630_v16 = vmul.f32 0.01, %v9566_v33  ;;  %vm9231_vm6 = vcmp.gt.f32.partialorder %v9199_v8, 0.0  ;;  %vm9232_vm7 = vcmp.gt.f32.partialorder %v9200_v43, 0.0  ;;  %vm9598_vm9 = vcmp.gt.f32.partialorder %v9566_v33, 0.0 }
 0x740   : > { %v9266_v50 = vmul.f32 0.01, %v9202_v34 }
 0x741   : > { %v9662_v49 = vsel %vm9598_vm9, %v9566_v33, %v9630_v16 }
 0x748   : > { %8690 = vmatmul.bf16.gmra.mxu0 %v8582_v14  ;;  %v9261_v14 = vmul.f32 0.01, %v9197_v52 }
 0x749   : > { %9059 = vmatmul.bf16.gmra.mxu1 %v8950_v35  ;;  %v9262_v35 = vmul.f32 0.01, %v9198_v17 }
 0x74a   : > { %9425 = vmatmul.bf16.gmra.mxu2 %v9316_v19  ;;  %v8559_v19 = vsel %vm8495_vm10, %v8463_v24, %v8527_v18  ;;  %v9293_v54 = vsel %vm9229_vm14, %v9197_v52, %v9261_v14  ;;  %v8432_v52 = vld [vmem:[#allocation2 + $0xc8] sm:$0xff]  ;;  %v8467_v14 = vadd.f32 %v15366_v29, %v8431_v15  ;;  %v9167_v15 = vld [vmem:[#allocation4 + $0xa0] sm:$0xff] }
 0x74b   : > { %9791 = vmatmul.bf16.gmra.mxu3 %v9682_v57  ;;  %v8560_v57 = vsel %vm8496_vm11, %v8464_v41, %v8528_v28  ;;  %v9294_v61 = vsel %vm9230_vm15, %v9198_v17, %v9262_v35  ;;  %v8799_v17 = vld [vmem:[#allocation3 + $0x90] sm:$0xff]  ;;  %v9685_v28 = vpack.c.bf16 %v9662_v49, %v9661_v31  ;;  %v8468_v20 = vadd.f32 %v15366_v29, %v8432_v52  ;;  %v8802_v49 = vld [vmem:[#allocation3 + $0xa8] sm:$0xff] }
 0x74c   : > { %v8584_v2 = vpack.c.bf16 %v8560_v57, %v8559_v19  ;;  %v9318_v11 = vpack.c.bf16 %v9294_v61, %v9293_v54  ;;  %v9165_v35 = vld [vmem:[#allocation4 + $0x90] sm:$0xff]  ;;  %v8835_v19 = vadd.f32 %v15371_v5, %v8799_v17  ;;  %v8531_v56 = vmul.f32 0.01, %v8467_v14  ;;  %v9168_v17 = vld [vmem:[#allocation4 + $0xa8] sm:$0xff] }
 0x74d   : > { %v9531_v57 = vld [vmem:[#allocation5 + $0x90] sm:$0xff]  ;;  %v9201_v61 = vadd.f32 %v15376_v32, %v9165_v35  ;;  %v9568_v29 = vadd.f32 %v15383_v30, %v9532_v55  ;;  %vm8499_vm10 = vcmp.gt.f32.partialorder %v8467_v14, 0.0  ;;  %vm8500_vm11 = vcmp.gt.f32.partialorder %v8468_v20, 0.0  ;;  %v15512_v35 = vld [vmem:[%s15811_s16] ss:$0 sm:$0xff] }
 0x74e   : > { %v8899_v10 = vmul.f32 0.01, %v8835_v19  ;;  %vm8867_vm12 = vcmp.gt.f32.partialorder %v8835_v19, 0.0  ;;  %v8900_v5 = vmul.f32 0.01, %v8836_v26  ;;  %vm9234_vm15 = vcmp.gt.f32.partialorder %v9202_v34, 0.0 }
 0x74f   : > { %vm9233_vm14 = vcmp.gt.f32.partialorder %v9201_v61, 0.0  ;;  %v9265_v32 = vmul.f32 0.01, %v9201_v61  ;;  %v9632_v62 = vmul.f32 0.01, %v9568_v29  ;;  %vm9600_vm1 = vcmp.gt.f32.partialorder %v9568_v29, 0.0 }
 0x750   : > { %v8563_v7 = vsel %vm8499_vm10, %v8467_v14, %v8531_v56  ;;  %v8931_v27 = vsel %vm8867_vm12, %v8835_v19, %v8899_v10  ;;  %v9298_v36 = vsel %vm9234_vm15, %v9202_v34, %v9266_v50  ;;  %v9203_v0 = vadd.f32 %v15512_v35, %v9167_v15  ;;  %v9170_v15 = vld [vmem:[#allocation4 + $0xb8] sm:$0xff] }
 0x752   : > { %vm9235_vm8 = vcmp.gt.f32.partialorder %v9203_v0, 0.0 }
 0x758   : > { %8695 = vmatmul.bf16.gmra.mxu0 %v8583_v37  ;;  %v9263_v37 = vmul.f32 0.01, %v9199_v8 }
 0x759   : > { %9064 = vmatmul.bf16.gmra.mxu1 %v8951_v48  ;;  %v9264_v48 = vmul.f32 0.01, %v9200_v43 }
 0x75a   : > { %9430 = vmatmul.bf16.gmra.mxu2 %v9317_v58  ;;  %v8561_v58 = vsel %vm8497_vm2, %v8465_v46, %v8529_v12  ;;  %v9295_v24 = vsel %vm9231_vm6, %v9199_v8, %v9263_v37  ;;  %v8932_v8 = vsel %vm8868_vm13, %v8836_v26, %v8900_v5  ;;  %v9664_v12 = vsel %vm9600_vm1, %v9568_v29, %v9632_v62  ;;  %v15519_v26 = vld [vmem:[%s15813_s14] ss:$0 sm:$0xff] }
 0x75b   : > { %9796 = vmatmul.bf16.gmra.mxu3 %v9683_v22  ;;  %v8562_v22 = vsel %vm8498_vm3, %v8466_v60, %v8530_v23  ;;  %v9296_v41 = vsel %vm9232_vm7, %v9200_v43, %v9264_v48  ;;  %v9297_v43 = vsel %vm9233_vm14, %v9201_v61, %v9265_v32  ;;  %v8954_v16 = vpack.c.bf16 %v8932_v8, %v8931_v27 }
 0x75c   : > { %v8585_v42 = vpack.c.bf16 %v8562_v22, %v8561_v58  ;;  %v9319_v18 = vpack.c.bf16 %v9296_v41, %v9295_v24  ;;  %v8434_v58 = vld [vmem:[#allocation2 + $0x90] sm:$0xff]  ;;  %v8801_v22 = vld [vmem:[#allocation3 + $0xa0] sm:$0xff]  ;;  %v9320_v41 = vpack.c.bf16 %v9298_v36, %v9297_v43 }
 0x768   : > { %8700 = vmatmul.bf16.gmra.mxu0 %v8584_v2  ;;  %v9567_v2 = vadd.f32 %v15383_v30, %v9531_v57  ;;  %v9204_v57 = vadd.f32 %v15512_v35, %v9168_v17 }
 0x769   : > { %9069 = vmatmul.bf16.gmra.mxu1 %v8952_v63  ;;  %v8532_v63 = vmul.f32 0.01, %v8468_v20 }
 0x76a   : > { %9435 = vmatmul.bf16.gmra.mxu2 %v9318_v11  ;;  %v9631_v46 = vmul.f32 0.01, %v9567_v2  ;;  %vm9599_vm0 = vcmp.gt.f32.partialorder %v9567_v2, 0.0  ;;  %vm9236_vm9 = vcmp.gt.f32.partialorder %v9204_v57, 0.0 }
 0x76b   : > { %9801 = vmatmul.bf16.gmra.mxu3 %v9684_v45  ;;  %v8564_v60 = vsel %vm8500_vm11, %v8468_v20, %v8532_v63 }
 0x76c   : > { %v9663_v33 = vsel %vm9599_vm0, %v9567_v2, %v9631_v46  ;;  %v8586_v9 = vpack.c.bf16 %v8564_v60, %v8563_v7 }
 0x76d   : > { %v9686_v31 = vpack.c.bf16 %v9664_v12, %v9663_v33  ;;  %v8435_v12 = vld [vmem:[#allocation2 + $0x70] sm:$0xff] }
 0x775   : > { %v8666_v40 = vpop.f32.mrf.mxu0 }
 0x776   : > { %v9035_v25 = vpop.f32.mrf.mxu1  ;;  %v8749_v59 = vadd.f32 %v15475_v38, %v8666_v40 }
 0x778   : > { %8705 = vmatmul.bf16.gmra.mxu0 %v8585_v42  ;;  %v9115_v54 = vadd.f32 %v9035_v25, %v8749_v59  ;;  %v9534_v59 = vld [vmem:[#allocation5 + $0xa8] sm:$0xff] }
 0x779   : > { %9074 = vmatmul.bf16.gmra.mxu1 %v8953_v4  ;;  %v15498_v4 = vld [vmem:[%s15809_s0] ss:$0 sm:$0xff]  ;;  %v9570_v61 = vadd.f32 %v15519_v26, %v9534_v59 }
 0x77a   : > { %9440 = vmatmul.bf16.gmra.mxu2 %v9319_v18  ;;  %v8469_v52 = vadd.f32 %v15498_v4, %v8433_v1  ;;  %v8470_v25 = vadd.f32 %v15498_v4, %v8434_v58  ;;  %v15505_v18 = vld [vmem:[%s15810_s8] ss:$0 sm:$0xff] }
 0x77b   : > { %9806 = vmatmul.bf16.gmra.mxu3 %v9685_v28  ;;  %v8837_v28 = vadd.f32 %v15505_v18, %v8801_v22  ;;  %v8838_v14 = vadd.f32 %v15505_v18, %v8802_v49  ;;  %v9634_v32 = vmul.f32 0.01, %v9570_v61  ;;  %vm9602_vm11 = vcmp.gt.f32.partialorder %v9570_v61, 0.0 }
 0x77c   : > { %v8533_v55 = vmul.f32 0.01, %v8469_v52  ;;  %vm8501_vm4 = vcmp.gt.f32.partialorder %v8469_v52, 0.0  ;;  %v8534_v56 = vmul.f32 0.01, %v8470_v25  ;;  %vm8502_vm5 = vcmp.gt.f32.partialorder %v8470_v25, 0.0 }
 0x77d   : > { %v9401_v11 = vpop.f32.mrf.mxu2  ;;  %v8668_v47 = vpop.f32.mrf.mxu0  ;;  %v8901_v2 = vmul.f32 0.01, %v8837_v28  ;;  %vm8869_vm6 = vcmp.gt.f32.partialorder %v8837_v28, 0.0  ;;  %vm8870_vm7 = vcmp.gt.f32.partialorder %v8838_v14, 0.0  ;;  %v8902_v10 = vmul.f32 0.01, %v8838_v14 }
 0x77e   : > { %v9767_v45 = vpop.f32.mrf.mxu3  ;;  %v9481_v51 = vadd.f32 %v9401_v11, %v9115_v54  ;;  %v9037_v39 = vpop.f32.mrf.mxu1  ;;  %v8750_v30 = vadd.f32 %v15475_v38, %v8668_v47  ;;  %v9569_v54 = vadd.f32 %v15519_v26, %v9533_v3  ;;  %v9268_v47 = vmul.f32 0.01, %v9204_v57 }
 0x77f   : > { %v8565_v62 = vsel %vm8501_vm4, %v8469_v52, %v8533_v55  ;;  %v8933_v7 = vsel %vm8869_vm6, %v8837_v28, %v8901_v2  ;;  %v8934_v60 = vsel %vm8870_vm7, %v8838_v14, %v8902_v10  ;;  %v9666_v43 = vsel %vm9602_vm11, %v9570_v61, %v9634_v32 }
 0x780   : > { %v9847_v53 = vadd.f32 %v9767_v45, %v9481_v51  ;;  %v9116_v44 = vadd.f32 %v9037_v39, %v8750_v30  ;;  %v9267_v51 = vmul.f32 0.01, %v9203_v0  ;;  %v9633_v39 = vmul.f32 0.01, %v9569_v54 }
 0x781   : > { %vm9601_vm10 = vcmp.gt.f32.partialorder %v9569_v54, 0.0  ;;  %v9300_v27 = vsel %vm9236_vm9, %v9204_v57, %v9268_v47  ;;  %v8471_v49 = vadd.f32 %v15498_v4, %v8435_v12 }
 0x782   : > { %vm9879_vm2 = vcmp.gt.f32.partialorder %v9847_v53, 0.0  ;;  %v9911_v21 = vmul.f32 0.01, %v9847_v53  ;;  %v9665_v8 = vsel %vm9601_vm10, %v9569_v54, %v9633_v39 }
 0x783   : > { %vm8503_vm14 = vcmp.gt.f32.partialorder %v8471_v49, 0.0 }
 0x784   : > { %v9943_v23 = vsel %vm9879_vm2, %v9847_v53, %v9911_v21  ;;  %v8566_v53 = vsel %vm8502_vm5, %v8470_v25, %v8534_v56  ;;  %v9299_v21 = vsel %vm9235_vm8, %v9203_v0, %v9267_v51  ;;  %v9536_v25 = vld [vmem:[#allocation5 + $0xb8] sm:$0xff]  ;;  %v9206_v0 = vadd.f32 %v15512_v35, %v9170_v15 }
 0x785   : > { %9975 = vst [vmem:[%s13863_s11] sm:$0xff] %v9943_v23  ;;  %v9403_v37 = vpop.f32.mrf.mxu2  ;;  %v8671_v13 = vpop.f32.mrf.mxu0  ;;  %v8587_v1 = vpack.c.bf16 %v8566_v53, %v8565_v62  ;;  %v9572_v57 = vadd.f32 %v15519_v26, %v9536_v25 }
 0x786   : > { %v9769_v48 = vpop.f32.mrf.mxu3  ;;  %v9482_v6 = vadd.f32 %v9403_v37, %v9116_v44  ;;  %v9040_v24 = vpop.f32.mrf.mxu1  ;;  %v8751_v42 = vadd.f32 %v15475_v38, %v8671_v13  ;;  %v8955_v37 = vpack.c.bf16 %v8934_v60, %v8933_v7  ;;  %v9687_v13 = vpack.c.bf16 %v9666_v43, %v9665_v8  ;;  %v8437_v43 = vld [vmem:[#allocation2 + $0xa8] sm:$0xff] }
 0x787   : > { %v9636_v51 = vmul.f32 0.01, %v9572_v57  ;;  %vm9604_vm5 = vcmp.gt.f32.partialorder %v9572_v57, 0.0 }
 0x788   : > { %v9848_v40 = vadd.f32 %v9769_v48, %v9482_v6  ;;  %8710 = vmatmul.bf16.gmra.mxu0 %v8586_v9  ;;  %v9117_v19 = vadd.f32 %v9040_v24, %v8751_v42  ;;  %v8436_v48 = vld [vmem:[#allocation2 + $0xc0] sm:$0xff]  ;;  %v8803_v9 = vld [vmem:[#allocation3 + $0xb0] sm:$0xff]  ;;  %v9321_v6 = vpack.c.bf16 %v9300_v27, %v9299_v21  ;;  %v8804_v24 = vld [vmem:[#allocation3 + $0xb8] sm:$0xff] }
 0x789   : > { %9079 = vmatmul.bf16.gmra.mxu1 %v8954_v16  ;;  %v8472_v52 = vadd.f32 %v15498_v4, %v8436_v48  ;;  %v8839_v17 = vadd.f32 %v15505_v18, %v8803_v9  ;;  %v8840_v28 = vadd.f32 %v15505_v18, %v8804_v24  ;;  %v9668_v21 = vsel %vm9604_vm5, %v9572_v57, %v9636_v51 }
 0x78a   : > { %vm9880_vm3 = vcmp.gt.f32.partialorder %v9848_v40, 0.0  ;;  %v9912_v20 = vmul.f32 0.01, %v9848_v40  ;;  %9445 = vmatmul.bf16.gmra.mxu2 %v9320_v41  ;;  %v9169_v41 = vld [vmem:[#allocation4 + $0xb0] sm:$0xff]  ;;  %v8473_v24 = vadd.f32 %v15498_v4, %v8437_v43 }
 0x78b   : > { %9811 = vmatmul.bf16.gmra.mxu3 %v9686_v31  ;;  %v9205_v3 = vadd.f32 %v15512_v35, %v9169_v41  ;;  %v8536_v54 = vmul.f32 0.01, %v8472_v52  ;;  %v8903_v61 = vmul.f32 0.01, %v8839_v17  ;;  %vm8504_vm15 = vcmp.gt.f32.partialorder %v8472_v52, 0.0 }
 0x78c   : > { %v9944_v34 = vsel %vm9880_vm3, %v9848_v40, %v9912_v20  ;;  %v9535_v40 = vld [vmem:[#allocation5 + $0xb0] sm:$0xff]  ;;  %v8535_v20 = vmul.f32 0.01, %v8471_v49  ;;  %vm8871_vm0 = vcmp.gt.f32.partialorder %v8839_v17, 0.0  ;;  %vm8872_vm1 = vcmp.gt.f32.partialorder %v8840_v28, 0.0 }
 0x78d   : > { %9976 = vst [vmem:[%s13863_s11 + $0x8] sm:$0xff] %v9944_v34  ;;  %v9406_v29 = vpop.f32.mrf.mxu2  ;;  %v8673_v45 = vpop.f32.mrf.mxu0  ;;  %v8904_v2 = vmul.f32 0.01, %v8840_v28  ;;  %vm9237_vm2 = vcmp.gt.f32.partialorder %v9205_v3, 0.0  ;;  %vm9238_vm3 = vcmp.gt.f32.partialorder %v9206_v0, 0.0  ;;  %v8935_v62 = vsel %vm8871_vm0, %v8839_v17, %v8903_v61 }
 0x78e   : > { %v9772_v63 = vpop.f32.mrf.mxu3  ;;  %v9483_v11 = vadd.f32 %v9406_v29, %v9117_v19  ;;  %v9042_v5 = vpop.f32.mrf.mxu1  ;;  %v8752_v46 = vadd.f32 %v15475_v38, %v8673_v45  ;;  %v9571_v19 = vadd.f32 %v15519_v26, %v9535_v40  ;;  %v9270_v45 = vmul.f32 0.01, %v9206_v0 }
 0x78f   : > { %v8567_v32 = vsel %vm8503_vm14, %v8471_v49, %v8535_v20  ;;  %v8936_v53 = vsel %vm8872_vm1, %v8840_v28, %v8904_v2  ;;  %vm8505_vm8 = vcmp.gt.f32.partialorder %v8473_v24, 0.0 }
 0x790   : > { %v9849_v50 = vadd.f32 %v9772_v63, %v9483_v11  ;;  %v9118_v33 = vadd.f32 %v9042_v5, %v8752_v46  ;;  %v9269_v11 = vmul.f32 0.01, %v9205_v3  ;;  %v9635_v5 = vmul.f32 0.01, %v9571_v19 }
 0x791   : > { %vm9603_vm4 = vcmp.gt.f32.partialorder %v9571_v19, 0.0  ;;  %v9302_v7 = vsel %vm9238_vm3, %v9206_v0, %v9270_v45 }
 0x792   : > { %vm9881_vm12 = vcmp.gt.f32.partialorder %v9849_v50, 0.0  ;;  %v9913_v30 = vmul.f32 0.01, %v9849_v50  ;;  %v9667_v60 = vsel %vm9603_vm4, %v9571_v19, %v9635_v5 }
 0x794   : > { %v9945_v36 = vsel %vm9881_vm12, %v9849_v50, %v9913_v30  ;;  %v8568_v50 = vsel %vm8504_vm15, %v8472_v52, %v8536_v54  ;;  %v9301_v30 = vsel %vm9237_vm2, %v9205_v3, %v9269_v11  ;;  %v9538_v52 = vld [vmem:[#allocation5 + $0xc8] sm:$0xff] }
 0x795   : > { %9977 = vst [vmem:[%s13863_s11 + $0x10] sm:$0xff] %v9945_v36  ;;  %v9408_v23 = vpop.f32.mrf.mxu2  ;;  %v8676_v58 = vpop.f32.mrf.mxu0  ;;  %v8438_v36 = vld [vmem:[#allocation2 + $0xd0] sm:$0xff]  ;;  %v9574_v20 = vadd.f32 %v15519_v26, %v9538_v52 }
 0x796   : > { %v9774_v44 = vpop.f32.mrf.mxu3  ;;  %v9484_v16 = vadd.f32 %v9408_v23, %v9118_v33  ;;  %v9045_v22 = vpop.f32.mrf.mxu1  ;;  %v8753_v31 = vadd.f32 %v15475_v38, %v8676_v58  ;;  %v8588_v23 = vpack.c.bf16 %v8568_v50, %v8567_v32  ;;  %v9688_v58 = vpack.c.bf16 %v9668_v21, %v9667_v60  ;;  %v8439_v21 = vld [vmem:[#allocation2 + $0x10] sm:$0xff] }
 0x797   : > { %v8474_v41 = vadd.f32 %v15498_v4, %v8438_v36  ;;  %v9638_v11 = vmul.f32 0.01, %v9574_v20  ;;  %vm9606_vm15 = vcmp.gt.f32.partialorder %v9574_v20, 0.0 }
 0x798   : > { %v9850_v42 = vadd.f32 %v9774_v44, %v9484_v16  ;;  %8715 = vmatmul.bf16.gmra.mxu0 %v8587_v1  ;;  %v9119_v14 = vadd.f32 %v9045_v22, %v8753_v31  ;;  %v8956_v44 = vpack.c.bf16 %v8936_v53, %v8935_v62  ;;  %v8805_v1 = vld [vmem:[#allocation3 + $0xc0] sm:$0xff]  ;;  %v9322_v16 = vpack.c.bf16 %v9302_v7, %v9301_v30  ;;  %v8806_v22 = vld [vmem:[#allocation3 + $0xc8] sm:$0xff] }
 0x799   : > { %9084 = vmatmul.bf16.gmra.mxu1 %v8955_v37  ;;  %v9172_v31 = vld [vmem:[#allocation4 + $0xc8] sm:$0xff]  ;;  %v8841_v15 = vadd.f32 %v15505_v18, %v8805_v1  ;;  %v8842_v17 = vadd.f32 %v15505_v18, %v8806_v22  ;;  %vm8506_vm9 = vcmp.gt.f32.partialorder %v8474_v41, 0.0  ;;  %v9670_v30 = vsel %vm9606_vm15, %v9574_v20, %v9638_v11 }
 0x79a   : > { %vm9882_vm13 = vcmp.gt.f32.partialorder %v9850_v42, 0.0  ;;  %v9914_v59 = vmul.f32 0.01, %v9850_v42  ;;  %9450 = vmatmul.bf16.gmra.mxu2 %v9321_v6  ;;  %v9171_v6 = vld [vmem:[#allocation4 + $0xc0] sm:$0xff]  ;;  %v9208_v3 = vadd.f32 %v15512_v35, %v9172_v31  ;;  %v8475_v22 = vadd.f32 %v15498_v4, %v8439_v21  ;;  %v9539_v31 = vld [vmem:[#allocation5 + $0xd0] sm:$0xff] }
 0x79b   : > { %9816 = vmatmul.bf16.gmra.mxu3 %v9687_v13  ;;  %v9207_v40 = vadd.f32 %v15512_v35, %v9171_v6  ;;  %vm8873_vm10 = vcmp.gt.f32.partialorder %v8841_v15, 0.0  ;;  %vm8874_vm11 = vcmp.gt.f32.partialorder %v8842_v17, 0.0  ;;  %v8905_v54 = vmul.f32 0.01, %v8841_v15 }
 0x79c   : > { %v9946_v55 = vsel %vm9882_vm13, %v9850_v42, %v9914_v59  ;;  %v9537_v42 = vld [vmem:[#allocation5 + $0xc0] sm:$0xff]  ;;  %v8537_v59 = vmul.f32 0.01, %v8473_v24  ;;  %v8906_v61 = vmul.f32 0.01, %v8842_v17  ;;  %vm9240_vm13 = vcmp.gt.f32.partialorder %v9208_v3, 0.0 }
 0x79d   : > { %9978 = vst [vmem:[%s13863_s11 + $0x18] sm:$0xff] %v9946_v55  ;;  %v9411_v34 = vpop.f32.mrf.mxu2  ;;  %v8678_v63 = vpop.f32.mrf.mxu0  ;;  %v9573_v0 = vadd.f32 %v15519_v26, %v9537_v42  ;;  %vm9239_vm12 = vcmp.gt.f32.partialorder %v9207_v40, 0.0  ;;  %v8937_v32 = vsel %vm8873_vm10, %v8841_v15, %v8905_v54  ;;  %vm8507_vm2 = vcmp.gt.f32.partialorder %v8475_v22, 0.0 }
 0x79e   : > { %v9777_v56 = vpop.f32.mrf.mxu3  ;;  %v9485_v29 = vadd.f32 %v9411_v34, %v9119_v14  ;;  %v9047_v10 = vpop.f32.mrf.mxu1  ;;  %v8754_v39 = vadd.f32 %v15475_v38, %v8678_v63  ;;  %v8538_v14 = vmul.f32 0.01, %v8474_v41  ;;  %v9272_v63 = vmul.f32 0.01, %v9208_v3 }
 0x79f   : > { %vm9605_vm14 = vcmp.gt.f32.partialorder %v9573_v0, 0.0  ;;  %v8569_v51 = vsel %vm8505_vm8, %v8473_v24, %v8537_v59  ;;  %v8938_v50 = vsel %vm8874_vm11, %v8842_v17, %v8906_v61 }
 0x7a0   : > { %v9851_v47 = vadd.f32 %v9777_v56, %v9485_v29  ;;  %v9120_v8 = vadd.f32 %v9047_v10, %v8754_v39  ;;  %v9271_v29 = vmul.f32 0.01, %v9207_v40  ;;  %v9637_v10 = vmul.f32 0.01, %v9573_v0 }
 0x7a1   : > { %v9304_v62 = vsel %vm9240_vm13, %v9208_v3, %v9272_v63  ;;  %v9575_v3 = vadd.f32 %v15519_v26, %v9539_v31 }
 0x7a2   : > { %vm9883_vm6 = vcmp.gt.f32.partialorder %v9851_v47, 0.0  ;;  %v9915_v46 = vmul.f32 0.01, %v9851_v47  ;;  %v9669_v53 = vsel %vm9605_vm14, %v9573_v0, %v9637_v10 }
 0x7a3   : > { %vm9607_vm8 = vcmp.gt.f32.partialorder %v9575_v3, 0.0 }
 0x7a4   : > { %v9947_v27 = vsel %vm9883_vm6, %v9851_v47, %v9915_v46  ;;  %v8570_v47 = vsel %vm8506_vm9, %v8474_v41, %v8538_v14  ;;  %v9303_v46 = vsel %vm9239_vm12, %v9207_v40, %v9271_v29 }
 0x7a5   : > { %9979 = vst [vmem:[%s13863_s11 + $0x20] sm:$0xff] %v9947_v27  ;;  %v9413_v33 = vpop.f32.mrf.mxu2  ;;  %v8681_v48 = vpop.f32.mrf.mxu0  ;;  %v8440_v27 = vld [vmem:[#allocation2 + $0x28] sm:$0xff]  ;;  %v8589_v36 = vpack.c.bf16 %v8570_v47, %v8569_v51 }
 0x7a6   : > { %v9779_v12 = vpop.f32.mrf.mxu3  ;;  %v9486_v37 = vadd.f32 %v9413_v33, %v9120_v8  ;;  %v9050_v9 = vpop.f32.mrf.mxu1  ;;  %v8755_v13 = vadd.f32 %v15475_v38, %v8681_v48  ;;  %v8957_v33 = vpack.c.bf16 %v8938_v50, %v8937_v32  ;;  %v9689_v48 = vpack.c.bf16 %v9670_v30, %v9669_v53  ;;  %v8441_v30 = vld [vmem:[#allocation2 + $0xa0] sm:$0xff] }
 0x7a7   : > { %v8476_v6 = vadd.f32 %v15498_v4, %v8440_v27 }
 0x7a8   : > { %v9852_v49 = vadd.f32 %v9779_v12, %v9486_v37  ;;  %8720 = vmatmul.bf16.gmra.mxu0 %v8588_v23  ;;  %v9121_v28 = vadd.f32 %v9050_v9, %v8755_v13  ;;  %v8807_v12 = vld [vmem:[#allocation3 + $0xd0] sm:$0xff]  ;;  %v9323_v37 = vpack.c.bf16 %v9304_v62, %v9303_v46  ;;  %v8808_v9 = vld [vmem:[#allocation3 + $0xd8] sm:$0xff] }
 0x7a9   : > { %9089 = vmatmul.bf16.gmra.mxu1 %v8956_v44  ;;  %v9174_v13 = vld [vmem:[#allocation4 + $0xd8] sm:$0xff]  ;;  %v8843_v41 = vadd.f32 %v15505_v18, %v8807_v12  ;;  %v8844_v15 = vadd.f32 %v15505_v18, %v8808_v9  ;;  %vm8508_vm3 = vcmp.gt.f32.partialorder %v8476_v6, 0.0  ;;  %v8477_v9 = vadd.f32 %v15498_v4, %v8441_v30 }
 0x7aa   : > { %vm9884_vm7 = vcmp.gt.f32.partialorder %v9852_v49, 0.0  ;;  %v9916_v25 = vmul.f32 0.01, %v9852_v49  ;;  %9455 = vmatmul.bf16.gmra.mxu2 %v9322_v16  ;;  %v9173_v16 = vld [vmem:[#allocation4 + $0xd0] sm:$0xff]  ;;  %v9210_v40 = vadd.f32 %v15512_v35, %v9174_v13  ;;  %v9541_v13 = vld [vmem:[#allocation5 + $0xe0] sm:$0xff] }
 0x7ab   : > { %9821 = vmatmul.bf16.gmra.mxu3 %v9688_v58  ;;  %v9209_v42 = vadd.f32 %v15512_v35, %v9173_v16  ;;  %vm8875_vm4 = vcmp.gt.f32.partialorder %v8843_v41, 0.0  ;;  %vm8876_vm5 = vcmp.gt.f32.partialorder %v8844_v15, 0.0  ;;  %vm8509_vm12 = vcmp.gt.f32.partialorder %v8477_v9, 0.0 }
 0x7ac   : > { %v9948_v19 = vsel %vm9884_vm7, %v9852_v49, %v9916_v25  ;;  %v9540_v49 = vld [vmem:[#allocation5 + $0xd8] sm:$0xff]  ;;  %v8539_v25 = vmul.f32 0.01, %v8475_v22  ;;  %vm9242_vm7 = vcmp.gt.f32.partialorder %v9210_v40, 0.0 }
 0x7ad   : > { %9980 = vst [vmem:[%s13863_s11 + $0x28] sm:$0xff] %v9948_v19  ;;  %v9416_v57 = vpop.f32.mrf.mxu2  ;;  %v8683_v56 = vpop.f32.mrf.mxu0  ;;  %v9576_v59 = vadd.f32 %v15519_v26, %v9540_v49  ;;  %v8907_v19 = vmul.f32 0.01, %v8843_v41  ;;  %vm9241_vm6 = vcmp.gt.f32.partialorder %v9209_v42, 0.0 }
 0x7ae   : > { %v9782_v55 = vpop.f32.mrf.mxu3  ;;  %v9487_v34 = vadd.f32 %v9416_v57, %v9121_v28  ;;  %v9052_v2 = vpop.f32.mrf.mxu1  ;;  %v8756_v5 = vadd.f32 %v15475_v38, %v8683_v56  ;;  %v8540_v28 = vmul.f32 0.01, %v8476_v6  ;;  %v8908_v57 = vmul.f32 0.01, %v8844_v15 }
 0x7af   : > { %v9274_v56 = vmul.f32 0.01, %v9210_v40  ;;  %v9640_v29 = vmul.f32 0.01, %v9576_v59  ;;  %vm9608_vm9 = vcmp.gt.f32.partialorder %v9576_v59, 0.0  ;;  %v8571_v11 = vsel %vm8507_vm2, %v8475_v22, %v8539_v25 }
 0x7b0   : > { %v9853_v45 = vadd.f32 %v9782_v55, %v9487_v34  ;;  %v9122_v60 = vadd.f32 %v9052_v2, %v8756_v5  ;;  %v9273_v34 = vmul.f32 0.01, %v9209_v42  ;;  %v9639_v2 = vmul.f32 0.01, %v9575_v3 }
 0x7b1   : > { %v8939_v51 = vsel %vm8875_vm4, %v8843_v41, %v8907_v19  ;;  %v8940_v47 = vsel %vm8876_vm5, %v8844_v15, %v8908_v57  ;;  %v9306_v32 = vsel %vm9242_vm7, %v9210_v40, %v9274_v56  ;;  %v9672_v46 = vsel %vm9608_vm9, %v9576_v59, %v9640_v29 }
 0x7b2   : > { %vm9885_vm0 = vcmp.gt.f32.partialorder %v9853_v45, 0.0  ;;  %v9917_v39 = vmul.f32 0.01, %v9853_v45  ;;  %v9671_v50 = vsel %vm9607_vm8, %v9575_v3, %v9639_v2  ;;  %v9577_v40 = vadd.f32 %v15519_v26, %v9541_v13 }
 0x7b4   : > { %v9949_v7 = vsel %vm9885_vm0, %v9853_v45, %v9917_v39  ;;  %v8572_v45 = vsel %vm8508_vm3, %v8476_v6, %v8540_v28  ;;  %v9305_v39 = vsel %vm9241_vm6, %v9209_v42, %v9273_v34  ;;  %vm9609_vm2 = vcmp.gt.f32.partialorder %v9577_v40, 0.0 }
 0x7b5   : > { %9981 = vst [vmem:[%s13863_s11 + $0x30] sm:$0xff] %v9949_v7  ;;  %v9418_v8 = vpop.f32.mrf.mxu2  ;;  %v8686_v44 = vpop.f32.mrf.mxu0  ;;  %v8442_v7 = vld [vmem:[#allocation2 + $0xf8] sm:$0xff]  ;;  %v8590_v27 = vpack.c.bf16 %v8572_v45, %v8571_v11 }
 0x7b6   : > { %v9784_v43 = vpop.f32.mrf.mxu3  ;;  %v9488_v23 = vadd.f32 %v9418_v8, %v9122_v60  ;;  %v9055_v1 = vpop.f32.mrf.mxu1  ;;  %v8757_v58 = vadd.f32 %v15475_v38, %v8686_v44  ;;  %v8958_v8 = vpack.c.bf16 %v8940_v47, %v8939_v51  ;;  %v9690_v44 = vpack.c.bf16 %v9672_v46, %v9671_v50  ;;  %v8443_v46 = vld [vmem:[#allocation2 + $0x20] sm:$0xff] }
 0x7b7   : > { %v8478_v16 = vadd.f32 %v15498_v4, %v8442_v7 }
 0x7b8   : > { %v9854_v24 = vadd.f32 %v9784_v43, %v9488_v23  ;;  %8725 = vmatmul.bf16.gmra.mxu0 %v8589_v36  ;;  %v9123_v17 = vadd.f32 %v9055_v1, %v8757_v58  ;;  %v8809_v43 = vld [vmem:[#allocation3 + $0xe0] sm:$0xff]  ;;  %v9324_v23 = vpack.c.bf16 %v9306_v32, %v9305_v39  ;;  %v8810_v1 = vld [vmem:[#allocation3 + $0xe8] sm:$0xff] }
 0x7b9   : > { %9094 = vmatmul.bf16.gmra.mxu1 %v8957_v33  ;;  %v9176_v58 = vld [vmem:[#allocation4 + $0xe8] sm:$0xff]  ;;  %v8845_v6 = vadd.f32 %v15505_v18, %v8809_v43  ;;  %v8846_v41 = vadd.f32 %v15505_v18, %v8810_v1  ;;  %vm8510_vm13 = vcmp.gt.f32.partialorder %v8478_v16, 0.0  ;;  %v8479_v1 = vadd.f32 %v15498_v4, %v8443_v46 }
 0x7ba   : > { %vm9886_vm1 = vcmp.gt.f32.partialorder %v9854_v24, 0.0  ;;  %v9918_v52 = vmul.f32 0.01, %v9854_v24  ;;  %9460 = vmatmul.bf16.gmra.mxu2 %v9323_v37  ;;  %v9175_v37 = vld [vmem:[#allocation4 + $0xe0] sm:$0xff]  ;;  %v9212_v42 = vadd.f32 %v15512_v35, %v9176_v58  ;;  %v9543_v58 = vld [vmem:[#allocation5 + $0xf0] sm:$0xff] }
 0x7bb   : > { %9826 = vmatmul.bf16.gmra.mxu3 %v9689_v48  ;;  %v9211_v31 = vadd.f32 %v15512_v35, %v9175_v37  ;;  %vm8877_vm14 = vcmp.gt.f32.partialorder %v8845_v6, 0.0  ;;  %vm8878_vm15 = vcmp.gt.f32.partialorder %v8846_v41, 0.0  ;;  %vm8511_vm6 = vcmp.gt.f32.partialorder %v8479_v1, 0.0 }
 0x7bc   : > { %v9950_v14 = vsel %vm9886_vm1, %v9854_v24, %v9918_v52  ;;  %v9542_v24 = vld [vmem:[#allocation5 + $0xe8] sm:$0xff]  ;;  %v8541_v52 = vmul.f32 0.01, %v8477_v9  ;;  %vm9244_vm1 = vcmp.gt.f32.partialorder %v9212_v42, 0.0 }
 0x7bd   : > { %9982 = vst [vmem:[%s13863_s11 + $0x38] sm:$0xff] %v9950_v14  ;;  %v9421_v0 = vpop.f32.mrf.mxu2  ;;  %v8688_v54 = vpop.f32.mrf.mxu0  ;;  %v9578_v25 = vadd.f32 %v15519_v26, %v9542_v24  ;;  %v8909_v14 = vmul.f32 0.01, %v8845_v6  ;;  %vm9243_vm0 = vcmp.gt.f32.partialorder %v9211_v31, 0.0 }
 0x7be   : > { %v9787_v20 = vpop.f32.mrf.mxu3  ;;  %v9489_v55 = vadd.f32 %v9421_v0, %v9123_v17  ;;  %v9057_v61 = vpop.f32.mrf.mxu1  ;;  %v8758_v10 = vadd.f32 %v15475_v38, %v8688_v54  ;;  %v8542_v17 = vmul.f32 0.01, %v8478_v16  ;;  %v8910_v0 = vmul.f32 0.01, %v8846_v41 }
 0x7bf   : > { %v9276_v54 = vmul.f32 0.01, %v9212_v42  ;;  %v9642_v34 = vmul.f32 0.01, %v9578_v25  ;;  %vm9610_vm3 = vcmp.gt.f32.partialorder %v9578_v25, 0.0  ;;  %v8573_v29 = vsel %vm8509_vm12, %v8477_v9, %v8541_v52 }
 0x7c0   : > { %v9855_v63 = vadd.f32 %v9787_v20, %v9489_v55  ;;  %v9124_v53 = vadd.f32 %v9057_v61, %v8758_v10  ;;  %v9275_v55 = vmul.f32 0.01, %v9211_v31  ;;  %v9641_v61 = vmul.f32 0.01, %v9577_v40 }
 0x7c1   : > { %v8941_v11 = vsel %vm8877_vm14, %v8845_v6, %v8909_v14  ;;  %v8942_v45 = vsel %vm8878_vm15, %v8846_v41, %v8910_v0  ;;  %v9308_v51 = vsel %vm9244_vm1, %v9212_v42, %v9276_v54  ;;  %v9674_v39 = vsel %vm9610_vm3, %v9578_v25, %v9642_v34 }
 0x7c2   : > { %vm9887_vm10 = vcmp.gt.f32.partialorder %v9855_v63, 0.0  ;;  %v9919_v5 = vmul.f32 0.01, %v9855_v63  ;;  %v9673_v47 = vsel %vm9609_vm2, %v9577_v40, %v9641_v61 }
 0x7c4   : > { %v9951_v62 = vsel %vm9887_vm10, %v9855_v63, %v9919_v5  ;;  %v8574_v63 = vsel %vm8510_vm13, %v8478_v16, %v8542_v17  ;;  %v9307_v5 = vsel %vm9243_vm0, %v9211_v31, %v9275_v55  ;;  %v8543_v31 = vmul.f32 0.01, %v8479_v1 }
 0x7c5   : > { %9983 = vst [vmem:[%s13863_s11 + $0x40] sm:$0xff] %v9951_v62  ;;  %v9423_v60 = vpop.f32.mrf.mxu2  ;;  %v8691_v33 = vpop.f32.mrf.mxu0  ;;  %v8444_v62 = vld [vmem:[#allocation2 + $0x98] sm:$0xff]  ;;  %v8591_v7 = vpack.c.bf16 %v8574_v63, %v8573_v29 }
 0x7c6   : > { %v9789_v21 = vpop.f32.mrf.mxu3  ;;  %v9490_v36 = vadd.f32 %v9423_v60, %v9124_v53  ;;  %v9060_v12 = vpop.f32.mrf.mxu1  ;;  %v8759_v48 = vadd.f32 %v15475_v38, %v8691_v33  ;;  %v8959_v60 = vpack.c.bf16 %v8942_v45, %v8941_v11  ;;  %v9691_v33 = vpack.c.bf16 %v9674_v39, %v9673_v47 }
 0x7c7   : > { %v8480_v37 = vadd.f32 %v15498_v4, %v8444_v62 }
 0x7c8   : > { %v9856_v22 = vadd.f32 %v9789_v21, %v9490_v36  ;;  %8730 = vmatmul.bf16.gmra.mxu0 %v8590_v27  ;;  %v9125_v15 = vadd.f32 %v9060_v12, %v8759_v48  ;;  %v8811_v21 = vld [vmem:[#allocation3 + $0xf0] sm:$0xff]  ;;  %v9325_v36 = vpack.c.bf16 %v9308_v51, %v9307_v5  ;;  %v8812_v12 = vld [vmem:[#allocation3 + $0xf8] sm:$0xff] }
 0x7c9   : > { %9099 = vmatmul.bf16.gmra.mxu1 %v8958_v8  ;;  %v9178_v48 = vld [vmem:[#allocation4 + $0xf8] sm:$0xff]  ;;  %v8847_v16 = vadd.f32 %v15505_v18, %v8811_v21  ;;  %v8848_v6 = vadd.f32 %v15505_v18, %v8812_v12  ;;  %vm8512_vm7 = vcmp.gt.f32.partialorder %v8480_v37, 0.0 }
 0x7ca   : > { %vm9888_vm11 = vcmp.gt.f32.partialorder %v9856_v22, 0.0  ;;  %v9920_v49 = vmul.f32 0.01, %v9856_v22  ;;  %9465 = vmatmul.bf16.gmra.mxu2 %v9324_v23  ;;  %v9177_v23 = vld [vmem:[#allocation4 + $0xf0] sm:$0xff]  ;;  %v9214_v4 = vadd.f32 %v15512_v35, %v9178_v48 }
 0x7cb   : > { %9831 = vmatmul.bf16.gmra.mxu3 %v9690_v44  ;;  %v9213_v13 = vadd.f32 %v15512_v35, %v9177_v23  ;;  %vm8879_vm8 = vcmp.gt.f32.partialorder %v8847_v16, 0.0  ;;  %vm8880_vm9 = vcmp.gt.f32.partialorder %v8848_v6, 0.0  ;;  %v8911_v40 = vmul.f32 0.01, %v8847_v16 }
 0x7cc   : > { %v9952_v28 = vsel %vm9888_vm11, %v9856_v22, %v9920_v49  ;;  %v9544_v22 = vld [vmem:[#allocation5 + $0xf8] sm:$0xff]  ;;  %v8544_v49 = vmul.f32 0.01, %v8480_v37  ;;  %v8912_v25 = vmul.f32 0.01, %v8848_v6  ;;  %vm9246_vm11 = vcmp.gt.f32.partialorder %v9214_v4, 0.0 }
 0x7cd   : > { %9984 = vst [vmem:[%s13863_s11 + $0x48] sm:$0xff] %v9952_v28  ;;  %v9426_v3 = vpop.f32.mrf.mxu2  ;;  %v8693_v19 = vpop.f32.mrf.mxu0  ;;  %v9580_v42 = vadd.f32 %v15519_v26, %v9544_v22  ;;  %vm9245_vm10 = vcmp.gt.f32.partialorder %v9213_v13, 0.0  ;;  %v9277_v35 = vmul.f32 0.01, %v9213_v13  ;;  %v9278_v14 = vmul.f32 0.01, %v9214_v4 }
 0x7ce   : > { %v9792_v59 = vpop.f32.mrf.mxu3  ;;  %v9491_v20 = vadd.f32 %v9426_v3, %v9125_v15  ;;  %v9062_v57 = vpop.f32.mrf.mxu1  ;;  %v8760_v2 = vadd.f32 %v15475_v38, %v8693_v19  ;;  %v9579_v15 = vadd.f32 %v15519_v26, %v9543_v58  ;;  %v8576_v55 = vsel %vm8512_vm7, %v8480_v37, %v8544_v49 }
 0x7cf   : > { %vm9612_vm13 = vcmp.gt.f32.partialorder %v9580_v42, 0.0  ;;  %v8943_v61 = vsel %vm8879_vm8, %v8847_v16, %v8911_v40  ;;  %v8944_v34 = vsel %vm8880_vm9, %v8848_v6, %v8912_v25 }
 0x7d0   : > { %v9857_v56 = vadd.f32 %v9792_v59, %v9491_v20  ;;  %v9126_v50 = vadd.f32 %v9062_v57, %v8760_v2  ;;  %v9643_v0 = vmul.f32 0.01, %v9579_v15  ;;  %v9644_v20 = vmul.f32 0.01, %v9580_v42 }
 0x7d1   : > { %vm9611_vm12 = vcmp.gt.f32.partialorder %v9579_v15, 0.0  ;;  %v8575_v57 = vsel %vm8511_vm6, %v8479_v1, %v8543_v31  ;;  %v9310_v2 = vsel %vm9246_vm11, %v9214_v4, %v9278_v14  ;;  %v8960_v47 = vpack.c.bf16 %v8944_v34, %v8943_v61 }
 0x7d2   : > { %vm9889_vm4 = vcmp.gt.f32.partialorder %v9857_v56, 0.0  ;;  %v9921_v10 = vmul.f32 0.01, %v9857_v56  ;;  %v9675_v29 = vsel %vm9611_vm12, %v9579_v15, %v9643_v0  ;;  %v9676_v63 = vsel %vm9612_vm13, %v9580_v42, %v9644_v20 }
 0x7d3   : > { %v8592_v51 = vpack.c.bf16 %v8576_v55, %v8575_v57  ;;  %v9692_v62 = vpack.c.bf16 %v9676_v63, %v9675_v29 }
 0x7d4   : > { %v9953_v32 = vsel %vm9889_vm4, %v9857_v56, %v9921_v10  ;;  %v9309_v56 = vsel %vm9245_vm10, %v9213_v13, %v9277_v35 }
 0x7d5   : > { %9985 = vst [vmem:[%s13863_s11 + $0x50] sm:$0xff] %v9953_v32  ;;  %v9428_v53 = vpop.f32.mrf.mxu2  ;;  %v8696_v8 = vpop.f32.mrf.mxu0  ;;  %v9326_v46 = vpack.c.bf16 %v9310_v2, %v9309_v56 }
 0x7d6   : > { %v9794_v30 = vpop.f32.mrf.mxu3  ;;  %v9492_v27 = vadd.f32 %v9428_v53, %v9126_v50  ;;  %v9065_v43 = vpop.f32.mrf.mxu1  ;;  %v8761_v44 = vadd.f32 %v15475_v38, %v8696_v8 }
 0x7d8   : > { %v9858_v9 = vadd.f32 %v9794_v30, %v9492_v27  ;;  %8735 = vmatmul.bf16.gmra.mxu0 %v8591_v7  ;;  %v9127_v41 = vadd.f32 %v9065_v43, %v8761_v44 }
 0x7d9   : > { %9104 = vmatmul.bf16.gmra.mxu1 %v8959_v60 }
 0x7da   : > { %vm9890_vm5 = vcmp.gt.f32.partialorder %v9858_v9, 0.0  ;;  %v9922_v24 = vmul.f32 0.01, %v9858_v9  ;;  %9470 = vmatmul.bf16.gmra.mxu2 %v9325_v36 }
 0x7db   : > { %9836 = vmatmul.bf16.gmra.mxu3 %v9691_v33 }
 0x7dc   : > { %v9954_v52 = vsel %vm9890_vm5, %v9858_v9, %v9922_v24 }
 0x7dd   : > { %9986 = vst [vmem:[%s13863_s11 + $0x58] sm:$0xff] %v9954_v52  ;;  %v9431_v18 = vpop.f32.mrf.mxu2  ;;  %v8698_v3 = vpop.f32.mrf.mxu0 }
 0x7de   : > { %v9797_v17 = vpop.f32.mrf.mxu3  ;;  %v9493_v28 = vadd.f32 %v9431_v18, %v9127_v41  ;;  %v9067_v59 = vpop.f32.mrf.mxu1  ;;  %v8762_v19 = vadd.f32 %v15475_v38, %v8698_v3 }
 0x7e0   : > { %v9859_v26 = vadd.f32 %v9797_v17, %v9493_v28  ;;  %v9128_v11 = vadd.f32 %v9067_v59, %v8762_v19 }
 0x7e2   : > { %vm9891_vm14 = vcmp.gt.f32.partialorder %v9859_v26, 0.0  ;;  %v9923_v54 = vmul.f32 0.01, %v9859_v26 }
 0x7e4   : > { %v9955_v10 = vsel %vm9891_vm14, %v9859_v26, %v9923_v54 }
 0x7e5   : > { %9987 = vst [vmem:[%s13863_s11 + $0x60] sm:$0xff] %v9955_v10  ;;  %v9433_v45 = vpop.f32.mrf.mxu2  ;;  %v8701_v32 = vpop.f32.mrf.mxu0 }
 0x7e6   : > { %v9799_v5 = vpop.f32.mrf.mxu3  ;;  %v9494_v39 = vadd.f32 %v9433_v45, %v9128_v11  ;;  %v9070_v50 = vpop.f32.mrf.mxu1  ;;  %v8763_v53 = vadd.f32 %v15475_v38, %v8701_v32  ;;  %v15627_v38 = vld [vmem:[%s15814_s10] ss:$0 sm:$0xff] }
 0x7e8   : > { %v9860_v30 = vadd.f32 %v9799_v5, %v9494_v39  ;;  %8740 = vmatmul.bf16.gmra.mxu0 %v8592_v51  ;;  %v9129_v60 = vadd.f32 %v9070_v50, %v8763_v53 }
 0x7e9   : > { %9109 = vmatmul.bf16.gmra.mxu1 %v8960_v47 }
 0x7ea   : > { %vm9892_vm15 = vcmp.gt.f32.partialorder %v9860_v30, 0.0  ;;  %v9924_v7 = vmul.f32 0.01, %v9860_v30  ;;  %9475 = vmatmul.bf16.gmra.mxu2 %v9326_v46 }
 0x7eb   : > { %9841 = vmatmul.bf16.gmra.mxu3 %v9692_v62 }
 0x7ec   : > { %v9956_v21 = vsel %vm9892_vm15, %v9860_v30, %v9924_v7 }
 0x7ed   : > { %9988 = vst [vmem:[%s13863_s11 + $0x68] sm:$0xff] %v9956_v21  ;;  %v9436_v27 = vpop.f32.mrf.mxu2  ;;  %v8703_v36 = vpop.f32.mrf.mxu0 }
 0x7ee   : > { %v9802_v8 = vpop.f32.mrf.mxu3  ;;  %v9495_v43 = vadd.f32 %v9436_v27, %v9129_v60  ;;  %v9072_v33 = vpop.f32.mrf.mxu1  ;;  %v8764_v23 = vadd.f32 %v15627_v38, %v8703_v36 }
 0x7f0   : > { %v9861_v12 = vadd.f32 %v9802_v8, %v9495_v43  ;;  %v9130_v37 = vadd.f32 %v9072_v33, %v8764_v23 }
 0x7f2   : > { %vm9893_vm0 = vcmp.gt.f32.partialorder %v9861_v12, 0.0  ;;  %v9925_v44 = vmul.f32 0.01, %v9861_v12 }
 0x7f4   : > { %v9957_v1 = vsel %vm9893_vm0, %v9861_v12, %v9925_v44 }
 0x7f5   : > { %9989 = vst [vmem:[%s13863_s11 + $0x70] sm:$0xff] %v9957_v1  ;;  %v9438_v48 = vpop.f32.mrf.mxu2  ;;  %v8706_v58 = vpop.f32.mrf.mxu0 }
 0x7f6   : > { %v9804_v9 = vpop.f32.mrf.mxu3  ;;  %v9496_v16 = vadd.f32 %v9438_v48, %v9130_v37  ;;  %v9075_v22 = vpop.f32.mrf.mxu1  ;;  %v8765_v6 = vadd.f32 %v15627_v38, %v8706_v58 }
 0x7f8   : > { %v9862_v13 = vadd.f32 %v9804_v9, %v9496_v16  ;;  %v9131_v41 = vadd.f32 %v9075_v22, %v8765_v6 }
 0x7fa   : > { %vm9894_vm1 = vcmp.gt.f32.partialorder %v9862_v13, 0.0  ;;  %v9926_v24 = vmul.f32 0.01, %v9862_v13 }
 0x7fc   : > { %v9958_v4 = vsel %vm9894_vm1, %v9862_v13, %v9926_v24 }
 0x7fd   : > { %9990 = vst [vmem:[%s13863_s11 + $0x78] sm:$0xff] %v9958_v4  ;;  %v9441_v31 = vpop.f32.mrf.mxu2  ;;  %v8708_v42 = vpop.f32.mrf.mxu0 }
 0x7fe   : > { %v9807_v49 = vpop.f32.mrf.mxu3  ;;  %v9497_v15 = vadd.f32 %v9441_v31, %v9131_v41  ;;  %v9077_v52 = vpop.f32.mrf.mxu1  ;;  %v8766_v17 = vadd.f32 %v15627_v38, %v8708_v42 }
 0x800   : > { %v9863_v18 = vadd.f32 %v9807_v49, %v9497_v15  ;;  %v9132_v28 = vadd.f32 %v9077_v52, %v8766_v17 }
 0x802   : > { %vm9895_vm2 = vcmp.gt.f32.partialorder %v9863_v18, 0.0  ;;  %v9927_v40 = vmul.f32 0.01, %v9863_v18 }
 0x804   : > { %v9959_v25 = vsel %vm9895_vm2, %v9863_v18, %v9927_v40 }
 0x805   : > { %9991 = vst [vmem:[%s13863_s11 + $0x80] sm:$0xff] %v9959_v25  ;;  %v9443_v3 = vpop.f32.mrf.mxu2  ;;  %v8711_v14 = vpop.f32.mrf.mxu0 }
 0x806   : > { %v9809_v59 = vpop.f32.mrf.mxu3  ;;  %v9498_v35 = vadd.f32 %v9443_v3, %v9132_v28  ;;  %v9080_v0 = vpop.f32.mrf.mxu1  ;;  %v8767_v20 = vadd.f32 %v15627_v38, %v8711_v14 }
 0x808   : > { %v9864_v26 = vadd.f32 %v9809_v59, %v9498_v35  ;;  %v9133_v57 = vadd.f32 %v9080_v0, %v8767_v20 }
 0x80a   : > { %vm9896_vm3 = vcmp.gt.f32.partialorder %v9864_v26, 0.0  ;;  %v9928_v19 = vmul.f32 0.01, %v9864_v26 }
 0x80c   : > { %v9960_v55 = vsel %vm9896_vm3, %v9864_v26, %v9928_v19 }
 0x80d   : > { %9992 = vst [vmem:[%s13863_s11 + $0x88] sm:$0xff] %v9960_v55  ;;  %v9446_v54 = vpop.f32.mrf.mxu2  ;;  %v8713_v56 = vpop.f32.mrf.mxu0 }
 0x80e   : > { %v9812_v61 = vpop.f32.mrf.mxu3  ;;  %v9499_v34 = vadd.f32 %v9446_v54, %v9133_v57  ;;  %v9082_v2 = vpop.f32.mrf.mxu1  ;;  %v8768_v63 = vadd.f32 %v15627_v38, %v8713_v56 }
 0x810   : > { %v9865_v29 = vadd.f32 %v9812_v61, %v9499_v34  ;;  %v9134_v45 = vadd.f32 %v9082_v2, %v8768_v63 }
 0x812   : > { %vm9897_vm4 = vcmp.gt.f32.partialorder %v9865_v29, 0.0  ;;  %v9929_v10 = vmul.f32 0.01, %v9865_v29 }
 0x814   : > { %v9961_v11 = vsel %vm9897_vm4, %v9865_v29, %v9929_v10 }
 0x815   : > { %9993 = vst [vmem:[%s13863_s11 + $0x90] sm:$0xff] %v9961_v11  ;;  %v9448_v5 = vpop.f32.mrf.mxu2  ;;  %v8716_v39 = vpop.f32.mrf.mxu0 }
 0x816   : > { %v9814_v51 = vpop.f32.mrf.mxu3  ;;  %v9500_v47 = vadd.f32 %v9448_v5, %v9134_v45  ;;  %v9085_v32 = vpop.f32.mrf.mxu1  ;;  %v8769_v50 = vadd.f32 %v15627_v38, %v8716_v39 }
 0x818   : > { %v9866_v46 = vadd.f32 %v9814_v51, %v9500_v47  ;;  %v9135_v53 = vadd.f32 %v9085_v32, %v8769_v50 }
 0x81a   : > { %vm9898_vm5 = vcmp.gt.f32.partialorder %v9866_v46, 0.0  ;;  %v9930_v62 = vmul.f32 0.01, %v9866_v46 }
 0x81c   : > { %v9962_v30 = vsel %vm9898_vm5, %v9866_v46, %v9930_v62 }
 0x81d   : > { %9994 = vst [vmem:[%s13863_s11 + $0x98] sm:$0xff] %v9962_v30  ;;  %v9451_v7 = vpop.f32.mrf.mxu2  ;;  %v8718_v27 = vpop.f32.mrf.mxu0 }
 0x81e   : > { %v9817_v60 = vpop.f32.mrf.mxu3  ;;  %v9501_v21 = vadd.f32 %v9451_v7, %v9135_v53  ;;  %v9087_v8 = vpop.f32.mrf.mxu1  ;;  %v8770_v36 = vadd.f32 %v15627_v38, %v8718_v27 }
 0x820   : > { %v9867_v43 = vadd.f32 %v9817_v60, %v9501_v21  ;;  %v9136_v23 = vadd.f32 %v9087_v8, %v8770_v36 }
 0x822   : > { %vm9899_vm6 = vcmp.gt.f32.partialorder %v9867_v43, 0.0  ;;  %v9931_v33 = vmul.f32 0.01, %v9867_v43 }
 0x824   : > { %v9963_v12 = vsel %vm9899_vm6, %v9867_v43, %v9931_v33 }
 0x825   : > { %9995 = vst [vmem:[%s13863_s11 + $0xa0] sm:$0xff] %v9963_v12  ;;  %v9453_v44 = vpop.f32.mrf.mxu2  ;;  %v8721_v48 = vpop.f32.mrf.mxu0 }
 0x826   : > { %v9819_v1 = vpop.f32.mrf.mxu3  ;;  %v9502_v37 = vadd.f32 %v9453_v44, %v9136_v23  ;;  %v9090_v9 = vpop.f32.mrf.mxu1  ;;  %v8771_v16 = vadd.f32 %v15627_v38, %v8721_v48 }
 0x828   : > { %v9868_v58 = vadd.f32 %v9819_v1, %v9502_v37  ;;  %v9137_v6 = vadd.f32 %v9090_v9, %v8771_v16 }
 0x82a   : > { %vm9900_vm7 = vcmp.gt.f32.partialorder %v9868_v58, 0.0  ;;  %v9932_v22 = vmul.f32 0.01, %v9868_v58 }
 0x82c   : > { %v9964_v13 = vsel %vm9900_vm7, %v9868_v58, %v9932_v22 }
 0x82d   : > { %9996 = vst [vmem:[%s13863_s11 + $0xa8] sm:$0xff] %v9964_v13  ;;  %v9456_v24 = vpop.f32.mrf.mxu2  ;;  %v8723_v31 = vpop.f32.mrf.mxu0 }
 0x82e   : > { %v9822_v41 = vpop.f32.mrf.mxu3  ;;  %v9503_v4 = vadd.f32 %v9456_v24, %v9137_v6  ;;  %v9092_v49 = vpop.f32.mrf.mxu1  ;;  %v8772_v42 = vadd.f32 %v15627_v38, %v8723_v31 }
 0x830   : > { %v9869_v15 = vadd.f32 %v9822_v41, %v9503_v4  ;;  %v9138_v17 = vadd.f32 %v9092_v49, %v8772_v42 }
 0x832   : > { %vm9901_vm8 = vcmp.gt.f32.partialorder %v9869_v15, 0.0  ;;  %v9933_v52 = vmul.f32 0.01, %v9869_v15 }
 0x834   : > { %v9965_v18 = vsel %vm9901_vm8, %v9869_v15, %v9933_v52 }
 0x835   : > { %9997 = vst [vmem:[%s13863_s11 + $0xb0] sm:$0xff] %v9965_v18  ;;  %v9458_v40 = vpop.f32.mrf.mxu2  ;;  %v8726_v3 = vpop.f32.mrf.mxu0 }
 0x836   : > { %v9824_v25 = vpop.f32.mrf.mxu3  ;;  %v9504_v28 = vadd.f32 %v9458_v40, %v9138_v17  ;;  %v9095_v59 = vpop.f32.mrf.mxu1  ;;  %v8773_v35 = vadd.f32 %v15627_v38, %v8726_v3 }
 0x838   : > { %v9870_v14 = vadd.f32 %v9824_v25, %v9504_v28  ;;  %v9139_v20 = vadd.f32 %v9095_v59, %v8773_v35 }
 0x83a   : > { %vm9902_vm9 = vcmp.gt.f32.partialorder %v9870_v14, 0.0  ;;  %v9934_v0 = vmul.f32 0.01, %v9870_v14 }
 0x83c   : > { %v9966_v26 = vsel %vm9902_vm9, %v9870_v14, %v9934_v0 }
 0x83d   : > { %9998 = vst [vmem:[%s13863_s11 + $0xb8] sm:$0xff] %v9966_v26  ;;  %v9461_v19 = vpop.f32.mrf.mxu2  ;;  %v8728_v54 = vpop.f32.mrf.mxu0 }
 0x83e   : > { %v9827_v57 = vpop.f32.mrf.mxu3  ;;  %v9505_v55 = vadd.f32 %v9461_v19, %v9139_v20  ;;  %v9097_v61 = vpop.f32.mrf.mxu1  ;;  %v8774_v56 = vadd.f32 %v15627_v38, %v8728_v54 }
 0x840   : > { %v9871_v34 = vadd.f32 %v9827_v57, %v9505_v55  ;;  %v9140_v63 = vadd.f32 %v9097_v61, %v8774_v56 }
 0x842   : > { %vm9903_vm10 = vcmp.gt.f32.partialorder %v9871_v34, 0.0  ;;  %v9935_v2 = vmul.f32 0.01, %v9871_v34 }
 0x844   : > { %v9967_v29 = vsel %vm9903_vm10, %v9871_v34, %v9935_v2 }
 0x845   : > { %9999 = vst [vmem:[%s13863_s11 + $0xc0] sm:$0xff] %v9967_v29  ;;  %v9463_v10 = vpop.f32.mrf.mxu2  ;;  %v8731_v5 = vpop.f32.mrf.mxu0 }
 0x846   : > { %v9829_v11 = vpop.f32.mrf.mxu3  ;;  %v9506_v45 = vadd.f32 %v9463_v10, %v9140_v63  ;;  %v9100_v51 = vpop.f32.mrf.mxu1  ;;  %v8775_v47 = vadd.f32 %v15627_v38, %v8731_v5 }
 0x848   : > { %v9872_v39 = vadd.f32 %v9829_v11, %v9506_v45  ;;  %v9141_v50 = vadd.f32 %v9100_v51, %v8775_v47 }
 0x84a   : > { %vm9904_vm11 = vcmp.gt.f32.partialorder %v9872_v39, 0.0  ;;  %v9936_v32 = vmul.f32 0.01, %v9872_v39 }
 0x84c   : > { %v9968_v46 = vsel %vm9904_vm11, %v9872_v39, %v9936_v32 }
 0x84d   : > { %10000 = vst [vmem:[%s13863_s11 + $0xc8] sm:$0xff] %v9968_v46  ;;  %v9466_v62 = vpop.f32.mrf.mxu2  ;;  %v8733_v7 = vpop.f32.mrf.mxu0 }
 0x84e   : > { %v9832_v53 = vpop.f32.mrf.mxu3  ;;  %v9507_v30 = vadd.f32 %v9466_v62, %v9141_v50  ;;  %v9102_v60 = vpop.f32.mrf.mxu1  ;;  %v8776_v27 = vadd.f32 %v15627_v38, %v8733_v7 }
 0x850   : > { %v9873_v21 = vadd.f32 %v9832_v53, %v9507_v30  ;;  %v9142_v36 = vadd.f32 %v9102_v60, %v8776_v27 }
 0x852   : > { %vm9905_vm12 = vcmp.gt.f32.partialorder %v9873_v21, 0.0  ;;  %v9937_v8 = vmul.f32 0.01, %v9873_v21 }
 0x854   : > { %v9969_v43 = vsel %vm9905_vm12, %v9873_v21, %v9937_v8 }
 0x855   : > { %10001 = vst [vmem:[%s13863_s11 + $0xd0] sm:$0xff] %v9969_v43  ;;  %v9468_v33 = vpop.f32.mrf.mxu2  ;;  %v8736_v44 = vpop.f32.mrf.mxu0 }
 0x856   : > { %v9834_v12 = vpop.f32.mrf.mxu3  ;;  %v9508_v23 = vadd.f32 %v9468_v33, %v9142_v36  ;;  %v9105_v1 = vpop.f32.mrf.mxu1  ;;  %v8777_v37 = vadd.f32 %v15627_v38, %v8736_v44 }
 0x858   : > { %v9874_v48 = vadd.f32 %v9834_v12, %v9508_v23  ;;  %v9143_v16 = vadd.f32 %v9105_v1, %v8777_v37 }
 0x85a   : > { %vm9906_vm13 = vcmp.gt.f32.partialorder %v9874_v48, 0.0  ;;  %v9938_v9 = vmul.f32 0.01, %v9874_v48 }
 0x85c   : > { %v9970_v58 = vsel %vm9906_vm13, %v9874_v48, %v9938_v9 }
 0x85d   : > { %10002 = vst [vmem:[%s13863_s11 + $0xd8] sm:$0xff] %v9970_v58  ;;  %v9471_v22 = vpop.f32.mrf.mxu2  ;;  %v8738_v24 = vpop.f32.mrf.mxu0 }
 0x85e   : > { %v9837_v6 = vpop.f32.mrf.mxu3  ;;  %v9509_v13 = vadd.f32 %v9471_v22, %v9143_v16  ;;  %v9107_v41 = vpop.f32.mrf.mxu1  ;;  %v8778_v31 = vadd.f32 %v15627_v38, %v8738_v24 }
 0x860   : > { %v9875_v4 = vadd.f32 %v9837_v6, %v9509_v13  ;;  %v9144_v42 = vadd.f32 %v9107_v41, %v8778_v31 }
 0x862   : > { %vm9907_vm14 = vcmp.gt.f32.partialorder %v9875_v4, 0.0  ;;  %v9939_v49 = vmul.f32 0.01, %v9875_v4 }
 0x864   : > { %v9971_v15 = vsel %vm9907_vm14, %v9875_v4, %v9939_v49 }
 0x865   : > { %10003 = vst [vmem:[%s13863_s11 + $0xe0] sm:$0xff] %v9971_v15  ;;  %v9473_v52 = vpop.f32.mrf.mxu2  ;;  %v8741_v40 = vpop.f32.mrf.mxu0 }
 0x866   : > { %v9839_v18 = vpop.f32.mrf.mxu3  ;;  %v9510_v17 = vadd.f32 %v9473_v52, %v9144_v42  ;;  %v8779_v25 = vadd.f32 %v15627_v38, %v8741_v40  ;;  %v9110_v3 = vpop.f32.mrf.mxu1 }
 0x868   : > { %v9876_v28 = vadd.f32 %v9839_v18, %v9510_v17  ;;  %v9145_v35 = vadd.f32 %v9110_v3, %v8779_v25 }
 0x86a   : > { %vm9908_vm15 = vcmp.gt.f32.partialorder %v9876_v28, 0.0  ;;  %v9940_v59 = vmul.f32 0.01, %v9876_v28 }
 0x86c   : > { %v9972_v14 = vsel %vm9908_vm15, %v9876_v28, %v9940_v59 }
 0x86d   : > { %10004 = vst [vmem:[%s13863_s11 + $0xe8] sm:$0xff] %v9972_v14  ;;  %v9476_v0 = vpop.f32.mrf.mxu2  ;;  %v8743_v19 = vpop.f32.mrf.mxu0 }
 0x86e   : > { %v9842_v20 = vpop.f32.mrf.mxu3  ;;  %v9511_v26 = vadd.f32 %v9476_v0, %v9145_v35  ;;  %v8780_v55 = vadd.f32 %v15627_v38, %v8743_v19  ;;  %v9112_v61 = vpop.f32.mrf.mxu1 }
 0x870   : > { %v9877_v57 = vadd.f32 %v9842_v20, %v9511_v26  ;;  %v9146_v56 = vadd.f32 %v9112_v61, %v8780_v55 }
 0x872   : > { %vm9909_vm0 = vcmp.gt.f32.partialorder %v9877_v57, 0.0  ;;  %v9941_v54 = vmul.f32 0.01, %v9877_v57 }
 0x874   : > { %v9973_v34 = vsel %vm9909_vm0, %v9877_v57, %v9941_v54 }
 0x875   : > { %10005 = vst [vmem:[%s13863_s11 + $0xf0] sm:$0xff] %v9973_v34  ;;  %v9478_v2 = vpop.f32.mrf.mxu2 }
 0x876   : > { %v9512_v29 = vadd.f32 %v9478_v2, %v9146_v56  ;;  %v9844_v63 = vpop.f32.mrf.mxu3 }
 0x878   : > { %v9878_v10 = vadd.f32 %v9844_v63, %v9512_v29 }
 0x87a   : > { %vm9910_vm1 = vcmp.gt.f32.partialorder %v9878_v10, 0.0  ;;  %v9942_v11 = vmul.f32 0.01, %v9878_v10 }
 0x87c   : > { %v9974_v45 = vsel %vm9910_vm1, %v9878_v10, %v9942_v11 }
 0x87d   : > { %10006 = vst [vmem:[%s13863_s11 + $0xf8] sm:$0xff] %v9974_v45 }
 0x87e PF: > { %s15815_s6 = sld [smem:[#allocation37_spill]]  ;;  %s10020_s20 = sshll.u32 %s13863_s11, 4  ;;  %s10021_s20 = int_to_ptr.vmem [resolvable:$true] %s10020_s20 }
 0x87f   : > { %s15818_s25 = sld [smem:[#allocation55_spill]]  ;;  %s10008_s23 = scalar_lea.sflag [#allocation8], %s673_s5 }
 0x884   : > { %s12996_s29 = sshll.u32 %s15815_s6, 8 }
 0x885   : > { %s15819_s12 = smov %s15818_s25  ;;  %s10019_s27 = scalar_lea.hbm %s15818_s25, %s12996_s29 }
 0x886   : > { %s10022_s17 = sshll.u32 %s10019_s27, 4  ;;  %s13357_s6 = scalar_lea.hbm %s15819_s12, 512  ;;  %s10023_s17 = int_to_ptr.hbm [resolvable:$true] %s10022_s17 }
 0x887   : > { %s13351_s9 = sshra.s32 %s10023_s17, 4  ;;  %s13352_s9 = int_to_ptr.hbm [resolvable:$true] %s13351_s9 }
 0x888   : > { %s13353_s15 = scalar_lea.hbm %s13352_s9, 256  ;;  %p13358_p11 = scmp.lt.s32.totalorder %s13352_s9, %s15819_s12 }
 0x889   : > { %p13354_p13 = scmp.ne.s32.totalorder %s13352_s9, %s13353_s15  ;;  %p13359_p0 = scmp.lt.s32.totalorder %s13357_s6, %s13353_s15 }
 0x88b   : > { %p13355_p5 = pnand %p13354_p13, %p13720_p7  ;;  %p13360_p1 = por %p13359_p0, %p13358_p11 }
 0x88d   : > { %p13356_p9 = pneg %p13355_p5 }
 0x88f   : > { %p13361_p4 = pnand %p13360_p1, %p13356_p9 }
 0x891   : > { %13364 = shalt.err (!%p13361_p4)
}
 0x892   : > { %s13522_s5 = smov 128   ;;  %s13523_s11 = smov 8  }
 0x893   : > { %13044 = dma.vmem_to_hbm [thread:$0]  (%p13720_p7), %s10021_s20, 4096, %s10023_s17, %s10008_s23, %s13522_s5, %s13522_s5, %s13523_s11  }
 0x894 PF: > { %s15820_s19 = sld [smem:[#allocation32_spill]]  ;;  %p13056_p2 = scmp.ge.s32.totalorder %s13495_s30, 2 }
 0x896   : > { %p13051_p3 = pnand %p13056_p2, %p13725_p10 }
 0x898   : > { %p13052_p6 = pneg %p13051_p3 }
 0x89a   : > { %s10037_s0 = sand.u32 1, %s15820_s19  }
 0x89b   : > { %s10038_s1 = scalar_lea.sflag [#allocation8], %s10037_s0 }
 0x89c   : > { %13438 = dma.done.wait (%p13052_p6), %s10038_s1, 4096  }
 0x89d   : > { %13440 = vsyncadd (%p13052_p6), %s10038_s1, 4294963200  ;;  %s34_s30 = sadd.s32 1, %s13495_s30   ;;  %s15823_s17 = sld [smem:[#allocation33_spill]] }
 0x89e   : > { %p15686_p8 = scmp.ge.s32.totalorder %s34_s30, 6   ;;  %s15824_s18 = sld [smem:[#allocation34_spill]] }
 0x89f   : > { %s15825_s19 = sld [smem:[#allocation44_spill]]  ;;  %s15832_s20 = smov %s13459_s21 }
 0x8a0   : > { %s15826_s26 = sld [smem:[#allocation41_spill]]  ;;  %s15833_s21 = smov %s13463_s22 }
 0x8a1   : > { %s15827_s25 = sld [smem:[#allocation35_spill]]  ;;  %s15835_s23 = smov %s13471_s24 }
 0x8a2   : > { %s15828_s27 = sld [smem:[#allocation42_spill]] }
 0x8a3   : > { %s15829_s9 = sld [smem:[#allocation38_spill]] }
 0x8a4   : > { %s15830_s15 = sld [smem:[#allocation39_spill]] }
 0x8a5   : > { %s15831_s29 = sld [smem:[#allocation40_spill]] }
 0x8a6   : > { %s15834_s22 = smov %s15826_s26  ;;  %s15838_s26 = smov %s13487_s28 }
 0x8a7   : > { %s15836_s24 = smov %s15827_s25  ;;  %33 = sbr.rel (!%p15686_p8) target bundleno = 25 (0x19), region = 217 }
 0x8a8   : > { %s15837_s25 = smov %s15828_s27 }
 0x8a9   : > { %s15839_s27 = smov %s15829_s9 }
 0x8aa   : > { %s15840_s28 = smov %s15830_s15 }
 0x8ac   :  { %10044 = vsyncpa [#allocation7], 1 }
 0x8ad   :  { %10046 = vsyncpa [#allocation7 + $0x1], 1 }
 0x8ae   :  { %10047 = vsyncpa [#allocation10], 1 }
 0x8af   :  { %10049 = vsyncpa [#allocation10 + $0x1], 1 }
 0x8b0   :  { %10050 = vsyncpa [#allocation13], 1 }
 0x8b1   :  { %10052 = vsyncpa [#allocation13 + $0x1], 1 }
 0x8b2   :  { %10053 = vsyncpa [#allocation16], 1 }
 0x8b3   :  { %10054 = vsyncpa [#allocation8], 1 }
 0x8b4   :  { %10056 = vsyncpa [#allocation8 + $0x1], 1 }

</bundles_post_ra>
